<compile_context>
chip_gen: v7x
topology: tpu7x:2x2x1
jax: 0.10.0
libtpu: 0.0.40
codegen_flags: <defaults>
</compile_context>

<pallas_src>
import jax
import jax.numpy as jnp
import numpy as np
from jax.experimental import pallas as pl
from jax.experimental.pallas import tpu as pltpu


# ----------------------------------------------------------------------------
# Kernel
# ----------------------------------------------------------------------------
def cross_attention_expert_kernel(
    wt_ref, x_ref,
    wq_ref, bq_ref, wk_ref, bk_ref, wv_ref, wof_ref, bfin_ref,
    out_ref):
    f32 = jnp.float32
    bf16 = jnp.bfloat16

    Bt, Lq, D = wt_ref.shape
    _, Lkv, _ = x_ref.shape
    H, _, hd = wq_ref.shape

    # Flatten batch*seq into the MXU row dimension once; hoisted out of the
    # head loop.
    wt2 = wt_ref[...].astype(bf16).reshape(Bt * Lq, D)      # [Bt*Lq, D]
    xv = x_ref[...].astype(bf16)                            # [Bt, Lkv, D]
    x2 = xv.reshape(Bt * Lkv, D)                            # [Bt*Lkv, D]

    acc = jnp.zeros((Bt, D), f32)
    for h in range(H):                                      # unrolled, H static
        # Per-head Q/K projections (softmax scale pre-folded into wq/bq).
        q2 = jnp.dot(wt2, wq_ref[h], preferred_element_type=f32) + bq_ref[h]
        k2 = jnp.dot(x2, wk_ref[h], preferred_element_type=f32) + bk_ref[h]
        qb = q2.astype(bf16).reshape(Bt, Lq, hd)
        kb = k2.astype(bf16).reshape(Bt, Lkv, hd)

        # Scores + softmax (f32), then pool over query positions.
        s = jnp.einsum('bqj,bkj->bqk', qb, kb,
                       preferred_element_type=f32)          # [Bt, Lq, Lkv]
        s = s - jnp.max(s, axis=-1, keepdims=True)
        e = jnp.exp(s)
        p = e * pl.reciprocal(jnp.sum(e, axis=-1, keepdims=True), approx=True)
        wbar = jnp.mean(p, axis=1, keepdims=True)           # [Bt, 1, Lkv]

        # Pooled value path with the V projection eliminated by linearity
        # (wbar rows sum to 1; bv folded into the final bias):
        #   mean_q(P_h @ V_h) = (wbar_h @ x) @ Wv_h + bv_h
        c = jnp.einsum('bqk,bkd->bqd', wbar.astype(bf16), xv,
                       preferred_element_type=f32)          # [Bt, 1, D]
        c2 = c.reshape(Bt, D).astype(bf16)
        pooled = jnp.dot(c2, wv_ref[h], preferred_element_type=f32)   # [Bt, hd]
        acc = acc + jnp.dot(pooled.astype(bf16), wof_ref[h],
                            preferred_element_type=f32)     # [Bt, D]

    y = acc + bfin_ref[...]                                 # [Bt, D] + [1, D]
    out_ref[...] = y.reshape(Bt, 1, D).astype(out_ref.dtype)


# ----------------------------------------------------------------------------
# Wrapper
# ----------------------------------------------------------------------------
def _pick_vmem_limit():
    try:
        info = pltpu.get_tpu_info()
        cap = int(getattr(info, "vmem_capacity_bytes", 128 * 1024 * 1024))
    except Exception:
        cap = 128 * 1024 * 1024
    if cap <= 64 * 1024 * 1024:          # v7x: 64 MiB physical per TensorCore
        return 48 * 1024 * 1024          # leave headroom for compiler scratch
    return 64 * 1024 * 1024              # v5e / v6e (128 MiB physical)


def _pick_batch_tile(B, Lq):
    target_rows = 256                    # fill MXU rows on v6e/v7x (>=128 on v5e)
    bt = max(1, min(B, target_rows // max(Lq, 1)))
    if B >= 2:
        bt = min(bt, -(-B // 2))         # keep >=2 grid steps (v7x has 2 TCs)
    while B % bt:
        bt -= 1
    return bt


def prepare_params(raw, num_heads):
    """One-time wrapper-side weight preprocessing (f32 math, cast once to bf16)."""
    f32 = jnp.float32
    D = raw['wq'].shape[0]
    hd = D // num_heads
    scale = 1.0 / np.sqrt(hd)

    def heads_in_out(w):                 # [D, D] (in, out) -> [H, D, hd]
        return jnp.transpose(w.astype(f32).reshape(D, num_heads, hd), (1, 0, 2))

    wq_hm = heads_in_out(raw['wq']) * scale
    wk_hm = heads_in_out(raw['wk'])
    wv_hm = heads_in_out(raw['wv'])
    bq_hm = (raw['bq'].astype(f32) * scale).reshape(num_heads, 1, hd)
    bk_hm = raw['bk'].astype(f32).reshape(num_heads, 1, hd)

    wof_full = raw['wo'].astype(f32) @ raw['wfc'].astype(f32)        # [D, D]
    wof_hm = wof_full.reshape(num_heads, hd, D)                      # [H, hd, D]
    bfin = (raw['bv'].astype(f32) @ wof_full
            + raw['bo'].astype(f32) @ raw['wfc'].astype(f32)
            + raw['bfc'].astype(f32)).reshape(1, D)

    bf16 = jnp.bfloat16
    return {
        'wq_hm': wq_hm.astype(bf16), 'bq_hm': bq_hm,
        'wk_hm': wk_hm.astype(bf16), 'bk_hm': bk_hm,
        'wv_hm': wv_hm.astype(bf16),
        'wof_hm': wof_hm.astype(bf16), 'bfin': bfin,
    }


def cross_attention_expert(wt, x, prepared, num_heads=8, batch_tile=None,
                           single_buffer_weights=True):
    """wt: [B, Lq, D], x: [B, Lkv, D]  ->  [B, D]."""
    B, Lq, D = wt.shape
    _, Lkv, _ = x.shape
    assert D % num_heads == 0
    H = num_heads
    hd = D // H

    Bt = batch_tile if batch_tile is not None else _pick_batch_tile(B, Lq)
    assert B % Bt == 0
    grid = (B // Bt,)

    def const_spec(shape):
        # Grid-invariant weights: constant index_map; single-buffer if supported.
        if single_buffer_weights:
            return pl.BlockSpec(shape, lambda i, _s=shape: (0,) * len(_s),
                                pipeline_mode=pl.Buffered(1))
        return pl.BlockSpec(shape, lambda i, _s=shape: (0,) * len(_s))

    in_specs = [
        pl.BlockSpec((Bt, Lq, D), lambda i: (i, 0, 0)),    # wt  (query source)
        pl.BlockSpec((Bt, Lkv, D), lambda i: (i, 0, 0)),   # x   (key/value source)
        const_spec((H, D, hd)),                            # wq  (scale folded)
        const_spec((H, 1, hd)),                            # bq  (scale folded)
        const_spec((H, D, hd)),                            # wk
        const_spec((H, 1, hd)),                            # bk
        const_spec((H, D, hd)),                            # wv
        const_spec((H, hd, D)),                            # Wo @ Wfc, head rows
        const_spec((1, D)),                                # fused bias
    ]
    grid_spec = pltpu.PrefetchScalarGridSpec(
        num_scalar_prefetch=0,
        grid=grid,
        in_specs=in_specs,
        out_specs=pl.BlockSpec((Bt, 1, D), lambda i: (i, 0, 0)),
    )
    out = pl.pallas_call(
        cross_attention_expert_kernel,
        out_shape=jax.ShapeDtypeStruct((B, 1, D), jnp.float32),
        grid_spec=grid_spec,
        compiler_params=pltpu.CompilerParams(
            dimension_semantics=("parallel",),
            vmem_limit_bytes=_pick_vmem_limit()),
    )(wt, x,
      prepared['wq_hm'], prepared['bq_hm'],
      prepared['wk_hm'], prepared['bk_hm'],
      prepared['wv_hm'], prepared['wof_hm'], prepared['bfin'])
    return out[:, 0, :]


# ----------------------------------------------------------------------------
# Pure-JAX f32 reference (mirrors the PyTorch eval-mode forward)
# ----------------------------------------------------------------------------
def reference(wt, x, raw, num_heads=8):
    f32 = jnp.float32
    wtf = wt.astype(f32)
    xf = x.astype(f32)
    B, Lq, D = wtf.shape
    hd = D // num_heads
    scale = 1.0 / np.sqrt(hd)

    q = jnp.einsum('bld,de->ble', wtf, raw['wq']) + raw['bq']
    k = jnp.einsum('bld,de->ble', xf, raw['wk']) + raw['bk']
    v = jnp.einsum('bld,de->ble', xf, raw['wv']) + raw['bv']

    heads = []
    for h in range(num_heads):
        sl = slice(h * hd, (h + 1) * hd)
        s = jnp.einsum('bqd,bkd->bqk', q[..., sl], k[..., sl]) * scale
        p = jax.nn.softmax(s, axis=-1)
        heads.append(jnp.einsum('bqk,bkd->bqd', p, v[..., sl]))
    attn = jnp.concatenate(heads, axis=-1)
    o = jnp.einsum('bld,de->ble', attn, raw['wo']) + raw['bo']
    pooled = jnp.mean(o, axis=1)
    return pooled @ raw['wfc'] + raw['bfc']


def make_params(key, D):
    ks = jax.random.split(key, 10)

    def w(k):
        return 0.05 * jax.random.normal(k, (D, D), dtype=jnp.float32)

    def b(k):
        return 0.05 * jax.random.normal(k, (D,), dtype=jnp.float32)

    return {'wq': w(ks[0]), 'bq': b(ks[1]), 'wk': w(ks[2]), 'bk': b(ks[3]),
            'wv': w(ks[4]), 'bv': b(ks[5]), 'wo': w(ks[6]), 'bo': b(ks[7]),
            'wfc': w(ks[8]), 'bfc': b(ks[9])}


if __name__ == "__main__":
    # Small shapes consistent with the module (real model: D=1280, H=8).
    B, Lq, Lkv, D, H = 8, 8, 16, 128, 8

    key = jax.random.PRNGKey(0)
    kwt, kx, kp = jax.random.split(key, 3)
    wt = jax.random.normal(kwt, (B, Lq, D), dtype=jnp.float32)
    x = jax.random.normal(kx, (B, Lkv, D), dtype=jnp.float32)
    raw = make_params(kp, D)
    prepared = prepare_params(raw, H)

    ref = jax.block_until_ready(reference(wt, x, raw, num_heads=H))

    def run(single_buffer):
        return jax.block_until_ready(
            cross_attention_expert(wt, x, prepared, num_heads=H,
                                   single_buffer_weights=single_buffer))

    # Prefer single-buffered (non-pipelined) weight blocks; fall back to the
    # standard double-buffered specs if this JAX build rejects Buffered(1).
    try:
        out = run(True)
        ok = np.allclose(np.asarray(out), np.asarray(ref), rtol=2e-2, atol=2e-2)
    except Exception:
        ok = False
    if not ok:
        out = run(False)

    np.testing.assert_allclose(np.asarray(out), np.asarray(ref),
                               rtol=2e-2, atol=2e-2)
    assert out.shape == (B, D)
    print("KERNEL_OK")
</pallas_src>

<mosaic_0001>
module attributes {stable_mosaic.version = 11 : i64} {
  func.func @cross_attention_expert_kernel(%arg0: i32, %arg1: memref<4x8x128xf32, #tpu.memory_space<vmem>>, %arg2: memref<4x16x128xf32, #tpu.memory_space<vmem>>, %arg3: memref<8x128x16xbf16, #tpu.memory_space<vmem>>, %arg4: memref<8x1x16xf32, #tpu.memory_space<vmem>>, %arg5: memref<8x128x16xbf16, #tpu.memory_space<vmem>>, %arg6: memref<8x1x16xf32, #tpu.memory_space<vmem>>, %arg7: memref<8x128x16xbf16, #tpu.memory_space<vmem>>, %arg8: memref<8x16x128xbf16, #tpu.memory_space<vmem>>, %arg9: memref<1x128xf32, #tpu.memory_space<vmem>>, %arg10: memref<4x1x128xf32, #tpu.memory_space<vmem>>) attributes {dimension_semantics = [#tpu.dimension_semantics<parallel>], iteration_bounds = array<i64: 2>, scalar_prefetch = 0 : i64, scratch_operands = 0 : i64, tpu.core_type = #tpu.core_type<tc>, window_params = [{transform_indices = @transform_0, window_bounds = array<i64: 4, 8, 128>}, {transform_indices = @transform_1, window_bounds = array<i64: 4, 16, 128>}, {pipeline_mode = #tpu.pipeline_mode<synchronous>, transform_indices = @transform_2, window_bounds = array<i64: 8, 128, 16>}, {pipeline_mode = #tpu.pipeline_mode<synchronous>, transform_indices = @transform_3, window_bounds = array<i64: 8, 1, 16>}, {pipeline_mode = #tpu.pipeline_mode<synchronous>, transform_indices = @transform_4, window_bounds = array<i64: 8, 128, 16>}, {pipeline_mode = #tpu.pipeline_mode<synchronous>, transform_indices = @transform_5, window_bounds = array<i64: 8, 1, 16>}, {pipeline_mode = #tpu.pipeline_mode<synchronous>, transform_indices = @transform_6, window_bounds = array<i64: 8, 128, 16>}, {pipeline_mode = #tpu.pipeline_mode<synchronous>, transform_indices = @transform_7, window_bounds = array<i64: 8, 16, 128>}, {pipeline_mode = #tpu.pipeline_mode<synchronous>, transform_indices = @transform_8, window_bounds = array<i64: 1, 128>}, {transform_indices = @transform_9, window_bounds = array<i64: 4, 1, 128>}]} {
    %c0 = arith.constant 0 : index
    %c0_0 = arith.constant 0 : index
    %c0_1 = arith.constant 0 : index
    %0 = vector.load %arg1[%c0, %c0_0, %c0_1] : memref<4x8x128xf32, #tpu.memory_space<vmem>>, vector<4x8x128xf32>
    %1 = arith.truncf %0 : vector<4x8x128xf32> to vector<4x8x128xbf16>
    %2 = vector.shape_cast %1 : vector<4x8x128xbf16> to vector<32x128xbf16>
    %c0_2 = arith.constant 0 : index
    %c0_3 = arith.constant 0 : index
    %c0_4 = arith.constant 0 : index
    %3 = vector.load %arg2[%c0_2, %c0_3, %c0_4] : memref<4x16x128xf32, #tpu.memory_space<vmem>>, vector<4x16x128xf32>
    %4 = arith.truncf %3 : vector<4x16x128xf32> to vector<4x16x128xbf16>
    %5 = vector.shape_cast %4 : vector<4x16x128xbf16> to vector<64x128xbf16>
    %cst = arith.constant 0.000000e+00 : f32
    %6 = vector.broadcast %cst : f32 to vector<4x128xf32>
    %c0_5 = arith.constant 0 : index
    %c0_6 = arith.constant 0 : index
    %c0_7 = arith.constant 0 : index
    %7 = vector.load %arg3[%c0_5, %c0_6, %c0_7] : memref<8x128x16xbf16, #tpu.memory_space<vmem>>, vector<1x128x16xbf16>
    %8 = vector.shape_cast %7 : vector<1x128x16xbf16> to vector<128x16xbf16>
    %cst_8 = arith.constant dense<0.000000e+00> : vector<32x16xf32>
    %9 = tpu.matmul %2, %8, %cst_8 {dimension_numbers = #tpu.dot_dimension_numbers<[1], [0], [0], [1], [0, 0, 1, 1], [], []>} : vector<32x128xbf16>, vector<128x16xbf16>, vector<32x16xf32> -> vector<32x16xf32>
    %c0_9 = arith.constant 0 : index
    %c0_10 = arith.constant 0 : index
    %c0_11 = arith.constant 0 : index
    %10 = vector.load %arg4[%c0_9, %c0_10, %c0_11] : memref<8x1x16xf32, #tpu.memory_space<vmem>>, vector<1x1x16xf32>
    %11 = vector.shape_cast %10 : vector<1x1x16xf32> to vector<1x16xf32>
    %12 = vector.broadcast %11 : vector<1x16xf32> to vector<32x16xf32>
    %13 = arith.addf %9, %12 : vector<32x16xf32>
    %c0_12 = arith.constant 0 : index
    %c0_13 = arith.constant 0 : index
    %c0_14 = arith.constant 0 : index
    %14 = vector.load %arg5[%c0_12, %c0_13, %c0_14] : memref<8x128x16xbf16, #tpu.memory_space<vmem>>, vector<1x128x16xbf16>
    %15 = vector.shape_cast %14 : vector<1x128x16xbf16> to vector<128x16xbf16>
    %cst_15 = arith.constant dense<0.000000e+00> : vector<64x16xf32>
    %16 = tpu.matmul %5, %15, %cst_15 {dimension_numbers = #tpu.dot_dimension_numbers<[1], [0], [0], [1], [0, 0, 1, 1], [], []>} : vector<64x128xbf16>, vector<128x16xbf16>, vector<64x16xf32> -> vector<64x16xf32>
    %c0_16 = arith.constant 0 : index
    %c0_17 = arith.constant 0 : index
    %c0_18 = arith.constant 0 : index
    %17 = vector.load %arg6[%c0_16, %c0_17, %c0_18] : memref<8x1x16xf32, #tpu.memory_space<vmem>>, vector<1x1x16xf32>
    %18 = vector.shape_cast %17 : vector<1x1x16xf32> to vector<1x16xf32>
    %19 = vector.broadcast %18 : vector<1x16xf32> to vector<64x16xf32>
    %20 = arith.addf %16, %19 : vector<64x16xf32>
    %21 = arith.truncf %13 : vector<32x16xf32> to vector<32x16xbf16>
    %22 = vector.shape_cast %21 : vector<32x16xbf16> to vector<4x8x16xbf16>
    %23 = arith.truncf %20 : vector<64x16xf32> to vector<64x16xbf16>
    %24 = vector.shape_cast %23 : vector<64x16xbf16> to vector<4x16x16xbf16>
    "tpu.trace_start"() <{level = 10 : i32, message = "bqj,bkj->bqk"}> : () -> ()
    %cst_19 = arith.constant dense<0.000000e+00> : vector<4x8x16xf32>
    %25 = tpu.matmul %22, %24, %cst_19 {dimension_numbers = #tpu.dot_dimension_numbers<[2], [2], [1], [1], [0, 0, 0, 1, 1, 1], [0], [0]>} : vector<4x8x16xbf16>, vector<4x16x16xbf16>, vector<4x8x16xf32> -> vector<4x8x16xf32>
    "tpu.trace_stop"() : () -> ()
    %cst_20 = arith.constant dense<0xFF800000> : vector<4x8xf32>
    %26 = vector.multi_reduction <maximumf>, %25, %cst_20 [2] : vector<4x8x16xf32> to vector<4x8xf32>
    %27 = vector.shape_cast %26 : vector<4x8xf32> to vector<4x8x1xf32>
    %28 = vector.broadcast %27 : vector<4x8x1xf32> to vector<4x8x16xf32>
    %29 = arith.subf %25, %28 : vector<4x8x16xf32>
    %30 = math.exp %29 : vector<4x8x16xf32>
    %cst_21 = arith.constant dense<0.000000e+00> : vector<4x8xf32>
    %31 = vector.multi_reduction <add>, %30, %cst_21 [2] : vector<4x8x16xf32> to vector<4x8xf32>
    %32 = vector.shape_cast %31 : vector<4x8xf32> to vector<4x8x1xf32>
    %33 = tpu.reciprocal %32 {approx = true} : vector<4x8x1xf32> -> vector<4x8x1xf32>
    %34 = vector.broadcast %33 : vector<4x8x1xf32> to vector<4x8x16xf32>
    %35 = arith.mulf %30, %34 : vector<4x8x16xf32>
    %cst_22 = arith.constant dense<0.000000e+00> : vector<4x16xf32>
    %36 = vector.multi_reduction <add>, %35, %cst_22 [1] : vector<4x8x16xf32> to vector<4x16xf32>
    %37 = vector.shape_cast %36 : vector<4x16xf32> to vector<4x1x16xf32>
    %cst_23 = arith.constant 8.000000e+00 : f32
    %38 = vector.broadcast %cst_23 : f32 to vector<4x1x16xf32>
    %39 = arith.divf %37, %38 : vector<4x1x16xf32>
    %40 = arith.truncf %39 : vector<4x1x16xf32> to vector<4x1x16xbf16>
    "tpu.trace_start"() <{level = 10 : i32, message = "bqk,bkd->bqd"}> : () -> ()
    %cst_24 = arith.constant dense<0.000000e+00> : vector<4x1x128xf32>
    %41 = tpu.matmul %40, %4, %cst_24 {dimension_numbers = #tpu.dot_dimension_numbers<[2], [1], [1], [2], [0, 0, 0, 1, 1, 2], [0], [0]>} : vector<4x1x16xbf16>, vector<4x16x128xbf16>, vector<4x1x128xf32> -> vector<4x1x128xf32>
    "tpu.trace_stop"() : () -> ()
    %42 = vector.shape_cast %41 : vector<4x1x128xf32> to vector<4x128xf32>
    %43 = arith.truncf %42 : vector<4x128xf32> to vector<4x128xbf16>
    %c0_25 = arith.constant 0 : index
    %c0_26 = arith.constant 0 : index
    %c0_27 = arith.constant 0 : index
    %44 = vector.load %arg7[%c0_25, %c0_26, %c0_27] : memref<8x128x16xbf16, #tpu.memory_space<vmem>>, vector<1x128x16xbf16>
    %45 = vector.shape_cast %44 : vector<1x128x16xbf16> to vector<128x16xbf16>
    %cst_28 = arith.constant dense<0.000000e+00> : vector<4x16xf32>
    %46 = tpu.matmul %43, %45, %cst_28 {dimension_numbers = #tpu.dot_dimension_numbers<[1], [0], [0], [1], [0, 0, 1, 1], [], []>} : vector<4x128xbf16>, vector<128x16xbf16>, vector<4x16xf32> -> vector<4x16xf32>
    %47 = arith.truncf %46 : vector<4x16xf32> to vector<4x16xbf16>
    %c0_29 = arith.constant 0 : index
    %c0_30 = arith.constant 0 : index
    %c0_31 = arith.constant 0 : index
    %48 = vector.load %arg8[%c0_29, %c0_30, %c0_31] : memref<8x16x128xbf16, #tpu.memory_space<vmem>>, vector<1x16x128xbf16>
    %49 = vector.shape_cast %48 : vector<1x16x128xbf16> to vector<16x128xbf16>
    %cst_32 = arith.constant dense<0.000000e+00> : vector<4x128xf32>
    %50 = tpu.matmul %47, %49, %cst_32 {dimension_numbers = #tpu.dot_dimension_numbers<[1], [0], [0], [1], [0, 0, 1, 1], [], []>} : vector<4x16xbf16>, vector<16x128xbf16>, vector<4x128xf32> -> vector<4x128xf32>
    %51 = arith.addf %6, %50 : vector<4x128xf32>
    %c1 = arith.constant 1 : index
    %c0_33 = arith.constant 0 : index
    %c0_34 = arith.constant 0 : index
    %52 = vector.load %arg3[%c1, %c0_33, %c0_34] : memref<8x128x16xbf16, #tpu.memory_space<vmem>>, vector<1x128x16xbf16>
    %53 = vector.shape_cast %52 : vector<1x128x16xbf16> to vector<128x16xbf16>
    %cst_35 = arith.constant dense<0.000000e+00> : vector<32x16xf32>
    %54 = tpu.matmul %2, %53, %cst_35 {dimension_numbers = #tpu.dot_dimension_numbers<[1], [0], [0], [1], [0, 0, 1, 1], [], []>} : vector<32x128xbf16>, vector<128x16xbf16>, vector<32x16xf32> -> vector<32x16xf32>
    %c1_36 = arith.constant 1 : index
    %c0_37 = arith.constant 0 : index
    %c0_38 = arith.constant 0 : index
    %55 = vector.load %arg4[%c1_36, %c0_37, %c0_38] : memref<8x1x16xf32, #tpu.memory_space<vmem>>, vector<1x1x16xf32>
    %56 = vector.shape_cast %55 : vector<1x1x16xf32> to vector<1x16xf32>
    %57 = vector.broadcast %56 : vector<1x16xf32> to vector<32x16xf32>
    %58 = arith.addf %54, %57 : vector<32x16xf32>
    %c1_39 = arith.constant 1 : index
    %c0_40 = arith.constant 0 : index
    %c0_41 = arith.constant 0 : index
    %59 = vector.load %arg5[%c1_39, %c0_40, %c0_41] : memref<8x128x16xbf16, #tpu.memory_space<vmem>>, vector<1x128x16xbf16>
    %60 = vector.shape_cast %59 : vector<1x128x16xbf16> to vector<128x16xbf16>
    %cst_42 = arith.constant dense<0.000000e+00> : vector<64x16xf32>
    %61 = tpu.matmul %5, %60, %cst_42 {dimension_numbers = #tpu.dot_dimension_numbers<[1], [0], [0], [1], [0, 0, 1, 1], [], []>} : vector<64x128xbf16>, vector<128x16xbf16>, vector<64x16xf32> -> vector<64x16xf32>
    %c1_43 = arith.constant 1 : index
    %c0_44 = arith.constant 0 : index
    %c0_45 = arith.constant 0 : index
    %62 = vector.load %arg6[%c1_43, %c0_44, %c0_45] : memref<8x1x16xf32, #tpu.memory_space<vmem>>, vector<1x1x16xf32>
    %63 = vector.shape_cast %62 : vector<1x1x16xf32> to vector<1x16xf32>
    %64 = vector.broadcast %63 : vector<1x16xf32> to vector<64x16xf32>
    %65 = arith.addf %61, %64 : vector<64x16xf32>
    %66 = arith.truncf %58 : vector<32x16xf32> to vector<32x16xbf16>
    %67 = vector.shape_cast %66 : vector<32x16xbf16> to vector<4x8x16xbf16>
    %68 = arith.truncf %65 : vector<64x16xf32> to vector<64x16xbf16>
    %69 = vector.shape_cast %68 : vector<64x16xbf16> to vector<4x16x16xbf16>
    "tpu.trace_start"() <{level = 10 : i32, message = "bqj,bkj->bqk"}> : () -> ()
    %cst_46 = arith.constant dense<0.000000e+00> : vector<4x8x16xf32>
    %70 = tpu.matmul %67, %69, %cst_46 {dimension_numbers = #tpu.dot_dimension_numbers<[2], [2], [1], [1], [0, 0, 0, 1, 1, 1], [0], [0]>} : vector<4x8x16xbf16>, vector<4x16x16xbf16>, vector<4x8x16xf32> -> vector<4x8x16xf32>
    "tpu.trace_stop"() : () -> ()
    %cst_47 = arith.constant dense<0xFF800000> : vector<4x8xf32>
    %71 = vector.multi_reduction <maximumf>, %70, %cst_47 [2] : vector<4x8x16xf32> to vector<4x8xf32>
    %72 = vector.shape_cast %71 : vector<4x8xf32> to vector<4x8x1xf32>
    %73 = vector.broadcast %72 : vector<4x8x1xf32> to vector<4x8x16xf32>
    %74 = arith.subf %70, %73 : vector<4x8x16xf32>
    %75 = math.exp %74 : vector<4x8x16xf32>
    %cst_48 = arith.constant dense<0.000000e+00> : vector<4x8xf32>
    %76 = vector.multi_reduction <add>, %75, %cst_48 [2] : vector<4x8x16xf32> to vector<4x8xf32>
    %77 = vector.shape_cast %76 : vector<4x8xf32> to vector<4x8x1xf32>
    %78 = tpu.reciprocal %77 {approx = true} : vector<4x8x1xf32> -> vector<4x8x1xf32>
    %79 = vector.broadcast %78 : vector<4x8x1xf32> to vector<4x8x16xf32>
    %80 = arith.mulf %75, %79 : vector<4x8x16xf32>
    %cst_49 = arith.constant dense<0.000000e+00> : vector<4x16xf32>
    %81 = vector.multi_reduction <add>, %80, %cst_49 [1] : vector<4x8x16xf32> to vector<4x16xf32>
    %82 = vector.shape_cast %81 : vector<4x16xf32> to vector<4x1x16xf32>
    %cst_50 = arith.constant 8.000000e+00 : f32
    %83 = vector.broadcast %cst_50 : f32 to vector<4x1x16xf32>
    %84 = arith.divf %82, %83 : vector<4x1x16xf32>
    %85 = arith.truncf %84 : vector<4x1x16xf32> to vector<4x1x16xbf16>
    "tpu.trace_start"() <{level = 10 : i32, message = "bqk,bkd->bqd"}> : () -> ()
    %cst_51 = arith.constant dense<0.000000e+00> : vector<4x1x128xf32>
    %86 = tpu.matmul %85, %4, %cst_51 {dimension_numbers = #tpu.dot_dimension_numbers<[2], [1], [1], [2], [0, 0, 0, 1, 1, 2], [0], [0]>} : vector<4x1x16xbf16>, vector<4x16x128xbf16>, vector<4x1x128xf32> -> vector<4x1x128xf32>
    "tpu.trace_stop"() : () -> ()
    %87 = vector.shape_cast %86 : vector<4x1x128xf32> to vector<4x128xf32>
    %88 = arith.truncf %87 : vector<4x128xf32> to vector<4x128xbf16>
    %c1_52 = arith.constant 1 : index
    %c0_53 = arith.constant 0 : index
    %c0_54 = arith.constant 0 : index
    %89 = vector.load %arg7[%c1_52, %c0_53, %c0_54] : memref<8x128x16xbf16, #tpu.memory_space<vmem>>, vector<1x128x16xbf16>
    %90 = vector.shape_cast %89 : vector<1x128x16xbf16> to vector<128x16xbf16>
    %cst_55 = arith.constant dense<0.000000e+00> : vector<4x16xf32>
    %91 = tpu.matmul %88, %90, %cst_55 {dimension_numbers = #tpu.dot_dimension_numbers<[1], [0], [0], [1], [0, 0, 1, 1], [], []>} : vector<4x128xbf16>, vector<128x16xbf16>, vector<4x16xf32> -> vector<4x16xf32>
    %92 = arith.truncf %91 : vector<4x16xf32> to vector<4x16xbf16>
    %c1_56 = arith.constant 1 : index
    %c0_57 = arith.constant 0 : index
    %c0_58 = arith.constant 0 : index
    %93 = vector.load %arg8[%c1_56, %c0_57, %c0_58] : memref<8x16x128xbf16, #tpu.memory_space<vmem>>, vector<1x16x128xbf16>
    %94 = vector.shape_cast %93 : vector<1x16x128xbf16> to vector<16x128xbf16>
    %cst_59 = arith.constant dense<0.000000e+00> : vector<4x128xf32>
    %95 = tpu.matmul %92, %94, %cst_59 {dimension_numbers = #tpu.dot_dimension_numbers<[1], [0], [0], [1], [0, 0, 1, 1], [], []>} : vector<4x16xbf16>, vector<16x128xbf16>, vector<4x128xf32> -> vector<4x128xf32>
    %96 = arith.addf %51, %95 : vector<4x128xf32>
    %c2 = arith.constant 2 : index
    %c0_60 = arith.constant 0 : index
    %c0_61 = arith.constant 0 : index
    %97 = vector.load %arg3[%c2, %c0_60, %c0_61] : memref<8x128x16xbf16, #tpu.memory_space<vmem>>, vector<1x128x16xbf16>
    %98 = vector.shape_cast %97 : vector<1x128x16xbf16> to vector<128x16xbf16>
    %cst_62 = arith.constant dense<0.000000e+00> : vector<32x16xf32>
    %99 = tpu.matmul %2, %98, %cst_62 {dimension_numbers = #tpu.dot_dimension_numbers<[1], [0], [0], [1], [0, 0, 1, 1], [], []>} : vector<32x128xbf16>, vector<128x16xbf16>, vector<32x16xf32> -> vector<32x16xf32>
    %c2_63 = arith.constant 2 : index
    %c0_64 = arith.constant 0 : index
    %c0_65 = arith.constant 0 : index
    %100 = vector.load %arg4[%c2_63, %c0_64, %c0_65] : memref<8x1x16xf32, #tpu.memory_space<vmem>>, vector<1x1x16xf32>
    %101 = vector.shape_cast %100 : vector<1x1x16xf32> to vector<1x16xf32>
    %102 = vector.broadcast %101 : vector<1x16xf32> to vector<32x16xf32>
    %103 = arith.addf %99, %102 : vector<32x16xf32>
    %c2_66 = arith.constant 2 : index
    %c0_67 = arith.constant 0 : index
    %c0_68 = arith.constant 0 : index
    %104 = vector.load %arg5[%c2_66, %c0_67, %c0_68] : memref<8x128x16xbf16, #tpu.memory_space<vmem>>, vector<1x128x16xbf16>
    %105 = vector.shape_cast %104 : vector<1x128x16xbf16> to vector<128x16xbf16>
    %cst_69 = arith.constant dense<0.000000e+00> : vector<64x16xf32>
    %106 = tpu.matmul %5, %105, %cst_69 {dimension_numbers = #tpu.dot_dimension_numbers<[1], [0], [0], [1], [0, 0, 1, 1], [], []>} : vector<64x128xbf16>, vector<128x16xbf16>, vector<64x16xf32> -> vector<64x16xf32>
    %c2_70 = arith.constant 2 : index
    %c0_71 = arith.constant 0 : index
    %c0_72 = arith.constant 0 : index
    %107 = vector.load %arg6[%c2_70, %c0_71, %c0_72] : memref<8x1x16xf32, #tpu.memory_space<vmem>>, vector<1x1x16xf32>
    %108 = vector.shape_cast %107 : vector<1x1x16xf32> to vector<1x16xf32>
    %109 = vector.broadcast %108 : vector<1x16xf32> to vector<64x16xf32>
    %110 = arith.addf %106, %109 : vector<64x16xf32>
    %111 = arith.truncf %103 : vector<32x16xf32> to vector<32x16xbf16>
    %112 = vector.shape_cast %111 : vector<32x16xbf16> to vector<4x8x16xbf16>
    %113 = arith.truncf %110 : vector<64x16xf32> to vector<64x16xbf16>
    %114 = vector.shape_cast %113 : vector<64x16xbf16> to vector<4x16x16xbf16>
    "tpu.trace_start"() <{level = 10 : i32, message = "bqj,bkj->bqk"}> : () -> ()
    %cst_73 = arith.constant dense<0.000000e+00> : vector<4x8x16xf32>
    %115 = tpu.matmul %112, %114, %cst_73 {dimension_numbers = #tpu.dot_dimension_numbers<[2], [2], [1], [1], [0, 0, 0, 1, 1, 1], [0], [0]>} : vector<4x8x16xbf16>, vector<4x16x16xbf16>, vector<4x8x16xf32> -> vector<4x8x16xf32>
    "tpu.trace_stop"() : () -> ()
    %cst_74 = arith.constant dense<0xFF800000> : vector<4x8xf32>
    %116 = vector.multi_reduction <maximumf>, %115, %cst_74 [2] : vector<4x8x16xf32> to vector<4x8xf32>
    %117 = vector.shape_cast %116 : vector<4x8xf32> to vector<4x8x1xf32>
    %118 = vector.broadcast %117 : vector<4x8x1xf32> to vector<4x8x16xf32>
    %119 = arith.subf %115, %118 : vector<4x8x16xf32>
    %120 = math.exp %119 : vector<4x8x16xf32>
    %cst_75 = arith.constant dense<0.000000e+00> : vector<4x8xf32>
    %121 = vector.multi_reduction <add>, %120, %cst_75 [2] : vector<4x8x16xf32> to vector<4x8xf32>
    %122 = vector.shape_cast %121 : vector<4x8xf32> to vector<4x8x1xf32>
    %123 = tpu.reciprocal %122 {approx = true} : vector<4x8x1xf32> -> vector<4x8x1xf32>
    %124 = vector.broadcast %123 : vector<4x8x1xf32> to vector<4x8x16xf32>
    %125 = arith.mulf %120, %124 : vector<4x8x16xf32>
    %cst_76 = arith.constant dense<0.000000e+00> : vector<4x16xf32>
    %126 = vector.multi_reduction <add>, %125, %cst_76 [1] : vector<4x8x16xf32> to vector<4x16xf32>
    %127 = vector.shape_cast %126 : vector<4x16xf32> to vector<4x1x16xf32>
    %cst_77 = arith.constant 8.000000e+00 : f32
    %128 = vector.broadcast %cst_77 : f32 to vector<4x1x16xf32>
    %129 = arith.divf %127, %128 : vector<4x1x16xf32>
    %130 = arith.truncf %129 : vector<4x1x16xf32> to vector<4x1x16xbf16>
    "tpu.trace_start"() <{level = 10 : i32, message = "bqk,bkd->bqd"}> : () -> ()
    %cst_78 = arith.constant dense<0.000000e+00> : vector<4x1x128xf32>
    %131 = tpu.matmul %130, %4, %cst_78 {dimension_numbers = #tpu.dot_dimension_numbers<[2], [1], [1], [2], [0, 0, 0, 1, 1, 2], [0], [0]>} : vector<4x1x16xbf16>, vector<4x16x128xbf16>, vector<4x1x128xf32> -> vector<4x1x128xf32>
    "tpu.trace_stop"() : () -> ()
    %132 = vector.shape_cast %131 : vector<4x1x128xf32> to vector<4x128xf32>
    %133 = arith.truncf %132 : vector<4x128xf32> to vector<4x128xbf16>
    %c2_79 = arith.constant 2 : index
    %c0_80 = arith.constant 0 : index
    %c0_81 = arith.constant 0 : index
    %134 = vector.load %arg7[%c2_79, %c0_80, %c0_81] : memref<8x128x16xbf16, #tpu.memory_space<vmem>>, vector<1x128x16xbf16>
    %135 = vector.shape_cast %134 : vector<1x128x16xbf16> to vector<128x16xbf16>
    %cst_82 = arith.constant dense<0.000000e+00> : vector<4x16xf32>
    %136 = tpu.matmul %133, %135, %cst_82 {dimension_numbers = #tpu.dot_dimension_numbers<[1], [0], [0], [1], [0, 0, 1, 1], [], []>} : vector<4x128xbf16>, vector<128x16xbf16>, vector<4x16xf32> -> vector<4x16xf32>
    %137 = arith.truncf %136 : vector<4x16xf32> to vector<4x16xbf16>
    %c2_83 = arith.constant 2 : index
    %c0_84 = arith.constant 0 : index
    %c0_85 = arith.constant 0 : index
    %138 = vector.load %arg8[%c2_83, %c0_84, %c0_85] : memref<8x16x128xbf16, #tpu.memory_space<vmem>>, vector<1x16x128xbf16>
    %139 = vector.shape_cast %138 : vector<1x16x128xbf16> to vector<16x128xbf16>
    %cst_86 = arith.constant dense<0.000000e+00> : vector<4x128xf32>
    %140 = tpu.matmul %137, %139, %cst_86 {dimension_numbers = #tpu.dot_dimension_numbers<[1], [0], [0], [1], [0, 0, 1, 1], [], []>} : vector<4x16xbf16>, vector<16x128xbf16>, vector<4x128xf32> -> vector<4x128xf32>
    %141 = arith.addf %96, %140 : vector<4x128xf32>
    %c3 = arith.constant 3 : index
    %c0_87 = arith.constant 0 : index
    %c0_88 = arith.constant 0 : index
    %142 = vector.load %arg3[%c3, %c0_87, %c0_88] : memref<8x128x16xbf16, #tpu.memory_space<vmem>>, vector<1x128x16xbf16>
    %143 = vector.shape_cast %142 : vector<1x128x16xbf16> to vector<128x16xbf16>
    %cst_89 = arith.constant dense<0.000000e+00> : vector<32x16xf32>
    %144 = tpu.matmul %2, %143, %cst_89 {dimension_numbers = #tpu.dot_dimension_numbers<[1], [0], [0], [1], [0, 0, 1, 1], [], []>} : vector<32x128xbf16>, vector<128x16xbf16>, vector<32x16xf32> -> vector<32x16xf32>
    %c3_90 = arith.constant 3 : index
    %c0_91 = arith.constant 0 : index
    %c0_92 = arith.constant 0 : index
    %145 = vector.load %arg4[%c3_90, %c0_91, %c0_92] : memref<8x1x16xf32, #tpu.memory_space<vmem>>, vector<1x1x16xf32>
    %146 = vector.shape_cast %145 : vector<1x1x16xf32> to vector<1x16xf32>
    %147 = vector.broadcast %146 : vector<1x16xf32> to vector<32x16xf32>
    %148 = arith.addf %144, %147 : vector<32x16xf32>
    %c3_93 = arith.constant 3 : index
    %c0_94 = arith.constant 0 : index
    %c0_95 = arith.constant 0 : index
    %149 = vector.load %arg5[%c3_93, %c0_94, %c0_95] : memref<8x128x16xbf16, #tpu.memory_space<vmem>>, vector<1x128x16xbf16>
    %150 = vector.shape_cast %149 : vector<1x128x16xbf16> to vector<128x16xbf16>
    %cst_96 = arith.constant dense<0.000000e+00> : vector<64x16xf32>
    %151 = tpu.matmul %5, %150, %cst_96 {dimension_numbers = #tpu.dot_dimension_numbers<[1], [0], [0], [1], [0, 0, 1, 1], [], []>} : vector<64x128xbf16>, vector<128x16xbf16>, vector<64x16xf32> -> vector<64x16xf32>
    %c3_97 = arith.constant 3 : index
    %c0_98 = arith.constant 0 : index
    %c0_99 = arith.constant 0 : index
    %152 = vector.load %arg6[%c3_97, %c0_98, %c0_99] : memref<8x1x16xf32, #tpu.memory_space<vmem>>, vector<1x1x16xf32>
    %153 = vector.shape_cast %152 : vector<1x1x16xf32> to vector<1x16xf32>
    %154 = vector.broadcast %153 : vector<1x16xf32> to vector<64x16xf32>
    %155 = arith.addf %151, %154 : vector<64x16xf32>
    %156 = arith.truncf %148 : vector<32x16xf32> to vector<32x16xbf16>
    %157 = vector.shape_cast %156 : vector<32x16xbf16> to vector<4x8x16xbf16>
    %158 = arith.truncf %155 : vector<64x16xf32> to vector<64x16xbf16>
    %159 = vector.shape_cast %158 : vector<64x16xbf16> to vector<4x16x16xbf16>
    "tpu.trace_start"() <{level = 10 : i32, message = "bqj,bkj->bqk"}> : () -> ()
    %cst_100 = arith.constant dense<0.000000e+00> : vector<4x8x16xf32>
    %160 = tpu.matmul %157, %159, %cst_100 {dimension_numbers = #tpu.dot_dimension_numbers<[2], [2], [1], [1], [0, 0, 0, 1, 1, 1], [0], [0]>} : vector<4x8x16xbf16>, vector<4x16x16xbf16>, vector<4x8x16xf32> -> vector<4x8x16xf32>
    "tpu.trace_stop"() : () -> ()
    %cst_101 = arith.constant dense<0xFF800000> : vector<4x8xf32>
    %161 = vector.multi_reduction <maximumf>, %160, %cst_101 [2] : vector<4x8x16xf32> to vector<4x8xf32>
    %162 = vector.shape_cast %161 : vector<4x8xf32> to vector<4x8x1xf32>
    %163 = vector.broadcast %162 : vector<4x8x1xf32> to vector<4x8x16xf32>
    %164 = arith.subf %160, %163 : vector<4x8x16xf32>
    %165 = math.exp %164 : vector<4x8x16xf32>
    %cst_102 = arith.constant dense<0.000000e+00> : vector<4x8xf32>
    %166 = vector.multi_reduction <add>, %165, %cst_102 [2] : vector<4x8x16xf32> to vector<4x8xf32>
    %167 = vector.shape_cast %166 : vector<4x8xf32> to vector<4x8x1xf32>
    %168 = tpu.reciprocal %167 {approx = true} : vector<4x8x1xf32> -> vector<4x8x1xf32>
    %169 = vector.broadcast %168 : vector<4x8x1xf32> to vector<4x8x16xf32>
    %170 = arith.mulf %165, %169 : vector<4x8x16xf32>
    %cst_103 = arith.constant dense<0.000000e+00> : vector<4x16xf32>
    %171 = vector.multi_reduction <add>, %170, %cst_103 [1] : vector<4x8x16xf32> to vector<4x16xf32>
    %172 = vector.shape_cast %171 : vector<4x16xf32> to vector<4x1x16xf32>
    %cst_104 = arith.constant 8.000000e+00 : f32
    %173 = vector.broadcast %cst_104 : f32 to vector<4x1x16xf32>
    %174 = arith.divf %172, %173 : vector<4x1x16xf32>
    %175 = arith.truncf %174 : vector<4x1x16xf32> to vector<4x1x16xbf16>
    "tpu.trace_start"() <{level = 10 : i32, message = "bqk,bkd->bqd"}> : () -> ()
    %cst_105 = arith.constant dense<0.000000e+00> : vector<4x1x128xf32>
    %176 = tpu.matmul %175, %4, %cst_105 {dimension_numbers = #tpu.dot_dimension_numbers<[2], [1], [1], [2], [0, 0, 0, 1, 1, 2], [0], [0]>} : vector<4x1x16xbf16>, vector<4x16x128xbf16>, vector<4x1x128xf32> -> vector<4x1x128xf32>
    "tpu.trace_stop"() : () -> ()
    %177 = vector.shape_cast %176 : vector<4x1x128xf32> to vector<4x128xf32>
    %178 = arith.truncf %177 : vector<4x128xf32> to vector<4x128xbf16>
    %c3_106 = arith.constant 3 : index
    %c0_107 = arith.constant 0 : index
    %c0_108 = arith.constant 0 : index
    %179 = vector.load %arg7[%c3_106, %c0_107, %c0_108] : memref<8x128x16xbf16, #tpu.memory_space<vmem>>, vector<1x128x16xbf16>
    %180 = vector.shape_cast %179 : vector<1x128x16xbf16> to vector<128x16xbf16>
    %cst_109 = arith.constant dense<0.000000e+00> : vector<4x16xf32>
    %181 = tpu.matmul %178, %180, %cst_109 {dimension_numbers = #tpu.dot_dimension_numbers<[1], [0], [0], [1], [0, 0, 1, 1], [], []>} : vector<4x128xbf16>, vector<128x16xbf16>, vector<4x16xf32> -> vector<4x16xf32>
    %182 = arith.truncf %181 : vector<4x16xf32> to vector<4x16xbf16>
    %c3_110 = arith.constant 3 : index
    %c0_111 = arith.constant 0 : index
    %c0_112 = arith.constant 0 : index
    %183 = vector.load %arg8[%c3_110, %c0_111, %c0_112] : memref<8x16x128xbf16, #tpu.memory_space<vmem>>, vector<1x16x128xbf16>
    %184 = vector.shape_cast %183 : vector<1x16x128xbf16> to vector<16x128xbf16>
    %cst_113 = arith.constant dense<0.000000e+00> : vector<4x128xf32>
    %185 = tpu.matmul %182, %184, %cst_113 {dimension_numbers = #tpu.dot_dimension_numbers<[1], [0], [0], [1], [0, 0, 1, 1], [], []>} : vector<4x16xbf16>, vector<16x128xbf16>, vector<4x128xf32> -> vector<4x128xf32>
    %186 = arith.addf %141, %185 : vector<4x128xf32>
    %c4 = arith.constant 4 : index
    %c0_114 = arith.constant 0 : index
    %c0_115 = arith.constant 0 : index
    %187 = vector.load %arg3[%c4, %c0_114, %c0_115] : memref<8x128x16xbf16, #tpu.memory_space<vmem>>, vector<1x128x16xbf16>
    %188 = vector.shape_cast %187 : vector<1x128x16xbf16> to vector<128x16xbf16>
    %cst_116 = arith.constant dense<0.000000e+00> : vector<32x16xf32>
    %189 = tpu.matmul %2, %188, %cst_116 {dimension_numbers = #tpu.dot_dimension_numbers<[1], [0], [0], [1], [0, 0, 1, 1], [], []>} : vector<32x128xbf16>, vector<128x16xbf16>, vector<32x16xf32> -> vector<32x16xf32>
    %c4_117 = arith.constant 4 : index
    %c0_118 = arith.constant 0 : index
    %c0_119 = arith.constant 0 : index
    %190 = vector.load %arg4[%c4_117, %c0_118, %c0_119] : memref<8x1x16xf32, #tpu.memory_space<vmem>>, vector<1x1x16xf32>
    %191 = vector.shape_cast %190 : vector<1x1x16xf32> to vector<1x16xf32>
    %192 = vector.broadcast %191 : vector<1x16xf32> to vector<32x16xf32>
    %193 = arith.addf %189, %192 : vector<32x16xf32>
    %c4_120 = arith.constant 4 : index
    %c0_121 = arith.constant 0 : index
    %c0_122 = arith.constant 0 : index
    %194 = vector.load %arg5[%c4_120, %c0_121, %c0_122] : memref<8x128x16xbf16, #tpu.memory_space<vmem>>, vector<1x128x16xbf16>
    %195 = vector.shape_cast %194 : vector<1x128x16xbf16> to vector<128x16xbf16>
    %cst_123 = arith.constant dense<0.000000e+00> : vector<64x16xf32>
    %196 = tpu.matmul %5, %195, %cst_123 {dimension_numbers = #tpu.dot_dimension_numbers<[1], [0], [0], [1], [0, 0, 1, 1], [], []>} : vector<64x128xbf16>, vector<128x16xbf16>, vector<64x16xf32> -> vector<64x16xf32>
    %c4_124 = arith.constant 4 : index
    %c0_125 = arith.constant 0 : index
    %c0_126 = arith.constant 0 : index
    %197 = vector.load %arg6[%c4_124, %c0_125, %c0_126] : memref<8x1x16xf32, #tpu.memory_space<vmem>>, vector<1x1x16xf32>
    %198 = vector.shape_cast %197 : vector<1x1x16xf32> to vector<1x16xf32>
    %199 = vector.broadcast %198 : vector<1x16xf32> to vector<64x16xf32>
    %200 = arith.addf %196, %199 : vector<64x16xf32>
    %201 = arith.truncf %193 : vector<32x16xf32> to vector<32x16xbf16>
    %202 = vector.shape_cast %201 : vector<32x16xbf16> to vector<4x8x16xbf16>
    %203 = arith.truncf %200 : vector<64x16xf32> to vector<64x16xbf16>
    %204 = vector.shape_cast %203 : vector<64x16xbf16> to vector<4x16x16xbf16>
    "tpu.trace_start"() <{level = 10 : i32, message = "bqj,bkj->bqk"}> : () -> ()
    %cst_127 = arith.constant dense<0.000000e+00> : vector<4x8x16xf32>
    %205 = tpu.matmul %202, %204, %cst_127 {dimension_numbers = #tpu.dot_dimension_numbers<[2], [2], [1], [1], [0, 0, 0, 1, 1, 1], [0], [0]>} : vector<4x8x16xbf16>, vector<4x16x16xbf16>, vector<4x8x16xf32> -> vector<4x8x16xf32>
    "tpu.trace_stop"() : () -> ()
    %cst_128 = arith.constant dense<0xFF800000> : vector<4x8xf32>
    %206 = vector.multi_reduction <maximumf>, %205, %cst_128 [2] : vector<4x8x16xf32> to vector<4x8xf32>
    %207 = vector.shape_cast %206 : vector<4x8xf32> to vector<4x8x1xf32>
    %208 = vector.broadcast %207 : vector<4x8x1xf32> to vector<4x8x16xf32>
    %209 = arith.subf %205, %208 : vector<4x8x16xf32>
    %210 = math.exp %209 : vector<4x8x16xf32>
    %cst_129 = arith.constant dense<0.000000e+00> : vector<4x8xf32>
    %211 = vector.multi_reduction <add>, %210, %cst_129 [2] : vector<4x8x16xf32> to vector<4x8xf32>
    %212 = vector.shape_cast %211 : vector<4x8xf32> to vector<4x8x1xf32>
    %213 = tpu.reciprocal %212 {approx = true} : vector<4x8x1xf32> -> vector<4x8x1xf32>
    %214 = vector.broadcast %213 : vector<4x8x1xf32> to vector<4x8x16xf32>
    %215 = arith.mulf %210, %214 : vector<4x8x16xf32>
    %cst_130 = arith.constant dense<0.000000e+00> : vector<4x16xf32>
    %216 = vector.multi_reduction <add>, %215, %cst_130 [1] : vector<4x8x16xf32> to vector<4x16xf32>
    %217 = vector.shape_cast %216 : vector<4x16xf32> to vector<4x1x16xf32>
    %cst_131 = arith.constant 8.000000e+00 : f32
    %218 = vector.broadcast %cst_131 : f32 to vector<4x1x16xf32>
    %219 = arith.divf %217, %218 : vector<4x1x16xf32>
    %220 = arith.truncf %219 : vector<4x1x16xf32> to vector<4x1x16xbf16>
    "tpu.trace_start"() <{level = 10 : i32, message = "bqk,bkd->bqd"}> : () -> ()
    %cst_132 = arith.constant dense<0.000000e+00> : vector<4x1x128xf32>
    %221 = tpu.matmul %220, %4, %cst_132 {dimension_numbers = #tpu.dot_dimension_numbers<[2], [1], [1], [2], [0, 0, 0, 1, 1, 2], [0], [0]>} : vector<4x1x16xbf16>, vector<4x16x128xbf16>, vector<4x1x128xf32> -> vector<4x1x128xf32>
    "tpu.trace_stop"() : () -> ()
    %222 = vector.shape_cast %221 : vector<4x1x128xf32> to vector<4x128xf32>
    %223 = arith.truncf %222 : vector<4x128xf32> to vector<4x128xbf16>
    %c4_133 = arith.constant 4 : index
    %c0_134 = arith.constant 0 : index
    %c0_135 = arith.constant 0 : index
    %224 = vector.load %arg7[%c4_133, %c0_134, %c0_135] : memref<8x128x16xbf16, #tpu.memory_space<vmem>>, vector<1x128x16xbf16>
    %225 = vector.shape_cast %224 : vector<1x128x16xbf16> to vector<128x16xbf16>
    %cst_136 = arith.constant dense<0.000000e+00> : vector<4x16xf32>
    %226 = tpu.matmul %223, %225, %cst_136 {dimension_numbers = #tpu.dot_dimension_numbers<[1], [0], [0], [1], [0, 0, 1, 1], [], []>} : vector<4x128xbf16>, vector<128x16xbf16>, vector<4x16xf32> -> vector<4x16xf32>
    %227 = arith.truncf %226 : vector<4x16xf32> to vector<4x16xbf16>
    %c4_137 = arith.constant 4 : index
    %c0_138 = arith.constant 0 : index
    %c0_139 = arith.constant 0 : index
    %228 = vector.load %arg8[%c4_137, %c0_138, %c0_139] : memref<8x16x128xbf16, #tpu.memory_space<vmem>>, vector<1x16x128xbf16>
    %229 = vector.shape_cast %228 : vector<1x16x128xbf16> to vector<16x128xbf16>
    %cst_140 = arith.constant dense<0.000000e+00> : vector<4x128xf32>
    %230 = tpu.matmul %227, %229, %cst_140 {dimension_numbers = #tpu.dot_dimension_numbers<[1], [0], [0], [1], [0, 0, 1, 1], [], []>} : vector<4x16xbf16>, vector<16x128xbf16>, vector<4x128xf32> -> vector<4x128xf32>
    %231 = arith.addf %186, %230 : vector<4x128xf32>
    %c5 = arith.constant 5 : index
    %c0_141 = arith.constant 0 : index
    %c0_142 = arith.constant 0 : index
    %232 = vector.load %arg3[%c5, %c0_141, %c0_142] : memref<8x128x16xbf16, #tpu.memory_space<vmem>>, vector<1x128x16xbf16>
    %233 = vector.shape_cast %232 : vector<1x128x16xbf16> to vector<128x16xbf16>
    %cst_143 = arith.constant dense<0.000000e+00> : vector<32x16xf32>
    %234 = tpu.matmul %2, %233, %cst_143 {dimension_numbers = #tpu.dot_dimension_numbers<[1], [0], [0], [1], [0, 0, 1, 1], [], []>} : vector<32x128xbf16>, vector<128x16xbf16>, vector<32x16xf32> -> vector<32x16xf32>
    %c5_144 = arith.constant 5 : index
    %c0_145 = arith.constant 0 : index
    %c0_146 = arith.constant 0 : index
    %235 = vector.load %arg4[%c5_144, %c0_145, %c0_146] : memref<8x1x16xf32, #tpu.memory_space<vmem>>, vector<1x1x16xf32>
    %236 = vector.shape_cast %235 : vector<1x1x16xf32> to vector<1x16xf32>
    %237 = vector.broadcast %236 : vector<1x16xf32> to vector<32x16xf32>
    %238 = arith.addf %234, %237 : vector<32x16xf32>
    %c5_147 = arith.constant 5 : index
    %c0_148 = arith.constant 0 : index
    %c0_149 = arith.constant 0 : index
    %239 = vector.load %arg5[%c5_147, %c0_148, %c0_149] : memref<8x128x16xbf16, #tpu.memory_space<vmem>>, vector<1x128x16xbf16>
    %240 = vector.shape_cast %239 : vector<1x128x16xbf16> to vector<128x16xbf16>
    %cst_150 = arith.constant dense<0.000000e+00> : vector<64x16xf32>
    %241 = tpu.matmul %5, %240, %cst_150 {dimension_numbers = #tpu.dot_dimension_numbers<[1], [0], [0], [1], [0, 0, 1, 1], [], []>} : vector<64x128xbf16>, vector<128x16xbf16>, vector<64x16xf32> -> vector<64x16xf32>
    %c5_151 = arith.constant 5 : index
    %c0_152 = arith.constant 0 : index
    %c0_153 = arith.constant 0 : index
    %242 = vector.load %arg6[%c5_151, %c0_152, %c0_153] : memref<8x1x16xf32, #tpu.memory_space<vmem>>, vector<1x1x16xf32>
    %243 = vector.shape_cast %242 : vector<1x1x16xf32> to vector<1x16xf32>
    %244 = vector.broadcast %243 : vector<1x16xf32> to vector<64x16xf32>
    %245 = arith.addf %241, %244 : vector<64x16xf32>
    %246 = arith.truncf %238 : vector<32x16xf32> to vector<32x16xbf16>
    %247 = vector.shape_cast %246 : vector<32x16xbf16> to vector<4x8x16xbf16>
    %248 = arith.truncf %245 : vector<64x16xf32> to vector<64x16xbf16>
    %249 = vector.shape_cast %248 : vector<64x16xbf16> to vector<4x16x16xbf16>
    "tpu.trace_start"() <{level = 10 : i32, message = "bqj,bkj->bqk"}> : () -> ()
    %cst_154 = arith.constant dense<0.000000e+00> : vector<4x8x16xf32>
    %250 = tpu.matmul %247, %249, %cst_154 {dimension_numbers = #tpu.dot_dimension_numbers<[2], [2], [1], [1], [0, 0, 0, 1, 1, 1], [0], [0]>} : vector<4x8x16xbf16>, vector<4x16x16xbf16>, vector<4x8x16xf32> -> vector<4x8x16xf32>
    "tpu.trace_stop"() : () -> ()
    %cst_155 = arith.constant dense<0xFF800000> : vector<4x8xf32>
    %251 = vector.multi_reduction <maximumf>, %250, %cst_155 [2] : vector<4x8x16xf32> to vector<4x8xf32>
    %252 = vector.shape_cast %251 : vector<4x8xf32> to vector<4x8x1xf32>
    %253 = vector.broadcast %252 : vector<4x8x1xf32> to vector<4x8x16xf32>
    %254 = arith.subf %250, %253 : vector<4x8x16xf32>
    %255 = math.exp %254 : vector<4x8x16xf32>
    %cst_156 = arith.constant dense<0.000000e+00> : vector<4x8xf32>
    %256 = vector.multi_reduction <add>, %255, %cst_156 [2] : vector<4x8x16xf32> to vector<4x8xf32>
    %257 = vector.shape_cast %256 : vector<4x8xf32> to vector<4x8x1xf32>
    %258 = tpu.reciprocal %257 {approx = true} : vector<4x8x1xf32> -> vector<4x8x1xf32>
    %259 = vector.broadcast %258 : vector<4x8x1xf32> to vector<4x8x16xf32>
    %260 = arith.mulf %255, %259 : vector<4x8x16xf32>
    %cst_157 = arith.constant dense<0.000000e+00> : vector<4x16xf32>
    %261 = vector.multi_reduction <add>, %260, %cst_157 [1] : vector<4x8x16xf32> to vector<4x16xf32>
    %262 = vector.shape_cast %261 : vector<4x16xf32> to vector<4x1x16xf32>
    %cst_158 = arith.constant 8.000000e+00 : f32
    %263 = vector.broadcast %cst_158 : f32 to vector<4x1x16xf32>
    %264 = arith.divf %262, %263 : vector<4x1x16xf32>
    %265 = arith.truncf %264 : vector<4x1x16xf32> to vector<4x1x16xbf16>
    "tpu.trace_start"() <{level = 10 : i32, message = "bqk,bkd->bqd"}> : () -> ()
    %cst_159 = arith.constant dense<0.000000e+00> : vector<4x1x128xf32>
    %266 = tpu.matmul %265, %4, %cst_159 {dimension_numbers = #tpu.dot_dimension_numbers<[2], [1], [1], [2], [0, 0, 0, 1, 1, 2], [0], [0]>} : vector<4x1x16xbf16>, vector<4x16x128xbf16>, vector<4x1x128xf32> -> vector<4x1x128xf32>
    "tpu.trace_stop"() : () -> ()
    %267 = vector.shape_cast %266 : vector<4x1x128xf32> to vector<4x128xf32>
    %268 = arith.truncf %267 : vector<4x128xf32> to vector<4x128xbf16>
    %c5_160 = arith.constant 5 : index
    %c0_161 = arith.constant 0 : index
    %c0_162 = arith.constant 0 : index
    %269 = vector.load %arg7[%c5_160, %c0_161, %c0_162] : memref<8x128x16xbf16, #tpu.memory_space<vmem>>, vector<1x128x16xbf16>
    %270 = vector.shape_cast %269 : vector<1x128x16xbf16> to vector<128x16xbf16>
    %cst_163 = arith.constant dense<0.000000e+00> : vector<4x16xf32>
    %271 = tpu.matmul %268, %270, %cst_163 {dimension_numbers = #tpu.dot_dimension_numbers<[1], [0], [0], [1], [0, 0, 1, 1], [], []>} : vector<4x128xbf16>, vector<128x16xbf16>, vector<4x16xf32> -> vector<4x16xf32>
    %272 = arith.truncf %271 : vector<4x16xf32> to vector<4x16xbf16>
    %c5_164 = arith.constant 5 : index
    %c0_165 = arith.constant 0 : index
    %c0_166 = arith.constant 0 : index
    %273 = vector.load %arg8[%c5_164, %c0_165, %c0_166] : memref<8x16x128xbf16, #tpu.memory_space<vmem>>, vector<1x16x128xbf16>
    %274 = vector.shape_cast %273 : vector<1x16x128xbf16> to vector<16x128xbf16>
    %cst_167 = arith.constant dense<0.000000e+00> : vector<4x128xf32>
    %275 = tpu.matmul %272, %274, %cst_167 {dimension_numbers = #tpu.dot_dimension_numbers<[1], [0], [0], [1], [0, 0, 1, 1], [], []>} : vector<4x16xbf16>, vector<16x128xbf16>, vector<4x128xf32> -> vector<4x128xf32>
    %276 = arith.addf %231, %275 : vector<4x128xf32>
    %c6 = arith.constant 6 : index
    %c0_168 = arith.constant 0 : index
    %c0_169 = arith.constant 0 : index
    %277 = vector.load %arg3[%c6, %c0_168, %c0_169] : memref<8x128x16xbf16, #tpu.memory_space<vmem>>, vector<1x128x16xbf16>
    %278 = vector.shape_cast %277 : vector<1x128x16xbf16> to vector<128x16xbf16>
    %cst_170 = arith.constant dense<0.000000e+00> : vector<32x16xf32>
    %279 = tpu.matmul %2, %278, %cst_170 {dimension_numbers = #tpu.dot_dimension_numbers<[1], [0], [0], [1], [0, 0, 1, 1], [], []>} : vector<32x128xbf16>, vector<128x16xbf16>, vector<32x16xf32> -> vector<32x16xf32>
    %c6_171 = arith.constant 6 : index
    %c0_172 = arith.constant 0 : index
    %c0_173 = arith.constant 0 : index
    %280 = vector.load %arg4[%c6_171, %c0_172, %c0_173] : memref<8x1x16xf32, #tpu.memory_space<vmem>>, vector<1x1x16xf32>
    %281 = vector.shape_cast %280 : vector<1x1x16xf32> to vector<1x16xf32>
    %282 = vector.broadcast %281 : vector<1x16xf32> to vector<32x16xf32>
    %283 = arith.addf %279, %282 : vector<32x16xf32>
    %c6_174 = arith.constant 6 : index
    %c0_175 = arith.constant 0 : index
    %c0_176 = arith.constant 0 : index
    %284 = vector.load %arg5[%c6_174, %c0_175, %c0_176] : memref<8x128x16xbf16, #tpu.memory_space<vmem>>, vector<1x128x16xbf16>
    %285 = vector.shape_cast %284 : vector<1x128x16xbf16> to vector<128x16xbf16>
    %cst_177 = arith.constant dense<0.000000e+00> : vector<64x16xf32>
    %286 = tpu.matmul %5, %285, %cst_177 {dimension_numbers = #tpu.dot_dimension_numbers<[1], [0], [0], [1], [0, 0, 1, 1], [], []>} : vector<64x128xbf16>, vector<128x16xbf16>, vector<64x16xf32> -> vector<64x16xf32>
    %c6_178 = arith.constant 6 : index
    %c0_179 = arith.constant 0 : index
    %c0_180 = arith.constant 0 : index
    %287 = vector.load %arg6[%c6_178, %c0_179, %c0_180] : memref<8x1x16xf32, #tpu.memory_space<vmem>>, vector<1x1x16xf32>
    %288 = vector.shape_cast %287 : vector<1x1x16xf32> to vector<1x16xf32>
    %289 = vector.broadcast %288 : vector<1x16xf32> to vector<64x16xf32>
    %290 = arith.addf %286, %289 : vector<64x16xf32>
    %291 = arith.truncf %283 : vector<32x16xf32> to vector<32x16xbf16>
    %292 = vector.shape_cast %291 : vector<32x16xbf16> to vector<4x8x16xbf16>
    %293 = arith.truncf %290 : vector<64x16xf32> to vector<64x16xbf16>
    %294 = vector.shape_cast %293 : vector<64x16xbf16> to vector<4x16x16xbf16>
    "tpu.trace_start"() <{level = 10 : i32, message = "bqj,bkj->bqk"}> : () -> ()
    %cst_181 = arith.constant dense<0.000000e+00> : vector<4x8x16xf32>
    %295 = tpu.matmul %292, %294, %cst_181 {dimension_numbers = #tpu.dot_dimension_numbers<[2], [2], [1], [1], [0, 0, 0, 1, 1, 1], [0], [0]>} : vector<4x8x16xbf16>, vector<4x16x16xbf16>, vector<4x8x16xf32> -> vector<4x8x16xf32>
    "tpu.trace_stop"() : () -> ()
    %cst_182 = arith.constant dense<0xFF800000> : vector<4x8xf32>
    %296 = vector.multi_reduction <maximumf>, %295, %cst_182 [2] : vector<4x8x16xf32> to vector<4x8xf32>
    %297 = vector.shape_cast %296 : vector<4x8xf32> to vector<4x8x1xf32>
    %298 = vector.broadcast %297 : vector<4x8x1xf32> to vector<4x8x16xf32>
    %299 = arith.subf %295, %298 : vector<4x8x16xf32>
    %300 = math.exp %299 : vector<4x8x16xf32>
    %cst_183 = arith.constant dense<0.000000e+00> : vector<4x8xf32>
    %301 = vector.multi_reduction <add>, %300, %cst_183 [2] : vector<4x8x16xf32> to vector<4x8xf32>
    %302 = vector.shape_cast %301 : vector<4x8xf32> to vector<4x8x1xf32>
    %303 = tpu.reciprocal %302 {approx = true} : vector<4x8x1xf32> -> vector<4x8x1xf32>
    %304 = vector.broadcast %303 : vector<4x8x1xf32> to vector<4x8x16xf32>
    %305 = arith.mulf %300, %304 : vector<4x8x16xf32>
    %cst_184 = arith.constant dense<0.000000e+00> : vector<4x16xf32>
    %306 = vector.multi_reduction <add>, %305, %cst_184 [1] : vector<4x8x16xf32> to vector<4x16xf32>
    %307 = vector.shape_cast %306 : vector<4x16xf32> to vector<4x1x16xf32>
    %cst_185 = arith.constant 8.000000e+00 : f32
    %308 = vector.broadcast %cst_185 : f32 to vector<4x1x16xf32>
    %309 = arith.divf %307, %308 : vector<4x1x16xf32>
    %310 = arith.truncf %309 : vector<4x1x16xf32> to vector<4x1x16xbf16>
    "tpu.trace_start"() <{level = 10 : i32, message = "bqk,bkd->bqd"}> : () -> ()
    %cst_186 = arith.constant dense<0.000000e+00> : vector<4x1x128xf32>
    %311 = tpu.matmul %310, %4, %cst_186 {dimension_numbers = #tpu.dot_dimension_numbers<[2], [1], [1], [2], [0, 0, 0, 1, 1, 2], [0], [0]>} : vector<4x1x16xbf16>, vector<4x16x128xbf16>, vector<4x1x128xf32> -> vector<4x1x128xf32>
    "tpu.trace_stop"() : () -> ()
    %312 = vector.shape_cast %311 : vector<4x1x128xf32> to vector<4x128xf32>
    %313 = arith.truncf %312 : vector<4x128xf32> to vector<4x128xbf16>
    %c6_187 = arith.constant 6 : index
    %c0_188 = arith.constant 0 : index
    %c0_189 = arith.constant 0 : index
    %314 = vector.load %arg7[%c6_187, %c0_188, %c0_189] : memref<8x128x16xbf16, #tpu.memory_space<vmem>>, vector<1x128x16xbf16>
    %315 = vector.shape_cast %314 : vector<1x128x16xbf16> to vector<128x16xbf16>
    %cst_190 = arith.constant dense<0.000000e+00> : vector<4x16xf32>
    %316 = tpu.matmul %313, %315, %cst_190 {dimension_numbers = #tpu.dot_dimension_numbers<[1], [0], [0], [1], [0, 0, 1, 1], [], []>} : vector<4x128xbf16>, vector<128x16xbf16>, vector<4x16xf32> -> vector<4x16xf32>
    %317 = arith.truncf %316 : vector<4x16xf32> to vector<4x16xbf16>
    %c6_191 = arith.constant 6 : index
    %c0_192 = arith.constant 0 : index
    %c0_193 = arith.constant 0 : index
    %318 = vector.load %arg8[%c6_191, %c0_192, %c0_193] : memref<8x16x128xbf16, #tpu.memory_space<vmem>>, vector<1x16x128xbf16>
    %319 = vector.shape_cast %318 : vector<1x16x128xbf16> to vector<16x128xbf16>
    %cst_194 = arith.constant dense<0.000000e+00> : vector<4x128xf32>
    %320 = tpu.matmul %317, %319, %cst_194 {dimension_numbers = #tpu.dot_dimension_numbers<[1], [0], [0], [1], [0, 0, 1, 1], [], []>} : vector<4x16xbf16>, vector<16x128xbf16>, vector<4x128xf32> -> vector<4x128xf32>
    %321 = arith.addf %276, %320 : vector<4x128xf32>
    %c7 = arith.constant 7 : index
    %c0_195 = arith.constant 0 : index
    %c0_196 = arith.constant 0 : index
    %322 = vector.load %arg3[%c7, %c0_195, %c0_196] : memref<8x128x16xbf16, #tpu.memory_space<vmem>>, vector<1x128x16xbf16>
    %323 = vector.shape_cast %322 : vector<1x128x16xbf16> to vector<128x16xbf16>
    %cst_197 = arith.constant dense<0.000000e+00> : vector<32x16xf32>
    %324 = tpu.matmul %2, %323, %cst_197 {dimension_numbers = #tpu.dot_dimension_numbers<[1], [0], [0], [1], [0, 0, 1, 1], [], []>} : vector<32x128xbf16>, vector<128x16xbf16>, vector<32x16xf32> -> vector<32x16xf32>
    %c7_198 = arith.constant 7 : index
    %c0_199 = arith.constant 0 : index
    %c0_200 = arith.constant 0 : index
    %325 = vector.load %arg4[%c7_198, %c0_199, %c0_200] : memref<8x1x16xf32, #tpu.memory_space<vmem>>, vector<1x1x16xf32>
    %326 = vector.shape_cast %325 : vector<1x1x16xf32> to vector<1x16xf32>
    %327 = vector.broadcast %326 : vector<1x16xf32> to vector<32x16xf32>
    %328 = arith.addf %324, %327 : vector<32x16xf32>
    %c7_201 = arith.constant 7 : index
    %c0_202 = arith.constant 0 : index
    %c0_203 = arith.constant 0 : index
    %329 = vector.load %arg5[%c7_201, %c0_202, %c0_203] : memref<8x128x16xbf16, #tpu.memory_space<vmem>>, vector<1x128x16xbf16>
    %330 = vector.shape_cast %329 : vector<1x128x16xbf16> to vector<128x16xbf16>
    %cst_204 = arith.constant dense<0.000000e+00> : vector<64x16xf32>
    %331 = tpu.matmul %5, %330, %cst_204 {dimension_numbers = #tpu.dot_dimension_numbers<[1], [0], [0], [1], [0, 0, 1, 1], [], []>} : vector<64x128xbf16>, vector<128x16xbf16>, vector<64x16xf32> -> vector<64x16xf32>
    %c7_205 = arith.constant 7 : index
    %c0_206 = arith.constant 0 : index
    %c0_207 = arith.constant 0 : index
    %332 = vector.load %arg6[%c7_205, %c0_206, %c0_207] : memref<8x1x16xf32, #tpu.memory_space<vmem>>, vector<1x1x16xf32>
    %333 = vector.shape_cast %332 : vector<1x1x16xf32> to vector<1x16xf32>
    %334 = vector.broadcast %333 : vector<1x16xf32> to vector<64x16xf32>
    %335 = arith.addf %331, %334 : vector<64x16xf32>
    %336 = arith.truncf %328 : vector<32x16xf32> to vector<32x16xbf16>
    %337 = vector.shape_cast %336 : vector<32x16xbf16> to vector<4x8x16xbf16>
    %338 = arith.truncf %335 : vector<64x16xf32> to vector<64x16xbf16>
    %339 = vector.shape_cast %338 : vector<64x16xbf16> to vector<4x16x16xbf16>
    "tpu.trace_start"() <{level = 10 : i32, message = "bqj,bkj->bqk"}> : () -> ()
    %cst_208 = arith.constant dense<0.000000e+00> : vector<4x8x16xf32>
    %340 = tpu.matmul %337, %339, %cst_208 {dimension_numbers = #tpu.dot_dimension_numbers<[2], [2], [1], [1], [0, 0, 0, 1, 1, 1], [0], [0]>} : vector<4x8x16xbf16>, vector<4x16x16xbf16>, vector<4x8x16xf32> -> vector<4x8x16xf32>
    "tpu.trace_stop"() : () -> ()
    %cst_209 = arith.constant dense<0xFF800000> : vector<4x8xf32>
    %341 = vector.multi_reduction <maximumf>, %340, %cst_209 [2] : vector<4x8x16xf32> to vector<4x8xf32>
    %342 = vector.shape_cast %341 : vector<4x8xf32> to vector<4x8x1xf32>
    %343 = vector.broadcast %342 : vector<4x8x1xf32> to vector<4x8x16xf32>
    %344 = arith.subf %340, %343 : vector<4x8x16xf32>
    %345 = math.exp %344 : vector<4x8x16xf32>
    %cst_210 = arith.constant dense<0.000000e+00> : vector<4x8xf32>
    %346 = vector.multi_reduction <add>, %345, %cst_210 [2] : vector<4x8x16xf32> to vector<4x8xf32>
    %347 = vector.shape_cast %346 : vector<4x8xf32> to vector<4x8x1xf32>
    %348 = tpu.reciprocal %347 {approx = true} : vector<4x8x1xf32> -> vector<4x8x1xf32>
    %349 = vector.broadcast %348 : vector<4x8x1xf32> to vector<4x8x16xf32>
    %350 = arith.mulf %345, %349 : vector<4x8x16xf32>
    %cst_211 = arith.constant dense<0.000000e+00> : vector<4x16xf32>
    %351 = vector.multi_reduction <add>, %350, %cst_211 [1] : vector<4x8x16xf32> to vector<4x16xf32>
    %352 = vector.shape_cast %351 : vector<4x16xf32> to vector<4x1x16xf32>
    %cst_212 = arith.constant 8.000000e+00 : f32
    %353 = vector.broadcast %cst_212 : f32 to vector<4x1x16xf32>
    %354 = arith.divf %352, %353 : vector<4x1x16xf32>
    %355 = arith.truncf %354 : vector<4x1x16xf32> to vector<4x1x16xbf16>
    "tpu.trace_start"() <{level = 10 : i32, message = "bqk,bkd->bqd"}> : () -> ()
    %cst_213 = arith.constant dense<0.000000e+00> : vector<4x1x128xf32>
    %356 = tpu.matmul %355, %4, %cst_213 {dimension_numbers = #tpu.dot_dimension_numbers<[2], [1], [1], [2], [0, 0, 0, 1, 1, 2], [0], [0]>} : vector<4x1x16xbf16>, vector<4x16x128xbf16>, vector<4x1x128xf32> -> vector<4x1x128xf32>
    "tpu.trace_stop"() : () -> ()
    %357 = vector.shape_cast %356 : vector<4x1x128xf32> to vector<4x128xf32>
    %358 = arith.truncf %357 : vector<4x128xf32> to vector<4x128xbf16>
    %c7_214 = arith.constant 7 : index
    %c0_215 = arith.constant 0 : index
    %c0_216 = arith.constant 0 : index
    %359 = vector.load %arg7[%c7_214, %c0_215, %c0_216] : memref<8x128x16xbf16, #tpu.memory_space<vmem>>, vector<1x128x16xbf16>
    %360 = vector.shape_cast %359 : vector<1x128x16xbf16> to vector<128x16xbf16>
    %cst_217 = arith.constant dense<0.000000e+00> : vector<4x16xf32>
    %361 = tpu.matmul %358, %360, %cst_217 {dimension_numbers = #tpu.dot_dimension_numbers<[1], [0], [0], [1], [0, 0, 1, 1], [], []>} : vector<4x128xbf16>, vector<128x16xbf16>, vector<4x16xf32> -> vector<4x16xf32>
    %362 = arith.truncf %361 : vector<4x16xf32> to vector<4x16xbf16>
    %c7_218 = arith.constant 7 : index
    %c0_219 = arith.constant 0 : index
    %c0_220 = arith.constant 0 : index
    %363 = vector.load %arg8[%c7_218, %c0_219, %c0_220] : memref<8x16x128xbf16, #tpu.memory_space<vmem>>, vector<1x16x128xbf16>
    %364 = vector.shape_cast %363 : vector<1x16x128xbf16> to vector<16x128xbf16>
    %cst_221 = arith.constant dense<0.000000e+00> : vector<4x128xf32>
    %365 = tpu.matmul %362, %364, %cst_221 {dimension_numbers = #tpu.dot_dimension_numbers<[1], [0], [0], [1], [0, 0, 1, 1], [], []>} : vector<4x16xbf16>, vector<16x128xbf16>, vector<4x128xf32> -> vector<4x128xf32>
    %366 = arith.addf %321, %365 : vector<4x128xf32>
    %c0_222 = arith.constant 0 : index
    %c0_223 = arith.constant 0 : index
    %367 = vector.load %arg9[%c0_222, %c0_223] : memref<1x128xf32, #tpu.memory_space<vmem>>, vector<1x128xf32>
    %368 = vector.broadcast %367 : vector<1x128xf32> to vector<4x128xf32>
    %369 = arith.addf %366, %368 : vector<4x128xf32>
    %370 = vector.shape_cast %369 : vector<4x128xf32> to vector<4x1x128xf32>
    %c0_224 = arith.constant 0 : index
    %c0_225 = arith.constant 0 : index
    %c0_226 = arith.constant 0 : index
    %371 = vector.load %arg10[%c0_224, %c0_225, %c0_226] : memref<4x1x128xf32, #tpu.memory_space<vmem>>, vector<4x1x128xf32>
    tpu.vector_store %arg10[%c0_224, %c0_225, %c0_226], %370 {strides = array<i32>} : memref<4x1x128xf32, #tpu.memory_space<vmem>>, vector<4x1x128xf32>,
    return
  }
  func.func @transform_0(%arg0: i32) -> (i32, i32, i32) {
    %c0_i32 = arith.constant 0 : i32
    %c0_i32_0 = arith.constant 0 : i32
    %c0_i32_1 = arith.constant 0 : i32
    return %arg0, %c0_i32, %c0_i32_0 : i32, i32, i32
  }
  func.func @transform_1(%arg0: i32) -> (i32, i32, i32) {
    %c0_i32 = arith.constant 0 : i32
    %c0_i32_0 = arith.constant 0 : i32
    %c0_i32_1 = arith.constant 0 : i32
    return %arg0, %c0_i32, %c0_i32_0 : i32, i32, i32
  }
  func.func @transform_2(%arg0: i32) -> (i32, i32, i32) {
    %c0_i32 = arith.constant 0 : i32
    %c0_i32_0 = arith.constant 0 : i32
    %c0_i32_1 = arith.constant 0 : i32
    %c0_i32_2 = arith.constant 0 : i32
    return %c0_i32, %c0_i32_0, %c0_i32_1 : i32, i32, i32
  }
  func.func @transform_3(%arg0: i32) -> (i32, i32, i32) {
    %c0_i32 = arith.constant 0 : i32
    %c0_i32_0 = arith.constant 0 : i32
    %c0_i32_1 = arith.constant 0 : i32
    %c0_i32_2 = arith.constant 0 : i32
    return %c0_i32, %c0_i32_0, %c0_i32_1 : i32, i32, i32
  }
  func.func @transform_4(%arg0: i32) -> (i32, i32, i32) {
    %c0_i32 = arith.constant 0 : i32
    %c0_i32_0 = arith.constant 0 : i32
    %c0_i32_1 = arith.constant 0 : i32
    %c0_i32_2 = arith.constant 0 : i32
    return %c0_i32, %c0_i32_0, %c0_i32_1 : i32, i32, i32
  }
  func.func @transform_5(%arg0: i32) -> (i32, i32, i32) {
    %c0_i32 = arith.constant 0 : i32
    %c0_i32_0 = arith.constant 0 : i32
    %c0_i32_1 = arith.constant 0 : i32
    %c0_i32_2 = arith.constant 0 : i32
    return %c0_i32, %c0_i32_0, %c0_i32_1 : i32, i32, i32
  }
  func.func @transform_6(%arg0: i32) -> (i32, i32, i32) {
    %c0_i32 = arith.constant 0 : i32
    %c0_i32_0 = arith.constant 0 : i32
    %c0_i32_1 = arith.constant 0 : i32
    %c0_i32_2 = arith.constant 0 : i32
    return %c0_i32, %c0_i32_0, %c0_i32_1 : i32, i32, i32
  }
  func.func @transform_7(%arg0: i32) -> (i32, i32, i32) {
    %c0_i32 = arith.constant 0 : i32
    %c0_i32_0 = arith.constant 0 : i32
    %c0_i32_1 = arith.constant 0 : i32
    %c0_i32_2 = arith.constant 0 : i32
    return %c0_i32, %c0_i32_0, %c0_i32_1 : i32, i32, i32
  }
  func.func @transform_8(%arg0: i32) -> (i32, i32) {
    %c0_i32 = arith.constant 0 : i32
    %c0_i32_0 = arith.constant 0 : i32
    %c0_i32_1 = arith.constant 0 : i32
    return %c0_i32, %c0_i32_0 : i32, i32
  }
  func.func @transform_9(%arg0: i32) -> (i32, i32, i32) {
    %c0_i32 = arith.constant 0 : i32
    %c0_i32_0 = arith.constant 0 : i32
    %c0_i32_1 = arith.constant 0 : i32
    return %arg0, %c0_i32, %c0_i32_0 : i32, i32, i32
  }
}

module attributes {stable_mosaic.version = 11 : i64} {
  func.func @cross_attention_expert_kernel(%arg0: i32, %arg1: memref<4x8x128xf32, #tpu.memory_space<vmem>>, %arg2: memref<4x16x128xf32, #tpu.memory_space<vmem>>, %arg3: memref<8x128x16xbf16, #tpu.memory_space<vmem>>, %arg4: memref<8x1x16xf32, #tpu.memory_space<vmem>>, %arg5: memref<8x128x16xbf16, #tpu.memory_space<vmem>>, %arg6: memref<8x1x16xf32, #tpu.memory_space<vmem>>, %arg7: memref<8x128x16xbf16, #tpu.memory_space<vmem>>, %arg8: memref<8x16x128xbf16, #tpu.memory_space<vmem>>, %arg9: memref<1x128xf32, #tpu.memory_space<vmem>>, %arg10: memref<4x1x128xf32, #tpu.memory_space<vmem>>) attributes {dimension_semantics = [#tpu.dimension_semantics<parallel>], iteration_bounds = array<i64: 2>, scalar_prefetch = 0 : i64, scratch_operands = 0 : i64, tpu.core_type = #tpu.core_type<tc>, window_params = [{transform_indices = @transform_0, window_bounds = array<i64: 4, 8, 128>}, {transform_indices = @transform_1, window_bounds = array<i64: 4, 16, 128>}, {pipeline_mode = #tpu.pipeline_mode<synchronous>, transform_indices = @transform_2, window_bounds = array<i64: 8, 128, 16>}, {pipeline_mode = #tpu.pipeline_mode<synchronous>, transform_indices = @transform_3, window_bounds = array<i64: 8, 1, 16>}, {pipeline_mode = #tpu.pipeline_mode<synchronous>, transform_indices = @transform_4, window_bounds = array<i64: 8, 128, 16>}, {pipeline_mode = #tpu.pipeline_mode<synchronous>, transform_indices = @transform_5, window_bounds = array<i64: 8, 1, 16>}, {pipeline_mode = #tpu.pipeline_mode<synchronous>, transform_indices = @transform_6, window_bounds = array<i64: 8, 128, 16>}, {pipeline_mode = #tpu.pipeline_mode<synchronous>, transform_indices = @transform_7, window_bounds = array<i64: 8, 16, 128>}, {pipeline_mode = #tpu.pipeline_mode<synchronous>, transform_indices = @transform_8, window_bounds = array<i64: 1, 128>}, {transform_indices = @transform_9, window_bounds = array<i64: 4, 1, 128>}]} {
    %c0 = arith.constant 0 : index
    %c0_0 = arith.constant 0 : index
    %c0_1 = arith.constant 0 : index
    %0 = vector.load %arg1[%c0, %c0_0, %c0_1] : memref<4x8x128xf32, #tpu.memory_space<vmem>>, vector<4x8x128xf32>
    %1 = arith.truncf %0 : vector<4x8x128xf32> to vector<4x8x128xbf16>
    %2 = vector.shape_cast %1 : vector<4x8x128xbf16> to vector<32x128xbf16>
    %c0_2 = arith.constant 0 : index
    %c0_3 = arith.constant 0 : index
    %c0_4 = arith.constant 0 : index
    %3 = vector.load %arg2[%c0_2, %c0_3, %c0_4] : memref<4x16x128xf32, #tpu.memory_space<vmem>>, vector<4x16x128xf32>
    %4 = arith.truncf %3 : vector<4x16x128xf32> to vector<4x16x128xbf16>
    %5 = vector.shape_cast %4 : vector<4x16x128xbf16> to vector<64x128xbf16>
    %cst = arith.constant 0.000000e+00 : f32
    %6 = vector.broadcast %cst : f32 to vector<4x128xf32>
    %c0_5 = arith.constant 0 : index
    %c0_6 = arith.constant 0 : index
    %c0_7 = arith.constant 0 : index
    %7 = vector.load %arg3[%c0_5, %c0_6, %c0_7] : memref<8x128x16xbf16, #tpu.memory_space<vmem>>, vector<1x128x16xbf16>
    %8 = vector.shape_cast %7 : vector<1x128x16xbf16> to vector<128x16xbf16>
    %cst_8 = arith.constant dense<0.000000e+00> : vector<32x16xf32>
    %9 = tpu.matmul %2, %8, %cst_8 {dimension_numbers = #tpu.dot_dimension_numbers<[1], [0], [0], [1], [0, 0, 1, 1], [], []>} : vector<32x128xbf16>, vector<128x16xbf16>, vector<32x16xf32> -> vector<32x16xf32>
    %c0_9 = arith.constant 0 : index
    %c0_10 = arith.constant 0 : index
    %c0_11 = arith.constant 0 : index
    %10 = vector.load %arg4[%c0_9, %c0_10, %c0_11] : memref<8x1x16xf32, #tpu.memory_space<vmem>>, vector<1x1x16xf32>
    %11 = vector.shape_cast %10 : vector<1x1x16xf32> to vector<1x16xf32>
    %12 = vector.broadcast %11 : vector<1x16xf32> to vector<32x16xf32>
    %13 = arith.addf %9, %12 : vector<32x16xf32>
    %c0_12 = arith.constant 0 : index
    %c0_13 = arith.constant 0 : index
    %c0_14 = arith.constant 0 : index
    %14 = vector.load %arg5[%c0_12, %c0_13, %c0_14] : memref<8x128x16xbf16, #tpu.memory_space<vmem>>, vector<1x128x16xbf16>
    %15 = vector.shape_cast %14 : vector<1x128x16xbf16> to vector<128x16xbf16>
    %cst_15 = arith.constant dense<0.000000e+00> : vector<64x16xf32>
    %16 = tpu.matmul %5, %15, %cst_15 {dimension_numbers = #tpu.dot_dimension_numbers<[1], [0], [0], [1], [0, 0, 1, 1], [], []>} : vector<64x128xbf16>, vector<128x16xbf16>, vector<64x16xf32> -> vector<64x16xf32>
    %c0_16 = arith.constant 0 : index
    %c0_17 = arith.constant 0 : index
    %c0_18 = arith.constant 0 : index
    %17 = vector.load %arg6[%c0_16, %c0_17, %c0_18] : memref<8x1x16xf32, #tpu.memory_space<vmem>>, vector<1x1x16xf32>
    %18 = vector.shape_cast %17 : vector<1x1x16xf32> to vector<1x16xf32>
    %19 = vector.broadcast %18 : vector<1x16xf32> to vector<64x16xf32>
    %20 = arith.addf %16, %19 : vector<64x16xf32>
    %21 = arith.truncf %13 : vector<32x16xf32> to vector<32x16xbf16>
    %22 = vector.shape_cast %21 : vector<32x16xbf16> to vector<4x8x16xbf16>
    %23 = arith.truncf %20 : vector<64x16xf32> to vector<64x16xbf16>
    %24 = vector.shape_cast %23 : vector<64x16xbf16> to vector<4x16x16xbf16>
    "tpu.trace_start"() <{level = 10 : i32, message = "bqj,bkj->bqk"}> : () -> ()
    %cst_19 = arith.constant dense<0.000000e+00> : vector<4x8x16xf32>
    %25 = tpu.matmul %22, %24, %cst_19 {dimension_numbers = #tpu.dot_dimension_numbers<[2], [2], [1], [1], [0, 0, 0, 1, 1, 1], [0], [0]>} : vector<4x8x16xbf16>, vector<4x16x16xbf16>, vector<4x8x16xf32> -> vector<4x8x16xf32>
    "tpu.trace_stop"() : () -> ()
    %cst_20 = arith.constant dense<0xFF800000> : vector<4x8xf32>
    %26 = vector.multi_reduction <maximumf>, %25, %cst_20 [2] : vector<4x8x16xf32> to vector<4x8xf32>
    %27 = vector.shape_cast %26 : vector<4x8xf32> to vector<4x8x1xf32>
    %28 = vector.broadcast %27 : vector<4x8x1xf32> to vector<4x8x16xf32>
    %29 = arith.subf %25, %28 : vector<4x8x16xf32>
    %30 = math.exp %29 : vector<4x8x16xf32>
    %cst_21 = arith.constant dense<0.000000e+00> : vector<4x8xf32>
    %31 = vector.multi_reduction <add>, %30, %cst_21 [2] : vector<4x8x16xf32> to vector<4x8xf32>
    %32 = vector.shape_cast %31 : vector<4x8xf32> to vector<4x8x1xf32>
    %33 = tpu.reciprocal %32 {approx = true} : vector<4x8x1xf32> -> vector<4x8x1xf32>
    %34 = vector.broadcast %33 : vector<4x8x1xf32> to vector<4x8x16xf32>
    %35 = arith.mulf %30, %34 : vector<4x8x16xf32>
    %cst_22 = arith.constant dense<0.000000e+00> : vector<4x16xf32>
    %36 = vector.multi_reduction <add>, %35, %cst_22 [1] : vector<4x8x16xf32> to vector<4x16xf32>
    %37 = vector.shape_cast %36 : vector<4x16xf32> to vector<4x1x16xf32>
    %cst_23 = arith.constant 8.000000e+00 : f32
    %38 = vector.broadcast %cst_23 : f32 to vector<4x1x16xf32>
    %39 = arith.divf %37, %38 : vector<4x1x16xf32>
    %40 = arith.truncf %39 : vector<4x1x16xf32> to vector<4x1x16xbf16>
    "tpu.trace_start"() <{level = 10 : i32, message = "bqk,bkd->bqd"}> : () -> ()
    %cst_24 = arith.constant dense<0.000000e+00> : vector<4x1x128xf32>
    %41 = tpu.matmul %40, %4, %cst_24 {dimension_numbers = #tpu.dot_dimension_numbers<[2], [1], [1], [2], [0, 0, 0, 1, 1, 2], [0], [0]>} : vector<4x1x16xbf16>, vector<4x16x128xbf16>, vector<4x1x128xf32> -> vector<4x1x128xf32>
    "tpu.trace_stop"() : () -> ()
    %42 = vector.shape_cast %41 : vector<4x1x128xf32> to vector<4x128xf32>
    %43 = arith.truncf %42 : vector<4x128xf32> to vector<4x128xbf16>
    %c0_25 = arith.constant 0 : index
    %c0_26 = arith.constant 0 : index
    %c0_27 = arith.constant 0 : index
    %44 = vector.load %arg7[%c0_25, %c0_26, %c0_27] : memref<8x128x16xbf16, #tpu.memory_space<vmem>>, vector<1x128x16xbf16>
    %45 = vector.shape_cast %44 : vector<1x128x16xbf16> to vector<128x16xbf16>
    %cst_28 = arith.constant dense<0.000000e+00> : vector<4x16xf32>
    %46 = tpu.matmul %43, %45, %cst_28 {dimension_numbers = #tpu.dot_dimension_numbers<[1], [0], [0], [1], [0, 0, 1, 1], [], []>} : vector<4x128xbf16>, vector<128x16xbf16>, vector<4x16xf32> -> vector<4x16xf32>
    %47 = arith.truncf %46 : vector<4x16xf32> to vector<4x16xbf16>
    %c0_29 = arith.constant 0 : index
    %c0_30 = arith.constant 0 : index
    %c0_31 = arith.constant 0 : index
    %48 = vector.load %arg8[%c0_29, %c0_30, %c0_31] : memref<8x16x128xbf16, #tpu.memory_space<vmem>>, vector<1x16x128xbf16>
    %49 = vector.shape_cast %48 : vector<1x16x128xbf16> to vector<16x128xbf16>
    %cst_32 = arith.constant dense<0.000000e+00> : vector<4x128xf32>
    %50 = tpu.matmul %47, %49, %cst_32 {dimension_numbers = #tpu.dot_dimension_numbers<[1], [0], [0], [1], [0, 0, 1, 1], [], []>} : vector<4x16xbf16>, vector<16x128xbf16>, vector<4x128xf32> -> vector<4x128xf32>
    %51 = arith.addf %6, %50 : vector<4x128xf32>
    %c1 = arith.constant 1 : index
    %c0_33 = arith.constant 0 : index
    %c0_34 = arith.constant 0 : index
    %52 = vector.load %arg3[%c1, %c0_33, %c0_34] : memref<8x128x16xbf16, #tpu.memory_space<vmem>>, vector<1x128x16xbf16>
    %53 = vector.shape_cast %52 : vector<1x128x16xbf16> to vector<128x16xbf16>
    %cst_35 = arith.constant dense<0.000000e+00> : vector<32x16xf32>
    %54 = tpu.matmul %2, %53, %cst_35 {dimension_numbers = #tpu.dot_dimension_numbers<[1], [0], [0], [1], [0, 0, 1, 1], [], []>} : vector<32x128xbf16>, vector<128x16xbf16>, vector<32x16xf32> -> vector<32x16xf32>
    %c1_36 = arith.constant 1 : index
    %c0_37 = arith.constant 0 : index
    %c0_38 = arith.constant 0 : index
    %55 = vector.load %arg4[%c1_36, %c0_37, %c0_38] : memref<8x1x16xf32, #tpu.memory_space<vmem>>, vector<1x1x16xf32>
    %56 = vector.shape_cast %55 : vector<1x1x16xf32> to vector<1x16xf32>
    %57 = vector.broadcast %56 : vector<1x16xf32> to vector<32x16xf32>
    %58 = arith.addf %54, %57 : vector<32x16xf32>
    %c1_39 = arith.constant 1 : index
    %c0_40 = arith.constant 0 : index
    %c0_41 = arith.constant 0 : index
    %59 = vector.load %arg5[%c1_39, %c0_40, %c0_41] : memref<8x128x16xbf16, #tpu.memory_space<vmem>>, vector<1x128x16xbf16>
    %60 = vector.shape_cast %59 : vector<1x128x16xbf16> to vector<128x16xbf16>
    %cst_42 = arith.constant dense<0.000000e+00> : vector<64x16xf32>
    %61 = tpu.matmul %5, %60, %cst_42 {dimension_numbers = #tpu.dot_dimension_numbers<[1], [0], [0], [1], [0, 0, 1, 1], [], []>} : vector<64x128xbf16>, vector<128x16xbf16>, vector<64x16xf32> -> vector<64x16xf32>
    %c1_43 = arith.constant 1 : index
    %c0_44 = arith.constant 0 : index
    %c0_45 = arith.constant 0 : index
    %62 = vector.load %arg6[%c1_43, %c0_44, %c0_45] : memref<8x1x16xf32, #tpu.memory_space<vmem>>, vector<1x1x16xf32>
    %63 = vector.shape_cast %62 : vector<1x1x16xf32> to vector<1x16xf32>
    %64 = vector.broadcast %63 : vector<1x16xf32> to vector<64x16xf32>
    %65 = arith.addf %61, %64 : vector<64x16xf32>
    %66 = arith.truncf %58 : vector<32x16xf32> to vector<32x16xbf16>
    %67 = vector.shape_cast %66 : vector<32x16xbf16> to vector<4x8x16xbf16>
    %68 = arith.truncf %65 : vector<64x16xf32> to vector<64x16xbf16>
    %69 = vector.shape_cast %68 : vector<64x16xbf16> to vector<4x16x16xbf16>
    "tpu.trace_start"() <{level = 10 : i32, message = "bqj,bkj->bqk"}> : () -> ()
    %cst_46 = arith.constant dense<0.000000e+00> : vector<4x8x16xf32>
    %70 = tpu.matmul %67, %69, %cst_46 {dimension_numbers = #tpu.dot_dimension_numbers<[2], [2], [1], [1], [0, 0, 0, 1, 1, 1], [0], [0]>} : vector<4x8x16xbf16>, vector<4x16x16xbf16>, vector<4x8x16xf32> -> vector<4x8x16xf32>
    "tpu.trace_stop"() : () -> ()
    %cst_47 = arith.constant dense<0xFF800000> : vector<4x8xf32>
    %71 = vector.multi_reduction <maximumf>, %70, %cst_47 [2] : vector<4x8x16xf32> to vector<4x8xf32>
    %72 = vector.shape_cast %71 : vector<4x8xf32> to vector<4x8x1xf32>
    %73 = vector.broadcast %72 : vector<4x8x1xf32> to vector<4x8x16xf32>
    %74 = arith.subf %70, %73 : vector<4x8x16xf32>
    %75 = math.exp %74 : vector<4x8x16xf32>
    %cst_48 = arith.constant dense<0.000000e+00> : vector<4x8xf32>
    %76 = vector.multi_reduction <add>, %75, %cst_48 [2] : vector<4x8x16xf32> to vector<4x8xf32>
    %77 = vector.shape_cast %76 : vector<4x8xf32> to vector<4x8x1xf32>
    %78 = tpu.reciprocal %77 {approx = true} : vector<4x8x1xf32> -> vector<4x8x1xf32>
    %79 = vector.broadcast %78 : vector<4x8x1xf32> to vector<4x8x16xf32>
    %80 = arith.mulf %75, %79 : vector<4x8x16xf32>
    %cst_49 = arith.constant dense<0.000000e+00> : vector<4x16xf32>
    %81 = vector.multi_reduction <add>, %80, %cst_49 [1] : vector<4x8x16xf32> to vector<4x16xf32>
    %82 = vector.shape_cast %81 : vector<4x16xf32> to vector<4x1x16xf32>
    %cst_50 = arith.constant 8.000000e+00 : f32
    %83 = vector.broadcast %cst_50 : f32 to vector<4x1x16xf32>
    %84 = arith.divf %82, %83 : vector<4x1x16xf32>
    %85 = arith.truncf %84 : vector<4x1x16xf32> to vector<4x1x16xbf16>
    "tpu.trace_start"() <{level = 10 : i32, message = "bqk,bkd->bqd"}> : () -> ()
    %cst_51 = arith.constant dense<0.000000e+00> : vector<4x1x128xf32>
    %86 = tpu.matmul %85, %4, %cst_51 {dimension_numbers = #tpu.dot_dimension_numbers<[2], [1], [1], [2], [0, 0, 0, 1, 1, 2], [0], [0]>} : vector<4x1x16xbf16>, vector<4x16x128xbf16>, vector<4x1x128xf32> -> vector<4x1x128xf32>
    "tpu.trace_stop"() : () -> ()
    %87 = vector.shape_cast %86 : vector<4x1x128xf32> to vector<4x128xf32>
    %88 = arith.truncf %87 : vector<4x128xf32> to vector<4x128xbf16>
    %c1_52 = arith.constant 1 : index
    %c0_53 = arith.constant 0 : index
    %c0_54 = arith.constant 0 : index
    %89 = vector.load %arg7[%c1_52, %c0_53, %c0_54] : memref<8x128x16xbf16, #tpu.memory_space<vmem>>, vector<1x128x16xbf16>
    %90 = vector.shape_cast %89 : vector<1x128x16xbf16> to vector<128x16xbf16>
    %cst_55 = arith.constant dense<0.000000e+00> : vector<4x16xf32>
    %91 = tpu.matmul %88, %90, %cst_55 {dimension_numbers = #tpu.dot_dimension_numbers<[1], [0], [0], [1], [0, 0, 1, 1], [], []>} : vector<4x128xbf16>, vector<128x16xbf16>, vector<4x16xf32> -> vector<4x16xf32>
    %92 = arith.truncf %91 : vector<4x16xf32> to vector<4x16xbf16>
    %c1_56 = arith.constant 1 : index
    %c0_57 = arith.constant 0 : index
    %c0_58 = arith.constant 0 : index
    %93 = vector.load %arg8[%c1_56, %c0_57, %c0_58] : memref<8x16x128xbf16, #tpu.memory_space<vmem>>, vector<1x16x128xbf16>
    %94 = vector.shape_cast %93 : vector<1x16x128xbf16> to vector<16x128xbf16>
    %cst_59 = arith.constant dense<0.000000e+00> : vector<4x128xf32>
    %95 = tpu.matmul %92, %94, %cst_59 {dimension_numbers = #tpu.dot_dimension_numbers<[1], [0], [0], [1], [0, 0, 1, 1], [], []>} : vector<4x16xbf16>, vector<16x128xbf16>, vector<4x128xf32> -> vector<4x128xf32>
    %96 = arith.addf %51, %95 : vector<4x128xf32>
    %c2 = arith.constant 2 : index
    %c0_60 = arith.constant 0 : index
    %c0_61 = arith.constant 0 : index
    %97 = vector.load %arg3[%c2, %c0_60, %c0_61] : memref<8x128x16xbf16, #tpu.memory_space<vmem>>, vector<1x128x16xbf16>
    %98 = vector.shape_cast %97 : vector<1x128x16xbf16> to vector<128x16xbf16>
    %cst_62 = arith.constant dense<0.000000e+00> : vector<32x16xf32>
    %99 = tpu.matmul %2, %98, %cst_62 {dimension_numbers = #tpu.dot_dimension_numbers<[1], [0], [0], [1], [0, 0, 1, 1], [], []>} : vector<32x128xbf16>, vector<128x16xbf16>, vector<32x16xf32> -> vector<32x16xf32>
    %c2_63 = arith.constant 2 : index
    %c0_64 = arith.constant 0 : index
    %c0_65 = arith.constant 0 : index
    %100 = vector.load %arg4[%c2_63, %c0_64, %c0_65] : memref<8x1x16xf32, #tpu.memory_space<vmem>>, vector<1x1x16xf32>
    %101 = vector.shape_cast %100 : vector<1x1x16xf32> to vector<1x16xf32>
    %102 = vector.broadcast %101 : vector<1x16xf32> to vector<32x16xf32>
    %103 = arith.addf %99, %102 : vector<32x16xf32>
    %c2_66 = arith.constant 2 : index
    %c0_67 = arith.constant 0 : index
    %c0_68 = arith.constant 0 : index
    %104 = vector.load %arg5[%c2_66, %c0_67, %c0_68] : memref<8x128x16xbf16, #tpu.memory_space<vmem>>, vector<1x128x16xbf16>
    %105 = vector.shape_cast %104 : vector<1x128x16xbf16> to vector<128x16xbf16>
    %cst_69 = arith.constant dense<0.000000e+00> : vector<64x16xf32>
    %106 = tpu.matmul %5, %105, %cst_69 {dimension_numbers = #tpu.dot_dimension_numbers<[1], [0], [0], [1], [0, 0, 1, 1], [], []>} : vector<64x128xbf16>, vector<128x16xbf16>, vector<64x16xf32> -> vector<64x16xf32>
    %c2_70 = arith.constant 2 : index
    %c0_71 = arith.constant 0 : index
    %c0_72 = arith.constant 0 : index
    %107 = vector.load %arg6[%c2_70, %c0_71, %c0_72] : memref<8x1x16xf32, #tpu.memory_space<vmem>>, vector<1x1x16xf32>
    %108 = vector.shape_cast %107 : vector<1x1x16xf32> to vector<1x16xf32>
    %109 = vector.broadcast %108 : vector<1x16xf32> to vector<64x16xf32>
    %110 = arith.addf %106, %109 : vector<64x16xf32>
    %111 = arith.truncf %103 : vector<32x16xf32> to vector<32x16xbf16>
    %112 = vector.shape_cast %111 : vector<32x16xbf16> to vector<4x8x16xbf16>
    %113 = arith.truncf %110 : vector<64x16xf32> to vector<64x16xbf16>
    %114 = vector.shape_cast %113 : vector<64x16xbf16> to vector<4x16x16xbf16>
    "tpu.trace_start"() <{level = 10 : i32, message = "bqj,bkj->bqk"}> : () -> ()
    %cst_73 = arith.constant dense<0.000000e+00> : vector<4x8x16xf32>
    %115 = tpu.matmul %112, %114, %cst_73 {dimension_numbers = #tpu.dot_dimension_numbers<[2], [2], [1], [1], [0, 0, 0, 1, 1, 1], [0], [0]>} : vector<4x8x16xbf16>, vector<4x16x16xbf16>, vector<4x8x16xf32> -> vector<4x8x16xf32>
    "tpu.trace_stop"() : () -> ()
    %cst_74 = arith.constant dense<0xFF800000> : vector<4x8xf32>
    %116 = vector.multi_reduction <maximumf>, %115, %cst_74 [2] : vector<4x8x16xf32> to vector<4x8xf32>
    %117 = vector.shape_cast %116 : vector<4x8xf32> to vector<4x8x1xf32>
    %118 = vector.broadcast %117 : vector<4x8x1xf32> to vector<4x8x16xf32>
    %119 = arith.subf %115, %118 : vector<4x8x16xf32>
    %120 = math.exp %119 : vector<4x8x16xf32>
    %cst_75 = arith.constant dense<0.000000e+00> : vector<4x8xf32>
    %121 = vector.multi_reduction <add>, %120, %cst_75 [2] : vector<4x8x16xf32> to vector<4x8xf32>
    %122 = vector.shape_cast %121 : vector<4x8xf32> to vector<4x8x1xf32>
    %123 = tpu.reciprocal %122 {approx = true} : vector<4x8x1xf32> -> vector<4x8x1xf32>
    %124 = vector.broadcast %123 : vector<4x8x1xf32> to vector<4x8x16xf32>
    %125 = arith.mulf %120, %124 : vector<4x8x16xf32>
    %cst_76 = arith.constant dense<0.000000e+00> : vector<4x16xf32>
    %126 = vector.multi_reduction <add>, %125, %cst_76 [1] : vector<4x8x16xf32> to vector<4x16xf32>
    %127 = vector.shape_cast %126 : vector<4x16xf32> to vector<4x1x16xf32>
    %cst_77 = arith.constant 8.000000e+00 : f32
    %128 = vector.broadcast %cst_77 : f32 to vector<4x1x16xf32>
    %129 = arith.divf %127, %128 : vector<4x1x16xf32>
    %130 = arith.truncf %129 : vector<4x1x16xf32> to vector<4x1x16xbf16>
    "tpu.trace_start"() <{level = 10 : i32, message = "bqk,bkd->bqd"}> : () -> ()
    %cst_78 = arith.constant dense<0.000000e+00> : vector<4x1x128xf32>
    %131 = tpu.matmul %130, %4, %cst_78 {dimension_numbers = #tpu.dot_dimension_numbers<[2], [1], [1], [2], [0, 0, 0, 1, 1, 2], [0], [0]>} : vector<4x1x16xbf16>, vector<4x16x128xbf16>, vector<4x1x128xf32> -> vector<4x1x128xf32>
    "tpu.trace_stop"() : () -> ()
    %132 = vector.shape_cast %131 : vector<4x1x128xf32> to vector<4x128xf32>
    %133 = arith.truncf %132 : vector<4x128xf32> to vector<4x128xbf16>
    %c2_79 = arith.constant 2 : index
    %c0_80 = arith.constant 0 : index
    %c0_81 = arith.constant 0 : index
    %134 = vector.load %arg7[%c2_79, %c0_80, %c0_81] : memref<8x128x16xbf16, #tpu.memory_space<vmem>>, vector<1x128x16xbf16>
    %135 = vector.shape_cast %134 : vector<1x128x16xbf16> to vector<128x16xbf16>
    %cst_82 = arith.constant dense<0.000000e+00> : vector<4x16xf32>
    %136 = tpu.matmul %133, %135, %cst_82 {dimension_numbers = #tpu.dot_dimension_numbers<[1], [0], [0], [1], [0, 0, 1, 1], [], []>} : vector<4x128xbf16>, vector<128x16xbf16>, vector<4x16xf32> -> vector<4x16xf32>
    %137 = arith.truncf %136 : vector<4x16xf32> to vector<4x16xbf16>
    %c2_83 = arith.constant 2 : index
    %c0_84 = arith.constant 0 : index
    %c0_85 = arith.constant 0 : index
    %138 = vector.load %arg8[%c2_83, %c0_84, %c0_85] : memref<8x16x128xbf16, #tpu.memory_space<vmem>>, vector<1x16x128xbf16>
    %139 = vector.shape_cast %138 : vector<1x16x128xbf16> to vector<16x128xbf16>
    %cst_86 = arith.constant dense<0.000000e+00> : vector<4x128xf32>
    %140 = tpu.matmul %137, %139, %cst_86 {dimension_numbers = #tpu.dot_dimension_numbers<[1], [0], [0], [1], [0, 0, 1, 1], [], []>} : vector<4x16xbf16>, vector<16x128xbf16>, vector<4x128xf32> -> vector<4x128xf32>
    %141 = arith.addf %96, %140 : vector<4x128xf32>
    %c3 = arith.constant 3 : index
    %c0_87 = arith.constant 0 : index
    %c0_88 = arith.constant 0 : index
    %142 = vector.load %arg3[%c3, %c0_87, %c0_88] : memref<8x128x16xbf16, #tpu.memory_space<vmem>>, vector<1x128x16xbf16>
    %143 = vector.shape_cast %142 : vector<1x128x16xbf16> to vector<128x16xbf16>
    %cst_89 = arith.constant dense<0.000000e+00> : vector<32x16xf32>
    %144 = tpu.matmul %2, %143, %cst_89 {dimension_numbers = #tpu.dot_dimension_numbers<[1], [0], [0], [1], [0, 0, 1, 1], [], []>} : vector<32x128xbf16>, vector<128x16xbf16>, vector<32x16xf32> -> vector<32x16xf32>
    %c3_90 = arith.constant 3 : index
    %c0_91 = arith.constant 0 : index
    %c0_92 = arith.constant 0 : index
    %145 = vector.load %arg4[%c3_90, %c0_91, %c0_92] : memref<8x1x16xf32, #tpu.memory_space<vmem>>, vector<1x1x16xf32>
    %146 = vector.shape_cast %145 : vector<1x1x16xf32> to vector<1x16xf32>
    %147 = vector.broadcast %146 : vector<1x16xf32> to vector<32x16xf32>
    %148 = arith.addf %144, %147 : vector<32x16xf32>
    %c3_93 = arith.constant 3 : index
    %c0_94 = arith.constant 0 : index
    %c0_95 = arith.constant 0 : index
    %149 = vector.load %arg5[%c3_93, %c0_94, %c0_95] : memref<8x128x16xbf16, #tpu.memory_space<vmem>>, vector<1x128x16xbf16>
    %150 = vector.shape_cast %149 : vector<1x128x16xbf16> to vector<128x16xbf16>
    %cst_96 = arith.constant dense<0.000000e+00> : vector<64x16xf32>
    %151 = tpu.matmul %5, %150, %cst_96 {dimension_numbers = #tpu.dot_dimension_numbers<[1], [0], [0], [1], [0, 0, 1, 1], [], []>} : vector<64x128xbf16>, vector<128x16xbf16>, vector<64x16xf32> -> vector<64x16xf32>
    %c3_97 = arith.constant 3 : index
    %c0_98 = arith.constant 0 : index
    %c0_99 = arith.constant 0 : index
    %152 = vector.load %arg6[%c3_97, %c0_98, %c0_99] : memref<8x1x16xf32, #tpu.memory_space<vmem>>, vector<1x1x16xf32>
    %153 = vector.shape_cast %152 : vector<1x1x16xf32> to vector<1x16xf32>
    %154 = vector.broadcast %153 : vector<1x16xf32> to vector<64x16xf32>
    %155 = arith.addf %151, %154 : vector<64x16xf32>
    %156 = arith.truncf %148 : vector<32x16xf32> to vector<32x16xbf16>
    %157 = vector.shape_cast %156 : vector<32x16xbf16> to vector<4x8x16xbf16>
    %158 = arith.truncf %155 : vector<64x16xf32> to vector<64x16xbf16>
    %159 = vector.shape_cast %158 : vector<64x16xbf16> to vector<4x16x16xbf16>
    "tpu.trace_start"() <{level = 10 : i32, message = "bqj,bkj->bqk"}> : () -> ()
    %cst_100 = arith.constant dense<0.000000e+00> : vector<4x8x16xf32>
    %160 = tpu.matmul %157, %159, %cst_100 {dimension_numbers = #tpu.dot_dimension_numbers<[2], [2], [1], [1], [0, 0, 0, 1, 1, 1], [0], [0]>} : vector<4x8x16xbf16>, vector<4x16x16xbf16>, vector<4x8x16xf32> -> vector<4x8x16xf32>
    "tpu.trace_stop"() : () -> ()
    %cst_101 = arith.constant dense<0xFF800000> : vector<4x8xf32>
    %161 = vector.multi_reduction <maximumf>, %160, %cst_101 [2] : vector<4x8x16xf32> to vector<4x8xf32>
    %162 = vector.shape_cast %161 : vector<4x8xf32> to vector<4x8x1xf32>
    %163 = vector.broadcast %162 : vector<4x8x1xf32> to vector<4x8x16xf32>
    %164 = arith.subf %160, %163 : vector<4x8x16xf32>
    %165 = math.exp %164 : vector<4x8x16xf32>
    %cst_102 = arith.constant dense<0.000000e+00> : vector<4x8xf32>
    %166 = vector.multi_reduction <add>, %165, %cst_102 [2] : vector<4x8x16xf32> to vector<4x8xf32>
    %167 = vector.shape_cast %166 : vector<4x8xf32> to vector<4x8x1xf32>
    %168 = tpu.reciprocal %167 {approx = true} : vector<4x8x1xf32> -> vector<4x8x1xf32>
    %169 = vector.broadcast %168 : vector<4x8x1xf32> to vector<4x8x16xf32>
    %170 = arith.mulf %165, %169 : vector<4x8x16xf32>
    %cst_103 = arith.constant dense<0.000000e+00> : vector<4x16xf32>
    %171 = vector.multi_reduction <add>, %170, %cst_103 [1] : vector<4x8x16xf32> to vector<4x16xf32>
    %172 = vector.shape_cast %171 : vector<4x16xf32> to vector<4x1x16xf32>
    %cst_104 = arith.constant 8.000000e+00 : f32
    %173 = vector.broadcast %cst_104 : f32 to vector<4x1x16xf32>
    %174 = arith.divf %172, %173 : vector<4x1x16xf32>
    %175 = arith.truncf %174 : vector<4x1x16xf32> to vector<4x1x16xbf16>
    "tpu.trace_start"() <{level = 10 : i32, message = "bqk,bkd->bqd"}> : () -> ()
    %cst_105 = arith.constant dense<0.000000e+00> : vector<4x1x128xf32>
    %176 = tpu.matmul %175, %4, %cst_105 {dimension_numbers = #tpu.dot_dimension_numbers<[2], [1], [1], [2], [0, 0, 0, 1, 1, 2], [0], [0]>} : vector<4x1x16xbf16>, vector<4x16x128xbf16>, vector<4x1x128xf32> -> vector<4x1x128xf32>
    "tpu.trace_stop"() : () -> ()
    %177 = vector.shape_cast %176 : vector<4x1x128xf32> to vector<4x128xf32>
    %178 = arith.truncf %177 : vector<4x128xf32> to vector<4x128xbf16>
    %c3_106 = arith.constant 3 : index
    %c0_107 = arith.constant 0 : index
    %c0_108 = arith.constant 0 : index
    %179 = vector.load %arg7[%c3_106, %c0_107, %c0_108] : memref<8x128x16xbf16, #tpu.memory_space<vmem>>, vector<1x128x16xbf16>
    %180 = vector.shape_cast %179 : vector<1x128x16xbf16> to vector<128x16xbf16>
    %cst_109 = arith.constant dense<0.000000e+00> : vector<4x16xf32>
    %181 = tpu.matmul %178, %180, %cst_109 {dimension_numbers = #tpu.dot_dimension_numbers<[1], [0], [0], [1], [0, 0, 1, 1], [], []>} : vector<4x128xbf16>, vector<128x16xbf16>, vector<4x16xf32> -> vector<4x16xf32>
    %182 = arith.truncf %181 : vector<4x16xf32> to vector<4x16xbf16>
    %c3_110 = arith.constant 3 : index
    %c0_111 = arith.constant 0 : index
    %c0_112 = arith.constant 0 : index
    %183 = vector.load %arg8[%c3_110, %c0_111, %c0_112] : memref<8x16x128xbf16, #tpu.memory_space<vmem>>, vector<1x16x128xbf16>
    %184 = vector.shape_cast %183 : vector<1x16x128xbf16> to vector<16x128xbf16>
    %cst_113 = arith.constant dense<0.000000e+00> : vector<4x128xf32>
    %185 = tpu.matmul %182, %184, %cst_113 {dimension_numbers = #tpu.dot_dimension_numbers<[1], [0], [0], [1], [0, 0, 1, 1], [], []>} : vector<4x16xbf16>, vector<16x128xbf16>, vector<4x128xf32> -> vector<4x128xf32>
    %186 = arith.addf %141, %185 : vector<4x128xf32>
    %c4 = arith.constant 4 : index
    %c0_114 = arith.constant 0 : index
    %c0_115 = arith.constant 0 : index
    %187 = vector.load %arg3[%c4, %c0_114, %c0_115] : memref<8x128x16xbf16, #tpu.memory_space<vmem>>, vector<1x128x16xbf16>
    %188 = vector.shape_cast %187 : vector<1x128x16xbf16> to vector<128x16xbf16>
    %cst_116 = arith.constant dense<0.000000e+00> : vector<32x16xf32>
    %189 = tpu.matmul %2, %188, %cst_116 {dimension_numbers = #tpu.dot_dimension_numbers<[1], [0], [0], [1], [0, 0, 1, 1], [], []>} : vector<32x128xbf16>, vector<128x16xbf16>, vector<32x16xf32> -> vector<32x16xf32>
    %c4_117 = arith.constant 4 : index
    %c0_118 = arith.constant 0 : index
    %c0_119 = arith.constant 0 : index
    %190 = vector.load %arg4[%c4_117, %c0_118, %c0_119] : memref<8x1x16xf32, #tpu.memory_space<vmem>>, vector<1x1x16xf32>
    %191 = vector.shape_cast %190 : vector<1x1x16xf32> to vector<1x16xf32>
    %192 = vector.broadcast %191 : vector<1x16xf32> to vector<32x16xf32>
    %193 = arith.addf %189, %192 : vector<32x16xf32>
    %c4_120 = arith.constant 4 : index
    %c0_121 = arith.constant 0 : index
    %c0_122 = arith.constant 0 : index
    %194 = vector.load %arg5[%c4_120, %c0_121, %c0_122] : memref<8x128x16xbf16, #tpu.memory_space<vmem>>, vector<1x128x16xbf16>
    %195 = vector.shape_cast %194 : vector<1x128x16xbf16> to vector<128x16xbf16>
    %cst_123 = arith.constant dense<0.000000e+00> : vector<64x16xf32>
    %196 = tpu.matmul %5, %195, %cst_123 {dimension_numbers = #tpu.dot_dimension_numbers<[1], [0], [0], [1], [0, 0, 1, 1], [], []>} : vector<64x128xbf16>, vector<128x16xbf16>, vector<64x16xf32> -> vector<64x16xf32>
    %c4_124 = arith.constant 4 : index
    %c0_125 = arith.constant 0 : index
    %c0_126 = arith.constant 0 : index
    %197 = vector.load %arg6[%c4_124, %c0_125, %c0_126] : memref<8x1x16xf32, #tpu.memory_space<vmem>>, vector<1x1x16xf32>
    %198 = vector.shape_cast %197 : vector<1x1x16xf32> to vector<1x16xf32>
    %199 = vector.broadcast %198 : vector<1x16xf32> to vector<64x16xf32>
    %200 = arith.addf %196, %199 : vector<64x16xf32>
    %201 = arith.truncf %193 : vector<32x16xf32> to vector<32x16xbf16>
    %202 = vector.shape_cast %201 : vector<32x16xbf16> to vector<4x8x16xbf16>
    %203 = arith.truncf %200 : vector<64x16xf32> to vector<64x16xbf16>
    %204 = vector.shape_cast %203 : vector<64x16xbf16> to vector<4x16x16xbf16>
    "tpu.trace_start"() <{level = 10 : i32, message = "bqj,bkj->bqk"}> : () -> ()
    %cst_127 = arith.constant dense<0.000000e+00> : vector<4x8x16xf32>
    %205 = tpu.matmul %202, %204, %cst_127 {dimension_numbers = #tpu.dot_dimension_numbers<[2], [2], [1], [1], [0, 0, 0, 1, 1, 1], [0], [0]>} : vector<4x8x16xbf16>, vector<4x16x16xbf16>, vector<4x8x16xf32> -> vector<4x8x16xf32>
    "tpu.trace_stop"() : () -> ()
    %cst_128 = arith.constant dense<0xFF800000> : vector<4x8xf32>
    %206 = vector.multi_reduction <maximumf>, %205, %cst_128 [2] : vector<4x8x16xf32> to vector<4x8xf32>
    %207 = vector.shape_cast %206 : vector<4x8xf32> to vector<4x8x1xf32>
    %208 = vector.broadcast %207 : vector<4x8x1xf32> to vector<4x8x16xf32>
    %209 = arith.subf %205, %208 : vector<4x8x16xf32>
    %210 = math.exp %209 : vector<4x8x16xf32>
    %cst_129 = arith.constant dense<0.000000e+00> : vector<4x8xf32>
    %211 = vector.multi_reduction <add>, %210, %cst_129 [2] : vector<4x8x16xf32> to vector<4x8xf32>
    %212 = vector.shape_cast %211 : vector<4x8xf32> to vector<4x8x1xf32>
    %213 = tpu.reciprocal %212 {approx = true} : vector<4x8x1xf32> -> vector<4x8x1xf32>
    %214 = vector.broadcast %213 : vector<4x8x1xf32> to vector<4x8x16xf32>
    %215 = arith.mulf %210, %214 : vector<4x8x16xf32>
    %cst_130 = arith.constant dense<0.000000e+00> : vector<4x16xf32>
    %216 = vector.multi_reduction <add>, %215, %cst_130 [1] : vector<4x8x16xf32> to vector<4x16xf32>
    %217 = vector.shape_cast %216 : vector<4x16xf32> to vector<4x1x16xf32>
    %cst_131 = arith.constant 8.000000e+00 : f32
    %218 = vector.broadcast %cst_131 : f32 to vector<4x1x16xf32>
    %219 = arith.divf %217, %218 : vector<4x1x16xf32>
    %220 = arith.truncf %219 : vector<4x1x16xf32> to vector<4x1x16xbf16>
    "tpu.trace_start"() <{level = 10 : i32, message = "bqk,bkd->bqd"}> : () -> ()
    %cst_132 = arith.constant dense<0.000000e+00> : vector<4x1x128xf32>
    %221 = tpu.matmul %220, %4, %cst_132 {dimension_numbers = #tpu.dot_dimension_numbers<[2], [1], [1], [2], [0, 0, 0, 1, 1, 2], [0], [0]>} : vector<4x1x16xbf16>, vector<4x16x128xbf16>, vector<4x1x128xf32> -> vector<4x1x128xf32>
    "tpu.trace_stop"() : () -> ()
    %222 = vector.shape_cast %221 : vector<4x1x128xf32> to vector<4x128xf32>
    %223 = arith.truncf %222 : vector<4x128xf32> to vector<4x128xbf16>
    %c4_133 = arith.constant 4 : index
    %c0_134 = arith.constant 0 : index
    %c0_135 = arith.constant 0 : index
    %224 = vector.load %arg7[%c4_133, %c0_134, %c0_135] : memref<8x128x16xbf16, #tpu.memory_space<vmem>>, vector<1x128x16xbf16>
    %225 = vector.shape_cast %224 : vector<1x128x16xbf16> to vector<128x16xbf16>
    %cst_136 = arith.constant dense<0.000000e+00> : vector<4x16xf32>
    %226 = tpu.matmul %223, %225, %cst_136 {dimension_numbers = #tpu.dot_dimension_numbers<[1], [0], [0], [1], [0, 0, 1, 1], [], []>} : vector<4x128xbf16>, vector<128x16xbf16>, vector<4x16xf32> -> vector<4x16xf32>
    %227 = arith.truncf %226 : vector<4x16xf32> to vector<4x16xbf16>
    %c4_137 = arith.constant 4 : index
    %c0_138 = arith.constant 0 : index
    %c0_139 = arith.constant 0 : index
    %228 = vector.load %arg8[%c4_137, %c0_138, %c0_139] : memref<8x16x128xbf16, #tpu.memory_space<vmem>>, vector<1x16x128xbf16>
    %229 = vector.shape_cast %228 : vector<1x16x128xbf16> to vector<16x128xbf16>
    %cst_140 = arith.constant dense<0.000000e+00> : vector<4x128xf32>
    %230 = tpu.matmul %227, %229, %cst_140 {dimension_numbers = #tpu.dot_dimension_numbers<[1], [0], [0], [1], [0, 0, 1, 1], [], []>} : vector<4x16xbf16>, vector<16x128xbf16>, vector<4x128xf32> -> vector<4x128xf32>
    %231 = arith.addf %186, %230 : vector<4x128xf32>
    %c5 = arith.constant 5 : index
    %c0_141 = arith.constant 0 : index
    %c0_142 = arith.constant 0 : index
    %232 = vector.load %arg3[%c5, %c0_141, %c0_142] : memref<8x128x16xbf16, #tpu.memory_space<vmem>>, vector<1x128x16xbf16>
    %233 = vector.shape_cast %232 : vector<1x128x16xbf16> to vector<128x16xbf16>
    %cst_143 = arith.constant dense<0.000000e+00> : vector<32x16xf32>
    %234 = tpu.matmul %2, %233, %cst_143 {dimension_numbers = #tpu.dot_dimension_numbers<[1], [0], [0], [1], [0, 0, 1, 1], [], []>} : vector<32x128xbf16>, vector<128x16xbf16>, vector<32x16xf32> -> vector<32x16xf32>
    %c5_144 = arith.constant 5 : index
    %c0_145 = arith.constant 0 : index
    %c0_146 = arith.constant 0 : index
    %235 = vector.load %arg4[%c5_144, %c0_145, %c0_146] : memref<8x1x16xf32, #tpu.memory_space<vmem>>, vector<1x1x16xf32>
    %236 = vector.shape_cast %235 : vector<1x1x16xf32> to vector<1x16xf32>
    %237 = vector.broadcast %236 : vector<1x16xf32> to vector<32x16xf32>
    %238 = arith.addf %234, %237 : vector<32x16xf32>
    %c5_147 = arith.constant 5 : index
    %c0_148 = arith.constant 0 : index
    %c0_149 = arith.constant 0 : index
    %239 = vector.load %arg5[%c5_147, %c0_148, %c0_149] : memref<8x128x16xbf16, #tpu.memory_space<vmem>>, vector<1x128x16xbf16>
    %240 = vector.shape_cast %239 : vector<1x128x16xbf16> to vector<128x16xbf16>
    %cst_150 = arith.constant dense<0.000000e+00> : vector<64x16xf32>
    %241 = tpu.matmul %5, %240, %cst_150 {dimension_numbers = #tpu.dot_dimension_numbers<[1], [0], [0], [1], [0, 0, 1, 1], [], []>} : vector<64x128xbf16>, vector<128x16xbf16>, vector<64x16xf32> -> vector<64x16xf32>
    %c5_151 = arith.constant 5 : index
    %c0_152 = arith.constant 0 : index
    %c0_153 = arith.constant 0 : index
    %242 = vector.load %arg6[%c5_151, %c0_152, %c0_153] : memref<8x1x16xf32, #tpu.memory_space<vmem>>, vector<1x1x16xf32>
    %243 = vector.shape_cast %242 : vector<1x1x16xf32> to vector<1x16xf32>
    %244 = vector.broadcast %243 : vector<1x16xf32> to vector<64x16xf32>
    %245 = arith.addf %241, %244 : vector<64x16xf32>
    %246 = arith.truncf %238 : vector<32x16xf32> to vector<32x16xbf16>
    %247 = vector.shape_cast %246 : vector<32x16xbf16> to vector<4x8x16xbf16>
    %248 = arith.truncf %245 : vector<64x16xf32> to vector<64x16xbf16>
    %249 = vector.shape_cast %248 : vector<64x16xbf16> to vector<4x16x16xbf16>
    "tpu.trace_start"() <{level = 10 : i32, message = "bqj,bkj->bqk"}> : () -> ()
    %cst_154 = arith.constant dense<0.000000e+00> : vector<4x8x16xf32>
    %250 = tpu.matmul %247, %249, %cst_154 {dimension_numbers = #tpu.dot_dimension_numbers<[2], [2], [1], [1], [0, 0, 0, 1, 1, 1], [0], [0]>} : vector<4x8x16xbf16>, vector<4x16x16xbf16>, vector<4x8x16xf32> -> vector<4x8x16xf32>
    "tpu.trace_stop"() : () -> ()
    %cst_155 = arith.constant dense<0xFF800000> : vector<4x8xf32>
    %251 = vector.multi_reduction <maximumf>, %250, %cst_155 [2] : vector<4x8x16xf32> to vector<4x8xf32>
    %252 = vector.shape_cast %251 : vector<4x8xf32> to vector<4x8x1xf32>
    %253 = vector.broadcast %252 : vector<4x8x1xf32> to vector<4x8x16xf32>
    %254 = arith.subf %250, %253 : vector<4x8x16xf32>
    %255 = math.exp %254 : vector<4x8x16xf32>
    %cst_156 = arith.constant dense<0.000000e+00> : vector<4x8xf32>
    %256 = vector.multi_reduction <add>, %255, %cst_156 [2] : vector<4x8x16xf32> to vector<4x8xf32>
    %257 = vector.shape_cast %256 : vector<4x8xf32> to vector<4x8x1xf32>
    %258 = tpu.reciprocal %257 {approx = true} : vector<4x8x1xf32> -> vector<4x8x1xf32>
    %259 = vector.broadcast %258 : vector<4x8x1xf32> to vector<4x8x16xf32>
    %260 = arith.mulf %255, %259 : vector<4x8x16xf32>
    %cst_157 = arith.constant dense<0.000000e+00> : vector<4x16xf32>
    %261 = vector.multi_reduction <add>, %260, %cst_157 [1] : vector<4x8x16xf32> to vector<4x16xf32>
    %262 = vector.shape_cast %261 : vector<4x16xf32> to vector<4x1x16xf32>
    %cst_158 = arith.constant 8.000000e+00 : f32
    %263 = vector.broadcast %cst_158 : f32 to vector<4x1x16xf32>
    %264 = arith.divf %262, %263 : vector<4x1x16xf32>
    %265 = arith.truncf %264 : vector<4x1x16xf32> to vector<4x1x16xbf16>
    "tpu.trace_start"() <{level = 10 : i32, message = "bqk,bkd->bqd"}> : () -> ()
    %cst_159 = arith.constant dense<0.000000e+00> : vector<4x1x128xf32>
    %266 = tpu.matmul %265, %4, %cst_159 {dimension_numbers = #tpu.dot_dimension_numbers<[2], [1], [1], [2], [0, 0, 0, 1, 1, 2], [0], [0]>} : vector<4x1x16xbf16>, vector<4x16x128xbf16>, vector<4x1x128xf32> -> vector<4x1x128xf32>
    "tpu.trace_stop"() : () -> ()
    %267 = vector.shape_cast %266 : vector<4x1x128xf32> to vector<4x128xf32>
    %268 = arith.truncf %267 : vector<4x128xf32> to vector<4x128xbf16>
    %c5_160 = arith.constant 5 : index
    %c0_161 = arith.constant 0 : index
    %c0_162 = arith.constant 0 : index
    %269 = vector.load %arg7[%c5_160, %c0_161, %c0_162] : memref<8x128x16xbf16, #tpu.memory_space<vmem>>, vector<1x128x16xbf16>
    %270 = vector.shape_cast %269 : vector<1x128x16xbf16> to vector<128x16xbf16>
    %cst_163 = arith.constant dense<0.000000e+00> : vector<4x16xf32>
    %271 = tpu.matmul %268, %270, %cst_163 {dimension_numbers = #tpu.dot_dimension_numbers<[1], [0], [0], [1], [0, 0, 1, 1], [], []>} : vector<4x128xbf16>, vector<128x16xbf16>, vector<4x16xf32> -> vector<4x16xf32>
    %272 = arith.truncf %271 : vector<4x16xf32> to vector<4x16xbf16>
    %c5_164 = arith.constant 5 : index
    %c0_165 = arith.constant 0 : index
    %c0_166 = arith.constant 0 : index
    %273 = vector.load %arg8[%c5_164, %c0_165, %c0_166] : memref<8x16x128xbf16, #tpu.memory_space<vmem>>, vector<1x16x128xbf16>
    %274 = vector.shape_cast %273 : vector<1x16x128xbf16> to vector<16x128xbf16>
    %cst_167 = arith.constant dense<0.000000e+00> : vector<4x128xf32>
    %275 = tpu.matmul %272, %274, %cst_167 {dimension_numbers = #tpu.dot_dimension_numbers<[1], [0], [0], [1], [0, 0, 1, 1], [], []>} : vector<4x16xbf16>, vector<16x128xbf16>, vector<4x128xf32> -> vector<4x128xf32>
    %276 = arith.addf %231, %275 : vector<4x128xf32>
    %c6 = arith.constant 6 : index
    %c0_168 = arith.constant 0 : index
    %c0_169 = arith.constant 0 : index
    %277 = vector.load %arg3[%c6, %c0_168, %c0_169] : memref<8x128x16xbf16, #tpu.memory_space<vmem>>, vector<1x128x16xbf16>
    %278 = vector.shape_cast %277 : vector<1x128x16xbf16> to vector<128x16xbf16>
    %cst_170 = arith.constant dense<0.000000e+00> : vector<32x16xf32>
    %279 = tpu.matmul %2, %278, %cst_170 {dimension_numbers = #tpu.dot_dimension_numbers<[1], [0], [0], [1], [0, 0, 1, 1], [], []>} : vector<32x128xbf16>, vector<128x16xbf16>, vector<32x16xf32> -> vector<32x16xf32>
    %c6_171 = arith.constant 6 : index
    %c0_172 = arith.constant 0 : index
    %c0_173 = arith.constant 0 : index
    %280 = vector.load %arg4[%c6_171, %c0_172, %c0_173] : memref<8x1x16xf32, #tpu.memory_space<vmem>>, vector<1x1x16xf32>
    %281 = vector.shape_cast %280 : vector<1x1x16xf32> to vector<1x16xf32>
    %282 = vector.broadcast %281 : vector<1x16xf32> to vector<32x16xf32>
    %283 = arith.addf %279, %282 : vector<32x16xf32>
    %c6_174 = arith.constant 6 : index
    %c0_175 = arith.constant 0 : index
    %c0_176 = arith.constant 0 : index
    %284 = vector.load %arg5[%c6_174, %c0_175, %c0_176] : memref<8x128x16xbf16, #tpu.memory_space<vmem>>, vector<1x128x16xbf16>
    %285 = vector.shape_cast %284 : vector<1x128x16xbf16> to vector<128x16xbf16>
    %cst_177 = arith.constant dense<0.000000e+00> : vector<64x16xf32>
    %286 = tpu.matmul %5, %285, %cst_177 {dimension_numbers = #tpu.dot_dimension_numbers<[1], [0], [0], [1], [0, 0, 1, 1], [], []>} : vector<64x128xbf16>, vector<128x16xbf16>, vector<64x16xf32> -> vector<64x16xf32>
    %c6_178 = arith.constant 6 : index
    %c0_179 = arith.constant 0 : index
    %c0_180 = arith.constant 0 : index
    %287 = vector.load %arg6[%c6_178, %c0_179, %c0_180] : memref<8x1x16xf32, #tpu.memory_space<vmem>>, vector<1x1x16xf32>
    %288 = vector.shape_cast %287 : vector<1x1x16xf32> to vector<1x16xf32>
    %289 = vector.broadcast %288 : vector<1x16xf32> to vector<64x16xf32>
    %290 = arith.addf %286, %289 : vector<64x16xf32>
    %291 = arith.truncf %283 : vector<32x16xf32> to vector<32x16xbf16>
    %292 = vector.shape_cast %291 : vector<32x16xbf16> to vector<4x8x16xbf16>
    %293 = arith.truncf %290 : vector<64x16xf32> to vector<64x16xbf16>
    %294 = vector.shape_cast %293 : vector<64x16xbf16> to vector<4x16x16xbf16>
    "tpu.trace_start"() <{level = 10 : i32, message = "bqj,bkj->bqk"}> : () -> ()
    %cst_181 = arith.constant dense<0.000000e+00> : vector<4x8x16xf32>
    %295 = tpu.matmul %292, %294, %cst_181 {dimension_numbers = #tpu.dot_dimension_numbers<[2], [2], [1], [1], [0, 0, 0, 1, 1, 1], [0], [0]>} : vector<4x8x16xbf16>, vector<4x16x16xbf16>, vector<4x8x16xf32> -> vector<4x8x16xf32>
    "tpu.trace_stop"() : () -> ()
    %cst_182 = arith.constant dense<0xFF800000> : vector<4x8xf32>
    %296 = vector.multi_reduction <maximumf>, %295, %cst_182 [2] : vector<4x8x16xf32> to vector<4x8xf32>
    %297 = vector.shape_cast %296 : vector<4x8xf32> to vector<4x8x1xf32>
    %298 = vector.broadcast %297 : vector<4x8x1xf32> to vector<4x8x16xf32>
    %299 = arith.subf %295, %298 : vector<4x8x16xf32>
    %300 = math.exp %299 : vector<4x8x16xf32>
    %cst_183 = arith.constant dense<0.000000e+00> : vector<4x8xf32>
    %301 = vector.multi_reduction <add>, %300, %cst_183 [2] : vector<4x8x16xf32> to vector<4x8xf32>
    %302 = vector.shape_cast %301 : vector<4x8xf32> to vector<4x8x1xf32>
    %303 = tpu.reciprocal %302 {approx = true} : vector<4x8x1xf32> -> vector<4x8x1xf32>
    %304 = vector.broadcast %303 : vector<4x8x1xf32> to vector<4x8x16xf32>
    %305 = arith.mulf %300, %304 : vector<4x8x16xf32>
    %cst_184 = arith.constant dense<0.000000e+00> : vector<4x16xf32>
    %306 = vector.multi_reduction <add>, %305, %cst_184 [1] : vector<4x8x16xf32> to vector<4x16xf32>
    %307 = vector.shape_cast %306 : vector<4x16xf32> to vector<4x1x16xf32>
    %cst_185 = arith.constant 8.000000e+00 : f32
    %308 = vector.broadcast %cst_185 : f32 to vector<4x1x16xf32>
    %309 = arith.divf %307, %308 : vector<4x1x16xf32>
    %310 = arith.truncf %309 : vector<4x1x16xf32> to vector<4x1x16xbf16>
    "tpu.trace_start"() <{level = 10 : i32, message = "bqk,bkd->bqd"}> : () -> ()
    %cst_186 = arith.constant dense<0.000000e+00> : vector<4x1x128xf32>
    %311 = tpu.matmul %310, %4, %cst_186 {dimension_numbers = #tpu.dot_dimension_numbers<[2], [1], [1], [2], [0, 0, 0, 1, 1, 2], [0], [0]>} : vector<4x1x16xbf16>, vector<4x16x128xbf16>, vector<4x1x128xf32> -> vector<4x1x128xf32>
    "tpu.trace_stop"() : () -> ()
    %312 = vector.shape_cast %311 : vector<4x1x128xf32> to vector<4x128xf32>
    %313 = arith.truncf %312 : vector<4x128xf32> to vector<4x128xbf16>
    %c6_187 = arith.constant 6 : index
    %c0_188 = arith.constant 0 : index
    %c0_189 = arith.constant 0 : index
    %314 = vector.load %arg7[%c6_187, %c0_188, %c0_189] : memref<8x128x16xbf16, #tpu.memory_space<vmem>>, vector<1x128x16xbf16>
    %315 = vector.shape_cast %314 : vector<1x128x16xbf16> to vector<128x16xbf16>
    %cst_190 = arith.constant dense<0.000000e+00> : vector<4x16xf32>
    %316 = tpu.matmul %313, %315, %cst_190 {dimension_numbers = #tpu.dot_dimension_numbers<[1], [0], [0], [1], [0, 0, 1, 1], [], []>} : vector<4x128xbf16>, vector<128x16xbf16>, vector<4x16xf32> -> vector<4x16xf32>
    %317 = arith.truncf %316 : vector<4x16xf32> to vector<4x16xbf16>
    %c6_191 = arith.constant 6 : index
    %c0_192 = arith.constant 0 : index
    %c0_193 = arith.constant 0 : index
    %318 = vector.load %arg8[%c6_191, %c0_192, %c0_193] : memref<8x16x128xbf16, #tpu.memory_space<vmem>>, vector<1x16x128xbf16>
    %319 = vector.shape_cast %318 : vector<1x16x128xbf16> to vector<16x128xbf16>
    %cst_194 = arith.constant dense<0.000000e+00> : vector<4x128xf32>
    %320 = tpu.matmul %317, %319, %cst_194 {dimension_numbers = #tpu.dot_dimension_numbers<[1], [0], [0], [1], [0, 0, 1, 1], [], []>} : vector<4x16xbf16>, vector<16x128xbf16>, vector<4x128xf32> -> vector<4x128xf32>
    %321 = arith.addf %276, %320 : vector<4x128xf32>
    %c7 = arith.constant 7 : index
    %c0_195 = arith.constant 0 : index
    %c0_196 = arith.constant 0 : index
    %322 = vector.load %arg3[%c7, %c0_195, %c0_196] : memref<8x128x16xbf16, #tpu.memory_space<vmem>>, vector<1x128x16xbf16>
    %323 = vector.shape_cast %322 : vector<1x128x16xbf16> to vector<128x16xbf16>
    %cst_197 = arith.constant dense<0.000000e+00> : vector<32x16xf32>
    %324 = tpu.matmul %2, %323, %cst_197 {dimension_numbers = #tpu.dot_dimension_numbers<[1], [0], [0], [1], [0, 0, 1, 1], [], []>} : vector<32x128xbf16>, vector<128x16xbf16>, vector<32x16xf32> -> vector<32x16xf32>
    %c7_198 = arith.constant 7 : index
    %c0_199 = arith.constant 0 : index
    %c0_200 = arith.constant 0 : index
    %325 = vector.load %arg4[%c7_198, %c0_199, %c0_200] : memref<8x1x16xf32, #tpu.memory_space<vmem>>, vector<1x1x16xf32>
    %326 = vector.shape_cast %325 : vector<1x1x16xf32> to vector<1x16xf32>
    %327 = vector.broadcast %326 : vector<1x16xf32> to vector<32x16xf32>
    %328 = arith.addf %324, %327 : vector<32x16xf32>
    %c7_201 = arith.constant 7 : index
    %c0_202 = arith.constant 0 : index
    %c0_203 = arith.constant 0 : index
    %329 = vector.load %arg5[%c7_201, %c0_202, %c0_203] : memref<8x128x16xbf16, #tpu.memory_space<vmem>>, vector<1x128x16xbf16>
    %330 = vector.shape_cast %329 : vector<1x128x16xbf16> to vector<128x16xbf16>
    %cst_204 = arith.constant dense<0.000000e+00> : vector<64x16xf32>
    %331 = tpu.matmul %5, %330, %cst_204 {dimension_numbers = #tpu.dot_dimension_numbers<[1], [0], [0], [1], [0, 0, 1, 1], [], []>} : vector<64x128xbf16>, vector<128x16xbf16>, vector<64x16xf32> -> vector<64x16xf32>
    %c7_205 = arith.constant 7 : index
    %c0_206 = arith.constant 0 : index
    %c0_207 = arith.constant 0 : index
    %332 = vector.load %arg6[%c7_205, %c0_206, %c0_207] : memref<8x1x16xf32, #tpu.memory_space<vmem>>, vector<1x1x16xf32>
    %333 = vector.shape_cast %332 : vector<1x1x16xf32> to vector<1x16xf32>
    %334 = vector.broadcast %333 : vector<1x16xf32> to vector<64x16xf32>
    %335 = arith.addf %331, %334 : vector<64x16xf32>
    %336 = arith.truncf %328 : vector<32x16xf32> to vector<32x16xbf16>
    %337 = vector.shape_cast %336 : vector<32x16xbf16> to vector<4x8x16xbf16>
    %338 = arith.truncf %335 : vector<64x16xf32> to vector<64x16xbf16>
    %339 = vector.shape_cast %338 : vector<64x16xbf16> to vector<4x16x16xbf16>
    "tpu.trace_start"() <{level = 10 : i32, message = "bqj,bkj->bqk"}> : () -> ()
    %cst_208 = arith.constant dense<0.000000e+00> : vector<4x8x16xf32>
    %340 = tpu.matmul %337, %339, %cst_208 {dimension_numbers = #tpu.dot_dimension_numbers<[2], [2], [1], [1], [0, 0, 0, 1, 1, 1], [0], [0]>} : vector<4x8x16xbf16>, vector<4x16x16xbf16>, vector<4x8x16xf32> -> vector<4x8x16xf32>
    "tpu.trace_stop"() : () -> ()
    %cst_209 = arith.constant dense<0xFF800000> : vector<4x8xf32>
    %341 = vector.multi_reduction <maximumf>, %340, %cst_209 [2] : vector<4x8x16xf32> to vector<4x8xf32>
    %342 = vector.shape_cast %341 : vector<4x8xf32> to vector<4x8x1xf32>
    %343 = vector.broadcast %342 : vector<4x8x1xf32> to vector<4x8x16xf32>
    %344 = arith.subf %340, %343 : vector<4x8x16xf32>
    %345 = math.exp %344 : vector<4x8x16xf32>
    %cst_210 = arith.constant dense<0.000000e+00> : vector<4x8xf32>
    %346 = vector.multi_reduction <add>, %345, %cst_210 [2] : vector<4x8x16xf32> to vector<4x8xf32>
    %347 = vector.shape_cast %346 : vector<4x8xf32> to vector<4x8x1xf32>
    %348 = tpu.reciprocal %347 {approx = true} : vector<4x8x1xf32> -> vector<4x8x1xf32>
    %349 = vector.broadcast %348 : vector<4x8x1xf32> to vector<4x8x16xf32>
    %350 = arith.mulf %345, %349 : vector<4x8x16xf32>
    %cst_211 = arith.constant dense<0.000000e+00> : vector<4x16xf32>
    %351 = vector.multi_reduction <add>, %350, %cst_211 [1] : vector<4x8x16xf32> to vector<4x16xf32>
    %352 = vector.shape_cast %351 : vector<4x16xf32> to vector<4x1x16xf32>
    %cst_212 = arith.constant 8.000000e+00 : f32
    %353 = vector.broadcast %cst_212 : f32 to vector<4x1x16xf32>
    %354 = arith.divf %352, %353 : vector<4x1x16xf32>
    %355 = arith.truncf %354 : vector<4x1x16xf32> to vector<4x1x16xbf16>
    "tpu.trace_start"() <{level = 10 : i32, message = "bqk,bkd->bqd"}> : () -> ()
    %cst_213 = arith.constant dense<0.000000e+00> : vector<4x1x128xf32>
    %356 = tpu.matmul %355, %4, %cst_213 {dimension_numbers = #tpu.dot_dimension_numbers<[2], [1], [1], [2], [0, 0, 0, 1, 1, 2], [0], [0]>} : vector<4x1x16xbf16>, vector<4x16x128xbf16>, vector<4x1x128xf32> -> vector<4x1x128xf32>
    "tpu.trace_stop"() : () -> ()
    %357 = vector.shape_cast %356 : vector<4x1x128xf32> to vector<4x128xf32>
    %358 = arith.truncf %357 : vector<4x128xf32> to vector<4x128xbf16>
    %c7_214 = arith.constant 7 : index
    %c0_215 = arith.constant 0 : index
    %c0_216 = arith.constant 0 : index
    %359 = vector.load %arg7[%c7_214, %c0_215, %c0_216] : memref<8x128x16xbf16, #tpu.memory_space<vmem>>, vector<1x128x16xbf16>
    %360 = vector.shape_cast %359 : vector<1x128x16xbf16> to vector<128x16xbf16>
    %cst_217 = arith.constant dense<0.000000e+00> : vector<4x16xf32>
    %361 = tpu.matmul %358, %360, %cst_217 {dimension_numbers = #tpu.dot_dimension_numbers<[1], [0], [0], [1], [0, 0, 1, 1], [], []>} : vector<4x128xbf16>, vector<128x16xbf16>, vector<4x16xf32> -> vector<4x16xf32>
    %362 = arith.truncf %361 : vector<4x16xf32> to vector<4x16xbf16>
    %c7_218 = arith.constant 7 : index
    %c0_219 = arith.constant 0 : index
    %c0_220 = arith.constant 0 : index
    %363 = vector.load %arg8[%c7_218, %c0_219, %c0_220] : memref<8x16x128xbf16, #tpu.memory_space<vmem>>, vector<1x16x128xbf16>
    %364 = vector.shape_cast %363 : vector<1x16x128xbf16> to vector<16x128xbf16>
    %cst_221 = arith.constant dense<0.000000e+00> : vector<4x128xf32>
    %365 = tpu.matmul %362, %364, %cst_221 {dimension_numbers = #tpu.dot_dimension_numbers<[1], [0], [0], [1], [0, 0, 1, 1], [], []>} : vector<4x16xbf16>, vector<16x128xbf16>, vector<4x128xf32> -> vector<4x128xf32>
    %366 = arith.addf %321, %365 : vector<4x128xf32>
    %c0_222 = arith.constant 0 : index
    %c0_223 = arith.constant 0 : index
    %367 = vector.load %arg9[%c0_222, %c0_223] : memref<1x128xf32, #tpu.memory_space<vmem>>, vector<1x128xf32>
    %368 = vector.broadcast %367 : vector<1x128xf32> to vector<4x128xf32>
    %369 = arith.addf %366, %368 : vector<4x128xf32>
    %370 = vector.shape_cast %369 : vector<4x128xf32> to vector<4x1x128xf32>
    %c0_224 = arith.constant 0 : index
    %c0_225 = arith.constant 0 : index
    %c0_226 = arith.constant 0 : index
    %371 = vector.load %arg10[%c0_224, %c0_225, %c0_226] : memref<4x1x128xf32, #tpu.memory_space<vmem>>, vector<4x1x128xf32>
    tpu.vector_store %arg10[%c0_224, %c0_225, %c0_226], %370 {strides = array<i32>} : memref<4x1x128xf32, #tpu.memory_space<vmem>>, vector<4x1x128xf32>,
    return
  }
  func.func @transform_0(%arg0: i32) -> (i32, i32, i32) {
    %c0_i32 = arith.constant 0 : i32
    %c0_i32_0 = arith.constant 0 : i32
    %c0_i32_1 = arith.constant 0 : i32
    return %arg0, %c0_i32, %c0_i32_0 : i32, i32, i32
  }
  func.func @transform_1(%arg0: i32) -> (i32, i32, i32) {
    %c0_i32 = arith.constant 0 : i32
    %c0_i32_0 = arith.constant 0 : i32
    %c0_i32_1 = arith.constant 0 : i32
    return %arg0, %c0_i32, %c0_i32_0 : i32, i32, i32
  }
  func.func @transform_2(%arg0: i32) -> (i32, i32, i32) {
    %c0_i32 = arith.constant 0 : i32
    %c0_i32_0 = arith.constant 0 : i32
    %c0_i32_1 = arith.constant 0 : i32
    %c0_i32_2 = arith.constant 0 : i32
    return %c0_i32, %c0_i32_0, %c0_i32_1 : i32, i32, i32
  }
  func.func @transform_3(%arg0: i32) -> (i32, i32, i32) {
    %c0_i32 = arith.constant 0 : i32
    %c0_i32_0 = arith.constant 0 : i32
    %c0_i32_1 = arith.constant 0 : i32
    %c0_i32_2 = arith.constant 0 : i32
    return %c0_i32, %c0_i32_0, %c0_i32_1 : i32, i32, i32
  }
  func.func @transform_4(%arg0: i32) -> (i32, i32, i32) {
    %c0_i32 = arith.constant 0 : i32
    %c0_i32_0 = arith.constant 0 : i32
    %c0_i32_1 = arith.constant 0 : i32
    %c0_i32_2 = arith.constant 0 : i32
    return %c0_i32, %c0_i32_0, %c0_i32_1 : i32, i32, i32
  }
  func.func @transform_5(%arg0: i32) -> (i32, i32, i32) {
    %c0_i32 = arith.constant 0 : i32
    %c0_i32_0 = arith.constant 0 : i32
    %c0_i32_1 = arith.constant 0 : i32
    %c0_i32_2 = arith.constant 0 : i32
    return %c0_i32, %c0_i32_0, %c0_i32_1 : i32, i32, i32
  }
  func.func @transform_6(%arg0: i32) -> (i32, i32, i32) {
    %c0_i32 = arith.constant 0 : i32
    %c0_i32_0 = arith.constant 0 : i32
    %c0_i32_1 = arith.constant 0 : i32
    %c0_i32_2 = arith.constant 0 : i32
    return %c0_i32, %c0_i32_0, %c0_i32_1 : i32, i32, i32
  }
  func.func @transform_7(%arg0: i32) -> (i32, i32, i32) {
    %c0_i32 = arith.constant 0 : i32
    %c0_i32_0 = arith.constant 0 : i32
    %c0_i32_1 = arith.constant 0 : i32
    %c0_i32_2 = arith.constant 0 : i32
    return %c0_i32, %c0_i32_0, %c0_i32_1 : i32, i32, i32
  }
  func.func @transform_8(%arg0: i32) -> (i32, i32) {
    %c0_i32 = arith.constant 0 : i32
    %c0_i32_0 = arith.constant 0 : i32
    %c0_i32_1 = arith.constant 0 : i32
    return %c0_i32, %c0_i32_0 : i32, i32
  }
  func.func @transform_9(%arg0: i32) -> (i32, i32, i32) {
    %c0_i32 = arith.constant 0 : i32
    %c0_i32_0 = arith.constant 0 : i32
    %c0_i32_1 = arith.constant 0 : i32
    return %arg0, %c0_i32, %c0_i32_0 : i32, i32, i32
  }
}

</mosaic_0001>

<bundles_post_ra>
// kernel: tpu_custom_call.1
= control target key start
LH: loop header
LB: loop body
LE: loop exit
PB: predicated region body
PF: predicated region fallthrough
CT: control target
= control target key end

     0   :  { %s11532_s0 = inlined_call_operand.hbm [shape: f32[8,8,128], index: 0, kind: input, shape index: {}]   ;;  %s11533_s1 = inlined_call_operand.hbm [shape: f32[8,16,128], index: 1, kind: input, shape index: {}]   ;;  %s11534_s2 = inlined_call_operand.hbm [shape: bf16[8,128,16], index: 2, kind: input, shape index: {}]   ;;  %s11535_s3 = inlined_call_operand.hbm [shape: f32[8,1,16], index: 3, kind: input, shape index: {}]   ;;  %s11536_s4 = inlined_call_operand.hbm [shape: bf16[8,128,16], index: 4, kind: input, shape index: {}]   ;;  %s11537_s5 = inlined_call_operand.hbm [shape: f32[8,1,16], index: 5, kind: input, shape index: {}]   ;;  %s11538_s6 = inlined_call_operand.hbm [shape: bf16[8,128,16], index: 6, kind: input, shape index: {}]   ;;  %s11539_s7 = inlined_call_operand.hbm [shape: bf16[8,16,128], index: 7, kind: input, shape index: {}]   ;;  %s11540_s8 = inlined_call_operand.hbm [shape: f32[1,128], index: 8, kind: input, shape index: {}]   ;;  %s11541_s9 = inlined_call_operand.hbm [shape: f32[8,1,128], index: 9, kind: output, shape index: {}]  }
   0x1   :  { %11550 = sst [smem:[#allocation25_spill]] %s11532_s0 }
   0x2   :  { %11551 = sst [smem:[#allocation26_spill]] %s11534_s2 }
   0x3   :  { %11552 = sst [smem:[#allocation27_spill]] %s11535_s3 }
   0x4   :  { %11553 = sst [smem:[#allocation28_spill]] %s11536_s4 }
   0x5   :  { %11554 = sst [smem:[#allocation29_spill]] %s11537_s5 }
   0x6   :  { %11555 = sst [smem:[#allocation30_spill]] %s11538_s6 }
   0x7   :  { %11556 = sst [smem:[#allocation31_spill]] %s11541_s9 }
   0x8   :  { %14 = vsyncpa [#allocation3], 0 }
   0x9   :  { %16 = vsyncpa [#allocation3 + $0x1], 0 }
   0xa   :  { %17 = vsyncpa [#allocation6], 0 }
   0xb   :  { %19 = vsyncpa [#allocation6 + $0x1], 0 }
   0xc   :  { %20 = vsyncpa [#allocation9], 0 }
   0xd   :  { %21 = vsyncpa [#allocation12], 0 }
   0xe   :  { %22 = vsyncpa [#allocation15], 0 }
   0xf   :  { %23 = vsyncpa [#allocation4], 0 }
  0x10   :  { %25 = vsyncpa [#allocation4 + $0x1], 0  ;;  %s10477_s30 = smov 0   ;;  %s10479_s10 = smov 0  }
  0x11   :  { %s10481_s11 = smov 0   ;;  %s10483_s12 = smov 0  }
  0x12 LB: > { %s10406_s13 = smov [#allocation7]   ;;  %s10498_s15 = sadd.s32 4294967295, %s10404_s12   ;;  %s10404_s12 = sphi %s10483_s12, %s11589_s12   ;;  %s10400_s11 = sphi %s10481_s11, %s11588_s11   ;;  %s10396_s10 = sphi %s10479_s10, %s11587_s10   ;;  %s10392_s30 = sphi %s10477_s30, %s11586_s30  }
  0x13   : > { %s273_s14 = sshll.u32 %s10406_s13, 4  ;;  %p7870_p0 = scmp.ge.s32.totalorder %s10404_s12, 1  ;;  %s10503_s14 = int_to_ptr.vmem [resolvable:$true] %s273_s14 }
  0x14   : > { %p11545_p1 = scmp.eq.s32.totalorder %s10498_s15, 0  ;;  %p261_p2 = scmp.lt.s32.totalorder %s10404_s12, 3 }
  0x15   : > { %s10407_s17 = smov [#allocation8]   ;;  %s10408_s20 = smov [#allocation11]  }
  0x16   : > { %p10505_p3 = pnand %p7870_p0, %p261_p2  ;;  %s286_s18 = sshll.u32 %s10407_s17, 4  ;;  %s10518_s18 = int_to_ptr.vmem [resolvable:$true] %s286_s18 }
  0x17   : > { %s10520_s21 = sshll.u32 %s10408_s20, 4  ;;  %s11559_s2 = sld [smem:[#allocation26_spill]]  ;;  %s313_s21 = int_to_ptr.vmem [resolvable:$true] %s10520_s21 }
  0x18   : > { %s11557_s16 = scalar_select %p10505_p3, 1, 0 }
  0x19   : > { %p9635_p5 = pneg %p10505_p3 }
  0x1b   : > { %p10514_p6 = pnand %p9635_p5, %p11545_p1 }
  0x1d   : > { %s10062_s24 = scalar_lea.hbm %s11559_s2, 8192  ;;  %p10530_p8 = pneg %p10514_p6 }
  0x1e   : > { %p10063_p7 = scmp.ne.s32.totalorder %s11559_s2, %s10062_s24  ;;  %p10069_p11 = scmp.lt.u32.totalorder %s10062_s24, %s11559_s2 }
  0x20   : > { %p10065_p9 = pnand %p10530_p8, %p10063_p7 }
  0x22   : > { %p10066_p10 = pneg %p10065_p9 }
  0x24   : > { %p10071_p12 = pnand %p10069_p11, %p10066_p10 }
  0x26   : > { %10074 = shalt.err (!%p10071_p12)
}
  0x27   : > { %s10075_s13 = scalar_lea.vmem %s10503_s14, 8192  ;;  %p10083_p5 = scmp.lt.s32.totalorder %s10503_s14, %s10503_s14 }
  0x28   : > { %p10076_p13 = scmp.ne.s32.totalorder %s10503_s14, %s10075_s13  ;;  %p10084_p4 = scmp.lt.s32.totalorder %s10075_s13, %s10075_s13 }
  0x2a   : > { %p10078_p0 = pnand %p10076_p13, %p10530_p8  ;;  %p10085_p7 = por %p10084_p4, %p10083_p5 }
  0x2c   : > { %p10079_p2 = pneg %p10078_p0 }
  0x2e   : > { %p10086_p9 = pnand %p10085_p7, %p10079_p2 }
  0x30   : > { %10089 = shalt.err (!%p10086_p9)
}
  0x31   : > { %s11543_s17 = smov 64   ;;  %s11547_s20 = smov 4  }
  0x32   : > { %9638 = dma.hbm_to_vmem [thread:$0]  (!%p10514_p6), %s11559_s2, 8192, %s10503_s14, [#allocation6], %s11543_s17, %s11543_s17, %s11547_s20  }
  0x33   : > { %s11561_s3 = sld [smem:[#allocation27_spill]] }
  0x39   : > { %s10090_s26 = scalar_lea.hbm %s11561_s3, 128 }
  0x3a   : > { %p10091_p4 = scmp.ne.s32.totalorder %s11561_s3, %s10090_s26  ;;  %p10097_p12 = scmp.lt.u32.totalorder %s10090_s26, %s11561_s3 }
  0x3c   : > { %p10093_p10 = pnand %p10091_p4, %p10530_p8 }
  0x3e   : > { %p10094_p11 = pneg %p10093_p10 }
  0x40   : > { %p10099_p13 = pnand %p10097_p12, %p10094_p11 }
  0x42   : > { %10102 = shalt.err (!%p10099_p13)
}
  0x43   : > { %s10103_s14 = scalar_lea.vmem %s10518_s18, 128  ;;  %p10111_p7 = scmp.lt.s32.totalorder %s10518_s18, %s10518_s18 }
  0x44   : > { %p10104_p0 = scmp.ne.s32.totalorder %s10518_s18, %s10103_s14  ;;  %p10112_p9 = scmp.lt.s32.totalorder %s10103_s14, %s10103_s14 }
  0x46   : > { %p10106_p2 = pnand %p10104_p0, %p10530_p8  ;;  %p10113_p4 = por %p10112_p9, %p10111_p7 }
  0x48   : > { %p10107_p5 = pneg %p10106_p2 }
  0x4a   : > { %p10114_p10 = pnand %p10113_p4, %p10107_p5 }
  0x4c   : > { %10117 = shalt.err (!%p10114_p10)
}
  0x4d   : > { %s10411_s22 = smov 16   ;;  %s10412_s9 = smov 1  }
  0x4e   : > { %9641 = dma.hbm_to_vmem [thread:$0]  (!%p10514_p6), %s11561_s3, 128, %s10518_s18, [#allocation9], %s10411_s22, %s10411_s22, %s10412_s9  }
  0x4f   : > { %s11562_s5 = sld [smem:[#allocation29_spill]] }
  0x55   : > { %s10118_s28 = scalar_lea.hbm %s11562_s5, 128 }
  0x56   : > { %p10119_p11 = scmp.ne.s32.totalorder %s11562_s5, %s10118_s28  ;;  %p10125_p0 = scmp.lt.u32.totalorder %s10118_s28, %s11562_s5 }
  0x58   : > { %p10121_p12 = pnand %p10119_p11, %p10530_p8 }
  0x5a   : > { %p10122_p13 = pneg %p10121_p12 }
  0x5c   : > { %p10127_p2 = pnand %p10125_p0, %p10122_p13 }
  0x5e   : > { %10130 = shalt.err (!%p10127_p2)
}
  0x5f   : > { %s10131_s23 = scalar_lea.vmem %s313_s21, 128  ;;  %p10139_p4 = scmp.lt.s32.totalorder %s313_s21, %s313_s21 }
  0x60   : > { %p10132_p5 = scmp.ne.s32.totalorder %s313_s21, %s10131_s23  ;;  %p10140_p10 = scmp.lt.s32.totalorder %s10131_s23, %s10131_s23 }
  0x62   : > { %p10134_p7 = pnand %p10132_p5, %p10530_p8  ;;  %p10141_p1 = por %p10140_p10, %p10139_p4 }
  0x64   : > { %p10135_p9 = pneg %p10134_p7 }
  0x66   : > { %p10142_p3 = pnand %p10141_p1, %p10135_p9 }
  0x68   : > { %10145 = shalt.err (!%p10142_p3)
}
  0x69   : > { %9647 = dma.hbm_to_vmem [thread:$0]  (!%p10514_p6), %s11562_s5, 128, %s313_s21, [#allocation12], %s10411_s22, %s10411_s22, %s10412_s9  }
  0x6a   : > { %s10413_s17 = smov [#allocation14]   ;;  %s10414_s26 = smov [#allocation10]  }
  0x6b   : > { %s338_s25 = sshll.u32 %s10413_s17, 4  ;;  %s299_s28 = sshll.u32 %s10414_s26, 4  ;;  %s339_s25 = int_to_ptr.vmem [resolvable:$true] %s338_s25  ;;  %s300_s28 = int_to_ptr.vmem [resolvable:$true] %s299_s28 }
  0x6c   : > { %s10146_s14 = scalar_lea.hbm %s11539_s7, 1024 }
  0x6d   : > { %p10147_p1 = scmp.ne.s32.totalorder %s11539_s7, %s10146_s14  ;;  %p10153_p12 = scmp.lt.u32.totalorder %s10146_s14, %s11539_s7 }
  0x6f   : > { %p10149_p3 = pnand %p10147_p1, %p10530_p8 }
  0x71   : > { %p10150_p11 = pneg %p10149_p3 }
  0x73   : > { %p10155_p13 = pnand %p10153_p12, %p10150_p11 }
  0x75   : > { %10158 = shalt.err (!%p10155_p13)
}
  0x76   : > { %s10159_s21 = scalar_lea.vmem %s339_s25, 1024  ;;  %p10167_p7 = scmp.lt.s32.totalorder %s339_s25, %s339_s25 }
  0x77   : > { %p10160_p0 = scmp.ne.s32.totalorder %s339_s25, %s10159_s21  ;;  %p10168_p9 = scmp.lt.s32.totalorder %s10159_s21, %s10159_s21 }
  0x79   : > { %p10162_p2 = pnand %p10160_p0, %p10530_p8  ;;  %p10169_p4 = por %p10168_p9, %p10167_p7 }
  0x7b   : > { %p10163_p5 = pneg %p10162_p2 }
  0x7d   : > { %p10170_p10 = pnand %p10169_p4, %p10163_p5 }
  0x7f   : > { %10173 = shalt.err (!%p10170_p10)
}
  0x80   : > { %s11563_s20 = smov 4   ;;  %s11564_s22 = smov 64  }
  0x81   : > { %9653 = dma.hbm_to_vmem [thread:$0]  (!%p10514_p6), %s11539_s7, 1024, %s339_s25, [#allocation15], %s11564_s22, %s11564_s22, %s11563_s20  }
  0x82   : > { %s11565_s4 = sld [smem:[#allocation28_spill]] }
  0x88   : > { %s10174_s26 = scalar_lea.hbm %s11565_s4, 8192 }
  0x89   : > { %p10175_p1 = scmp.ne.s32.totalorder %s11565_s4, %s10174_s26  ;;  %p10181_p12 = scmp.lt.u32.totalorder %s10174_s26, %s11565_s4 }
  0x8b   : > { %p10177_p3 = pnand %p10175_p1, %p10530_p8 }
  0x8d   : > { %p10178_p11 = pneg %p10177_p3 }
  0x8f   : > { %p10183_p13 = pnand %p10181_p12, %p10178_p11 }
  0x91   : > { %10186 = shalt.err (!%p10183_p13)
}
  0x92   : > { %s10187_s18 = scalar_lea.vmem %s300_s28, 8192  ;;  %p10195_p7 = scmp.lt.s32.totalorder %s300_s28, %s300_s28 }
  0x93   : > { %p10188_p0 = scmp.ne.s32.totalorder %s300_s28, %s10187_s18  ;;  %p10196_p9 = scmp.lt.s32.totalorder %s10187_s18, %s10187_s18 }
  0x95   : > { %p10190_p2 = pnand %p10188_p0, %p10530_p8  ;;  %p10197_p4 = por %p10196_p9, %p10195_p7 }
  0x97   : > { %p10191_p5 = pneg %p10190_p2 }
  0x99   : > { %p10198_p10 = pnand %p10197_p4, %p10191_p5 }
  0x9b   : > { %10201 = shalt.err (!%p10198_p10)
}
  0x9c   : > { %9644 = dma.hbm_to_vmem [thread:$0]  (!%p10514_p6), %s11565_s4, 8192, %s300_s28, [#allocation9], %s11564_s22, %s11564_s22, %s11563_s20  }
  0x9d   : > { %s10415_s2 = smov [#allocation13]   ;;  %s10416_s24 = smov [#allocation16]  }
  0x9e   : > { %s325_s9 = sshll.u32 %s10415_s2, 4  ;;  %s352_s17 = sshll.u32 %s10416_s24, 4  ;;  %s326_s9 = int_to_ptr.vmem [resolvable:$true] %s325_s9  ;;  %s353_s17 = int_to_ptr.vmem [resolvable:$true] %s352_s17 }
  0x9f   : > { %s11566_s6 = sld [smem:[#allocation30_spill]] }
  0xa5   : > { %s10202_s13 = scalar_lea.hbm %s11566_s6, 8192 }
  0xa6   : > { %p10203_p1 = scmp.ne.s32.totalorder %s11566_s6, %s10202_s13  ;;  %p10209_p12 = scmp.lt.u32.totalorder %s10202_s13, %s11566_s6 }
  0xa8   : > { %p10205_p3 = pnand %p10203_p1, %p10530_p8 }
  0xaa   : > { %p10206_p11 = pneg %p10205_p3 }
  0xac   : > { %p10211_p13 = pnand %p10209_p12, %p10206_p11 }
  0xae   : > { %10214 = shalt.err (!%p10211_p13)
}
  0xaf   : > { %s10215_s28 = scalar_lea.vmem %s326_s9, 8192  ;;  %p10223_p7 = scmp.lt.s32.totalorder %s326_s9, %s326_s9 }
  0xb0   : > { %p10216_p0 = scmp.ne.s32.totalorder %s326_s9, %s10215_s28  ;;  %p10224_p9 = scmp.lt.s32.totalorder %s10215_s28, %s10215_s28 }
  0xb2   : > { %p10218_p2 = pnand %p10216_p0, %p10530_p8  ;;  %p10225_p4 = por %p10224_p9, %p10223_p7 }
  0xb4   : > { %p10219_p5 = pneg %p10218_p2 }
  0xb6   : > { %p10226_p10 = pnand %p10225_p4, %p10219_p5 }
  0xb8   : > { %10229 = shalt.err (!%p10226_p10)
}
  0xb9   : > { %9650 = dma.hbm_to_vmem [thread:$0]  (!%p10514_p6), %s11566_s6, 8192, %s326_s9, [#allocation12], %s11564_s22, %s11564_s22, %s11563_s20  }
  0xba   : > { %s10230_s29 = scalar_lea.hbm %s11540_s8, 16 }
  0xbb   : > { %p10231_p1 = scmp.ne.s32.totalorder %s11540_s8, %s10230_s29  ;;  %p10237_p12 = scmp.lt.u32.totalorder %s10230_s29, %s11540_s8 }
  0xbd   : > { %p10233_p3 = pnand %p10231_p1, %p10530_p8 }
  0xbf   : > { %p10234_p11 = pneg %p10233_p3 }
  0xc1   : > { %p10239_p13 = pnand %p10237_p12, %p10234_p11 }
  0xc3   : > { %10242 = shalt.err (!%p10239_p13)
}
  0xc4   : > { %s10243_s25 = scalar_lea.vmem %s353_s17, 16  ;;  %s10250_s20 = scalar_lea.vmem %s353_s17, 32 }
  0xc5   : > { %p10244_p0 = scmp.ne.s32.totalorder %s353_s17, %s10243_s25  ;;  %p10251_p7 = scmp.lt.s32.totalorder %s353_s17, %s353_s17 }
  0xc6   : > { %p10252_p9 = scmp.lt.s32.totalorder %s10250_s20, %s10243_s25 }
  0xc7   : > { %p10246_p2 = pnand %p10244_p0, %p10530_p8 }
  0xc8   : > { %p10253_p4 = por %p10252_p9, %p10251_p7 }
  0xc9   : > { %p10247_p5 = pneg %p10246_p2 }
  0xcb   : > { %p10254_p10 = pnand %p10253_p4, %p10247_p5 }
  0xcd   : > { %10257 = shalt.err (!%p10254_p10)
}
  0xce   : > { %9656 = dma.hbm_to_vmem [thread:$0]  (!%p10514_p6), %s11540_s8, 16, %s353_s17, [#allocation15]  }
  0xcf   : > { %s7869_s27 = sadd.s32 4294967294, %s10404_s12   ;;  %s10679_s19 = sadd.s32 1, %s10404_s12  }
  0xd0   : > { %s38_s28 = sadd.s32 1, %s10400_s11  ;;  %s35_s21 = ssub.s32 %s10404_s12, %s10679_s19 }
  0xd1   : > { %p45_p8 = scmp.ne.s32.totalorder %s10400_s11, %s10396_s10  ;;  %p36_p1 = scmp.eq.s32.totalorder %s35_s21, 0 }
  0xd2   : > { %p46_p3 = scmp.eq.s32.totalorder %s10404_s12, 0  ;;  %p51_p11 = scmp.ne.s32.totalorder %s10396_s10, %s10392_s30 }
  0xd3   : > { %p248_p12 = scmp.eq.s32.totalorder %s10498_s15, 1  ;;  %p11567_p0 = scmp.eq.s32.totalorder %s10498_s15, 0 }
  0xd4   : > { %s10691_s2 = scalar_select %p36_p1, %s10400_s11, %s38_s28  }
  0xd5   : > { %p47_p13 = por %p46_p3, %p45_p8  ;;  %p10695_p2 = por %p11567_p0, %p51_p11 }
  0xd6   : > { %p10699_p6 = por %p248_p12, %p45_p8  ;;  %p254_p5 = scmp.eq.s32.totalorder %s7869_s27, 1 }
  0xd7   : > { %p9675_p7 = scmp.lt.s32.totalorder %s10404_s12, 2  ;;  %s10705_s26 = sand.u32 1, %s10400_s11  }
  0xd8   : > { %s11569_s17 = scalar_select %p10699_p6, 1, 0 }
  0xd9   : > { %p10707_p9 = por %p254_p5, %p51_p11  ;;  %s7879_s13 = sshll.u32 %s10705_s26, 5 }
  0xda   : > { %s8227_s14 = sshll.u32 %s10404_s12, 9  ;;  %s11571_s0 = sld [smem:[#allocation25_spill]] }
  0xdb   : > { %s11570_s29 = scalar_select %p10707_p9, 1, 0 }
  0xdc   : > { %s367_s20 = scalar_lea.vmem [#allocation2], %s7879_s13  ;;  %p10718_p4 = pnand %p9675_p7, %p47_p13 }
  0xdd   : > { %s374_s22 = sshll.u32 %s367_s20, 4  ;;  %s364_s27 = scalar_lea.sflag [#allocation3], %s10705_s26  ;;  %s10722_s22 = int_to_ptr.vmem [resolvable:$true] %s374_s22 }
  0xde   : > { %p10260_p8 = pneg %p10718_p4 }
  0xe0   : > { %s10716_s25 = scalar_lea.hbm %s11571_s0, %s8227_s14  ;;  %s10263_s14 = scalar_lea.hbm %s11571_s0, 1024 }
  0xe1   : > { %s10258_s28 = scalar_lea.hbm %s10716_s25, 512  ;;  %p10264_p11 = scmp.lt.u32.totalorder %s10716_s25, %s11571_s0 }
  0xe2   : > { %p10259_p10 = scmp.ne.s32.totalorder %s10716_s25, %s10258_s28  ;;  %p10265_p12 = scmp.lt.u32.totalorder %s10263_s14, %s10258_s28 }
  0xe3   : > { %p10267_p0 = scmp.lt.u32.totalorder %s10258_s28, %s10716_s25 }
  0xe4   : > { %p10261_p1 = pnand %p10260_p8, %p10259_p10  ;;  %p10266_p13 = por %p10265_p12, %p10264_p11 }
  0xe6   : > { %p10262_p3 = pneg %p10261_p1  ;;  %p10268_p5 = por %p10267_p0, %p10266_p13 }
  0xe8   : > { %p10269_p7 = pnand %p10268_p5, %p10262_p3 }
  0xea   : > { %10272 = shalt.err (!%p10269_p7)
}
  0xeb   : > { %s10273_s20 = scalar_lea.vmem %s10722_s22, 512  ;;  %s10417_s21 = smov [#allocation2]  }
  0xec   : > { %p10274_p10 = scmp.ne.s32.totalorder %s10722_s22, %s10273_s20  ;;  %s10278_s13 = sshll.u32 %s10417_s21, 4  ;;  %s10279_s13 = int_to_ptr.vmem [resolvable:$false] %s10278_s13 }
  0xed   : > { %s10280_s23 = scalar_lea.vmem %s10279_s13, 1024  ;;  %p10281_p6 = scmp.lt.s32.totalorder %s10722_s22, %s10279_s13 }
  0xee   : > { %p10276_p1 = pnand %p10274_p10, %p10260_p8  ;;  %p10282_p11 = scmp.lt.s32.totalorder %s10280_s23, %s10273_s20 }
  0xf0   : > { %p10277_p9 = pneg %p10276_p1  ;;  %p10283_p12 = por %p10282_p11, %p10281_p6 }
  0xf2   : > { %p10284_p13 = pnand %p10283_p12, %p10277_p9 }
  0xf4   : > { %10287 = shalt.err (!%p10284_p13)
}
  0xf5   : > { %s10418_s28 = smov 128   ;;  %s10419_s14 = smov 8  }
  0xf6   : > { %9660 = dma.hbm_to_vmem [thread:$0]  (!%p10718_p4), %s10716_s25, 512, %s10722_s22, %s364_s27, %s10418_s28, %s10418_s28, %s10419_s14  }
  0xf7   : > { %s384_s18 = sand.u32 1, %s10404_s12   ;;  %s7882_s20 = sshll.u32 %s10705_s26, 6 }
  0xf8   : > { %s8229_s21 = sshll.u32 %s10404_s12, 10  ;;  %s388_s13 = scalar_lea.vmem [#allocation5], %s7882_s20 }
  0xf9   : > { %s396_s23 = sshll.u32 %s388_s13, 4  ;;  %s10761_s4 = scalar_lea.hbm %s11533_s1, %s8229_s21  ;;  %s10763_s23 = int_to_ptr.vmem [resolvable:$true] %s396_s23 }
  0xfa   : > { %s10765_s5 = scalar_lea.sflag [#allocation6], %s384_s18  ;;  %s10288_s6 = scalar_lea.hbm %s10761_s4, 1024 }
  0xfb   : > { %p10289_p6 = scmp.ne.s32.totalorder %s10761_s4, %s10288_s6  ;;  %s10293_s0 = scalar_lea.hbm %s11533_s1, 2048 }
  0xfc   : > { %p10294_p0 = scmp.lt.u32.totalorder %s10761_s4, %s11533_s1  ;;  %p10295_p5 = scmp.lt.u32.totalorder %s10293_s0, %s10288_s6 }
  0xfd   : > { %p10291_p9 = pnand %p10289_p6, %p10260_p8  ;;  %p10297_p10 = scmp.lt.u32.totalorder %s10288_s6, %s10761_s4 }
  0xfe   : > { %p10296_p7 = por %p10295_p5, %p10294_p0 }
  0xff   : > { %p10292_p3 = pneg %p10291_p9 }
 0x100   : > { %p10298_p1 = por %p10297_p10, %p10296_p7 }
 0x102   : > { %p10299_p11 = pnand %p10298_p1, %p10292_p3 }
 0x104   : > { %10302 = shalt.err (!%p10299_p11)
}
 0x105   : > { %s10303_s27 = scalar_lea.vmem %s10763_s23, 1024  ;;  %s10420_s18 = smov [#allocation5]  }
 0x106   : > { %p10304_p12 = scmp.ne.s32.totalorder %s10763_s23, %s10303_s27  ;;  %s10308_s20 = sshll.u32 %s10420_s18, 4  ;;  %s10309_s20 = int_to_ptr.vmem [resolvable:$false] %s10308_s20 }
 0x107   : > { %s10310_s21 = scalar_lea.vmem %s10309_s20, 2048  ;;  %p10311_p9 = scmp.lt.s32.totalorder %s10763_s23, %s10309_s20 }
 0x108   : > { %p10306_p13 = pnand %p10304_p12, %p10260_p8  ;;  %p10312_p0 = scmp.lt.s32.totalorder %s10310_s21, %s10303_s27 }
 0x10a   : > { %p10307_p6 = pneg %p10306_p13  ;;  %p10313_p5 = por %p10312_p0, %p10311_p9 }
 0x10c   : > { %p10314_p7 = pnand %p10313_p5, %p10307_p6 }
 0x10e   : > { %10317 = shalt.err (!%p10314_p7)
}
 0x10f   : > { %9663 = dma.hbm_to_vmem [thread:$0]  (!%p10718_p4), %s10761_s4, 1024, %s10763_s23, %s10765_s5, %s10418_s28, %s10418_s28, %s10419_s14  }
 0x110   : > { %p11573_p8 = scmp.ne.s32.totalorder %s11557_s16, 0 }
 0x111   : > { %s10797_s6 = sand.u32 (!%p11573_p8), 1, %s10396_s10  }
 0x112   : > { %408 = sbr.rel (%p11573_p8) target bundleno = 10353 (0x2871), region = 56  ;;  %s7887_s13 = sshll.u32 (!%p11573_p8), %s10797_s6, 5 }
 0x113   : > { %s411_s26 = scalar_lea.sflag (!%p11573_p8), [#allocation3], %s10797_s6  ;;  %s10801_s25 = scalar_lea.vmem (!%p11573_p8), [#allocation2], %s7887_s13 }
 0x119   : > { %10363 = dma.done.wait (%p10695_p2), %s411_s26, 512  }
 0x11a   : > { %10365 = vsyncadd (%p10695_p2), %s411_s26, 4294966784  ;;  %s419_s4 = sand.u32 1, %s10498_s15   ;;  %s7888_s5 = sshll.u32 %s10797_s6, 6 }
 0x11b   : > { %s420_s16 = scalar_lea.sflag [#allocation6], %s419_s4  ;;  %s10809_s9 = scalar_lea.vmem [#allocation5], %s7888_s5 }
 0x11c   : > { %10367 = dma.done.wait (%p10695_p2), %s420_s16, 1024  }
 0x11d   : > { %10369 = vsyncadd (%p10695_p2), %s420_s16, 4294966272  ;;  %p11574_p4 = scmp.eq.s32.totalorder %s10498_s15, 0 }
 0x11f   : > { %10371 = dma.done.wait (%p11574_p4), [#allocation6], 8192   ;;  %p11575_p3 = pmov %p11574_p4 }
 0x121   : > { %10373 = vsyncadd (%p11575_p3), [#allocation6], 4294959104  ;;  %p11576_p10 = pmov %p11575_p3 }
 0x122   : > { %p11577_p1 = pmov %p11575_p3 }
 0x123   : > { %10375 = dma.done.wait (%p11576_p10), [#allocation9], 8320  }
 0x124   : > { %10377 = vsyncadd (%p11577_p1), [#allocation9], 4294958976  ;;  %p11578_p11 = pmov %p11577_p1 }
 0x125   : > { %p11579_p12 = pmov %p11577_p1 }
 0x126   : > { %10379 = dma.done.wait (%p11578_p11), [#allocation12], 8320  }
 0x127   : > { %10381 = vsyncadd (%p11579_p12), [#allocation12], 4294958976  ;;  %p11580_p2 = pmov %p11577_p1 }
 0x128   : > { %p11581_p13 = pmov %p11577_p1 }
 0x129   : > { %10383 = dma.done.wait (%p11580_p2), [#allocation15], 1040  }
 0x12a   : > { %10385 = vsyncadd (%p11581_p13), [#allocation15], 4294966256  ;;  %v9734_v0 = vld [vmem:[#allocation10] sm:$0xff]   ;;  %v9735_v1 = vld [vmem:[#allocation10 + $0x8] sm:$0xff]   ;;  %v10421_v34 = vmov 0.0   ;;  %vm10422_vm0 = vmmov 0  }
 0x12b   : > { %8677 = vmatprep.subr.bf16.mxu1 %v9734_v0  ;;  %v9736_v2 = vld [vmem:[#allocation7] sm:$0xff]   ;;  %v9737_v3 = vld [vmem:[#allocation10 + $0x10] sm:$0xff]   ;;  %v9738_v4 = vld [vmem:[#allocation7 + $0x8] sm:$0xff]   ;;  %vm799_vm1 = vcmask 130048   ;;  %vm1266_vm2 = vcmask 1041409   ;;  %vm1269_vm3 = vcmask 1042434  }
 0x12c   : > { %8678 = vmatpush3.bf16.msra.mxu1 %v9734_v0  ;;  %8657 = vmatprep.subr.bf16.mxu0 %v9736_v2  ;;  %v9740_v5 = vld [vmem:[#allocation7 + $0x10] sm:$0xff]   ;;  %v9739_v6 = vld [vmem:[#allocation10 + $0x18] sm:$0xff]   ;;  %v9742_v7 = vld [vmem:[#allocation7 + $0x18] sm:$0xff]   ;;  %vm1272_vm4 = vcmask 1043459   ;;  %s7896_s24 = sshll.u32 %s10797_s6, 2  ;;  %s8264_s23 = sshll.u32 %s10498_s15, 6 }
 0x12d   : > { %8679 = vmatprep.subr.bf16.mxu1 %v9735_v1  ;;  %8658 = vmatpush3.bf16.msra.mxu0 %v9736_v2  ;;  %v9741_v8 = vld [vmem:[#allocation10 + $0x20] sm:$0xff]   ;;  %v9744_v9 = vld [vmem:[#allocation7 + $0x20] sm:$0xff]   ;;  %v9743_v12 = vld [vmem:[#allocation10 + $0x28] sm:$0xff]   ;;  %s490_s28 = scalar_lea.vmem [#allocation17], %s7896_s24  ;;  %s11582_s22 = sld [smem:[#allocation31_spill]] }
 0x12e   : > { %8659 = vmatprep.subr.bf16.mxu0 %v9738_v4  ;;  %v503_v10 = vld [vmem:[%s10809_s9] sm:$0xff]  ;;  %v504_v11 = vld [vmem:[%s10809_s9 + $0x8] sm:$0xff]  ;;  %v9745_v18 = vld [vmem:[#allocation10 + $0x30] sm:$0xff]   ;;  %s7707_s14 = sshll.u32 %s490_s28, 4  ;;  %s7694_s18 = scalar_lea.sflag [#allocation4], %s10797_s6  ;;  %s11483_s14 = int_to_ptr.vmem [resolvable:$true] %s7707_s14 }
 0x12f   : > { %v10833_v13 = vpack.c.bf16 %v504_v11, %v503_v10  ;;  %v495_v14 = vld [vmem:[%s10801_s25] sm:$0xff]  ;;  %v496_v15 = vld [vmem:[%s10801_s25 + $0x8] sm:$0xff]  ;;  %v9748_v19 = vld [vmem:[#allocation7 + $0x30] sm:$0xff]   ;;  %s10318_s20 = scalar_lea.vmem %s11483_s14, 64  ;;  %p11583_p9 = scmp.ne.s32.totalorder %s11569_s17, 0 }
 0x130   : > { %8680 = vmatpush3.bf16.msra.mxu1 %v9735_v1  ;;  %v9746_v16 = vld [vmem:[#allocation7 + $0x28] sm:$0xff]   ;;  %v10838_v17 = vpack.c.bf16 %v496_v15, %v495_v14  ;;  %v9747_v20 = vld [vmem:[#allocation10 + $0x38] sm:$0xff]   ;;  %v9749_v21 = vld [vmem:[#allocation7 + $0x38] sm:$0xff]   ;;  %p10319_p6 = scmp.ne.s32.totalorder %s11483_s14, %s10318_s20  ;;  %s10424_s15 = smov [#allocation17]  }
 0x131   : > { %8681 = vmatprep.subr.bf16.mxu1 %v9737_v3  ;;  %8660 = vmatpush3.bf16.msra.mxu0 %v9738_v4  ;;  %v505_v22 = vld [vmem:[%s10809_s9 + $0x10] sm:$0xff]  ;;  %v506_v23 = vld [vmem:[%s10809_s9 + $0x18] sm:$0xff]  ;;  %v507_v24 = vld [vmem:[%s10809_s9 + $0x20] sm:$0xff]  ;;  %s10322_s21 = sshll.u32 %s10424_s15, 4  ;;  %s10323_s21 = int_to_ptr.vmem [resolvable:$false] %s10322_s21 }
 0x132   : > { %8661 = vmatprep.subr.bf16.mxu0 %v9740_v5  ;;  %8693 = vmatprep.mubr.bf16.mxu1 %v10833_v13  ;;  %v508_v25 = vld [vmem:[%s10809_s9 + $0x28] sm:$0xff]  ;;  %v497_v26 = vld [vmem:[%s10801_s25 + $0x10] sm:$0xff]  ;;  %v498_v27 = vld [vmem:[%s10801_s25 + $0x18] sm:$0xff]  ;;  %v10847_v28 = vpack.c.bf16 %v506_v23, %v505_v22  ;;  %p10320_p0 = pnand %p10319_p6, %p11583_p9  ;;  %s10324_s13 = scalar_lea.vmem %s10323_s21, 128 }
 0x133   : > { %8673 = vmatprep.mubr.bf16.mxu0 %v10838_v17  ;;  %v10849_v29 = vpack.c.bf16 %v508_v25, %v507_v24  ;;  %v10851_v30 = vpack.c.bf16 %v498_v27, %v497_v26  ;;  %v509_v31 = vld [vmem:[%s10809_s9 + $0x30] sm:$0xff]  ;;  %v510_v32 = vld [vmem:[%s10809_s9 + $0x38] sm:$0xff]  ;;  %v7908_v36 = vld [vmem:[#allocation11] ss:$0 sm:$0xff]  ;;  %s11488_s27 = scalar_lea.hbm %s11582_s22, %s8264_s23  ;;  %p10325_p7 = scmp.lt.s32.totalorder %s11483_s14, %s10323_s21 }
 0x134   : > { %8682 = vmatpush3.bf16.msra.mxu1 %v9737_v3  ;;  %v10858_v33 = vpack.c.bf16 %v510_v32, %v509_v31  ;;  %v7897_v48 = vld [vmem:[#allocation8] ss:$0 sm:$0xff]  ;;  %p10321_p5 = pneg %p10320_p0  ;;  %p10326_p8 = scmp.lt.s32.totalorder %s10324_s13, %s10318_s20 }
 0x135   : > { %8683 = vmatprep.subr.bf16.mxu1 %v9739_v6  ;;  %8662 = vmatpush3.bf16.msra.mxu0 %v9740_v5 }
 0x136   : > { %8663 = vmatprep.subr.bf16.mxu0 %v9742_v7  ;;  %p10327_p4 = por %p10326_p8, %p10325_p7 }
 0x138   : > { %8684 = vmatpush3.bf16.msra.mxu1 %v9739_v6  ;;  %p10328_p3 = pnand %p10327_p4, %p10321_p5 }
 0x139   : > { %8685 = vmatprep.subr.bf16.mxu1 %v9741_v8  ;;  %8664 = vmatpush3.bf16.msra.mxu0 %v9742_v7 }
 0x13a   : > { %8665 = vmatprep.subr.bf16.mxu0 %v9744_v9 }
 0x13c   : > { %8686 = vmatpush3.bf16.msra.mxu1 %v9741_v8 }
 0x13d   : > { %8687 = vmatprep.subr.bf16.mxu1 %v9743_v12  ;;  %8666 = vmatpush3.bf16.msra.mxu0 %v9744_v9 }
 0x13e   : > { %8667 = vmatprep.subr.bf16.mxu0 %v9746_v16 }
 0x140   : > { %8688 = vmatpush3.bf16.msra.mxu1 %v9743_v12 }
 0x141   : > { %8689 = vmatprep.subr.bf16.mxu1 %v9745_v18  ;;  %8668 = vmatpush3.bf16.msra.mxu0 %v9746_v16 }
 0x142   : > { %8669 = vmatprep.subr.bf16.mxu0 %v9748_v19 }
 0x144   : > { %8690 = vmatpush3.bf16.msra.mxu1 %v9745_v18 }
 0x145   : > { %8691 = vmatprep.subr.bf16.mxu1 %v9747_v20  ;;  %8670 = vmatpush3.bf16.msra.mxu0 %v9748_v19 }
 0x146   : > { %8671 = vmatprep.subr.bf16.mxu0 %v9749_v21 }
 0x148   : > { %8692 = vmatpush3.bf16.msra.mxu1 %v9747_v20 }
 0x149   : > { %8672 = vmatpush3.bf16.msra.mxu0 %v9749_v21  ;;  %8725 = vmatprep.subr.bf16.mxu1 %v10421_v34 }
 0x14a   : > { %8701 = vmatprep.subr.bf16.mxu0 %v10421_v34 }
 0x14b   : > { %8694 = vmatmul.mubr.bf16.vlgmr.msra.gmra.mrb[0].mxu1 %v10847_v28 }
 0x14c   : > { %8697 = vmatprep.mubr.bf16.mxu1 %v10849_v29  ;;  %8674 = vmatmul.mubr.bf16.vlgmr.msra.gmra.mrb[0].mxu0 %v10851_v30 }
 0x14d   : > { %8726 = vmatpush3.bf16.msra.mxu1 %v10833_v13  ;;  %8703 = vmatprep.mubr.msk.bf16.mxu0 %vm10422_vm0, %v10421_v34 }
 0x14e   : > { %8737 = vmatprep.subr.bf16.mxu1 %v10421_v34 }
 0x153   : > { %8698 = vmatmul.mubr.bf16.gmra.mrb[4].mxu1 %v10858_v33 }
 0x154   : > { %8727 = vmatprep.mubr.msk.bf16.mxu1 %vm10422_vm0, %v10421_v34 }
 0x21e   : > { %v8695_v35 = vpop.f32.mrb[0].mxu1 }
 0x21f   : > { %v752_v37 = vpop.f32.mrb[1].mxu1  ;;  %v8675_v39 = vpop.f32.mrb[0].mxu0  ;;  %v761_v40 = vadd.f32 %v8695_v35, %v7908_v36 }
 0x220   : > { %v8696_v38 = vpop.f32.mrb[2].mxu1  ;;  %v632_v43 = vpop.f32.mrb[1].mxu0  ;;  %v753_v44 = vadd.f32 %v7908_v36, %v752_v37  ;;  %v641_v4 = vadd.f32 %v8675_v39, %v7897_v48 }
 0x221   : > { %v764_v41 = vadd.f32 %v8696_v38, %v7908_v36  ;;  %v755_v42 = vpop.f32.mrb[3].mxu1  ;;  %v8676_v46 = vpop.f32.mrb[2].mxu0  ;;  %v633_v51 = vadd.f32 %v7897_v48, %v632_v43 }
 0x222   : > { %v756_v45 = vadd.f32 %v7908_v36, %v755_v42  ;;  %v635_v49 = vpop.f32.mrb[3].mxu0  ;;  %v8234_v5 = vpack.c.bf16 %v641_v4, %v641_v4  ;;  %v644_v7 = vadd.f32 %v8676_v46, %v7897_v48 }
 0x223   : > { %v796_v47 = vpack.c.bf16 %v764_v41, %v761_v40  ;;  %v8232_v60 = vpack.c.bf16 %v633_v51, %v633_v51  ;;  %v636_v1 = vadd.f32 %v7897_v48, %v635_v49 }
 0x224   : > { %v795_v50 = vpack.c.bf16 %v756_v45, %v753_v44  ;;  %v8235_v8 = vpack.c.bf16 %v644_v7, %v644_v7 }
 0x225   : > { %v850_v0 = vsel %vm799_vm1, %v796_v47, 0  ;;  %v8233_v2 = vpack.c.bf16 %v636_v1, %v636_v1 }
 0x226   : > { %v804_v52 = vsel %vm799_vm1, %v795_v50, 0  ;;  %v8699_v53 = vpop.f32.mrb[4].mxu1 }
 0x227   : > { %8702 = vmatpush3.bf16.xpose.msra.mxu0 %v804_v52  ;;  %v777_v54 = vadd.f32 %v8699_v53, %v7908_v36  ;;  %v768_v55 = vpop.f32.mrb[5].mxu1 }
 0x228   : > { %v769_v56 = vadd.f32 %v7908_v36, %v768_v55  ;;  %v8700_v57 = vpop.f32.mrb[6].mxu1  ;;  %8707 = vmatprep.subr.bf16.mxu0 %v10421_v34 }
 0x229   : > { %v780_v58 = vadd.f32 %v8700_v57, %v7908_v36  ;;  %v771_v59 = vpop.f32.mrb[7].mxu1 }
 0x22a   : > { %v772_v61 = vadd.f32 %v7908_v36, %v771_v59 }
 0x22b   : > { %v798_v62 = vpack.c.bf16 %v780_v58, %v777_v54 }
 0x22c   : > { %v797_v63 = vpack.c.bf16 %v772_v61, %v769_v56 }
 0x22d   : > { %v942_v6 = vsel %vm799_vm1, %v798_v62, 0 }
 0x22e   : > { %8704 = vmatmul.mubr.msk.bf16.vlgmr.msra.gmra.mrb[4].mxu0 %vm799_vm1, %v8232_v60  ;;  %v896_v3 = vsel %vm799_vm1, %v797_v63, 0 }
 0x22f   : > { %8708 = vmatpush3.bf16.xpose.msra.mxu0 %v850_v0  ;;  %8709 = vmatprep.mubr.msk.bf16.mxu0 %vm10422_vm0, %v10421_v34 }
 0x230   : > { %8713 = vmatprep.subr.bf16.mxu0 %v10421_v34 }
 0x236   : > { %8710 = vmatmul.mubr.msk.bf16.vlgmr.msra.gmra.mrb[8].mxu0 %vm799_vm1, %v8233_v2 }
 0x237   : > { %8714 = vmatpush3.bf16.xpose.msra.mxu0 %v896_v3  ;;  %8715 = vmatprep.mubr.msk.bf16.mxu0 %vm10422_vm0, %v10421_v34 }
 0x238   : > { %8719 = vmatprep.subr.bf16.mxu0 %v10421_v34 }
 0x23e   : > { %8716 = vmatmul.mubr.msk.bf16.vlgmr.msra.gmra.mrb[12].mxu0 %vm799_vm1, %v8234_v5 }
 0x23f   : > { %8720 = vmatpush3.bf16.xpose.msra.mxu0 %v942_v6  ;;  %8721 = vmatprep.mubr.msk.bf16.mxu0 %vm10422_vm0, %v10421_v34 }
 0x240   : > { %8731 = vmatprep.subr.bf16.mxu0 %v10421_v34 }
 0x246   : > { %8722 = vmatmul.mubr.msk.bf16.vlgmr.msra.gmra.mrb[16].mxu0 %vm799_vm1, %v8235_v8 }
 0x247   : > { %8732 = vmatpush3.bf16.msra.mxu0 %v10847_v28  ;;  %8733 = vmatprep.mubr.msk.bf16.mxu0 %vm10422_vm0, %v10421_v34 }
 0x248   : > { %8743 = vmatprep.subr.bf16.mxu0 %v10421_v34 }
 0x301   : > { %v840_v9 = vpop.f32.mrb[4].mxu0 }
 0x302   : > { %v8705_v10 = vpop.f32.mrb[5].mxu0  ;;  %v984_v11 = vsel %vm799_vm1, %v840_v9, -inf }
 0x303   : > { %985 = vmax.xlane.f32.xlu0 %v984_v11  ;;  %v843_v12 = vpop.f32.mrb[6].mxu0 }
 0x304   : > { %v8706_v14 = vpop.f32.mrb[7].mxu0 }
 0x309   : > { %v886_v15 = vpop.f32.mrb[8].mxu0 }
 0x30a   : > { %v8711_v16 = vpop.f32.mrb[9].mxu0  ;;  %v987_v18 = vsel %vm799_vm1, %v886_v15, -inf }
 0x30b   : > { %988 = vmax.xlane.f32.xlu0 %v987_v18  ;;  %v889_v19 = vpop.f32.mrb[10].mxu0 }
 0x30c   : > { %v8712_v20 = vpop.f32.mrb[11].mxu0 }
 0x311   : > { %v932_v21 = vpop.f32.mrb[12].mxu0 }
 0x312   : > { %v8717_v22 = vpop.f32.mrb[13].mxu0  ;;  %v990_v23 = vsel %vm799_vm1, %v932_v21, -inf }
 0x313   : > { %991 = vmax.xlane.f32.xlu1 %v990_v23  ;;  %v935_v24 = vpop.f32.mrb[14].mxu0 }
 0x314   : > { %v8718_v25 = vpop.f32.mrb[15].mxu0 }
 0x319   : > { %v978_v26 = vpop.f32.mrb[16].mxu0 }
 0x31a   : > { %v8723_v27 = vpop.f32.mrb[17].mxu0  ;;  %v993_v31 = vsel %vm799_vm1, %v978_v26, -inf }
 0x31b   : > { %994 = vmax.xlane.f32.xlu1 %v993_v31  ;;  %v981_v32 = vpop.f32.mrb[18].mxu0 }
 0x31c   : > { %v8724_v35 = vpop.f32.mrb[19].mxu0 }
 0x390   : > { %v986_v36 = vpop.xlane.xlu0 %985 }
 0x391   : > { %v996_v37 = vsub.f32 %v840_v9, %v986_v36 }
 0x393   : > { %v1000_v38 = vmul.f32 1.442695, %v996_v37 }
 0x395   : > { %9934 = vpow2.f32 %v1000_v38 }
 0x398   : > { %v989_v39 = vpop.xlane.xlu0 %988 }
 0x399   : > { %v997_v40 = vsub.f32 %v886_v15, %v989_v39 }
 0x39b   : > { %v1002_v41 = vmul.f32 1.442695, %v997_v40 }
 0x39d   : > { %9936 = vpow2.f32 %v1002_v41 }
 0x39f   : > { %v9935_v42 = vpop.eup %9934 }
 0x3a0   : > { %v992_v43 = vpop.xlane.xlu1 %991  ;;  %v1008_v44 = vsel %vm799_vm1, %v9935_v42, 0.0 }
 0x3a1   : > { %v998_v45 = vsub.f32 %v932_v21, %v992_v43  ;;  %1009 = vadd.xlane.f32.xlu0 %v1008_v44 }
 0x3a3   : > { %v1004_v46 = vmul.f32 1.442695, %v998_v45 }
 0x3a5   : > { %9938 = vpow2.f32 %v1004_v46 }
 0x3a7   : > { %v9937_v47 = vpop.eup %9936 }
 0x3a8   : > { %v995_v48 = vpop.xlane.xlu1 %994  ;;  %v1011_v49 = vsel %vm799_vm1, %v9937_v47, 0.0 }
 0x3a9   : > { %v999_v50 = vsub.f32 %v978_v26, %v995_v48  ;;  %1012 = vadd.xlane.f32.xlu1 %v1011_v49  ;;  %v9751_v48 = vld [vmem:[#allocation13 + $0x8] sm:$0xff]   ;;  %v9752_v49 = vld [vmem:[#allocation13 + $0x10] sm:$0xff]  }
 0x3ab   : > { %v1006_v51 = vmul.f32 1.442695, %v999_v50  ;;  %v9753_v50 = vld [vmem:[#allocation13 + $0x18] sm:$0xff]  }
 0x3ad   : > { %9940 = vpow2.f32 %v1006_v51  ;;  %v9754_v51 = vld [vmem:[#allocation13 + $0x20] sm:$0xff]  }
 0x3af   : > { %v9939_v52 = vpop.eup %9938 }
 0x3b0   : > { %v1014_v53 = vsel %vm799_vm1, %v9939_v52, 0.0 }
 0x3b1   : > { %1015 = vadd.xlane.f32.xlu0 %v1014_v53  ;;  %v9756_v53 = vld [vmem:[#allocation13 + $0x30] sm:$0xff]  }
 0x3b7   : > { %v9941_v54 = vpop.eup %9940 }
 0x3b8   : > { %v1017_v55 = vsel %vm799_vm1, %v9941_v54, 0.0 }
 0x3b9   : > { %1018 = vadd.xlane.f32.xlu1 %v1017_v55  ;;  %v10924_v55 = vld [vmem:[#allocation10 + $0x40] sm:$0xff]  }
 0x42e   : > { %v1010_v56 = vpop.xlane.xlu0 %1009 }
 0x42f   : > { %9942 = vrcp.f32 %v1010_v56  ;;  %v9760_v56 = vld [vmem:[#allocation7 + $0x40] sm:$0xff]  }
 0x436   : > { %v1013_v57 = vpop.xlane.xlu1 %1012 }
 0x437   : > { %9944 = vrcp.f32 %v1013_v57  ;;  %v9762_v57 = vld [vmem:[#allocation7 + $0x48] sm:$0xff]  }
 0x439   : > { %v9943_v58 = vpop.eup %9942 }
 0x43a   : > { %v1024_v59 = vmul.f32 %v9943_v58, %v9935_v42  ;;  %v9764_v58 = vld [vmem:[#allocation7 + $0x50] sm:$0xff]  }
 0x43c   : > { %v1028_v60 = vsel %vm799_vm1, %v1024_v59, 0.0  ;;  %v9766_v59 = vld [vmem:[#allocation7 + $0x58] sm:$0xff]  }
 0x43d   : > { %v1029_v61 = vrot.slane %v1028_v60, 4 }
 0x43e   : > { %v1016_v62 = vpop.xlane.xlu0 %1015 }
 0x43f   : > { %v1030_v63 = vadd.f32 %v1029_v61, %v1028_v60  ;;  %9946 = vrcp.f32 %v1016_v62  ;;  %v9768_v60 = vld [vmem:[#allocation7 + $0x60] sm:$0xff]   ;;  %v9770_v61 = vld [vmem:[#allocation7 + $0x68] sm:$0xff]   ;;  %v9772_v62 = vld [vmem:[#allocation7 + $0x70] sm:$0xff]  }
 0x441   : > { %v9945_v0 = vpop.eup %9944  ;;  %v1031_v1 = vrot.slane %v1030_v63, 2 }
 0x442   : > { %v1025_v2 = vmul.f32 %v9945_v0, %v9937_v47  ;;  %v9750_v47 = vld [vmem:[#allocation13] sm:$0xff]  }
 0x443   : > { %v1032_v3 = vadd.f32 %v1031_v1, %v1030_v63  ;;  %v9773_v63 = vld [vmem:[#allocation7 + $0x78] sm:$0xff]  }
 0x444   : > { %v1035_v4 = vsel %vm799_vm1, %v1025_v2, 0.0 }
 0x445   : > { %v1033_v5 = vrot.slane %v1032_v3, 1  ;;  %v1036_v6 = vrot.slane %v1035_v4, 4 }
 0x446   : > { %v1019_v7 = vpop.xlane.xlu1 %1018 }
 0x447   : > { %v1037_v8 = vadd.f32 %v1036_v6, %v1035_v4  ;;  %9948 = vrcp.f32 %v1019_v7  ;;  %v1034_v9 = vadd.f32 %v1033_v5, %v1032_v3 }
 0x449   : > { %v9947_v10 = vpop.eup %9946  ;;  %v1038_v11 = vrot.slane %v1037_v8, 2  ;;  %v1057_v12 = vmul.f32 0.125, %v1034_v9 }
 0x44a   : > { %v1026_v14 = vmul.f32 %v9947_v10, %v9939_v52  ;;  %v9755_v52 = vld [vmem:[#allocation13 + $0x28] sm:$0xff]  }
 0x44b   : > { %v1061_v15 = vpack.c.bf16 %v1057_v12, %v1057_v12  ;;  %v1039_v16 = vadd.f32 %v1038_v11, %v1037_v8 }
 0x44c   : > { %v1042_v18 = vsel %vm799_vm1, %v1026_v14, 0.0 }
 0x44d   : > { %v1043_v19 = vrot.slane %v1042_v18, 4  ;;  %8728 = vmatmul.mubr.msk.bf16.vlgmr.msra.gmra.mrb[8].mxu1 %vm799_vm1, %v1061_v15  ;;  %v1040_v20 = vrot.slane %v1039_v16, 1 }
 0x44e   : > { %8738 = vmatpush3.bf16.msra.mxu1 %v10849_v29  ;;  %8739 = vmatprep.mubr.msk.bf16.mxu1 %vm10422_vm0, %v10421_v34 }
 0x44f   : > { %v1044_v21 = vadd.f32 %v1043_v19, %v1042_v18  ;;  %v1041_v22 = vadd.f32 %v1040_v20, %v1039_v16  ;;  %8749 = vmatprep.subr.bf16.mxu1 %v10421_v34 }
 0x451   : > { %v9949_v23 = vpop.eup %9948  ;;  %v1045_v24 = vrot.slane %v1044_v21, 2  ;;  %v1058_v25 = vmul.f32 0.125, %v1041_v22 }
 0x452   : > { %v1027_v26 = vmul.f32 %v9949_v23, %v9941_v54  ;;  %v9757_v54 = vld [vmem:[#allocation13 + $0x38] sm:$0xff]  }
 0x453   : > { %v1062_v27 = vpack.c.bf16 %v1058_v25, %v1058_v25  ;;  %v1046_v31 = vadd.f32 %v1045_v24, %v1044_v21 }
 0x454   : > { %v1049_v32 = vsel %vm799_vm1, %v1027_v26, 0.0 }
 0x455   : > { %v1050_v35 = vrot.slane %v1049_v32, 4  ;;  %8734 = vmatmul.mubr.msk.bf16.vlgmr.msra.gmra.mrb[20].mxu0 %vm799_vm1, %v1062_v27  ;;  %v1047_v36 = vrot.slane %v1046_v31, 1 }
 0x456   : > { %8744 = vmatpush3.bf16.msra.mxu0 %v10858_v33  ;;  %8745 = vmatprep.mubr.msk.bf16.mxu0 %vm10422_vm0, %v10421_v34 }
 0x457   : > { %v1051_v37 = vadd.f32 %v1050_v35, %v1049_v32  ;;  %v1048_v38 = vadd.f32 %v1047_v36, %v1046_v31  ;;  %8769 = vmatprep.subr.bf16.mxu0 %v9760_v56 }
 0x459   : > { %v1052_v39 = vrot.slane %v1051_v37, 2  ;;  %v1059_v40 = vmul.f32 0.125, %v1048_v38  ;;  %v9759_v38 = vld [vmem:[#allocation10 + $0x48] sm:$0xff]  }
 0x45b   : > { %v1063_v41 = vpack.c.bf16 %v1059_v40, %v1059_v40  ;;  %v1053_v42 = vadd.f32 %v1052_v39, %v1051_v37  ;;  %v9761_v39 = vld [vmem:[#allocation10 + $0x50] sm:$0xff]   ;;  %v9763_v40 = vld [vmem:[#allocation10 + $0x58] sm:$0xff]  }
 0x45d   : > { %8740 = vmatmul.mubr.msk.bf16.vlgmr.msra.gmra.mrb[12].mxu1 %vm799_vm1, %v1063_v41  ;;  %v1054_v43 = vrot.slane %v1053_v42, 1  ;;  %v9765_v41 = vld [vmem:[#allocation10 + $0x60] sm:$0xff]  }
 0x45e   : > { %8765 = vmatprep.mubr.msk.bf16.mxu1 %vm10422_vm0, %v10421_v34  ;;  %8750 = vmatpush3.bf16.msra.mxu1 %v9750_v47 }
 0x45f   : > { %v1055_v44 = vadd.f32 %v1054_v43, %v1053_v42  ;;  %8751 = vmatprep.subr.bf16.mxu1 %v10421_v34  ;;  %v9767_v42 = vld [vmem:[#allocation10 + $0x68] sm:$0xff]   ;;  %v9769_v43 = vld [vmem:[#allocation10 + $0x70] sm:$0xff]  }
 0x461   : > { %v1060_v45 = vmul.f32 0.125, %v1055_v44  ;;  %v9771_v44 = vld [vmem:[#allocation10 + $0x78] sm:$0xff]  }
 0x462   : > { %8752 = vmatpush3.bf16.msra.mxu1 %v9751_v48 }
 0x463   : > { %v1064_v46 = vpack.c.bf16 %v1060_v45, %v1060_v45  ;;  %8753 = vmatprep.subr.bf16.mxu1 %v10421_v34 }
 0x465   : > { %8746 = vmatmul.mubr.msk.bf16.vlgmr.msra.gmra.mrb[24].mxu0 %vm799_vm1, %v1064_v46 }
 0x466   : > { %8785 = vmatprep.mubr.bf16.mxu0 %v10838_v17  ;;  %8754 = vmatpush3.bf16.msra.mxu1 %v9752_v49 }
 0x467   : > { %8755 = vmatprep.subr.bf16.mxu1 %v10421_v34  ;;  %8770 = vmatpush3.bf16.msra.mxu0 %v9760_v56 }
 0x468   : > { %8771 = vmatprep.subr.bf16.mxu0 %v9762_v57 }
 0x46a   : > { %8756 = vmatpush3.bf16.msra.mxu1 %v9753_v50 }
 0x46b   : > { %8757 = vmatprep.subr.bf16.mxu1 %v10421_v34  ;;  %8772 = vmatpush3.bf16.msra.mxu0 %v9762_v57 }
 0x46c   : > { %8773 = vmatprep.subr.bf16.mxu0 %v9764_v58 }
 0x46e   : > { %8758 = vmatpush3.bf16.msra.mxu1 %v9754_v51 }
 0x46f   : > { %8759 = vmatprep.subr.bf16.mxu1 %v10421_v34  ;;  %8774 = vmatpush3.bf16.msra.mxu0 %v9764_v58 }
 0x470   : > { %8775 = vmatprep.subr.bf16.mxu0 %v9766_v59 }
 0x472   : > { %8760 = vmatpush3.bf16.msra.mxu1 %v9755_v52 }
 0x473   : > { %8761 = vmatprep.subr.bf16.mxu1 %v10421_v34  ;;  %8776 = vmatpush3.bf16.msra.mxu0 %v9766_v59 }
 0x474   : > { %8777 = vmatprep.subr.bf16.mxu0 %v9768_v60 }
 0x476   : > { %8762 = vmatpush3.bf16.msra.mxu1 %v9756_v53 }
 0x477   : > { %8763 = vmatprep.subr.bf16.mxu1 %v10421_v34  ;;  %8778 = vmatpush3.bf16.msra.mxu0 %v9768_v60 }
 0x478   : > { %8779 = vmatprep.subr.bf16.mxu0 %v9770_v61 }
 0x47a   : > { %8764 = vmatpush3.bf16.msra.mxu1 %v9757_v54  ;;  %v7946_v54 = vld [vmem:[#allocation11 + $0x1] ss:$0 sm:$0xff] }
 0x47b   : > { %8789 = vmatprep.subr.bf16.mxu1 %v10924_v55  ;;  %8780 = vmatpush3.bf16.msra.mxu0 %v9770_v61 }
 0x47c   : > { %8781 = vmatprep.subr.bf16.mxu0 %v9772_v62 }
 0x47f   : > { %8782 = vmatpush3.bf16.msra.mxu0 %v9772_v62 }
 0x480   : > { %8783 = vmatprep.subr.bf16.mxu0 %v9773_v63 }
 0x483   : > { %8784 = vmatpush3.bf16.msra.mxu0 %v9773_v63  ;;  %v7937_v63 = vld [vmem:[#allocation8 + $0x1] ss:$0 sm:$0xff] }
 0x484   : > { %8813 = vmatprep.subr.bf16.mxu0 %v10421_v34 }
 0x486   : > { %8786 = vmatmul.mubr.bf16.vlgmr.msra.gmra.mrb[28].mxu0 %v10851_v30 }
 0x487   : > { %8815 = vmatprep.mubr.msk.bf16.mxu0 %vm10422_vm0, %v10421_v34 }
 0x520   : > { %v1102_v0 = vpop.f32.mrb[8].mxu1 }
 0x521   : > { %v8729_v1 = vpop.f32.mrb[9].mxu1  ;;  %v1237_v5 = vpack.c.bf16 %v1102_v0, %v1102_v0 }
 0x522   : > { %v1105_v2 = vpop.f32.mrb[10].mxu1 }
 0x523   : > { %v8730_v3 = vpop.f32.mrb[11].mxu1  ;;  %v1261_v11 = vunpack.c.l.b16 %v1237_v5 }
 0x528   : > { %v1145_v4 = vpop.f32.mrb[20].mxu0 }
 0x529   : > { %v1238_v6 = vpack.c.bf16 %v1145_v4, %v1145_v4  ;;  %v8735_v7 = vpop.f32.mrb[21].mxu0 }
 0x52a   : > { %v1148_v8 = vpop.f32.mrb[22].mxu0 }
 0x52b   : > { %v1262_v9 = vunpack.c.l.b16 %v1238_v6  ;;  %v8736_v10 = vpop.f32.mrb[23].mxu0 }
 0x52d   : > { %v1265_v12 = vrot.slane %v1262_v9, 7 }
 0x52f   : > { %v1267_v14 = vsel %vm1266_vm2, %v1265_v12, %v1261_v11 }
 0x530   : > { %v1188_v15 = vpop.f32.mrb[12].mxu1 }
 0x531   : > { %v1239_v16 = vpack.c.bf16 %v1188_v15, %v1188_v15  ;;  %v8741_v18 = vpop.f32.mrb[13].mxu1 }
 0x532   : > { %v1191_v19 = vpop.f32.mrb[14].mxu1 }
 0x533   : > { %v1263_v20 = vunpack.c.l.b16 %v1239_v16  ;;  %v8742_v21 = vpop.f32.mrb[15].mxu1 }
 0x535   : > { %v1268_v22 = vrot.slane %v1263_v20, 6 }
 0x537   : > { %v1270_v23 = vsel %vm1269_vm3, %v1268_v22, %v1267_v14 }
 0x538   : > { %v1231_v24 = vpop.f32.mrb[24].mxu0 }
 0x539   : > { %v1240_v25 = vpack.c.bf16 %v1231_v24, %v1231_v24  ;;  %v8747_v26 = vpop.f32.mrb[25].mxu0 }
 0x53a   : > { %v1234_v27 = vpop.f32.mrb[26].mxu0 }
 0x53b   : > { %v1264_v31 = vunpack.c.l.b16 %v1240_v25  ;;  %v8748_v32 = vpop.f32.mrb[27].mxu0 }
 0x53d   : > { %v1271_v35 = vrot.slane %v1264_v31, 5 }
 0x53f   : > { %v1273_v36 = vsel %vm1272_vm4, %v1271_v35, %v1270_v23 }
 0x540   : > { %v1274_v37 = vpack.c.b16 %v1273_v36, %v1273_v36 }
 0x542   : > { %8766 = vmatmul.mubr.bf16.vlgmr.msra.gmra.mrb[16].mxu1 %v1274_v37 }
 0x543   : > { %8790 = vmatpush3.bf16.msra.mxu1 %v10924_v55  ;;  %8805 = vmatprep.mubr.bf16.mxu1 %v10833_v13 }
 0x544   : > { %8791 = vmatprep.subr.bf16.mxu1 %v9759_v38 }
 0x547   : > { %8792 = vmatpush3.bf16.msra.mxu1 %v9759_v38 }
 0x548   : > { %8793 = vmatprep.subr.bf16.mxu1 %v9761_v39 }
 0x54b   : > { %8794 = vmatpush3.bf16.msra.mxu1 %v9761_v39 }
 0x54c   : > { %8795 = vmatprep.subr.bf16.mxu1 %v9763_v40 }
 0x54f   : > { %8796 = vmatpush3.bf16.msra.mxu1 %v9763_v40 }
 0x550   : > { %8797 = vmatprep.subr.bf16.mxu1 %v9765_v41 }
 0x553   : > { %8798 = vmatpush3.bf16.msra.mxu1 %v9765_v41 }
 0x554   : > { %8799 = vmatprep.subr.bf16.mxu1 %v9767_v42 }
 0x557   : > { %8800 = vmatpush3.bf16.msra.mxu1 %v9767_v42 }
 0x558   : > { %8801 = vmatprep.subr.bf16.mxu1 %v9769_v43 }
 0x559   : > { %v8787_v45 = vpop.f32.mrb[28].mxu0 }
 0x55a   : > { %v1474_v46 = vpop.f32.mrb[29].mxu0  ;;  %v1483_v20 = vadd.f32 %v8787_v45, %v7937_v63 }
 0x55b   : > { %8802 = vmatpush3.bf16.msra.mxu1 %v9769_v43  ;;  %v8788_v47 = vpop.f32.mrb[30].mxu0  ;;  %v1475_v1 = vadd.f32 %v7937_v63, %v1474_v46 }
 0x55c   : > { %8803 = vmatprep.subr.bf16.mxu1 %v9771_v44  ;;  %v1477_v48 = vpop.f32.mrb[31].mxu0  ;;  %v8238_v21 = vpack.c.bf16 %v1483_v20, %v1483_v20  ;;  %v1486_v23 = vadd.f32 %v8788_v47, %v7937_v63 }
 0x55d   : > { %v8236_v10 = vpack.c.bf16 %v1475_v1, %v1475_v1  ;;  %v1478_v16 = vadd.f32 %v7937_v63, %v1477_v48 }
 0x55e   : > { %v8239_v24 = vpack.c.bf16 %v1486_v23, %v1486_v23 }
 0x55f   : > { %8804 = vmatpush3.bf16.msra.mxu1 %v9771_v44  ;;  %v8237_v18 = vpack.c.bf16 %v1478_v16, %v1478_v16 }
 0x560   : > { %8843 = vmatprep.subr.bf16.mxu1 %v10421_v34 }
 0x562   : > { %8806 = vmatmul.mubr.bf16.vlgmr.msra.gmra.mrb[20].mxu1 %v10847_v28 }
 0x563   : > { %8809 = vmatprep.mubr.bf16.mxu1 %v10849_v29  ;;  %8844 = vmatpush3.bf16.msra.mxu1 %v10847_v28 }
 0x564   : > { %8855 = vmatprep.subr.bf16.mxu1 %v10421_v34 }
 0x56a   : > { %8810 = vmatmul.mubr.bf16.gmra.mrb[24].mxu1 %v10858_v33 }
 0x56b   : > { %8845 = vmatprep.mubr.msk.bf16.mxu1 %vm10422_vm0, %v10421_v34 }
 0x615   : > { %v10944_v49 = vpop.f32.mrb[16].mxu1 }
 0x616   : > { %v8767_v50 = vpop.f32.mrb[17].mxu1 }
 0x617   : > { %v1361_v51 = vpop.f32.mrb[18].mxu1 }
 0x618   : > { %v8768_v52 = vpop.f32.mrb[19].mxu1 }
 0x635   : > { %v8807_v53 = vpop.f32.mrb[20].mxu1 }
 0x636   : > { %v1596_v55 = vpop.f32.mrb[21].mxu1  ;;  %v1605_v57 = vadd.f32 %v8807_v53, %v7946_v54 }
 0x637   : > { %v8808_v56 = vpop.f32.mrb[22].mxu1  ;;  %v1597_v60 = vadd.f32 %v7946_v54, %v1596_v55 }
 0x638   : > { %v1608_v58 = vadd.f32 %v8808_v56, %v7946_v54  ;;  %v1599_v59 = vpop.f32.mrb[23].mxu1 }
 0x639   : > { %v1600_v61 = vadd.f32 %v7946_v54, %v1599_v59 }
 0x63a   : > { %v1640_v62 = vpack.c.bf16 %v1608_v58, %v1605_v57 }
 0x63b   : > { %v1639_v0 = vpack.c.bf16 %v1600_v61, %v1597_v60 }
 0x63c   : > { %v1693_v15 = vsel %vm799_vm1, %v1640_v62, 0 }
 0x63d   : > { %v1647_v2 = vsel %vm799_vm1, %v1639_v0, 0  ;;  %v8811_v3 = vpop.f32.mrb[24].mxu1 }
 0x63e   : > { %8814 = vmatpush3.bf16.xpose.msra.mxu0 %v1647_v2  ;;  %v1621_v4 = vadd.f32 %v8811_v3, %v7946_v54  ;;  %v1612_v5 = vpop.f32.mrb[25].mxu1 }
 0x63f   : > { %v1613_v6 = vadd.f32 %v7946_v54, %v1612_v5  ;;  %v8812_v7 = vpop.f32.mrb[26].mxu1  ;;  %8819 = vmatprep.subr.bf16.mxu0 %v10421_v34 }
 0x640   : > { %v1624_v8 = vadd.f32 %v8812_v7, %v7946_v54  ;;  %v1615_v9 = vpop.f32.mrb[27].mxu1 }
 0x641   : > { %v1616_v11 = vadd.f32 %v7946_v54, %v1615_v9 }
 0x642   : > { %v1642_v12 = vpack.c.bf16 %v1624_v8, %v1621_v4 }
 0x643   : > { %v1641_v14 = vpack.c.bf16 %v1616_v11, %v1613_v6 }
 0x644   : > { %v1785_v22 = vsel %vm799_vm1, %v1642_v12, 0 }
 0x645   : > { %8816 = vmatmul.mubr.msk.bf16.vlgmr.msra.gmra.mrb[32].mxu0 %vm799_vm1, %v8236_v10  ;;  %v1739_v19 = vsel %vm799_vm1, %v1641_v14, 0 }
 0x646   : > { %8820 = vmatpush3.bf16.xpose.msra.mxu0 %v1693_v15  ;;  %8821 = vmatprep.mubr.msk.bf16.mxu0 %vm10422_vm0, %v10421_v34 }
 0x647   : > { %8825 = vmatprep.subr.bf16.mxu0 %v10421_v34 }
 0x64d   : > { %8822 = vmatmul.mubr.msk.bf16.vlgmr.msra.gmra.mrb[36].mxu0 %vm799_vm1, %v8237_v18 }
 0x64e   : > { %8826 = vmatpush3.bf16.xpose.msra.mxu0 %v1739_v19  ;;  %8827 = vmatprep.mubr.msk.bf16.mxu0 %vm10422_vm0, %v10421_v34 }
 0x64f   : > { %8831 = vmatprep.subr.bf16.mxu0 %v10421_v34 }
 0x655   : > { %8828 = vmatmul.mubr.msk.bf16.vlgmr.msra.gmra.mrb[40].mxu0 %vm799_vm1, %v8238_v21 }
 0x656   : > { %8832 = vmatpush3.bf16.xpose.msra.mxu0 %v1785_v22  ;;  %8833 = vmatprep.mubr.msk.bf16.mxu0 %vm10422_vm0, %v10421_v34 }
 0x657   : > { %8837 = vmatprep.subr.bf16.mxu0 %v10421_v34 }
 0x65d   : > { %8834 = vmatmul.mubr.msk.bf16.vlgmr.msra.gmra.mrb[44].mxu0 %vm799_vm1, %v8239_v24 }
 0x65e   : > { %8838 = vmatpush3.bf16.msra.mxu0 %v10833_v13  ;;  %8839 = vmatprep.mubr.msk.bf16.mxu0 %vm10422_vm0, %v10421_v34 }
 0x65f   : > { %8849 = vmatprep.subr.bf16.mxu0 %v10421_v34 }
 0x718   : > { %v1683_v25 = vpop.f32.mrb[32].mxu0 }
 0x719   : > { %v8817_v26 = vpop.f32.mrb[33].mxu0  ;;  %v1827_v27 = vsel %vm799_vm1, %v1683_v25, -inf }
 0x71a   : > { %1828 = vmax.xlane.f32.xlu0 %v1827_v27  ;;  %v1686_v31 = vpop.f32.mrb[34].mxu0 }
 0x71b   : > { %v8818_v32 = vpop.f32.mrb[35].mxu0 }
 0x720   : > { %v1729_v35 = vpop.f32.mrb[36].mxu0 }
 0x721   : > { %v8823_v36 = vpop.f32.mrb[37].mxu0  ;;  %v1830_v37 = vsel %vm799_vm1, %v1729_v35, -inf }
 0x722   : > { %1831 = vmax.xlane.f32.xlu1 %v1830_v37  ;;  %v1732_v38 = vpop.f32.mrb[38].mxu0 }
 0x723   : > { %v8824_v39 = vpop.f32.mrb[39].mxu0 }
 0x728   : > { %v1775_v40 = vpop.f32.mrb[40].mxu0 }
 0x729   : > { %v8829_v41 = vpop.f32.mrb[41].mxu0  ;;  %v1833_v42 = vsel %vm799_vm1, %v1775_v40, -inf }
 0x72a   : > { %1834 = vmax.xlane.f32.xlu0 %v1833_v42  ;;  %v1778_v43 = vpop.f32.mrb[42].mxu0 }
 0x72b   : > { %v8830_v44 = vpop.f32.mrb[43].mxu0 }
 0x730   : > { %v1821_v45 = vpop.f32.mrb[44].mxu0 }
 0x731   : > { %v8835_v46 = vpop.f32.mrb[45].mxu0  ;;  %v1836_v47 = vsel %vm799_vm1, %v1821_v45, -inf }
 0x732   : > { %1837 = vmax.xlane.f32.xlu1 %v1836_v47  ;;  %v1824_v48 = vpop.f32.mrb[46].mxu0 }
 0x733   : > { %v8836_v50 = vpop.f32.mrb[47].mxu0 }
 0x7a7   : > { %v1829_v51 = vpop.xlane.xlu0 %1828 }
 0x7a8   : > { %v1839_v52 = vsub.f32 %v1683_v25, %v1829_v51 }
 0x7aa   : > { %v1843_v53 = vmul.f32 1.442695, %v1839_v52 }
 0x7ac   : > { %9950 = vpow2.f32 %v1843_v53 }
 0x7af   : > { %v1832_v54 = vpop.xlane.xlu1 %1831 }
 0x7b0   : > { %v1840_v55 = vsub.f32 %v1729_v35, %v1832_v54 }
 0x7b2   : > { %v1845_v56 = vmul.f32 1.442695, %v1840_v55 }
 0x7b4   : > { %9952 = vpow2.f32 %v1845_v56 }
 0x7b6   : > { %v9951_v57 = vpop.eup %9950 }
 0x7b7   : > { %v1835_v58 = vpop.xlane.xlu0 %1834  ;;  %v1851_v59 = vsel %vm799_vm1, %v9951_v57, 0.0 }
 0x7b8   : > { %v1841_v60 = vsub.f32 %v1775_v40, %v1835_v58  ;;  %1852 = vadd.xlane.f32.xlu0 %v1851_v59 }
 0x7ba   : > { %v1847_v61 = vmul.f32 1.442695, %v1841_v60 }
 0x7bc   : > { %9954 = vpow2.f32 %v1847_v61 }
 0x7be   : > { %v9953_v62 = vpop.eup %9952 }
 0x7bf   : > { %v1838_v63 = vpop.xlane.xlu1 %1837  ;;  %v1854_v0 = vsel %vm799_vm1, %v9953_v62, 0.0 }
 0x7c0   : > { %v1842_v1 = vsub.f32 %v1821_v45, %v1838_v63  ;;  %1855 = vadd.xlane.f32.xlu1 %v1854_v0  ;;  %v9774_v63 = vld [vmem:[#allocation13 + $0x40] sm:$0xff]   ;;  %v9775_v0 = vld [vmem:[#allocation13 + $0x48] sm:$0xff]  }
 0x7c2   : > { %v1849_v2 = vmul.f32 1.442695, %v1842_v1  ;;  %v9776_v1 = vld [vmem:[#allocation13 + $0x50] sm:$0xff]  }
 0x7c4   : > { %9956 = vpow2.f32 %v1849_v2  ;;  %v9777_v2 = vld [vmem:[#allocation13 + $0x58] sm:$0xff]  }
 0x7c6   : > { %v9955_v3 = vpop.eup %9954 }
 0x7c7   : > { %v1857_v4 = vsel %vm799_vm1, %v9955_v3, 0.0 }
 0x7c8   : > { %1858 = vadd.xlane.f32.xlu0 %v1857_v4  ;;  %v9779_v4 = vld [vmem:[#allocation13 + $0x68] sm:$0xff]  }
 0x7ce   : > { %v9957_v5 = vpop.eup %9956 }
 0x7cf   : > { %v1860_v6 = vsel %vm799_vm1, %v9957_v5, 0.0 }
 0x7d0   : > { %1861 = vadd.xlane.f32.xlu1 %v1860_v6  ;;  %v9781_v6 = vld [vmem:[#allocation13 + $0x78] sm:$0xff]  }
 0x845   : > { %v1853_v7 = vpop.xlane.xlu0 %1852 }
 0x846   : > { %9958 = vrcp.f32 %v1853_v7  ;;  %v9782_v7 = vld [vmem:[#allocation10 + $0x80] sm:$0xff]  }
 0x84d   : > { %v1856_v8 = vpop.xlane.xlu1 %1855 }
 0x84e   : > { %9960 = vrcp.f32 %v1856_v8  ;;  %v9783_v8 = vld [vmem:[#allocation14 + $0x8] sm:$0xff]  }
 0x850   : > { %v9959_v9 = vpop.eup %9958 }
 0x851   : > { %v1867_v10 = vmul.f32 %v9959_v9, %v9951_v57 }
 0x853   : > { %v1871_v11 = vsel %vm799_vm1, %v1867_v10, 0.0 }
 0x854   : > { %v1872_v12 = vrot.slane %v1871_v11, 4 }
 0x855   : > { %v1859_v14 = vpop.xlane.xlu0 %1858 }
 0x856   : > { %v1873_v15 = vadd.f32 %v1872_v12, %v1871_v11  ;;  %9962 = vrcp.f32 %v1859_v14 }
 0x858   : > { %v9961_v16 = vpop.eup %9960  ;;  %v1874_v18 = vrot.slane %v1873_v15, 2 }
 0x859   : > { %v1868_v19 = vmul.f32 %v9961_v16, %v9953_v62 }
 0x85a   : > { %v1875_v20 = vadd.f32 %v1874_v18, %v1873_v15 }
 0x85b   : > { %v1878_v21 = vsel %vm799_vm1, %v1868_v19, 0.0 }
 0x85c   : > { %v1879_v22 = vrot.slane %v1878_v21, 4  ;;  %v1876_v23 = vrot.slane %v1875_v20, 1 }
 0x85d   : > { %v1862_v24 = vpop.xlane.xlu1 %1861 }
 0x85e   : > { %v1880_v25 = vadd.f32 %v1879_v22, %v1878_v21  ;;  %9964 = vrcp.f32 %v1862_v24  ;;  %v1877_v26 = vadd.f32 %v1876_v23, %v1875_v20 }
 0x860   : > { %v9963_v27 = vpop.eup %9962  ;;  %v1881_v31 = vrot.slane %v1880_v25, 2  ;;  %v1899_v32 = vmul.f32 0.125, %v1877_v26 }
 0x861   : > { %v1869_v35 = vmul.f32 %v9963_v27, %v9955_v3  ;;  %v9778_v3 = vld [vmem:[#allocation13 + $0x60] sm:$0xff]  }
 0x862   : > { %v1882_v36 = vadd.f32 %v1881_v31, %v1880_v25  ;;  %v1903_v37 = vpack.c.bf16 %v1899_v32, %v1899_v32 }
 0x863   : > { %v1885_v38 = vsel %vm799_vm1, %v1869_v35, 0.0 }
 0x864   : > { %v1883_v39 = vrot.slane %v1882_v36, 1  ;;  %v1886_v40 = vrot.slane %v1885_v38, 4  ;;  %8840 = vmatmul.mubr.msk.bf16.vlgmr.msra.gmra.mrb[48].mxu0 %vm799_vm1, %v1903_v37 }
 0x865   : > { %8850 = vmatpush3.bf16.msra.mxu0 %v10849_v29  ;;  %8851 = vmatprep.mubr.msk.bf16.mxu0 %vm10422_vm0, %v10421_v34 }
 0x866   : > { %v1887_v41 = vadd.f32 %v1886_v40, %v1885_v38  ;;  %v1884_v42 = vadd.f32 %v1883_v39, %v1882_v36  ;;  %8861 = vmatprep.subr.bf16.mxu0 %v10421_v34 }
 0x868   : > { %v9965_v43 = vpop.eup %9964  ;;  %v1888_v44 = vrot.slane %v1887_v41, 2  ;;  %v1900_v45 = vmul.f32 0.125, %v1884_v42 }
 0x869   : > { %v1870_v46 = vmul.f32 %v9965_v43, %v9957_v5  ;;  %v9780_v5 = vld [vmem:[#allocation13 + $0x70] sm:$0xff]  }
 0x86a   : > { %v1904_v47 = vpack.c.bf16 %v1900_v45, %v1900_v45  ;;  %v1889_v48 = vadd.f32 %v1888_v44, %v1887_v41 }
 0x86b   : > { %v1892_v50 = vsel %vm799_vm1, %v1870_v46, 0.0 }
 0x86c   : > { %v1893_v51 = vrot.slane %v1892_v50, 4  ;;  %8846 = vmatmul.mubr.msk.bf16.vlgmr.msra.gmra.mrb[28].mxu1 %vm799_vm1, %v1904_v47  ;;  %v1890_v52 = vrot.slane %v1889_v48, 1  ;;  %v9784_v47 = vld [vmem:[#allocation10 + $0x88] sm:$0xff]  }
 0x86d   : > { %8856 = vmatpush3.bf16.msra.mxu1 %v10858_v33  ;;  %8857 = vmatprep.mubr.msk.bf16.mxu1 %vm10422_vm0, %v10421_v34 }
 0x86e   : > { %v1894_v53 = vadd.f32 %v1893_v51, %v1892_v50  ;;  %v1891_v54 = vadd.f32 %v1890_v52, %v1889_v48  ;;  %8881 = vmatprep.subr.bf16.mxu1 %v10421_v34  ;;  %v9785_v48 = vld [vmem:[#allocation10 + $0x90] sm:$0xff]   ;;  %v9787_v50 = vld [vmem:[#allocation10 + $0x98] sm:$0xff]   ;;  %v9789_v51 = vld [vmem:[#allocation10 + $0xa0] sm:$0xff]  }
 0x86f   : > { %v9791_v52 = vld [vmem:[#allocation10 + $0xa8] sm:$0xff]  }
 0x870   : > { %v1895_v55 = vrot.slane %v1894_v53, 2  ;;  %v1901_v56 = vmul.f32 0.125, %v1891_v54  ;;  %v9795_v54 = vld [vmem:[#allocation10 + $0xb8] sm:$0xff]  }
 0x872   : > { %v1905_v57 = vpack.c.bf16 %v1901_v56, %v1901_v56  ;;  %v1896_v58 = vadd.f32 %v1895_v55, %v1894_v53  ;;  %v9793_v53 = vld [vmem:[#allocation10 + $0xb0] sm:$0xff]   ;;  %v9786_v56 = vld [vmem:[#allocation14] sm:$0xff]  }
 0x874   : > { %8852 = vmatmul.mubr.msk.bf16.vlgmr.msra.gmra.mrb[52].mxu0 %vm799_vm1, %v1905_v57  ;;  %v1897_v59 = vrot.slane %v1896_v58, 1 }
 0x875   : > { %8877 = vmatprep.mubr.msk.bf16.mxu0 %vm10422_vm0, %v10421_v34  ;;  %8862 = vmatpush3.bf16.msra.mxu0 %v9774_v63  ;;  %v9790_v63 = vld [vmem:[#allocation7 + $0x88] sm:$0xff]  }
 0x876   : > { %v1898_v60 = vadd.f32 %v1897_v59, %v1896_v58  ;;  %8863 = vmatprep.subr.bf16.mxu0 %v10421_v34  ;;  %v9788_v59 = vld [vmem:[#allocation7 + $0x80] sm:$0xff]  }
 0x878   : > { %v1902_v61 = vmul.f32 0.125, %v1898_v60 }
 0x879   : > { %8864 = vmatpush3.bf16.msra.mxu0 %v9775_v0  ;;  %v9792_v0 = vld [vmem:[#allocation7 + $0x90] sm:$0xff]  }
 0x87a   : > { %v1906_v62 = vpack.c.bf16 %v1902_v61, %v1902_v61  ;;  %8865 = vmatprep.subr.bf16.mxu0 %v10421_v34 }
 0x87c   : > { %8858 = vmatmul.mubr.msk.bf16.vlgmr.msra.gmra.mrb[32].mxu1 %vm799_vm1, %v1906_v62  ;;  %v1364_v62 = vpack.c.bf16 %v10944_v49, %v10944_v49  ;;  %v9798_v49 = vld [vmem:[#allocation7 + $0xb0] sm:$0xff]  }
 0x87d   : > { %8883 = vmatprep.mubr.msk.bf16.mxu1 %vm10422_vm0, %v10421_v34  ;;  %8866 = vmatpush3.bf16.msra.mxu0 %v9776_v1  ;;  %v9794_v1 = vld [vmem:[#allocation7 + $0x98] sm:$0xff]  }
 0x87e   : > { %8867 = vmatprep.subr.bf16.mxu0 %v10421_v34  ;;  %8882 = vmatpush3.bf16.msra.mxu1 %v9783_v8 }
 0x87f   : > { %8887 = vmatprep.subr.bf16.mxu1 %v10421_v34 }
 0x881   : > { %8868 = vmatpush3.bf16.msra.mxu0 %v9777_v2  ;;  %v9796_v2 = vld [vmem:[#allocation7 + $0xa0] sm:$0xff]  }
 0x882   : > { %8869 = vmatprep.subr.bf16.mxu0 %v10421_v34 }
 0x885   : > { %8870 = vmatpush3.bf16.msra.mxu0 %v9778_v3  ;;  %v9797_v3 = vld [vmem:[#allocation7 + $0xa8] sm:$0xff]  }
 0x886   : > { %8871 = vmatprep.subr.bf16.mxu0 %v10421_v34 }
 0x889   : > { %8872 = vmatpush3.bf16.msra.mxu0 %v9779_v4  ;;  %v9799_v4 = vld [vmem:[#allocation7 + $0xb8] sm:$0xff]  }
 0x88a   : > { %8873 = vmatprep.subr.bf16.mxu0 %v10421_v34 }
 0x88d   : > { %8874 = vmatpush3.bf16.msra.mxu0 %v9780_v5  ;;  %v7988_v5 = vld [vmem:[#allocation11 + $0x2] ss:$0 sm:$0xff] }
 0x88e   : > { %8875 = vmatprep.subr.bf16.mxu0 %v10421_v34 }
 0x891   : > { %8876 = vmatpush3.bf16.msra.mxu0 %v9781_v6 }
 0x892   : > { %8913 = vmatprep.subr.bf16.mxu0 %v9782_v7 }
 0x937   : > { %v1944_v9 = vpop.f32.mrb[48].mxu0 }
 0x938   : > { %v8841_v10 = vpop.f32.mrb[49].mxu0  ;;  %v2079_v15 = vpack.c.bf16 %v1944_v9, %v1944_v9 }
 0x939   : > { %v1947_v11 = vpop.f32.mrb[50].mxu0 }
 0x93a   : > { %v8842_v12 = vpop.f32.mrb[51].mxu0  ;;  %v2104_v22 = vunpack.c.l.b16 %v2079_v15 }
 0x93f   : > { %v1987_v14 = vpop.f32.mrb[28].mxu1 }
 0x940   : > { %v2080_v16 = vpack.c.bf16 %v1987_v14, %v1987_v14  ;;  %v8847_v18 = vpop.f32.mrb[29].mxu1 }
 0x941   : > { %v1990_v19 = vpop.f32.mrb[30].mxu1 }
 0x942   : > { %v2105_v20 = vunpack.c.l.b16 %v2080_v16  ;;  %v8848_v21 = vpop.f32.mrb[31].mxu1 }
 0x944   : > { %v2108_v23 = vrot.slane %v2105_v20, 7 }
 0x946   : > { %v2109_v24 = vsel %vm1266_vm2, %v2108_v23, %v2104_v22 }
 0x947   : > { %v2030_v25 = vpop.f32.mrb[52].mxu0 }
 0x948   : > { %v2081_v26 = vpack.c.bf16 %v2030_v25, %v2030_v25  ;;  %v8853_v27 = vpop.f32.mrb[53].mxu0 }
 0x949   : > { %v2033_v31 = vpop.f32.mrb[54].mxu0 }
 0x94a   : > { %v2106_v32 = vunpack.c.l.b16 %v2081_v26  ;;  %v8854_v35 = vpop.f32.mrb[55].mxu0 }
 0x94c   : > { %v2110_v36 = vrot.slane %v2106_v32, 6 }
 0x94e   : > { %v2111_v37 = vsel %vm1269_vm3, %v2110_v36, %v2109_v24 }
 0x94f   : > { %v2073_v38 = vpop.f32.mrb[32].mxu1 }
 0x950   : > { %v2082_v39 = vpack.c.bf16 %v2073_v38, %v2073_v38  ;;  %v8859_v40 = vpop.f32.mrb[33].mxu1 }
 0x951   : > { %v2076_v41 = vpop.f32.mrb[34].mxu1 }
 0x952   : > { %v2107_v42 = vunpack.c.l.b16 %v2082_v39  ;;  %v8860_v43 = vpop.f32.mrb[35].mxu1 }
 0x954   : > { %v2112_v44 = vrot.slane %v2107_v42, 5 }
 0x956   : > { %v2113_v45 = vsel %vm1272_vm4, %v2112_v44, %v2111_v37  ;;  %v7979_v44 = vld [vmem:[#allocation8 + $0x2] ss:$0 sm:$0xff] }
 0x957   : > { %v2114_v46 = vpack.c.b16 %v2113_v45, %v2113_v45 }
 0x959   : > { %8878 = vmatmul.mubr.bf16.vlgmr.msra.gmra.mrb[56].mxu0 %v2114_v46 }
 0x95a   : > { %8914 = vmatpush3.bf16.msra.mxu0 %v9782_v7  ;;  %8929 = vmatprep.mubr.bf16.mxu0 %v10833_v13 }
 0x95b   : > { %8915 = vmatprep.subr.bf16.mxu0 %v9784_v47 }
 0x95e   : > { %8916 = vmatpush3.bf16.msra.mxu0 %v9784_v47 }
 0x95f   : > { %8917 = vmatprep.subr.bf16.mxu0 %v9785_v48 }
 0x962   : > { %8918 = vmatpush3.bf16.msra.mxu0 %v9785_v48 }
 0x963   : > { %8919 = vmatprep.subr.bf16.mxu0 %v9787_v50 }
 0x966   : > { %8920 = vmatpush3.bf16.msra.mxu0 %v9787_v50 }
 0x967   : > { %8921 = vmatprep.subr.bf16.mxu0 %v9789_v51 }
 0x96a   : > { %8922 = vmatpush3.bf16.msra.mxu0 %v9789_v51 }
 0x96b   : > { %8923 = vmatprep.subr.bf16.mxu0 %v9791_v52 }
 0x96e   : > { %8924 = vmatpush3.bf16.msra.mxu0 %v9791_v52 }
 0x96f   : > { %8925 = vmatprep.subr.bf16.mxu0 %v9793_v53 }
 0x972   : > { %8926 = vmatpush3.bf16.msra.mxu0 %v9793_v53 }
 0x973   : > { %8927 = vmatprep.subr.bf16.mxu0 %v9795_v54 }
 0x976   : > { %8928 = vmatpush3.bf16.msra.mxu0 %v9795_v54 }
 0x977   : > { %8955 = vmatprep.subr.bf16.mxu0 %v10421_v34 }
 0x979   : > { %8930 = vmatmul.mubr.bf16.vlgmr.msra.gmra.mrb[60].mxu0 %v10847_v28 }
 0x97a   : > { %8933 = vmatprep.mubr.bf16.mxu0 %v10849_v29 }
 0x981   : > { %8934 = vmatmul.mubr.bf16.gmra.mrb[64].mxu0 %v10858_v33 }
 0x982   : > { %8957 = vmatprep.mubr.msk.bf16.mxu0 %vm10422_vm0, %v10421_v34 }
 0xa2c   : > { %v2198_v55 = vpop.f32.mrb[56].mxu0 }
 0xa2d   : > { %v2204_v57 = vpack.c.bf16 %v2198_v55, %v2198_v55  ;;  %v8879_v58 = vpop.f32.mrb[57].mxu0 }
 0xa2e   : > { %v2201_v60 = vpop.f32.mrb[58].mxu0 }
 0xa2f   : > { %v8880_v61 = vpop.f32.mrb[59].mxu0  ;;  %8884 = vmatmul.mubr.msk.bf16.vlgmr.msra.gmra.mrb[36].mxu1 %vm799_vm1, %v2204_v57 }
 0xa30   : > { %8888 = vmatpush3.bf16.msra.mxu1 %v9786_v56  ;;  %8889 = vmatprep.mubr.msk.bf16.mxu1 %vm10422_vm0, %v10421_v34 }
 0xa31   : > { %8893 = vmatprep.subr.bf16.mxu1 %v9788_v59 }
 0xa37   : > { %8890 = vmatmul.mubr.msk.bf16.vlgmr.msra.gmra.mrb[40].mxu1 %vm799_vm1, %v1364_v62 }
 0xa38   : > { %8894 = vmatpush3.bf16.msra.mxu1 %v9788_v59  ;;  %8909 = vmatprep.mubr.bf16.mxu1 %v10838_v17 }
 0xa39   : > { %8895 = vmatprep.subr.bf16.mxu1 %v9790_v63 }
 0xa3c   : > { %8896 = vmatpush3.bf16.msra.mxu1 %v9790_v63 }
 0xa3d   : > { %8897 = vmatprep.subr.bf16.mxu1 %v9792_v0 }
 0xa40   : > { %8898 = vmatpush3.bf16.msra.mxu1 %v9792_v0 }
 0xa41   : > { %8899 = vmatprep.subr.bf16.mxu1 %v9794_v1 }
 0xa44   : > { %8900 = vmatpush3.bf16.msra.mxu1 %v9794_v1 }
 0xa45   : > { %8901 = vmatprep.subr.bf16.mxu1 %v9796_v2 }
 0xa48   : > { %8902 = vmatpush3.bf16.msra.mxu1 %v9796_v2 }
 0xa49   : > { %8903 = vmatprep.subr.bf16.mxu1 %v9797_v3 }
 0xa4c   : > { %8904 = vmatpush3.bf16.msra.mxu1 %v9797_v3  ;;  %v8931_v6 = vpop.f32.mrb[60].mxu0 }
 0xa4d   : > { %8905 = vmatprep.subr.bf16.mxu1 %v9798_v49  ;;  %v2544_v7 = vadd.f32 %v8931_v6, %v7988_v5  ;;  %v2535_v8 = vpop.f32.mrb[61].mxu0 }
 0xa4e   : > { %v2536_v9 = vadd.f32 %v7988_v5, %v2535_v8  ;;  %v8932_v10 = vpop.f32.mrb[62].mxu0 }
 0xa4f   : > { %v2547_v11 = vadd.f32 %v8932_v10, %v7988_v5  ;;  %v2538_v12 = vpop.f32.mrb[63].mxu0 }
 0xa50   : > { %8906 = vmatpush3.bf16.msra.mxu1 %v9798_v49  ;;  %v2539_v14 = vadd.f32 %v7988_v5, %v2538_v12 }
 0xa51   : > { %8907 = vmatprep.subr.bf16.mxu1 %v9799_v4  ;;  %v2579_v15 = vpack.c.bf16 %v2547_v11, %v2544_v7 }
 0xa52   : > { %v2578_v16 = vpack.c.bf16 %v2539_v14, %v2536_v9 }
 0xa53   : > { %v2632_v54 = vsel %vm799_vm1, %v2579_v15, 0 }
 0xa54   : > { %8908 = vmatpush3.bf16.msra.mxu1 %v9799_v4  ;;  %v8935_v18 = vpop.f32.mrb[64].mxu0  ;;  %v2586_v19 = vsel %vm799_vm1, %v2578_v16, 0 }
 0xa55   : > { %8937 = vmatprep.subr.bf16.mxu1 %v10421_v34  ;;  %v2560_v20 = vadd.f32 %v8935_v18, %v7988_v5  ;;  %v2551_v21 = vpop.f32.mrb[65].mxu0 }
 0xa56   : > { %v2552_v22 = vadd.f32 %v7988_v5, %v2551_v21  ;;  %v8936_v23 = vpop.f32.mrb[66].mxu0 }
 0xa57   : > { %8910 = vmatmul.mubr.bf16.vlgmr.msra.gmra.mrb[44].mxu1 %v10851_v30  ;;  %v2563_v24 = vadd.f32 %v8936_v23, %v7988_v5  ;;  %v2554_v27 = vpop.f32.mrb[67].mxu0 }
 0xa58   : > { %8939 = vmatprep.mubr.msk.bf16.mxu1 %vm10422_vm0, %v10421_v34  ;;  %v2555_v31 = vadd.f32 %v7988_v5, %v2554_v27 }
 0xa59   : > { %v2581_v25 = vpack.c.bf16 %v2563_v24, %v2560_v20 }
 0xa5a   : > { %v2580_v32 = vpack.c.bf16 %v2555_v31, %v2552_v22 }
 0xa5b   : > { %v2724_v26 = vsel %vm799_vm1, %v2581_v25, 0 }
 0xa5c   : > { %8956 = vmatpush3.bf16.xpose.msra.mxu0 %v2724_v26  ;;  %v2678_v57 = vsel %vm799_vm1, %v2580_v32, 0 }
 0xa5d   : > { %8938 = vmatpush3.bf16.xpose.msra.mxu1 %v2586_v19  ;;  %8967 = vmatprep.subr.bf16.mxu0 %v10421_v34 }
 0xa5e   : > { %8943 = vmatprep.subr.bf16.mxu1 %v10421_v34 }
 0xb02   : > { %v2251_v35 = vpop.f32.mrb[36].mxu1 }
 0xb03   : > { %v8885_v36 = vpop.f32.mrb[37].mxu1 }
 0xb04   : > { %v2254_v37 = vpop.f32.mrb[38].mxu1 }
 0xb05   : > { %v8886_v38 = vpop.f32.mrb[39].mxu1 }
 0xb0a   : > { %v2300_v39 = vpop.f32.mrb[40].mxu1 }
 0xb0b   : > { %v11029_v40 = vadd.f32 %v2300_v39, %v2251_v35  ;;  %v8891_v41 = vpop.f32.mrb[41].mxu1 }
 0xb0c   : > { %v2303_v42 = vpop.f32.mrb[42].mxu1 }
 0xb0d   : > { %v8892_v43 = vpop.f32.mrb[43].mxu1 }
 0xb2a   : > { %v8911_v45 = vpop.f32.mrb[44].mxu1 }
 0xb2b   : > { %v2413_v46 = vpop.f32.mrb[45].mxu1  ;;  %v2422_v58 = vadd.f32 %v8911_v45, %v7979_v44 }
 0xb2c   : > { %v2414_v47 = vadd.f32 %v7979_v44, %v2413_v46  ;;  %v8912_v48 = vpop.f32.mrb[46].mxu1 }
 0xb2d   : > { %v2425_v50 = vadd.f32 %v8912_v48, %v7979_v44  ;;  %v2416_v51 = vpop.f32.mrb[47].mxu1  ;;  %v8242_v59 = vpack.c.bf16 %v2422_v58, %v2422_v58 }
 0xb2e   : > { %v8240_v52 = vpack.c.bf16 %v2414_v47, %v2414_v47  ;;  %v2417_v55 = vadd.f32 %v7979_v44, %v2416_v51 }
 0xb2f   : > { %v8243_v53 = vpack.c.bf16 %v2425_v50, %v2425_v50 }
 0xb30   : > { %8940 = vmatmul.mubr.msk.bf16.vlgmr.msra.gmra.mrb[48].mxu1 %vm799_vm1, %v8240_v52  ;;  %v8241_v56 = vpack.c.bf16 %v2417_v55, %v2417_v55 }
 0xb31   : > { %8944 = vmatpush3.bf16.xpose.msra.mxu1 %v2632_v54  ;;  %8958 = vmatmul.mubr.msk.bf16.vlgmr.msra.gmra.mrb[68].mxu0 %vm799_vm1, %v8243_v53 }
 0xb32   : > { %8945 = vmatprep.mubr.msk.bf16.mxu1 %vm10422_vm0, %v10421_v34  ;;  %8949 = vmatprep.subr.bf16.mxu1 %v10421_v34 }
 0xb33   : > { %8968 = vmatpush3.bf16.msra.mxu0 %v10847_v28  ;;  %8969 = vmatprep.mubr.msk.bf16.mxu0 %vm10422_vm0, %v10421_v34 }
 0xb34   : > { %8979 = vmatprep.subr.bf16.mxu0 %v10421_v34 }
 0xb38   : > { %8946 = vmatmul.mubr.msk.bf16.vlgmr.msra.gmra.mrb[52].mxu1 %vm799_vm1, %v8241_v56 }
 0xb39   : > { %8950 = vmatpush3.bf16.xpose.msra.mxu1 %v2678_v57  ;;  %8951 = vmatprep.mubr.msk.bf16.mxu1 %vm10422_vm0, %v10421_v34 }
 0xb3a   : > { %8961 = vmatprep.subr.bf16.mxu1 %v10421_v34 }
 0xb40   : > { %8952 = vmatmul.mubr.msk.bf16.vlgmr.msra.gmra.mrb[56].mxu1 %vm799_vm1, %v8242_v59 }
 0xb41   : > { %8962 = vmatpush3.bf16.msra.mxu1 %v10833_v13  ;;  %8963 = vmatprep.mubr.msk.bf16.mxu1 %vm10422_vm0, %v10421_v34 }
 0xb42   : > { %8973 = vmatprep.subr.bf16.mxu1 %v10421_v34 }
 0xc03   : > { %v2622_v60 = vpop.f32.mrb[48].mxu1 }
 0xc04   : > { %v8941_v61 = vpop.f32.mrb[49].mxu1  ;;  %v2760_v62 = vpop.f32.mrb[68].mxu0  ;;  %v2766_v63 = vsel %vm799_vm1, %v2622_v60, -inf }
 0xc05   : > { %v8959_v0 = vpop.f32.mrb[69].mxu0  ;;  %2767 = vmax.xlane.f32.xlu0 %v2766_v63  ;;  %v2625_v1 = vpop.f32.mrb[50].mxu1  ;;  %v2775_v9 = vsel %vm799_vm1, %v2760_v62, -inf }
 0xc06   : > { %v8942_v2 = vpop.f32.mrb[51].mxu1  ;;  %v2763_v3 = vpop.f32.mrb[70].mxu0 }
 0xc07   : > { %v8960_v49 = vpop.f32.mrb[71].mxu0 }
 0xc0b   : > { %v2668_v4 = vpop.f32.mrb[52].mxu1 }
 0xc0c   : > { %v8947_v5 = vpop.f32.mrb[53].mxu1  ;;  %v2769_v6 = vsel %vm799_vm1, %v2668_v4, -inf }
 0xc0d   : > { %2770 = vmax.xlane.f32.xlu1 %v2769_v6  ;;  %v2671_v7 = vpop.f32.mrb[54].mxu1 }
 0xc0e   : > { %v8948_v8 = vpop.f32.mrb[55].mxu1 }
 0xc11   : > { %2776 = vmax.xlane.f32.xlu1 %v2775_v9 }
 0xc13   : > { %v2714_v10 = vpop.f32.mrb[56].mxu1 }
 0xc14   : > { %v8953_v11 = vpop.f32.mrb[57].mxu1  ;;  %v2772_v12 = vsel %vm799_vm1, %v2714_v10, -inf }
 0xc15   : > { %2773 = vmax.xlane.f32.xlu0 %v2772_v12  ;;  %v2717_v14 = vpop.f32.mrb[58].mxu1 }
 0xc16   : > { %v8954_v15 = vpop.f32.mrb[59].mxu1 }
 0xc92   : > { %v2768_v16 = vpop.xlane.xlu0 %2767 }
 0xc93   : > { %v2778_v18 = vsub.f32 %v2622_v60, %v2768_v16 }
 0xc95   : > { %v2782_v19 = vmul.f32 1.442695, %v2778_v18 }
 0xc97   : > { %9966 = vpow2.f32 %v2782_v19 }
 0xc9a   : > { %v2771_v20 = vpop.xlane.xlu1 %2770 }
 0xc9b   : > { %v2779_v21 = vsub.f32 %v2668_v4, %v2771_v20 }
 0xc9d   : > { %v2784_v22 = vmul.f32 1.442695, %v2779_v21 }
 0xc9e   : > { %v2777_v23 = vpop.xlane.xlu1 %2776 }
 0xc9f   : > { %9968 = vpow2.f32 %v2784_v22  ;;  %v2781_v24 = vsub.f32 %v2760_v62, %v2777_v23 }
 0xca1   : > { %v9967_v25 = vpop.eup %9966  ;;  %v2788_v26 = vmul.f32 1.442695, %v2781_v24 }
 0xca2   : > { %v2774_v27 = vpop.xlane.xlu0 %2773  ;;  %v2790_v31 = vsel %vm799_vm1, %v9967_v25, 0.0 }
 0xca3   : > { %9970 = vpow2.f32 %v2788_v26  ;;  %v2780_v32 = vsub.f32 %v2714_v10, %v2774_v27  ;;  %2791 = vadd.xlane.f32.xlu0 %v2790_v31  ;;  %v9800_v27 = vld [vmem:[#allocation13 + $0x80] sm:$0xff]  }
 0xca5   : > { %v2786_v35 = vmul.f32 1.442695, %v2780_v32 }
 0xca7   : > { %9972 = vpow2.f32 %v2786_v35  ;;  %v9801_v35 = vld [vmem:[#allocation13 + $0x88] sm:$0xff]  }
 0xca9   : > { %v9969_v36 = vpop.eup %9968 }
 0xcaa   : > { %v2793_v37 = vsel %vm799_vm1, %v9969_v36, 0.0 }
 0xcab   : > { %2794 = vadd.xlane.f32.xlu1 %v2793_v37  ;;  %v9803_v37 = vld [vmem:[#allocation13 + $0x98] sm:$0xff]  }
 0xcad   : > { %v9971_v38 = vpop.eup %9970 }
 0xcae   : > { %v2799_v39 = vsel %vm799_vm1, %v9971_v38, 0.0 }
 0xcaf   : > { %2800 = vadd.xlane.f32.xlu1 %v2799_v39  ;;  %v9805_v39 = vld [vmem:[#allocation13 + $0xa8] sm:$0xff]  }
 0xcb1   : > { %v9973_v41 = vpop.eup %9972 }
 0xcb2   : > { %v2796_v42 = vsel %vm799_vm1, %v9973_v41, 0.0 }
 0xcb3   : > { %2797 = vadd.xlane.f32.xlu0 %v2796_v42  ;;  %v9807_v42 = vld [vmem:[#allocation13 + $0xb8] sm:$0xff]  }
 0xd30   : > { %v2792_v43 = vpop.xlane.xlu0 %2791 }
 0xd31   : > { %9974 = vrcp.f32 %v2792_v43  ;;  %v9808_v43 = vld [vmem:[#allocation10 + $0xc0] sm:$0xff]  }
 0xd38   : > { %v2795_v44 = vpop.xlane.xlu1 %2794 }
 0xd39   : > { %9976 = vrcp.f32 %v2795_v44  ;;  %v9810_v44 = vld [vmem:[#allocation14 + $0x10] sm:$0xff]  }
 0xd3b   : > { %v9975_v45 = vpop.eup %9974 }
 0xd3c   : > { %v2806_v46 = vmul.f32 %v9975_v45, %v9967_v25  ;;  %v2801_v47 = vpop.xlane.xlu1 %2800 }
 0xd3d   : > { %9978 = vrcp.f32 %v2801_v47 }
 0xd3e   : > { %v2810_v48 = vsel %vm799_vm1, %v2806_v46, 0.0 }
 0xd3f   : > { %v2811_v50 = vrot.slane %v2810_v48, 4 }
 0xd40   : > { %v2798_v51 = vpop.xlane.xlu0 %2797 }
 0xd41   : > { %v2812_v52 = vadd.f32 %v2811_v50, %v2810_v48  ;;  %9980 = vrcp.f32 %v2798_v51 }
 0xd43   : > { %v9977_v53 = vpop.eup %9976  ;;  %v2813_v54 = vrot.slane %v2812_v52, 2 }
 0xd44   : > { %v2807_v55 = vmul.f32 %v9977_v53, %v9969_v36  ;;  %v9802_v36 = vld [vmem:[#allocation13 + $0x90] sm:$0xff]  }
 0xd45   : > { %v2814_v56 = vadd.f32 %v2813_v54, %v2812_v52 }
 0xd46   : > { %v2817_v57 = vsel %vm799_vm1, %v2807_v55, 0.0 }
 0xd47   : > { %v9979_v58 = vpop.eup %9978  ;;  %v2818_v59 = vrot.slane %v2817_v57, 4  ;;  %v2815_v60 = vrot.slane %v2814_v56, 1 }
 0xd48   : > { %v2809_v61 = vmul.f32 %v9979_v58, %v9971_v38  ;;  %v9804_v38 = vld [vmem:[#allocation13 + $0xa0] sm:$0xff]  }
 0xd49   : > { %v2819_v62 = vadd.f32 %v2818_v59, %v2817_v57  ;;  %v2816_v63 = vadd.f32 %v2815_v60, %v2814_v56 }
 0xd4a   : > { %v2831_v0 = vsel %vm799_vm1, %v2809_v61, 0.0 }
 0xd4b   : > { %v9981_v1 = vpop.eup %9980  ;;  %v2820_v2 = vrot.slane %v2819_v62, 2  ;;  %v2832_v3 = vrot.slane %v2831_v0, 4  ;;  %v2838_v49 = vmul.f32 0.125, %v2816_v63 }
 0xd4c   : > { %v2808_v4 = vmul.f32 %v9981_v1, %v9973_v41  ;;  %v9806_v41 = vld [vmem:[#allocation13 + $0xb0] sm:$0xff]  }
 0xd4d   : > { %v2833_v5 = vadd.f32 %v2832_v3, %v2831_v0  ;;  %v2842_v6 = vpack.c.bf16 %v2838_v49, %v2838_v49  ;;  %v2821_v7 = vadd.f32 %v2820_v2, %v2819_v62 }
 0xd4e   : > { %v2824_v8 = vsel %vm799_vm1, %v2808_v4, 0.0 }
 0xd4f   : > { %v2834_v9 = vrot.slane %v2833_v5, 2  ;;  %v2825_v10 = vrot.slane %v2824_v8, 4  ;;  %8964 = vmatmul.mubr.msk.bf16.vlgmr.msra.gmra.mrb[60].mxu1 %vm799_vm1, %v2842_v6  ;;  %v2822_v11 = vrot.slane %v2821_v7, 1 }
 0xd50   : > { %8974 = vmatpush3.bf16.msra.mxu1 %v10849_v29  ;;  %8975 = vmatprep.mubr.msk.bf16.mxu1 %vm10422_vm0, %v10421_v34 }
 0xd51   : > { %v2826_v12 = vadd.f32 %v2825_v10, %v2824_v8  ;;  %v2823_v14 = vadd.f32 %v2822_v11, %v2821_v7  ;;  %v2835_v15 = vadd.f32 %v2834_v9, %v2833_v5  ;;  %8985 = vmatprep.subr.bf16.mxu1 %v10421_v34 }
 0xd53   : > { %v2827_v16 = vrot.slane %v2826_v12, 2  ;;  %v2839_v18 = vmul.f32 0.125, %v2823_v14  ;;  %v2836_v19 = vrot.slane %v2835_v15, 1  ;;  %v9811_v14 = vld [vmem:[#allocation10 + $0xd0] sm:$0xff]  }
 0xd55   : > { %v2843_v20 = vpack.c.bf16 %v2839_v18, %v2839_v18  ;;  %v2828_v21 = vadd.f32 %v2827_v16, %v2826_v12  ;;  %v2837_v22 = vadd.f32 %v2836_v19, %v2835_v15  ;;  %v9809_v12 = vld [vmem:[#allocation10 + $0xc8] sm:$0xff]   ;;  %v9812_v15 = vld [vmem:[#allocation10 + $0xd8] sm:$0xff]   ;;  %v9814_v18 = vld [vmem:[#allocation10 + $0xe0] sm:$0xff]  }
 0xd56   : > { %v9813_v16 = vld [vmem:[#allocation7 + $0xc0] sm:$0xff]   ;;  %v9816_v19 = vld [vmem:[#allocation10 + $0xe8] sm:$0xff]  }
 0xd57   : > { %8970 = vmatmul.mubr.msk.bf16.vlgmr.msra.gmra.mrb[72].mxu0 %vm799_vm1, %v2843_v20  ;;  %v2829_v23 = vrot.slane %v2828_v21, 1  ;;  %v2841_v25 = vmul.f32 0.125, %v2837_v22  ;;  %v9818_v20 = vld [vmem:[#allocation10 + $0xf0] sm:$0xff]  }
 0xd58   : > { %8980 = vmatpush3.bf16.msra.mxu0 %v10858_v33  ;;  %8981 = vmatprep.mubr.msk.bf16.mxu0 %vm10422_vm0, %v10421_v34 }
 0xd59   : > { %v2830_v24 = vadd.f32 %v2829_v23, %v2828_v21  ;;  %9005 = vmatprep.subr.bf16.mxu0 %v10421_v34  ;;  %v2845_v32 = vpack.c.bf16 %v2841_v25, %v2841_v25  ;;  %v9820_v21 = vld [vmem:[#allocation10 + $0xf8] sm:$0xff]   ;;  %v9815_v25 = vld [vmem:[#allocation7 + $0xc8] sm:$0xff]  }
 0xd5b   : > { %v2840_v26 = vmul.f32 0.125, %v2830_v24 }
 0xd5d   : > { %v2844_v31 = vpack.c.bf16 %v2840_v26, %v2840_v26 }
 0xd5f   : > { %8976 = vmatmul.mubr.msk.bf16.vlgmr.msra.gmra.mrb[64].mxu1 %vm799_vm1, %v2844_v31  ;;  %8982 = vmatmul.mubr.msk.bf16.vlgmr.msra.gmra.mrb[76].mxu0 %vm799_vm1, %v2845_v32  ;;  %v9817_v31 = vld [vmem:[#allocation7 + $0xd0] sm:$0xff]   ;;  %v9819_v32 = vld [vmem:[#allocation7 + $0xd8] sm:$0xff]  }
 0xd60   : > { %8986 = vmatpush3.bf16.msra.mxu1 %v9800_v27  ;;  %9001 = vmatprep.mubr.msk.bf16.mxu1 %vm10422_vm0, %v10421_v34 }
 0xd61   : > { %8987 = vmatprep.subr.bf16.mxu1 %v10421_v34  ;;  %9007 = vmatprep.mubr.msk.bf16.mxu0 %vm10422_vm0, %v10421_v34 }
 0xd62   : > { %9006 = vmatpush3.bf16.msra.mxu0 %v9810_v44 }
 0xd63   : > { %9011 = vmatprep.subr.bf16.mxu0 %v9813_v16 }
 0xd64   : > { %8988 = vmatpush3.bf16.msra.mxu1 %v9801_v35  ;;  %v9821_v35 = vld [vmem:[#allocation7 + $0xe0] sm:$0xff]  }
 0xd65   : > { %8989 = vmatprep.subr.bf16.mxu1 %v10421_v34 }
 0xd68   : > { %8990 = vmatpush3.bf16.msra.mxu1 %v9802_v36  ;;  %v9822_v36 = vld [vmem:[#allocation7 + $0xe8] sm:$0xff]  }
 0xd69   : > { %8991 = vmatprep.subr.bf16.mxu1 %v10421_v34 }
 0xd6c   : > { %8992 = vmatpush3.bf16.msra.mxu1 %v9803_v37  ;;  %v9823_v37 = vld [vmem:[#allocation7 + $0xf0] sm:$0xff]  }
 0xd6d   : > { %8993 = vmatprep.subr.bf16.mxu1 %v10421_v34 }
 0xd70   : > { %8994 = vmatpush3.bf16.msra.mxu1 %v9804_v38  ;;  %v9824_v38 = vld [vmem:[#allocation7 + $0xf8] sm:$0xff]  }
 0xd71   : > { %8995 = vmatprep.subr.bf16.mxu1 %v10421_v34 }
 0xd74   : > { %8996 = vmatpush3.bf16.msra.mxu1 %v9805_v39  ;;  %v8028_v39 = vld [vmem:[#allocation11 + $0x3] ss:$0 sm:$0xff] }
 0xd75   : > { %8997 = vmatprep.subr.bf16.mxu1 %v10421_v34 }
 0xd78   : > { %8998 = vmatpush3.bf16.msra.mxu1 %v9806_v41 }
 0xd79   : > { %8999 = vmatprep.subr.bf16.mxu1 %v10421_v34 }
 0xd7c   : > { %9000 = vmatpush3.bf16.msra.mxu1 %v9807_v42 }
 0xd7d   : > { %9031 = vmatprep.subr.bf16.mxu1 %v9808_v43 }
 0xe22   : > { %v2883_v45 = vpop.f32.mrb[60].mxu1 }
 0xe23   : > { %v8965_v46 = vpop.f32.mrb[61].mxu1  ;;  %v3018_v51 = vpack.c.bf16 %v2883_v45, %v2883_v45 }
 0xe24   : > { %v2886_v47 = vpop.f32.mrb[62].mxu1 }
 0xe25   : > { %v8966_v48 = vpop.f32.mrb[63].mxu1  ;;  %v3043_v57 = vunpack.c.l.b16 %v3018_v51 }
 0xe2a   : > { %v2926_v50 = vpop.f32.mrb[72].mxu0 }
 0xe2b   : > { %v3019_v52 = vpack.c.bf16 %v2926_v50, %v2926_v50  ;;  %v8971_v53 = vpop.f32.mrb[73].mxu0 }
 0xe2c   : > { %v2929_v54 = vpop.f32.mrb[74].mxu0 }
 0xe2d   : > { %v3044_v55 = vunpack.c.l.b16 %v3019_v52  ;;  %v8972_v56 = vpop.f32.mrb[75].mxu0 }
 0xe2f   : > { %v3047_v58 = vrot.slane %v3044_v55, 7 }
 0xe31   : > { %v3048_v59 = vsel %vm1266_vm2, %v3047_v58, %v3043_v57 }
 0xe32   : > { %v2969_v60 = vpop.f32.mrb[64].mxu1  ;;  %v3012_v61 = vpop.f32.mrb[76].mxu0 }
 0xe33   : > { %v3020_v62 = vpack.c.bf16 %v2969_v60, %v2969_v60  ;;  %v3021_v63 = vpack.c.bf16 %v3012_v61, %v3012_v61  ;;  %v8977_v0 = vpop.f32.mrb[65].mxu1  ;;  %v8983_v1 = vpop.f32.mrb[77].mxu0 }
 0xe34   : > { %v2972_v2 = vpop.f32.mrb[66].mxu1  ;;  %v3015_v3 = vpop.f32.mrb[78].mxu0 }
 0xe35   : > { %v3045_v49 = vunpack.c.l.b16 %v3020_v62  ;;  %v3046_v4 = vunpack.c.l.b16 %v3021_v63  ;;  %v8978_v5 = vpop.f32.mrb[67].mxu1  ;;  %v8984_v6 = vpop.f32.mrb[79].mxu0 }
 0xe37   : > { %v3049_v7 = vrot.slane %v3045_v49, 6  ;;  %v3051_v8 = vrot.slane %v3046_v4, 5  ;;  %v8019_v49 = vld [vmem:[#allocation8 + $0x3] ss:$0 sm:$0xff] }
 0xe39   : > { %v3050_v9 = vsel %vm1269_vm3, %v3049_v7, %v3048_v59 }
 0xe3a   : > { %v3052_v10 = vsel %vm1272_vm4, %v3051_v8, %v3050_v9 }
 0xe3b   : > { %v3053_v11 = vpack.c.b16 %v3052_v10, %v3052_v10 }
 0xe3d   : > { %9002 = vmatmul.mubr.bf16.vlgmr.msra.gmra.mrb[68].mxu1 %v3053_v11 }
 0xe3e   : > { %9032 = vmatpush3.bf16.msra.mxu1 %v9808_v43  ;;  %9047 = vmatprep.mubr.bf16.mxu1 %v10833_v13 }
 0xe3f   : > { %9033 = vmatprep.subr.bf16.mxu1 %v9809_v12 }
 0xe42   : > { %9034 = vmatpush3.bf16.msra.mxu1 %v9809_v12 }
 0xe43   : > { %9035 = vmatprep.subr.bf16.mxu1 %v9811_v14 }
 0xe46   : > { %9036 = vmatpush3.bf16.msra.mxu1 %v9811_v14 }
 0xe47   : > { %9037 = vmatprep.subr.bf16.mxu1 %v9812_v15 }
 0xe4a   : > { %9038 = vmatpush3.bf16.msra.mxu1 %v9812_v15 }
 0xe4b   : > { %9039 = vmatprep.subr.bf16.mxu1 %v9814_v18 }
 0xe4e   : > { %9040 = vmatpush3.bf16.msra.mxu1 %v9814_v18 }
 0xe4f   : > { %9041 = vmatprep.subr.bf16.mxu1 %v9816_v19 }
 0xe52   : > { %9042 = vmatpush3.bf16.msra.mxu1 %v9816_v19 }
 0xe53   : > { %9043 = vmatprep.subr.bf16.mxu1 %v9818_v20 }
 0xe56   : > { %9044 = vmatpush3.bf16.msra.mxu1 %v9818_v20 }
 0xe57   : > { %9045 = vmatprep.subr.bf16.mxu1 %v9820_v21 }
 0xe5a   : > { %9046 = vmatpush3.bf16.msra.mxu1 %v9820_v21 }
 0xe5b   : > { %9079 = vmatprep.subr.bf16.mxu1 %v10421_v34 }
 0xe5d   : > { %9048 = vmatmul.mubr.bf16.vlgmr.msra.gmra.mrb[72].mxu1 %v10847_v28 }
 0xe5e   : > { %9051 = vmatprep.mubr.bf16.mxu1 %v10849_v29  ;;  %9080 = vmatpush3.bf16.msra.mxu1 %v10833_v13 }
 0xe5f   : > { %9091 = vmatprep.subr.bf16.mxu1 %v10421_v34 }
 0xe65   : > { %9052 = vmatmul.mubr.bf16.gmra.mrb[76].mxu1 %v10858_v33 }
 0xe66   : > { %9081 = vmatprep.mubr.msk.bf16.mxu1 %vm10422_vm0, %v10421_v34 }
 0xf10   : > { %v3137_v22 = vpop.f32.mrb[68].mxu1 }
 0xf11   : > { %v3143_v23 = vpack.c.bf16 %v3137_v22, %v3137_v22  ;;  %v9003_v24 = vpop.f32.mrb[69].mxu1 }
 0xf12   : > { %v3140_v26 = vpop.f32.mrb[70].mxu1 }
 0xf13   : > { %v9004_v27 = vpop.f32.mrb[71].mxu1  ;;  %9008 = vmatmul.mubr.msk.bf16.vlgmr.msra.gmra.mrb[80].mxu0 %vm799_vm1, %v3143_v23 }
 0xf14   : > { %9012 = vmatpush3.bf16.msra.mxu0 %v9813_v16  ;;  %9027 = vmatprep.mubr.bf16.mxu0 %v10838_v17 }
 0xf15   : > { %9013 = vmatprep.subr.bf16.mxu0 %v9815_v25 }
 0xf18   : > { %9014 = vmatpush3.bf16.msra.mxu0 %v9815_v25 }
 0xf19   : > { %9015 = vmatprep.subr.bf16.mxu0 %v9817_v31 }
 0xf1c   : > { %9016 = vmatpush3.bf16.msra.mxu0 %v9817_v31 }
 0xf1d   : > { %9017 = vmatprep.subr.bf16.mxu0 %v9819_v32 }
 0xf20   : > { %9018 = vmatpush3.bf16.msra.mxu0 %v9819_v32 }
 0xf21   : > { %9019 = vmatprep.subr.bf16.mxu0 %v9821_v35 }
 0xf24   : > { %9020 = vmatpush3.bf16.msra.mxu0 %v9821_v35 }
 0xf25   : > { %9021 = vmatprep.subr.bf16.mxu0 %v9822_v36 }
 0xf28   : > { %9022 = vmatpush3.bf16.msra.mxu0 %v9822_v36 }
 0xf29   : > { %9023 = vmatprep.subr.bf16.mxu0 %v9823_v37 }
 0xf2c   : > { %9024 = vmatpush3.bf16.msra.mxu0 %v9823_v37 }
 0xf2d   : > { %9025 = vmatprep.subr.bf16.mxu0 %v9824_v38 }
 0xf30   : > { %9026 = vmatpush3.bf16.msra.mxu0 %v9824_v38  ;;  %v9049_v41 = vpop.f32.mrb[72].mxu1 }
 0xf31   : > { %9055 = vmatprep.subr.bf16.mxu0 %v10421_v34  ;;  %v3435_v42 = vadd.f32 %v9049_v41, %v8028_v39  ;;  %v3426_v43 = vpop.f32.mrb[73].mxu1 }
 0xf32   : > { %v3427_v44 = vadd.f32 %v8028_v39, %v3426_v43  ;;  %v9050_v45 = vpop.f32.mrb[74].mxu1 }
 0xf33   : > { %9028 = vmatmul.mubr.bf16.vlgmr.msra.gmra.mrb[84].mxu0 %v10851_v30  ;;  %v3438_v46 = vadd.f32 %v9050_v45, %v8028_v39  ;;  %v3429_v47 = vpop.f32.mrb[75].mxu1 }
 0xf34   : > { %9057 = vmatprep.mubr.msk.bf16.mxu0 %vm10422_vm0, %v10421_v34  ;;  %v3430_v48 = vadd.f32 %v8028_v39, %v3429_v47 }
 0xf35   : > { %v3470_v50 = vpack.c.bf16 %v3438_v46, %v3435_v42 }
 0xf36   : > { %v3469_v51 = vpack.c.bf16 %v3430_v48, %v3427_v44 }
 0xf37   : > { %v3523_v10 = vsel %vm799_vm1, %v3470_v50, 0 }
 0xf38   : > { %v3477_v52 = vsel %vm799_vm1, %v3469_v51, 0  ;;  %v9053_v53 = vpop.f32.mrb[76].mxu1 }
 0xf39   : > { %9056 = vmatpush3.bf16.xpose.msra.mxu0 %v3477_v52  ;;  %v3442_v54 = vpop.f32.mrb[77].mxu1  ;;  %v3451_v56 = vadd.f32 %v9053_v53, %v8028_v39 }
 0xf3a   : > { %9061 = vmatprep.subr.bf16.mxu0 %v10421_v34  ;;  %v9054_v55 = vpop.f32.mrb[78].mxu1  ;;  %v3443_v57 = vadd.f32 %v8028_v39, %v3442_v54 }
 0xf3b   : > { %v3454_v58 = vadd.f32 %v9054_v55, %v8028_v39  ;;  %v3445_v59 = vpop.f32.mrb[79].mxu1 }
 0xf3c   : > { %v3446_v60 = vadd.f32 %v8028_v39, %v3445_v59 }
 0xf3d   : > { %v3472_v61 = vpack.c.bf16 %v3454_v58, %v3451_v56 }
 0xf3e   : > { %v3471_v62 = vpack.c.bf16 %v3446_v60, %v3443_v57 }
 0xf3f   : > { %v3615_v16 = vsel %vm799_vm1, %v3472_v61, 0 }
 0xf40   : > { %v3569_v12 = vsel %vm799_vm1, %v3471_v62, 0 }
 0xfe6   : > { %v3190_v63 = vpop.f32.mrb[80].mxu0 }
 0xfe7   : > { %v11107_v0 = vadd.f32 %v3190_v63, %v11029_v40  ;;  %v9009_v1 = vpop.f32.mrb[81].mxu0 }
 0xfe8   : > { %v3193_v2 = vpop.f32.mrb[82].mxu0 }
 0xfe9   : > { %v9010_v3 = vpop.f32.mrb[83].mxu0 }
0x1006   : > { %v9029_v4 = vpop.f32.mrb[84].mxu0 }
0x1007   : > { %v3304_v5 = vpop.f32.mrb[85].mxu0  ;;  %v3313_v14 = vadd.f32 %v9029_v4, %v8019_v49 }
0x1008   : > { %v3305_v6 = vadd.f32 %v8019_v49, %v3304_v5  ;;  %v9030_v7 = vpop.f32.mrb[86].mxu0 }
0x1009   : > { %v3307_v8 = vpop.f32.mrb[87].mxu0  ;;  %v8246_v15 = vpack.c.bf16 %v3313_v14, %v3313_v14  ;;  %v3316_v18 = vadd.f32 %v9030_v7, %v8019_v49 }
0x100a   : > { %v8244_v9 = vpack.c.bf16 %v3305_v6, %v3305_v6  ;;  %v3308_v40 = vadd.f32 %v8019_v49, %v3307_v8 }
0x100b   : > { %v8247_v19 = vpack.c.bf16 %v3316_v18, %v3316_v18 }
0x100c   : > { %9058 = vmatmul.mubr.msk.bf16.vlgmr.msra.gmra.mrb[88].mxu0 %vm799_vm1, %v8244_v9  ;;  %v8245_v11 = vpack.c.bf16 %v3308_v40, %v3308_v40 }
0x100d   : > { %9062 = vmatpush3.bf16.xpose.msra.mxu0 %v3523_v10  ;;  %9063 = vmatprep.mubr.msk.bf16.mxu0 %vm10422_vm0, %v10421_v34 }
0x100e   : > { %9067 = vmatprep.subr.bf16.mxu0 %v10421_v34 }
0x1014   : > { %9064 = vmatmul.mubr.msk.bf16.vlgmr.msra.gmra.mrb[92].mxu0 %vm799_vm1, %v8245_v11 }
0x1015   : > { %9068 = vmatpush3.bf16.xpose.msra.mxu0 %v3569_v12  ;;  %9069 = vmatprep.mubr.msk.bf16.mxu0 %vm10422_vm0, %v10421_v34 }
0x1016   : > { %9073 = vmatprep.subr.bf16.mxu0 %v10421_v34 }
0x101c   : > { %9070 = vmatmul.mubr.msk.bf16.vlgmr.msra.gmra.mrb[96].mxu0 %vm799_vm1, %v8246_v15 }
0x101d   : > { %9074 = vmatpush3.bf16.xpose.msra.mxu0 %v3615_v16  ;;  %9075 = vmatprep.mubr.msk.bf16.mxu0 %vm10422_vm0, %v10421_v34 }
0x101e   : > { %9085 = vmatprep.subr.bf16.mxu0 %v10421_v34 }
0x1024   : > { %9076 = vmatmul.mubr.msk.bf16.vlgmr.msra.gmra.mrb[100].mxu0 %vm799_vm1, %v8247_v19 }
0x1025   : > { %9086 = vmatpush3.bf16.msra.mxu0 %v10847_v28  ;;  %9087 = vmatprep.mubr.msk.bf16.mxu0 %vm10422_vm0, %v10421_v34 }
0x1026   : > { %9097 = vmatprep.subr.bf16.mxu0 %v10421_v34 }
0x10df   : > { %v3513_v20 = vpop.f32.mrb[88].mxu0 }
0x10e0   : > { %v9059_v21 = vpop.f32.mrb[89].mxu0  ;;  %v3657_v22 = vsel %vm799_vm1, %v3513_v20, -inf }
0x10e1   : > { %3658 = vmax.xlane.f32.xlu0 %v3657_v22  ;;  %v3516_v23 = vpop.f32.mrb[90].mxu0 }
0x10e2   : > { %v9060_v24 = vpop.f32.mrb[91].mxu0 }
0x10e7   : > { %v3559_v25 = vpop.f32.mrb[92].mxu0 }
0x10e8   : > { %v9065_v26 = vpop.f32.mrb[93].mxu0  ;;  %v3660_v27 = vsel %vm799_vm1, %v3559_v25, -inf }
0x10e9   : > { %3661 = vmax.xlane.f32.xlu1 %v3660_v27  ;;  %v3562_v31 = vpop.f32.mrb[94].mxu0 }
0x10ea   : > { %v9066_v32 = vpop.f32.mrb[95].mxu0 }
0x10ef   : > { %v3605_v35 = vpop.f32.mrb[96].mxu0 }
0x10f0   : > { %v9071_v36 = vpop.f32.mrb[97].mxu0  ;;  %v3663_v37 = vsel %vm799_vm1, %v3605_v35, -inf }
0x10f1   : > { %3664 = vmax.xlane.f32.xlu0 %v3663_v37  ;;  %v3608_v38 = vpop.f32.mrb[98].mxu0 }
0x10f2   : > { %v9072_v39 = vpop.f32.mrb[99].mxu0 }
0x10f7   : > { %v3651_v41 = vpop.f32.mrb[100].mxu0 }
0x10f8   : > { %v9077_v42 = vpop.f32.mrb[101].mxu0  ;;  %v3666_v43 = vsel %vm799_vm1, %v3651_v41, -inf }
0x10f9   : > { %3667 = vmax.xlane.f32.xlu1 %v3666_v43  ;;  %v3654_v44 = vpop.f32.mrb[102].mxu0 }
0x10fa   : > { %v9078_v45 = vpop.f32.mrb[103].mxu0 }
0x116e   : > { %v3659_v46 = vpop.xlane.xlu0 %3658 }
0x116f   : > { %v3669_v47 = vsub.f32 %v3513_v20, %v3659_v46 }
0x1171   : > { %v3673_v48 = vmul.f32 1.442695, %v3669_v47 }
0x1173   : > { %9982 = vpow2.f32 %v3673_v48 }
0x1176   : > { %v3662_v50 = vpop.xlane.xlu1 %3661 }
0x1177   : > { %v3670_v51 = vsub.f32 %v3559_v25, %v3662_v50 }
0x1179   : > { %v3675_v52 = vmul.f32 1.442695, %v3670_v51 }
0x117b   : > { %9984 = vpow2.f32 %v3675_v52 }
0x117d   : > { %v9983_v53 = vpop.eup %9982 }
0x117e   : > { %v3665_v54 = vpop.xlane.xlu0 %3664  ;;  %v3681_v55 = vsel %vm799_vm1, %v9983_v53, 0.0 }
0x117f   : > { %v3671_v56 = vsub.f32 %v3605_v35, %v3665_v54  ;;  %3682 = vadd.xlane.f32.xlu0 %v3681_v55 }
0x1181   : > { %v3677_v57 = vmul.f32 1.442695, %v3671_v56 }
0x1183   : > { %9986 = vpow2.f32 %v3677_v57 }
0x1185   : > { %v9985_v58 = vpop.eup %9984 }
0x1186   : > { %v3668_v59 = vpop.xlane.xlu1 %3667  ;;  %v3684_v60 = vsel %vm799_vm1, %v9985_v58, 0.0 }
0x1187   : > { %v3672_v61 = vsub.f32 %v3651_v41, %v3668_v59  ;;  %3685 = vadd.xlane.f32.xlu1 %v3684_v60  ;;  %v9825_v59 = vld [vmem:[#allocation13 + $0xc0] sm:$0xff]   ;;  %v9826_v60 = vld [vmem:[#allocation13 + $0xc8] sm:$0xff]  }
0x1189   : > { %v3679_v62 = vmul.f32 1.442695, %v3672_v61  ;;  %v9827_v61 = vld [vmem:[#allocation13 + $0xd0] sm:$0xff]  }
0x118b   : > { %9988 = vpow2.f32 %v3679_v62  ;;  %v9828_v62 = vld [vmem:[#allocation13 + $0xd8] sm:$0xff]  }
0x118d   : > { %v9987_v63 = vpop.eup %9986 }
0x118e   : > { %v3687_v1 = vsel %vm799_vm1, %v9987_v63, 0.0 }
0x118f   : > { %3688 = vadd.xlane.f32.xlu0 %v3687_v1  ;;  %v9830_v1 = vld [vmem:[#allocation13 + $0xe8] sm:$0xff]  }
0x1195   : > { %v9989_v2 = vpop.eup %9988 }
0x1196   : > { %v3690_v3 = vsel %vm799_vm1, %v9989_v2, 0.0 }
0x1197   : > { %3691 = vadd.xlane.f32.xlu1 %v3690_v3  ;;  %v9832_v3 = vld [vmem:[#allocation13 + $0xf8] sm:$0xff]  }
0x120c   : > { %v3683_v49 = vpop.xlane.xlu0 %3682 }
0x120d   : > { %9990 = vrcp.f32 %v3683_v49  ;;  %v9833_v49 = vld [vmem:[#allocation10 + $0x100] sm:$0xff]  }
0x1214   : > { %v3686_v4 = vpop.xlane.xlu1 %3685 }
0x1215   : > { %9992 = vrcp.f32 %v3686_v4  ;;  %v9835_v4 = vld [vmem:[#allocation14 + $0x18] sm:$0xff]  }
0x1217   : > { %v9991_v5 = vpop.eup %9990 }
0x1218   : > { %v3697_v6 = vmul.f32 %v9991_v5, %v9983_v53 }
0x121a   : > { %v3701_v7 = vsel %vm799_vm1, %v3697_v6, 0.0 }
0x121b   : > { %v3702_v8 = vrot.slane %v3701_v7, 4 }
0x121c   : > { %v3689_v9 = vpop.xlane.xlu0 %3688 }
0x121d   : > { %v3703_v10 = vadd.f32 %v3702_v8, %v3701_v7  ;;  %9994 = vrcp.f32 %v3689_v9 }
0x121f   : > { %v9993_v40 = vpop.eup %9992  ;;  %v3704_v11 = vrot.slane %v3703_v10, 2 }
0x1220   : > { %v3698_v12 = vmul.f32 %v9993_v40, %v9985_v58 }
0x1221   : > { %v3705_v14 = vadd.f32 %v3704_v11, %v3703_v10 }
0x1222   : > { %v3708_v15 = vsel %vm799_vm1, %v3698_v12, 0.0 }
0x1223   : > { %v3706_v16 = vrot.slane %v3705_v14, 1  ;;  %v3709_v18 = vrot.slane %v3708_v15, 4 }
0x1224   : > { %v3692_v19 = vpop.xlane.xlu1 %3691 }
0x1225   : > { %v3710_v20 = vadd.f32 %v3709_v18, %v3708_v15  ;;  %9996 = vrcp.f32 %v3692_v19  ;;  %v3707_v21 = vadd.f32 %v3706_v16, %v3705_v14 }
0x1227   : > { %v9995_v22 = vpop.eup %9994  ;;  %v3711_v23 = vrot.slane %v3710_v20, 2  ;;  %v3729_v24 = vmul.f32 0.125, %v3707_v21 }
0x1228   : > { %v3699_v25 = vmul.f32 %v9995_v22, %v9987_v63  ;;  %v9829_v63 = vld [vmem:[#allocation13 + $0xe0] sm:$0xff]  }
0x1229   : > { %v3733_v26 = vpack.c.bf16 %v3729_v24, %v3729_v24  ;;  %v3712_v27 = vadd.f32 %v3711_v23, %v3710_v20 }
0x122a   : > { %v3715_v31 = vsel %vm799_vm1, %v3699_v25, 0.0 }
0x122b   : > { %v3716_v32 = vrot.slane %v3715_v31, 4  ;;  %9082 = vmatmul.mubr.msk.bf16.vlgmr.msra.gmra.mrb[80].mxu1 %vm799_vm1, %v3733_v26  ;;  %v3713_v35 = vrot.slane %v3712_v27, 1 }
0x122c   : > { %9092 = vmatpush3.bf16.msra.mxu1 %v10849_v29  ;;  %9093 = vmatprep.mubr.msk.bf16.mxu1 %vm10422_vm0, %v10421_v34 }
0x122d   : > { %v3717_v36 = vadd.f32 %v3716_v32, %v3715_v31  ;;  %v3714_v37 = vadd.f32 %v3713_v35, %v3712_v27  ;;  %9103 = vmatprep.subr.bf16.mxu1 %v10421_v34 }
0x122f   : > { %v9997_v38 = vpop.eup %9996  ;;  %v3718_v39 = vrot.slane %v3717_v36, 2  ;;  %v3730_v41 = vmul.f32 0.125, %v3714_v37 }
0x1230   : > { %v3700_v42 = vmul.f32 %v9997_v38, %v9989_v2  ;;  %v9831_v2 = vld [vmem:[#allocation13 + $0xf0] sm:$0xff]  }
0x1231   : > { %v3734_v43 = vpack.c.bf16 %v3730_v41, %v3730_v41  ;;  %v3719_v44 = vadd.f32 %v3718_v39, %v3717_v36 }
0x1232   : > { %v3722_v45 = vsel %vm799_vm1, %v3700_v42, 0.0 }
0x1233   : > { %v3723_v46 = vrot.slane %v3722_v45, 4  ;;  %9088 = vmatmul.mubr.msk.bf16.vlgmr.msra.gmra.mrb[104].mxu0 %vm799_vm1, %v3734_v43  ;;  %v3720_v47 = vrot.slane %v3719_v44, 1  ;;  %v9834_v43 = vld [vmem:[#allocation10 + $0x108] sm:$0xff]  }
0x1234   : > { %9098 = vmatpush3.bf16.msra.mxu0 %v10858_v33  ;;  %9099 = vmatprep.mubr.msk.bf16.mxu0 %vm10422_vm0, %v10421_v34 }
0x1235   : > { %v3724_v48 = vadd.f32 %v3723_v46, %v3722_v45  ;;  %v3721_v50 = vadd.f32 %v3720_v47, %v3719_v44  ;;  %9123 = vmatprep.subr.bf16.mxu0 %v10421_v34  ;;  %v9836_v44 = vld [vmem:[#allocation10 + $0x110] sm:$0xff]   ;;  %v9837_v45 = vld [vmem:[#allocation10 + $0x118] sm:$0xff]   ;;  %v9839_v47 = vld [vmem:[#allocation10 + $0x120] sm:$0xff]  }
0x1236   : > { %v9838_v46 = vld [vmem:[#allocation7 + $0x100] sm:$0xff]  }
0x1237   : > { %v3725_v51 = vrot.slane %v3724_v48, 2  ;;  %v3731_v52 = vmul.f32 0.125, %v3721_v50  ;;  %v9843_v50 = vld [vmem:[#allocation10 + $0x130] sm:$0xff]  }
0x1239   : > { %v3735_v53 = vpack.c.bf16 %v3731_v52, %v3731_v52  ;;  %v3726_v54 = vadd.f32 %v3725_v51, %v3724_v48  ;;  %v9841_v48 = vld [vmem:[#allocation10 + $0x128] sm:$0xff]   ;;  %v9845_v51 = vld [vmem:[#allocation10 + $0x138] sm:$0xff]  }
0x123b   : > { %9094 = vmatmul.mubr.msk.bf16.vlgmr.msra.gmra.mrb[84].mxu1 %vm799_vm1, %v3735_v53  ;;  %v3727_v55 = vrot.slane %v3726_v54, 1 }
0x123c   : > { %9119 = vmatprep.mubr.msk.bf16.mxu1 %vm10422_vm0, %v10421_v34  ;;  %9104 = vmatpush3.bf16.msra.mxu1 %v9825_v59  ;;  %v9844_v59 = vld [vmem:[#allocation7 + $0x118] sm:$0xff]  }
0x123d   : > { %v3728_v56 = vadd.f32 %v3727_v55, %v3726_v54  ;;  %9105 = vmatprep.subr.bf16.mxu1 %v10421_v34  ;;  %v9840_v55 = vld [vmem:[#allocation7 + $0x108] sm:$0xff]  }
0x123f   : > { %v3732_v57 = vmul.f32 0.125, %v3728_v56 }
0x1240   : > { %9106 = vmatpush3.bf16.msra.mxu1 %v9826_v60  ;;  %v9846_v60 = vld [vmem:[#allocation7 + $0x120] sm:$0xff]  }
0x1241   : > { %v3736_v58 = vpack.c.bf16 %v3732_v57, %v3732_v57  ;;  %9107 = vmatprep.subr.bf16.mxu1 %v10421_v34 }
0x1243   : > { %9100 = vmatmul.mubr.msk.bf16.vlgmr.msra.gmra.mrb[108].mxu0 %vm799_vm1, %v3736_v58  ;;  %v9842_v58 = vld [vmem:[#allocation7 + $0x110] sm:$0xff]  }
0x1244   : > { %9125 = vmatprep.mubr.msk.bf16.mxu0 %vm10422_vm0, %v10421_v34  ;;  %9108 = vmatpush3.bf16.msra.mxu1 %v9827_v61  ;;  %v9847_v61 = vld [vmem:[#allocation7 + $0x128] sm:$0xff]  }
0x1245   : > { %9109 = vmatprep.subr.bf16.mxu1 %v10421_v34  ;;  %9124 = vmatpush3.bf16.msra.mxu0 %v9835_v4 }
0x1246   : > { %9129 = vmatprep.subr.bf16.mxu0 %v9838_v46 }
0x1248   : > { %9110 = vmatpush3.bf16.msra.mxu1 %v9828_v62  ;;  %v9848_v62 = vld [vmem:[#allocation7 + $0x130] sm:$0xff]  }
0x1249   : > { %9111 = vmatprep.subr.bf16.mxu1 %v10421_v34 }
0x124c   : > { %9112 = vmatpush3.bf16.msra.mxu1 %v9829_v63  ;;  %v9849_v63 = vld [vmem:[#allocation7 + $0x138] sm:$0xff]  }
0x124d   : > { %9113 = vmatprep.subr.bf16.mxu1 %v10421_v34 }
0x1250   : > { %9114 = vmatpush3.bf16.msra.mxu1 %v9830_v1  ;;  %v8068_v1 = vld [vmem:[#allocation11 + $0x4] ss:$0 sm:$0xff] }
0x1251   : > { %9115 = vmatprep.subr.bf16.mxu1 %v10421_v34 }
0x1254   : > { %9116 = vmatpush3.bf16.msra.mxu1 %v9831_v2 }
0x1255   : > { %9117 = vmatprep.subr.bf16.mxu1 %v10421_v34 }
0x1258   : > { %9118 = vmatpush3.bf16.msra.mxu1 %v9832_v3 }
0x1259   : > { %9149 = vmatprep.subr.bf16.mxu1 %v9833_v49 }
0x12fe   : > { %v3774_v5 = vpop.f32.mrb[80].mxu1 }
0x12ff   : > { %v9083_v6 = vpop.f32.mrb[81].mxu1  ;;  %v3909_v10 = vpack.c.bf16 %v3774_v5, %v3774_v5 }
0x1300   : > { %v3777_v7 = vpop.f32.mrb[82].mxu1 }
0x1301   : > { %v9084_v8 = vpop.f32.mrb[83].mxu1  ;;  %v3934_v16 = vunpack.c.l.b16 %v3909_v10 }
0x1306   : > { %v3817_v9 = vpop.f32.mrb[104].mxu0 }
0x1307   : > { %v3910_v40 = vpack.c.bf16 %v3817_v9, %v3817_v9  ;;  %v9089_v11 = vpop.f32.mrb[105].mxu0 }
0x1308   : > { %v3820_v12 = vpop.f32.mrb[106].mxu0 }
0x1309   : > { %v3935_v14 = vunpack.c.l.b16 %v3910_v40  ;;  %v9090_v15 = vpop.f32.mrb[107].mxu0 }
0x130b   : > { %v3938_v18 = vrot.slane %v3935_v14, 7 }
0x130d   : > { %v3939_v19 = vsel %vm1266_vm2, %v3938_v18, %v3934_v16 }
0x130e   : > { %v3860_v20 = vpop.f32.mrb[84].mxu1 }
0x130f   : > { %v3911_v21 = vpack.c.bf16 %v3860_v20, %v3860_v20  ;;  %v9095_v22 = vpop.f32.mrb[85].mxu1 }
0x1310   : > { %v3863_v23 = vpop.f32.mrb[86].mxu1 }
0x1311   : > { %v3936_v24 = vunpack.c.l.b16 %v3911_v21  ;;  %v9096_v25 = vpop.f32.mrb[87].mxu1 }
0x1313   : > { %v3940_v26 = vrot.slane %v3936_v24, 6 }
0x1315   : > { %v3941_v27 = vsel %vm1269_vm3, %v3940_v26, %v3939_v19 }
0x1316   : > { %v3903_v31 = vpop.f32.mrb[108].mxu0 }
0x1317   : > { %v3912_v32 = vpack.c.bf16 %v3903_v31, %v3903_v31  ;;  %v9101_v35 = vpop.f32.mrb[109].mxu0  ;;  %v8059_v31 = vld [vmem:[#allocation8 + $0x4] ss:$0 sm:$0xff] }
0x1318   : > { %v3906_v36 = vpop.f32.mrb[110].mxu0 }
0x1319   : > { %v3937_v37 = vunpack.c.l.b16 %v3912_v32  ;;  %v9102_v38 = vpop.f32.mrb[111].mxu0 }
0x131b   : > { %v3942_v39 = vrot.slane %v3937_v37, 5 }
0x131d   : > { %v3943_v41 = vsel %vm1272_vm4, %v3942_v39, %v3941_v27 }
0x131e   : > { %v3944_v42 = vpack.c.b16 %v3943_v41, %v3943_v41 }
0x1320   : > { %9120 = vmatmul.mubr.bf16.vlgmr.msra.gmra.mrb[88].mxu1 %v3944_v42 }
0x1321   : > { %9150 = vmatpush3.bf16.msra.mxu1 %v9833_v49  ;;  %9165 = vmatprep.mubr.bf16.mxu1 %v10833_v13 }
0x1322   : > { %9151 = vmatprep.subr.bf16.mxu1 %v9834_v43 }
0x1325   : > { %9152 = vmatpush3.bf16.msra.mxu1 %v9834_v43 }
0x1326   : > { %9153 = vmatprep.subr.bf16.mxu1 %v9836_v44 }
0x1329   : > { %9154 = vmatpush3.bf16.msra.mxu1 %v9836_v44 }
0x132a   : > { %9155 = vmatprep.subr.bf16.mxu1 %v9837_v45 }
0x132d   : > { %9156 = vmatpush3.bf16.msra.mxu1 %v9837_v45 }
0x132e   : > { %9157 = vmatprep.subr.bf16.mxu1 %v9839_v47 }
0x1331   : > { %9158 = vmatpush3.bf16.msra.mxu1 %v9839_v47 }
0x1332   : > { %9159 = vmatprep.subr.bf16.mxu1 %v9841_v48 }
0x1335   : > { %9160 = vmatpush3.bf16.msra.mxu1 %v9841_v48 }
0x1336   : > { %9161 = vmatprep.subr.bf16.mxu1 %v9843_v50 }
0x1339   : > { %9162 = vmatpush3.bf16.msra.mxu1 %v9843_v50 }
0x133a   : > { %9163 = vmatprep.subr.bf16.mxu1 %v9845_v51 }
0x133d   : > { %9164 = vmatpush3.bf16.msra.mxu1 %v9845_v51 }
0x133e   : > { %9197 = vmatprep.subr.bf16.mxu1 %v10421_v34 }
0x1340   : > { %9166 = vmatmul.mubr.bf16.vlgmr.msra.gmra.mrb[92].mxu1 %v10847_v28 }
0x1341   : > { %9169 = vmatprep.mubr.bf16.mxu1 %v10849_v29  ;;  %9198 = vmatpush3.bf16.msra.mxu1 %v10833_v13 }
0x1342   : > { %9209 = vmatprep.subr.bf16.mxu1 %v10421_v34 }
0x1348   : > { %9170 = vmatmul.mubr.bf16.gmra.mrb[96].mxu1 %v10858_v33 }
0x1349   : > { %9199 = vmatprep.mubr.msk.bf16.mxu1 %vm10422_vm0, %v10421_v34 }
0x13f3   : > { %v4028_v52 = vpop.f32.mrb[88].mxu1 }
0x13f4   : > { %v4034_v53 = vpack.c.bf16 %v4028_v52, %v4028_v52  ;;  %v9121_v54 = vpop.f32.mrb[89].mxu1 }
0x13f5   : > { %v4031_v56 = vpop.f32.mrb[90].mxu1 }
0x13f6   : > { %v9122_v57 = vpop.f32.mrb[91].mxu1  ;;  %9126 = vmatmul.mubr.msk.bf16.vlgmr.msra.gmra.mrb[112].mxu0 %vm799_vm1, %v4034_v53 }
0x13f7   : > { %9130 = vmatpush3.bf16.msra.mxu0 %v9838_v46  ;;  %9145 = vmatprep.mubr.bf16.mxu0 %v10838_v17 }
0x13f8   : > { %9131 = vmatprep.subr.bf16.mxu0 %v9840_v55 }
0x13fb   : > { %9132 = vmatpush3.bf16.msra.mxu0 %v9840_v55 }
0x13fc   : > { %9133 = vmatprep.subr.bf16.mxu0 %v9842_v58 }
0x13ff   : > { %9134 = vmatpush3.bf16.msra.mxu0 %v9842_v58 }
0x1400   : > { %9135 = vmatprep.subr.bf16.mxu0 %v9844_v59 }
0x1403   : > { %9136 = vmatpush3.bf16.msra.mxu0 %v9844_v59 }
0x1404   : > { %9137 = vmatprep.subr.bf16.mxu0 %v9846_v60 }
0x1407   : > { %9138 = vmatpush3.bf16.msra.mxu0 %v9846_v60 }
0x1408   : > { %9139 = vmatprep.subr.bf16.mxu0 %v9847_v61 }
0x140b   : > { %9140 = vmatpush3.bf16.msra.mxu0 %v9847_v61 }
0x140c   : > { %9141 = vmatprep.subr.bf16.mxu0 %v9848_v62 }
0x140f   : > { %9142 = vmatpush3.bf16.msra.mxu0 %v9848_v62 }
0x1410   : > { %9143 = vmatprep.subr.bf16.mxu0 %v9849_v63 }
0x1413   : > { %9144 = vmatpush3.bf16.msra.mxu0 %v9849_v63  ;;  %v9167_v2 = vpop.f32.mrb[92].mxu1 }
0x1414   : > { %9173 = vmatprep.subr.bf16.mxu0 %v10421_v34  ;;  %v4326_v3 = vadd.f32 %v9167_v2, %v8068_v1  ;;  %v4317_v49 = vpop.f32.mrb[93].mxu1 }
0x1415   : > { %v4318_v4 = vadd.f32 %v8068_v1, %v4317_v49  ;;  %v9168_v5 = vpop.f32.mrb[94].mxu1 }
0x1416   : > { %9146 = vmatmul.mubr.bf16.vlgmr.msra.gmra.mrb[116].mxu0 %v10851_v30  ;;  %v4329_v6 = vadd.f32 %v9168_v5, %v8068_v1  ;;  %v4320_v7 = vpop.f32.mrb[95].mxu1 }
0x1417   : > { %9175 = vmatprep.mubr.msk.bf16.mxu0 %vm10422_vm0, %v10421_v34  ;;  %v4321_v8 = vadd.f32 %v8068_v1, %v4320_v7 }
0x1418   : > { %v4361_v9 = vpack.c.bf16 %v4329_v6, %v4326_v3 }
0x1419   : > { %v4360_v10 = vpack.c.bf16 %v4321_v8, %v4318_v4 }
0x141a   : > { %v4414_v41 = vsel %vm799_vm1, %v4361_v9, 0 }
0x141b   : > { %v4368_v40 = vsel %vm799_vm1, %v4360_v10, 0  ;;  %v9171_v11 = vpop.f32.mrb[96].mxu1 }
0x141c   : > { %9174 = vmatpush3.bf16.xpose.msra.mxu0 %v4368_v40  ;;  %v4333_v12 = vpop.f32.mrb[97].mxu1  ;;  %v4342_v15 = vadd.f32 %v9171_v11, %v8068_v1 }
0x141d   : > { %9179 = vmatprep.subr.bf16.mxu0 %v10421_v34  ;;  %v9172_v14 = vpop.f32.mrb[98].mxu1  ;;  %v4334_v16 = vadd.f32 %v8068_v1, %v4333_v12 }
0x141e   : > { %v4345_v18 = vadd.f32 %v9172_v14, %v8068_v1  ;;  %v4336_v19 = vpop.f32.mrb[99].mxu1 }
0x141f   : > { %v4337_v20 = vadd.f32 %v8068_v1, %v4336_v19 }
0x1420   : > { %v4363_v21 = vpack.c.bf16 %v4345_v18, %v4342_v15 }
0x1421   : > { %v4362_v22 = vpack.c.bf16 %v4337_v20, %v4334_v16 }
0x1422   : > { %v4506_v46 = vsel %vm799_vm1, %v4363_v21, 0 }
0x1423   : > { %v4460_v43 = vsel %vm799_vm1, %v4362_v22, 0 }
0x14c9   : > { %v4081_v23 = vpop.f32.mrb[112].mxu0 }
0x14ca   : > { %v11185_v24 = vadd.f32 %v4081_v23, %v11107_v0  ;;  %v9127_v25 = vpop.f32.mrb[113].mxu0 }
0x14cb   : > { %v4084_v26 = vpop.f32.mrb[114].mxu0 }
0x14cc   : > { %v9128_v27 = vpop.f32.mrb[115].mxu0 }
0x14e9   : > { %v9147_v32 = vpop.f32.mrb[116].mxu0 }
0x14ea   : > { %v4195_v35 = vpop.f32.mrb[117].mxu0  ;;  %v4204_v44 = vadd.f32 %v9147_v32, %v8059_v31 }
0x14eb   : > { %v4196_v36 = vadd.f32 %v8059_v31, %v4195_v35  ;;  %v9148_v37 = vpop.f32.mrb[118].mxu0 }
0x14ec   : > { %v4198_v38 = vpop.f32.mrb[119].mxu0  ;;  %v8250_v45 = vpack.c.bf16 %v4204_v44, %v4204_v44  ;;  %v4207_v47 = vadd.f32 %v9148_v37, %v8059_v31 }
0x14ed   : > { %v8248_v39 = vpack.c.bf16 %v4196_v36, %v4196_v36  ;;  %v4199_v0 = vadd.f32 %v8059_v31, %v4198_v38 }
0x14ee   : > { %v8251_v48 = vpack.c.bf16 %v4207_v47, %v4207_v47 }
0x14ef   : > { %9176 = vmatmul.mubr.msk.bf16.vlgmr.msra.gmra.mrb[120].mxu0 %vm799_vm1, %v8248_v39  ;;  %v8249_v42 = vpack.c.bf16 %v4199_v0, %v4199_v0 }
0x14f0   : > { %9180 = vmatpush3.bf16.xpose.msra.mxu0 %v4414_v41  ;;  %9181 = vmatprep.mubr.msk.bf16.mxu0 %vm10422_vm0, %v10421_v34 }
0x14f1   : > { %9185 = vmatprep.subr.bf16.mxu0 %v10421_v34 }
0x14f7   : > { %9182 = vmatmul.mubr.msk.bf16.vlgmr.msra.gmra.mrb[124].mxu0 %vm799_vm1, %v8249_v42 }
0x14f8   : > { %9186 = vmatpush3.bf16.xpose.msra.mxu0 %v4460_v43  ;;  %9187 = vmatprep.mubr.msk.bf16.mxu0 %vm10422_vm0, %v10421_v34 }
0x14f9   : > { %9191 = vmatprep.subr.bf16.mxu0 %v10421_v34 }
0x14ff   : > { %9188 = vmatmul.mubr.msk.bf16.vlgmr.msra.gmra.mrb[128].mxu0 %vm799_vm1, %v8250_v45 }
0x1500   : > { %9192 = vmatpush3.bf16.xpose.msra.mxu0 %v4506_v46  ;;  %9193 = vmatprep.mubr.msk.bf16.mxu0 %vm10422_vm0, %v10421_v34 }
0x1501   : > { %9203 = vmatprep.subr.bf16.mxu0 %v10421_v34 }
0x1507   : > { %9194 = vmatmul.mubr.msk.bf16.vlgmr.msra.gmra.mrb[132].mxu0 %vm799_vm1, %v8251_v48 }
0x1508   : > { %9204 = vmatpush3.bf16.msra.mxu0 %v10847_v28  ;;  %9205 = vmatprep.mubr.msk.bf16.mxu0 %vm10422_vm0, %v10421_v34 }
0x1509   : > { %9215 = vmatprep.subr.bf16.mxu0 %v10421_v34 }
0x15c2   : > { %v4404_v50 = vpop.f32.mrb[120].mxu0 }
0x15c3   : > { %v9177_v51 = vpop.f32.mrb[121].mxu0  ;;  %v4548_v52 = vsel %vm799_vm1, %v4404_v50, -inf }
0x15c4   : > { %4549 = vmax.xlane.f32.xlu0 %v4548_v52  ;;  %v4407_v53 = vpop.f32.mrb[122].mxu0 }
0x15c5   : > { %v9178_v54 = vpop.f32.mrb[123].mxu0 }
0x15ca   : > { %v4450_v55 = vpop.f32.mrb[124].mxu0 }
0x15cb   : > { %v9183_v56 = vpop.f32.mrb[125].mxu0  ;;  %v4551_v57 = vsel %vm799_vm1, %v4450_v55, -inf }
0x15cc   : > { %4552 = vmax.xlane.f32.xlu1 %v4551_v57  ;;  %v4453_v58 = vpop.f32.mrb[126].mxu0 }
0x15cd   : > { %v9184_v59 = vpop.f32.mrb[127].mxu0 }
0x15d2   : > { %v4496_v60 = vpop.f32.mrb[128].mxu0 }
0x15d3   : > { %v9189_v61 = vpop.f32.mrb[129].mxu0  ;;  %v4554_v62 = vsel %vm799_vm1, %v4496_v60, -inf }
0x15d4   : > { %4555 = vmax.xlane.f32.xlu0 %v4554_v62  ;;  %v4499_v63 = vpop.f32.mrb[130].mxu0 }
0x15d5   : > { %v9190_v1 = vpop.f32.mrb[131].mxu0 }
0x15da   : > { %v4542_v2 = vpop.f32.mrb[132].mxu0 }
0x15db   : > { %v9195_v3 = vpop.f32.mrb[133].mxu0  ;;  %v4557_v49 = vsel %vm799_vm1, %v4542_v2, -inf }
0x15dc   : > { %4558 = vmax.xlane.f32.xlu1 %v4557_v49  ;;  %v4545_v4 = vpop.f32.mrb[134].mxu0 }
0x15dd   : > { %v9196_v5 = vpop.f32.mrb[135].mxu0 }
0x1651   : > { %v4550_v6 = vpop.xlane.xlu0 %4549 }
0x1652   : > { %v4560_v7 = vsub.f32 %v4404_v50, %v4550_v6 }
0x1654   : > { %v4564_v8 = vmul.f32 1.442695, %v4560_v7 }
0x1656   : > { %9998 = vpow2.f32 %v4564_v8 }
0x1659   : > { %v4553_v9 = vpop.xlane.xlu1 %4552 }
0x165a   : > { %v4561_v10 = vsub.f32 %v4450_v55, %v4553_v9 }
0x165c   : > { %v4566_v40 = vmul.f32 1.442695, %v4561_v10 }
0x165e   : > { %10000 = vpow2.f32 %v4566_v40 }
0x1660   : > { %v9999_v11 = vpop.eup %9998 }
0x1661   : > { %v4556_v12 = vpop.xlane.xlu0 %4555  ;;  %v4572_v14 = vsel %vm799_vm1, %v9999_v11, 0.0 }
0x1662   : > { %v4562_v15 = vsub.f32 %v4496_v60, %v4556_v12  ;;  %4573 = vadd.xlane.f32.xlu0 %v4572_v14 }
0x1664   : > { %v4568_v16 = vmul.f32 1.442695, %v4562_v15 }
0x1666   : > { %10002 = vpow2.f32 %v4568_v16 }
0x1668   : > { %v10001_v18 = vpop.eup %10000 }
0x1669   : > { %v4559_v19 = vpop.xlane.xlu1 %4558  ;;  %v4575_v20 = vsel %vm799_vm1, %v10001_v18, 0.0 }
0x166a   : > { %v4563_v21 = vsub.f32 %v4542_v2, %v4559_v19  ;;  %4576 = vadd.xlane.f32.xlu1 %v4575_v20  ;;  %v9850_v19 = vld [vmem:[#allocation13 + $0x100] sm:$0xff]   ;;  %v9851_v20 = vld [vmem:[#allocation13 + $0x108] sm:$0xff]  }
0x166c   : > { %v4570_v22 = vmul.f32 1.442695, %v4563_v21  ;;  %v9852_v21 = vld [vmem:[#allocation13 + $0x110] sm:$0xff]  }
0x166e   : > { %10004 = vpow2.f32 %v4570_v22  ;;  %v9853_v22 = vld [vmem:[#allocation13 + $0x118] sm:$0xff]  }
0x1670   : > { %v10003_v23 = vpop.eup %10002 }
0x1671   : > { %v4578_v25 = vsel %vm799_vm1, %v10003_v23, 0.0 }
0x1672   : > { %4579 = vadd.xlane.f32.xlu0 %v4578_v25  ;;  %v9855_v25 = vld [vmem:[#allocation13 + $0x128] sm:$0xff]  }
0x1678   : > { %v10005_v26 = vpop.eup %10004 }
0x1679   : > { %v4581_v27 = vsel %vm799_vm1, %v10005_v26, 0.0 }
0x167a   : > { %4582 = vadd.xlane.f32.xlu1 %v4581_v27  ;;  %v9857_v27 = vld [vmem:[#allocation13 + $0x138] sm:$0xff]  }
0x16ef   : > { %v4574_v31 = vpop.xlane.xlu0 %4573 }
0x16f0   : > { %10006 = vrcp.f32 %v4574_v31  ;;  %v9858_v31 = vld [vmem:[#allocation10 + $0x140] sm:$0xff]  }
0x16f7   : > { %v4577_v32 = vpop.xlane.xlu1 %4576 }
0x16f8   : > { %10008 = vrcp.f32 %v4577_v32  ;;  %v9860_v32 = vld [vmem:[#allocation14 + $0x20] sm:$0xff]  }
0x16fa   : > { %v10007_v35 = vpop.eup %10006 }
0x16fb   : > { %v4588_v36 = vmul.f32 %v10007_v35, %v9999_v11 }
0x16fd   : > { %v4592_v37 = vsel %vm799_vm1, %v4588_v36, 0.0 }
0x16fe   : > { %v4593_v38 = vrot.slane %v4592_v37, 4 }
0x16ff   : > { %v4580_v39 = vpop.xlane.xlu0 %4579 }
0x1700   : > { %v4594_v41 = vadd.f32 %v4593_v38, %v4592_v37  ;;  %10010 = vrcp.f32 %v4580_v39 }
0x1702   : > { %v10009_v0 = vpop.eup %10008  ;;  %v4595_v42 = vrot.slane %v4594_v41, 2 }
0x1703   : > { %v4589_v43 = vmul.f32 %v10009_v0, %v10001_v18 }
0x1704   : > { %v4596_v44 = vadd.f32 %v4595_v42, %v4594_v41 }
0x1705   : > { %v4599_v45 = vsel %vm799_vm1, %v4589_v43, 0.0 }
0x1706   : > { %v4597_v46 = vrot.slane %v4596_v44, 1  ;;  %v4600_v47 = vrot.slane %v4599_v45, 4 }
0x1707   : > { %v4583_v48 = vpop.xlane.xlu1 %4582 }
0x1708   : > { %v4601_v50 = vadd.f32 %v4600_v47, %v4599_v45  ;;  %10012 = vrcp.f32 %v4583_v48  ;;  %v4598_v51 = vadd.f32 %v4597_v46, %v4596_v44 }
0x170a   : > { %v10011_v52 = vpop.eup %10010  ;;  %v4602_v53 = vrot.slane %v4601_v50, 2  ;;  %v4620_v54 = vmul.f32 0.125, %v4598_v51 }
0x170b   : > { %v4590_v55 = vmul.f32 %v10011_v52, %v10003_v23  ;;  %v9854_v23 = vld [vmem:[#allocation13 + $0x120] sm:$0xff]  }
0x170c   : > { %v4624_v56 = vpack.c.bf16 %v4620_v54, %v4620_v54  ;;  %v4603_v57 = vadd.f32 %v4602_v53, %v4601_v50 }
0x170d   : > { %v4606_v58 = vsel %vm799_vm1, %v4590_v55, 0.0 }
0x170e   : > { %v4607_v59 = vrot.slane %v4606_v58, 4  ;;  %9200 = vmatmul.mubr.msk.bf16.vlgmr.msra.gmra.mrb[100].mxu1 %vm799_vm1, %v4624_v56  ;;  %v4604_v60 = vrot.slane %v4603_v57, 1 }
0x170f   : > { %9210 = vmatpush3.bf16.msra.mxu1 %v10849_v29  ;;  %9211 = vmatprep.mubr.msk.bf16.mxu1 %vm10422_vm0, %v10421_v34 }
0x1710   : > { %v4608_v61 = vadd.f32 %v4607_v59, %v4606_v58  ;;  %v4605_v62 = vadd.f32 %v4604_v60, %v4603_v57  ;;  %9221 = vmatprep.subr.bf16.mxu1 %v10421_v34 }
0x1712   : > { %v10013_v63 = vpop.eup %10012  ;;  %v4609_v1 = vrot.slane %v4608_v61, 2  ;;  %v4621_v2 = vmul.f32 0.125, %v4605_v62 }
0x1713   : > { %v4591_v3 = vmul.f32 %v10013_v63, %v10005_v26  ;;  %v9856_v26 = vld [vmem:[#allocation13 + $0x130] sm:$0xff]  }
0x1714   : > { %v4625_v49 = vpack.c.bf16 %v4621_v2, %v4621_v2  ;;  %v4610_v4 = vadd.f32 %v4609_v1, %v4608_v61 }
0x1715   : > { %v4613_v5 = vsel %vm799_vm1, %v4591_v3, 0.0 }
0x1716   : > { %v4614_v6 = vrot.slane %v4613_v5, 4  ;;  %9206 = vmatmul.mubr.msk.bf16.vlgmr.msra.gmra.mrb[136].mxu0 %vm799_vm1, %v4625_v49  ;;  %v4611_v7 = vrot.slane %v4610_v4, 1  ;;  %v9859_v49 = vld [vmem:[#allocation10 + $0x148] sm:$0xff]  }
0x1717   : > { %9216 = vmatpush3.bf16.msra.mxu0 %v10858_v33  ;;  %9217 = vmatprep.mubr.msk.bf16.mxu0 %vm10422_vm0, %v10421_v34 }
0x1718   : > { %v4615_v8 = vadd.f32 %v4614_v6, %v4613_v5  ;;  %v4612_v9 = vadd.f32 %v4611_v7, %v4610_v4  ;;  %9241 = vmatprep.subr.bf16.mxu0 %v10421_v34  ;;  %v9861_v4 = vld [vmem:[#allocation10 + $0x150] sm:$0xff]   ;;  %v9862_v5 = vld [vmem:[#allocation10 + $0x158] sm:$0xff]   ;;  %v9864_v7 = vld [vmem:[#allocation10 + $0x160] sm:$0xff]  }
0x1719   : > { %v9863_v6 = vld [vmem:[#allocation7 + $0x140] sm:$0xff]  }
0x171a   : > { %v4616_v10 = vrot.slane %v4615_v8, 2  ;;  %v4622_v40 = vmul.f32 0.125, %v4612_v9  ;;  %v9868_v9 = vld [vmem:[#allocation10 + $0x170] sm:$0xff]  }
0x171c   : > { %v4626_v11 = vpack.c.bf16 %v4622_v40, %v4622_v40  ;;  %v4617_v12 = vadd.f32 %v4616_v10, %v4615_v8  ;;  %v9866_v8 = vld [vmem:[#allocation10 + $0x168] sm:$0xff]   ;;  %v9870_v10 = vld [vmem:[#allocation10 + $0x178] sm:$0xff]  }
0x171e   : > { %9212 = vmatmul.mubr.msk.bf16.vlgmr.msra.gmra.mrb[104].mxu1 %vm799_vm1, %v4626_v11  ;;  %v4618_v14 = vrot.slane %v4617_v12, 1 }
0x171f   : > { %9237 = vmatprep.mubr.msk.bf16.mxu1 %vm10422_vm0, %v10421_v34  ;;  %9222 = vmatpush3.bf16.msra.mxu1 %v9850_v19  ;;  %v9869_v19 = vld [vmem:[#allocation7 + $0x158] sm:$0xff]  }
0x1720   : > { %v4619_v15 = vadd.f32 %v4618_v14, %v4617_v12  ;;  %9223 = vmatprep.subr.bf16.mxu1 %v10421_v34  ;;  %v9865_v14 = vld [vmem:[#allocation7 + $0x148] sm:$0xff]  }
0x1722   : > { %v4623_v16 = vmul.f32 0.125, %v4619_v15 }
0x1723   : > { %9224 = vmatpush3.bf16.msra.mxu1 %v9851_v20  ;;  %v9871_v20 = vld [vmem:[#allocation7 + $0x160] sm:$0xff]  }
0x1724   : > { %v4627_v18 = vpack.c.bf16 %v4623_v16, %v4623_v16  ;;  %9225 = vmatprep.subr.bf16.mxu1 %v10421_v34 }
0x1726   : > { %9218 = vmatmul.mubr.msk.bf16.vlgmr.msra.gmra.mrb[140].mxu0 %vm799_vm1, %v4627_v18  ;;  %v9867_v18 = vld [vmem:[#allocation7 + $0x150] sm:$0xff]  }
0x1727   : > { %9243 = vmatprep.mubr.msk.bf16.mxu0 %vm10422_vm0, %v10421_v34  ;;  %9226 = vmatpush3.bf16.msra.mxu1 %v9852_v21  ;;  %v9872_v21 = vld [vmem:[#allocation7 + $0x168] sm:$0xff]  }
0x1728   : > { %9227 = vmatprep.subr.bf16.mxu1 %v10421_v34  ;;  %9242 = vmatpush3.bf16.msra.mxu0 %v9860_v32 }
0x1729   : > { %9247 = vmatprep.subr.bf16.mxu0 %v9863_v6 }
0x172b   : > { %9228 = vmatpush3.bf16.msra.mxu1 %v9853_v22  ;;  %v9873_v22 = vld [vmem:[#allocation7 + $0x170] sm:$0xff]  }
0x172c   : > { %9229 = vmatprep.subr.bf16.mxu1 %v10421_v34 }
0x172f   : > { %9230 = vmatpush3.bf16.msra.mxu1 %v9854_v23  ;;  %v9874_v23 = vld [vmem:[#allocation7 + $0x178] sm:$0xff]  }
0x1730   : > { %9231 = vmatprep.subr.bf16.mxu1 %v10421_v34 }
0x1733   : > { %9232 = vmatpush3.bf16.msra.mxu1 %v9855_v25  ;;  %v8108_v25 = vld [vmem:[#allocation11 + $0x5] ss:$0 sm:$0xff] }
0x1734   : > { %9233 = vmatprep.subr.bf16.mxu1 %v10421_v34 }
0x1737   : > { %9234 = vmatpush3.bf16.msra.mxu1 %v9856_v26 }
0x1738   : > { %9235 = vmatprep.subr.bf16.mxu1 %v10421_v34 }
0x173b   : > { %9236 = vmatpush3.bf16.msra.mxu1 %v9857_v27 }
0x173c   : > { %9267 = vmatprep.subr.bf16.mxu1 %v9858_v31 }
0x17e1   : > { %v4665_v35 = vpop.f32.mrb[100].mxu1 }
0x17e2   : > { %v9201_v36 = vpop.f32.mrb[101].mxu1  ;;  %v4800_v41 = vpack.c.bf16 %v4665_v35, %v4665_v35 }
0x17e3   : > { %v4668_v37 = vpop.f32.mrb[102].mxu1 }
0x17e4   : > { %v9202_v38 = vpop.f32.mrb[103].mxu1  ;;  %v4825_v46 = vunpack.c.l.b16 %v4800_v41 }
0x17e9   : > { %v4708_v39 = vpop.f32.mrb[136].mxu0 }
0x17ea   : > { %v4801_v0 = vpack.c.bf16 %v4708_v39, %v4708_v39  ;;  %v9207_v42 = vpop.f32.mrb[137].mxu0 }
0x17eb   : > { %v4711_v43 = vpop.f32.mrb[138].mxu0 }
0x17ec   : > { %v4826_v44 = vunpack.c.l.b16 %v4801_v0  ;;  %v9208_v45 = vpop.f32.mrb[139].mxu0 }
0x17ee   : > { %v4829_v47 = vrot.slane %v4826_v44, 7 }
0x17f0   : > { %v4830_v48 = vsel %vm1266_vm2, %v4829_v47, %v4825_v46 }
0x17f1   : > { %v4751_v50 = vpop.f32.mrb[104].mxu1 }
0x17f2   : > { %v4802_v51 = vpack.c.bf16 %v4751_v50, %v4751_v50  ;;  %v9213_v52 = vpop.f32.mrb[105].mxu1 }
0x17f3   : > { %v4754_v53 = vpop.f32.mrb[106].mxu1 }
0x17f4   : > { %v4827_v54 = vunpack.c.l.b16 %v4802_v51  ;;  %v9214_v55 = vpop.f32.mrb[107].mxu1 }
0x17f6   : > { %v4831_v56 = vrot.slane %v4827_v54, 6 }
0x17f8   : > { %v4832_v57 = vsel %vm1269_vm3, %v4831_v56, %v4830_v48 }
0x17f9   : > { %v4794_v58 = vpop.f32.mrb[140].mxu0 }
0x17fa   : > { %v4803_v59 = vpack.c.bf16 %v4794_v58, %v4794_v58  ;;  %v9219_v60 = vpop.f32.mrb[141].mxu0  ;;  %v8099_v58 = vld [vmem:[#allocation8 + $0x5] ss:$0 sm:$0xff] }
0x17fb   : > { %v4797_v61 = vpop.f32.mrb[142].mxu0 }
0x17fc   : > { %v4828_v62 = vunpack.c.l.b16 %v4803_v59  ;;  %v9220_v63 = vpop.f32.mrb[143].mxu0 }
0x17fe   : > { %v4833_v1 = vrot.slane %v4828_v62, 5 }
0x1800   : > { %v4834_v2 = vsel %vm1272_vm4, %v4833_v1, %v4832_v57 }
0x1801   : > { %v4835_v3 = vpack.c.b16 %v4834_v2, %v4834_v2 }
0x1803   : > { %9238 = vmatmul.mubr.bf16.vlgmr.msra.gmra.mrb[108].mxu1 %v4835_v3 }
0x1804   : > { %9268 = vmatpush3.bf16.msra.mxu1 %v9858_v31  ;;  %9283 = vmatprep.mubr.bf16.mxu1 %v10833_v13 }
0x1805   : > { %9269 = vmatprep.subr.bf16.mxu1 %v9859_v49 }
0x1808   : > { %9270 = vmatpush3.bf16.msra.mxu1 %v9859_v49 }
0x1809   : > { %9271 = vmatprep.subr.bf16.mxu1 %v9861_v4 }
0x180c   : > { %9272 = vmatpush3.bf16.msra.mxu1 %v9861_v4 }
0x180d   : > { %9273 = vmatprep.subr.bf16.mxu1 %v9862_v5 }
0x1810   : > { %9274 = vmatpush3.bf16.msra.mxu1 %v9862_v5 }
0x1811   : > { %9275 = vmatprep.subr.bf16.mxu1 %v9864_v7 }
0x1814   : > { %9276 = vmatpush3.bf16.msra.mxu1 %v9864_v7 }
0x1815   : > { %9277 = vmatprep.subr.bf16.mxu1 %v9866_v8 }
0x1818   : > { %9278 = vmatpush3.bf16.msra.mxu1 %v9866_v8 }
0x1819   : > { %9279 = vmatprep.subr.bf16.mxu1 %v9868_v9 }
0x181c   : > { %9280 = vmatpush3.bf16.msra.mxu1 %v9868_v9 }
0x181d   : > { %9281 = vmatprep.subr.bf16.mxu1 %v9870_v10 }
0x1820   : > { %9282 = vmatpush3.bf16.msra.mxu1 %v9870_v10 }
0x1821   : > { %9315 = vmatprep.subr.bf16.mxu1 %v10421_v34 }
0x1823   : > { %9284 = vmatmul.mubr.bf16.vlgmr.msra.gmra.mrb[112].mxu1 %v10847_v28 }
0x1824   : > { %9287 = vmatprep.mubr.bf16.mxu1 %v10849_v29  ;;  %9316 = vmatpush3.bf16.msra.mxu1 %v10833_v13 }
0x1825   : > { %9327 = vmatprep.subr.bf16.mxu1 %v10421_v34 }
0x182b   : > { %9288 = vmatmul.mubr.bf16.gmra.mrb[116].mxu1 %v10858_v33 }
0x182c   : > { %9317 = vmatprep.mubr.msk.bf16.mxu1 %vm10422_vm0, %v10421_v34 }
0x18d6   : > { %v4919_v40 = vpop.f32.mrb[108].mxu1 }
0x18d7   : > { %v4925_v11 = vpack.c.bf16 %v4919_v40, %v4919_v40  ;;  %v9239_v12 = vpop.f32.mrb[109].mxu1 }
0x18d8   : > { %v4922_v15 = vpop.f32.mrb[110].mxu1 }
0x18d9   : > { %v9240_v16 = vpop.f32.mrb[111].mxu1  ;;  %9244 = vmatmul.mubr.msk.bf16.vlgmr.msra.gmra.mrb[144].mxu0 %vm799_vm1, %v4925_v11 }
0x18da   : > { %9248 = vmatpush3.bf16.msra.mxu0 %v9863_v6  ;;  %9263 = vmatprep.mubr.bf16.mxu0 %v10838_v17 }
0x18db   : > { %9249 = vmatprep.subr.bf16.mxu0 %v9865_v14 }
0x18de   : > { %9250 = vmatpush3.bf16.msra.mxu0 %v9865_v14 }
0x18df   : > { %9251 = vmatprep.subr.bf16.mxu0 %v9867_v18 }
0x18e2   : > { %9252 = vmatpush3.bf16.msra.mxu0 %v9867_v18 }
0x18e3   : > { %9253 = vmatprep.subr.bf16.mxu0 %v9869_v19 }
0x18e6   : > { %9254 = vmatpush3.bf16.msra.mxu0 %v9869_v19 }
0x18e7   : > { %9255 = vmatprep.subr.bf16.mxu0 %v9871_v20 }
0x18ea   : > { %9256 = vmatpush3.bf16.msra.mxu0 %v9871_v20 }
0x18eb   : > { %9257 = vmatprep.subr.bf16.mxu0 %v9872_v21 }
0x18ee   : > { %9258 = vmatpush3.bf16.msra.mxu0 %v9872_v21 }
0x18ef   : > { %9259 = vmatprep.subr.bf16.mxu0 %v9873_v22 }
0x18f2   : > { %9260 = vmatpush3.bf16.msra.mxu0 %v9873_v22 }
0x18f3   : > { %9261 = vmatprep.subr.bf16.mxu0 %v9874_v23 }
0x18f6   : > { %9262 = vmatpush3.bf16.msra.mxu0 %v9874_v23  ;;  %v9285_v26 = vpop.f32.mrb[112].mxu1 }
0x18f7   : > { %9291 = vmatprep.subr.bf16.mxu0 %v10421_v34  ;;  %v5217_v27 = vadd.f32 %v9285_v26, %v8108_v25  ;;  %v5208_v31 = vpop.f32.mrb[113].mxu1 }
0x18f8   : > { %v5209_v32 = vadd.f32 %v8108_v25, %v5208_v31  ;;  %v9286_v35 = vpop.f32.mrb[114].mxu1 }
0x18f9   : > { %9264 = vmatmul.mubr.bf16.vlgmr.msra.gmra.mrb[148].mxu0 %v10851_v30  ;;  %v5220_v36 = vadd.f32 %v9286_v35, %v8108_v25  ;;  %v5211_v37 = vpop.f32.mrb[115].mxu1 }
0x18fa   : > { %9293 = vmatprep.mubr.msk.bf16.mxu0 %vm10422_vm0, %v10421_v34  ;;  %v5212_v38 = vadd.f32 %v8108_v25, %v5211_v37 }
0x18fb   : > { %v5252_v39 = vpack.c.bf16 %v5220_v36, %v5217_v27 }
0x18fc   : > { %v5251_v41 = vpack.c.bf16 %v5212_v38, %v5209_v32 }
0x18fd   : > { %v5305_v2 = vsel %vm799_vm1, %v5252_v39, 0 }
0x18fe   : > { %v5259_v0 = vsel %vm799_vm1, %v5251_v41, 0  ;;  %v9289_v42 = vpop.f32.mrb[116].mxu1 }
0x18ff   : > { %9292 = vmatpush3.bf16.xpose.msra.mxu0 %v5259_v0  ;;  %v5224_v43 = vpop.f32.mrb[117].mxu1  ;;  %v5233_v45 = vadd.f32 %v9289_v42, %v8108_v25 }
0x1900   : > { %9297 = vmatprep.subr.bf16.mxu0 %v10421_v34  ;;  %v9290_v44 = vpop.f32.mrb[118].mxu1  ;;  %v5225_v46 = vadd.f32 %v8108_v25, %v5224_v43 }
0x1901   : > { %v5236_v47 = vadd.f32 %v9290_v44, %v8108_v25  ;;  %v5227_v48 = vpop.f32.mrb[119].mxu1 }
0x1902   : > { %v5228_v50 = vadd.f32 %v8108_v25, %v5227_v48 }
0x1903   : > { %v5254_v51 = vpack.c.bf16 %v5236_v47, %v5233_v45 }
0x1904   : > { %v5253_v52 = vpack.c.bf16 %v5228_v50, %v5225_v46 }
0x1905   : > { %v5397_v6 = vsel %vm799_vm1, %v5254_v51, 0 }
0x1906   : > { %v5351_v49 = vsel %vm799_vm1, %v5253_v52, 0 }
0x19ac   : > { %v4972_v53 = vpop.f32.mrb[144].mxu0 }
0x19ad   : > { %v11263_v54 = vadd.f32 %v4972_v53, %v11185_v24  ;;  %v9245_v55 = vpop.f32.mrb[145].mxu0 }
0x19ae   : > { %v4975_v56 = vpop.f32.mrb[146].mxu0 }
0x19af   : > { %v9246_v57 = vpop.f32.mrb[147].mxu0 }
0x19cc   : > { %v9265_v59 = vpop.f32.mrb[148].mxu0 }
0x19cd   : > { %v5086_v60 = vpop.f32.mrb[149].mxu0  ;;  %v5095_v4 = vadd.f32 %v9265_v59, %v8099_v58 }
0x19ce   : > { %v5087_v61 = vadd.f32 %v8099_v58, %v5086_v60  ;;  %v9266_v62 = vpop.f32.mrb[150].mxu0 }
0x19cf   : > { %v5089_v63 = vpop.f32.mrb[151].mxu0  ;;  %v8254_v5 = vpack.c.bf16 %v5095_v4, %v5095_v4  ;;  %v5098_v7 = vadd.f32 %v9266_v62, %v8099_v58 }
0x19d0   : > { %v8252_v1 = vpack.c.bf16 %v5087_v61, %v5087_v61  ;;  %v5090_v24 = vadd.f32 %v8099_v58, %v5089_v63 }
0x19d1   : > { %v8255_v8 = vpack.c.bf16 %v5098_v7, %v5098_v7 }
0x19d2   : > { %9294 = vmatmul.mubr.msk.bf16.vlgmr.msra.gmra.mrb[152].mxu0 %vm799_vm1, %v8252_v1  ;;  %v8253_v3 = vpack.c.bf16 %v5090_v24, %v5090_v24 }
0x19d3   : > { %9298 = vmatpush3.bf16.xpose.msra.mxu0 %v5305_v2  ;;  %9299 = vmatprep.mubr.msk.bf16.mxu0 %vm10422_vm0, %v10421_v34 }
0x19d4   : > { %9303 = vmatprep.subr.bf16.mxu0 %v10421_v34 }
0x19da   : > { %9300 = vmatmul.mubr.msk.bf16.vlgmr.msra.gmra.mrb[156].mxu0 %vm799_vm1, %v8253_v3 }
0x19db   : > { %9304 = vmatpush3.bf16.xpose.msra.mxu0 %v5351_v49  ;;  %9305 = vmatprep.mubr.msk.bf16.mxu0 %vm10422_vm0, %v10421_v34 }
0x19dc   : > { %9309 = vmatprep.subr.bf16.mxu0 %v10421_v34 }
0x19e2   : > { %9306 = vmatmul.mubr.msk.bf16.vlgmr.msra.gmra.mrb[160].mxu0 %vm799_vm1, %v8254_v5 }
0x19e3   : > { %9310 = vmatpush3.bf16.xpose.msra.mxu0 %v5397_v6  ;;  %9311 = vmatprep.mubr.msk.bf16.mxu0 %vm10422_vm0, %v10421_v34 }
0x19e4   : > { %9321 = vmatprep.subr.bf16.mxu0 %v10421_v34 }
0x19ea   : > { %9312 = vmatmul.mubr.msk.bf16.vlgmr.msra.gmra.mrb[164].mxu0 %vm799_vm1, %v8255_v8 }
0x19eb   : > { %9322 = vmatpush3.bf16.msra.mxu0 %v10847_v28  ;;  %9323 = vmatprep.mubr.msk.bf16.mxu0 %vm10422_vm0, %v10421_v34 }
0x19ec   : > { %9333 = vmatprep.subr.bf16.mxu0 %v10421_v34 }
0x1aa5   : > { %v5295_v9 = vpop.f32.mrb[152].mxu0 }
0x1aa6   : > { %v9295_v10 = vpop.f32.mrb[153].mxu0  ;;  %v5439_v40 = vsel %vm799_vm1, %v5295_v9, -inf }
0x1aa7   : > { %5440 = vmax.xlane.f32.xlu0 %v5439_v40  ;;  %v5298_v11 = vpop.f32.mrb[154].mxu0 }
0x1aa8   : > { %v9296_v12 = vpop.f32.mrb[155].mxu0 }
0x1aad   : > { %v5341_v14 = vpop.f32.mrb[156].mxu0 }
0x1aae   : > { %v9301_v15 = vpop.f32.mrb[157].mxu0  ;;  %v5442_v16 = vsel %vm799_vm1, %v5341_v14, -inf }
0x1aaf   : > { %5443 = vmax.xlane.f32.xlu1 %v5442_v16  ;;  %v5344_v18 = vpop.f32.mrb[158].mxu0 }
0x1ab0   : > { %v9302_v19 = vpop.f32.mrb[159].mxu0 }
0x1ab5   : > { %v5387_v20 = vpop.f32.mrb[160].mxu0 }
0x1ab6   : > { %v9307_v21 = vpop.f32.mrb[161].mxu0  ;;  %v5445_v22 = vsel %vm799_vm1, %v5387_v20, -inf }
0x1ab7   : > { %5446 = vmax.xlane.f32.xlu0 %v5445_v22  ;;  %v5390_v23 = vpop.f32.mrb[162].mxu0 }
0x1ab8   : > { %v9308_v25 = vpop.f32.mrb[163].mxu0 }
0x1abd   : > { %v5433_v26 = vpop.f32.mrb[164].mxu0 }
0x1abe   : > { %v9313_v27 = vpop.f32.mrb[165].mxu0  ;;  %v5448_v31 = vsel %vm799_vm1, %v5433_v26, -inf }
0x1abf   : > { %5449 = vmax.xlane.f32.xlu1 %v5448_v31  ;;  %v5436_v32 = vpop.f32.mrb[166].mxu0 }
0x1ac0   : > { %v9314_v35 = vpop.f32.mrb[167].mxu0 }
0x1b34   : > { %v5441_v36 = vpop.xlane.xlu0 %5440 }
0x1b35   : > { %v5451_v37 = vsub.f32 %v5295_v9, %v5441_v36 }
0x1b37   : > { %v5455_v38 = vmul.f32 1.442695, %v5451_v37 }
0x1b39   : > { %10014 = vpow2.f32 %v5455_v38 }
0x1b3c   : > { %v5444_v39 = vpop.xlane.xlu1 %5443 }
0x1b3d   : > { %v5452_v41 = vsub.f32 %v5341_v14, %v5444_v39 }
0x1b3f   : > { %v5457_v0 = vmul.f32 1.442695, %v5452_v41 }
0x1b41   : > { %10016 = vpow2.f32 %v5457_v0 }
0x1b43   : > { %v10015_v42 = vpop.eup %10014 }
0x1b44   : > { %v5447_v43 = vpop.xlane.xlu0 %5446  ;;  %v5463_v44 = vsel %vm799_vm1, %v10015_v42, 0.0 }
0x1b45   : > { %v5453_v45 = vsub.f32 %v5387_v20, %v5447_v43  ;;  %5464 = vadd.xlane.f32.xlu0 %v5463_v44 }
0x1b47   : > { %v5459_v46 = vmul.f32 1.442695, %v5453_v45 }
0x1b49   : > { %10018 = vpow2.f32 %v5459_v46 }
0x1b4b   : > { %v10017_v47 = vpop.eup %10016 }
0x1b4c   : > { %v5450_v48 = vpop.xlane.xlu1 %5449  ;;  %v5466_v50 = vsel %vm799_vm1, %v10017_v47, 0.0 }
0x1b4d   : > { %v5454_v51 = vsub.f32 %v5433_v26, %v5450_v48  ;;  %5467 = vadd.xlane.f32.xlu1 %v5466_v50  ;;  %v9875_v48 = vld [vmem:[#allocation13 + $0x140] sm:$0xff]   ;;  %v9876_v50 = vld [vmem:[#allocation13 + $0x148] sm:$0xff]  }
0x1b4f   : > { %v5461_v52 = vmul.f32 1.442695, %v5454_v51  ;;  %v9877_v51 = vld [vmem:[#allocation13 + $0x150] sm:$0xff]  }
0x1b51   : > { %10020 = vpow2.f32 %v5461_v52  ;;  %v9878_v52 = vld [vmem:[#allocation13 + $0x158] sm:$0xff]  }
0x1b53   : > { %v10019_v53 = vpop.eup %10018 }
0x1b54   : > { %v5469_v55 = vsel %vm799_vm1, %v10019_v53, 0.0 }
0x1b55   : > { %5470 = vadd.xlane.f32.xlu0 %v5469_v55  ;;  %v9880_v55 = vld [vmem:[#allocation13 + $0x168] sm:$0xff]  }
0x1b5b   : > { %v10021_v56 = vpop.eup %10020 }
0x1b5c   : > { %v5472_v57 = vsel %vm799_vm1, %v10021_v56, 0.0 }
0x1b5d   : > { %5473 = vadd.xlane.f32.xlu1 %v5472_v57  ;;  %v9882_v57 = vld [vmem:[#allocation13 + $0x178] sm:$0xff]  }
0x1bd2   : > { %v5465_v58 = vpop.xlane.xlu0 %5464 }
0x1bd3   : > { %10022 = vrcp.f32 %v5465_v58  ;;  %v9883_v58 = vld [vmem:[#allocation10 + $0x180] sm:$0xff]  }
0x1bda   : > { %v5468_v59 = vpop.xlane.xlu1 %5467 }
0x1bdb   : > { %10024 = vrcp.f32 %v5468_v59  ;;  %v9885_v59 = vld [vmem:[#allocation14 + $0x28] sm:$0xff]  }
0x1bdd   : > { %v10023_v60 = vpop.eup %10022 }
0x1bde   : > { %v5479_v61 = vmul.f32 %v10023_v60, %v10015_v42 }
0x1be0   : > { %v5483_v62 = vsel %vm799_vm1, %v5479_v61, 0.0 }
0x1be1   : > { %v5484_v63 = vrot.slane %v5483_v62, 4 }
0x1be2   : > { %v5471_v1 = vpop.xlane.xlu0 %5470 }
0x1be3   : > { %v5485_v2 = vadd.f32 %v5484_v63, %v5483_v62  ;;  %10026 = vrcp.f32 %v5471_v1 }
0x1be5   : > { %v10025_v24 = vpop.eup %10024  ;;  %v5486_v3 = vrot.slane %v5485_v2, 2 }
0x1be6   : > { %v5480_v49 = vmul.f32 %v10025_v24, %v10017_v47 }
0x1be7   : > { %v5487_v4 = vadd.f32 %v5486_v3, %v5485_v2 }
0x1be8   : > { %v5490_v5 = vsel %vm799_vm1, %v5480_v49, 0.0 }
0x1be9   : > { %v5488_v6 = vrot.slane %v5487_v4, 1  ;;  %v5491_v7 = vrot.slane %v5490_v5, 4 }
0x1bea   : > { %v5474_v8 = vpop.xlane.xlu1 %5473 }
0x1beb   : > { %v5492_v9 = vadd.f32 %v5491_v7, %v5490_v5  ;;  %10028 = vrcp.f32 %v5474_v8  ;;  %v5489_v10 = vadd.f32 %v5488_v6, %v5487_v4 }
0x1bed   : > { %v10027_v40 = vpop.eup %10026  ;;  %v5493_v11 = vrot.slane %v5492_v9, 2  ;;  %v5511_v12 = vmul.f32 0.125, %v5489_v10 }
0x1bee   : > { %v5481_v14 = vmul.f32 %v10027_v40, %v10019_v53  ;;  %v9879_v53 = vld [vmem:[#allocation13 + $0x160] sm:$0xff]  }
0x1bef   : > { %v5515_v15 = vpack.c.bf16 %v5511_v12, %v5511_v12  ;;  %v5494_v16 = vadd.f32 %v5493_v11, %v5492_v9 }
0x1bf0   : > { %v5497_v18 = vsel %vm799_vm1, %v5481_v14, 0.0 }
0x1bf1   : > { %v5498_v19 = vrot.slane %v5497_v18, 4  ;;  %9318 = vmatmul.mubr.msk.bf16.vlgmr.msra.gmra.mrb[120].mxu1 %vm799_vm1, %v5515_v15  ;;  %v5495_v20 = vrot.slane %v5494_v16, 1 }
0x1bf2   : > { %9328 = vmatpush3.bf16.msra.mxu1 %v10849_v29  ;;  %9329 = vmatprep.mubr.msk.bf16.mxu1 %vm10422_vm0, %v10421_v34 }
0x1bf3   : > { %v5499_v21 = vadd.f32 %v5498_v19, %v5497_v18  ;;  %v5496_v22 = vadd.f32 %v5495_v20, %v5494_v16  ;;  %9339 = vmatprep.subr.bf16.mxu1 %v10421_v34 }
0x1bf5   : > { %v10029_v23 = vpop.eup %10028  ;;  %v5500_v25 = vrot.slane %v5499_v21, 2  ;;  %v5512_v26 = vmul.f32 0.125, %v5496_v22 }
0x1bf6   : > { %v5482_v27 = vmul.f32 %v10029_v23, %v10021_v56  ;;  %v9881_v56 = vld [vmem:[#allocation13 + $0x170] sm:$0xff]  }
0x1bf7   : > { %v5516_v31 = vpack.c.bf16 %v5512_v26, %v5512_v26  ;;  %v5501_v32 = vadd.f32 %v5500_v25, %v5499_v21 }
0x1bf8   : > { %v5504_v35 = vsel %vm799_vm1, %v5482_v27, 0.0 }
0x1bf9   : > { %v5505_v36 = vrot.slane %v5504_v35, 4  ;;  %9324 = vmatmul.mubr.msk.bf16.vlgmr.msra.gmra.mrb[168].mxu0 %vm799_vm1, %v5516_v31  ;;  %v5502_v37 = vrot.slane %v5501_v32, 1  ;;  %v9884_v31 = vld [vmem:[#allocation10 + $0x188] sm:$0xff]  }
0x1bfa   : > { %9334 = vmatpush3.bf16.msra.mxu0 %v10858_v33  ;;  %9335 = vmatprep.mubr.msk.bf16.mxu0 %vm10422_vm0, %v10421_v34 }
0x1bfb   : > { %v5506_v38 = vadd.f32 %v5505_v36, %v5504_v35  ;;  %v5503_v39 = vadd.f32 %v5502_v37, %v5501_v32  ;;  %9359 = vmatprep.subr.bf16.mxu0 %v10421_v34  ;;  %v9886_v32 = vld [vmem:[#allocation10 + $0x190] sm:$0xff]   ;;  %v9887_v35 = vld [vmem:[#allocation10 + $0x198] sm:$0xff]   ;;  %v9889_v37 = vld [vmem:[#allocation10 + $0x1a0] sm:$0xff]  }
0x1bfc   : > { %v9888_v36 = vld [vmem:[#allocation7 + $0x180] sm:$0xff]  }
0x1bfd   : > { %v5507_v41 = vrot.slane %v5506_v38, 2  ;;  %v5513_v0 = vmul.f32 0.125, %v5503_v39  ;;  %v9893_v39 = vld [vmem:[#allocation10 + $0x1b0] sm:$0xff]  }
0x1bff   : > { %v5517_v42 = vpack.c.bf16 %v5513_v0, %v5513_v0  ;;  %v5508_v43 = vadd.f32 %v5507_v41, %v5506_v38  ;;  %v9891_v38 = vld [vmem:[#allocation10 + $0x1a8] sm:$0xff]   ;;  %v9895_v41 = vld [vmem:[#allocation10 + $0x1b8] sm:$0xff]  }
0x1c01   : > { %9330 = vmatmul.mubr.msk.bf16.vlgmr.msra.gmra.mrb[124].mxu1 %vm799_vm1, %v5517_v42  ;;  %v5509_v44 = vrot.slane %v5508_v43, 1 }
0x1c02   : > { %9355 = vmatprep.mubr.msk.bf16.mxu1 %vm10422_vm0, %v10421_v34  ;;  %9340 = vmatpush3.bf16.msra.mxu1 %v9875_v48  ;;  %v9894_v48 = vld [vmem:[#allocation7 + $0x198] sm:$0xff]  }
0x1c03   : > { %v5510_v45 = vadd.f32 %v5509_v44, %v5508_v43  ;;  %9341 = vmatprep.subr.bf16.mxu1 %v10421_v34  ;;  %v9890_v44 = vld [vmem:[#allocation7 + $0x188] sm:$0xff]  }
0x1c05   : > { %v5514_v46 = vmul.f32 0.125, %v5510_v45 }
0x1c06   : > { %9342 = vmatpush3.bf16.msra.mxu1 %v9876_v50  ;;  %v9896_v50 = vld [vmem:[#allocation7 + $0x1a0] sm:$0xff]  }
0x1c07   : > { %v5518_v47 = vpack.c.bf16 %v5514_v46, %v5514_v46  ;;  %9343 = vmatprep.subr.bf16.mxu1 %v10421_v34 }
0x1c09   : > { %9336 = vmatmul.mubr.msk.bf16.vlgmr.msra.gmra.mrb[172].mxu0 %vm799_vm1, %v5518_v47  ;;  %v9892_v47 = vld [vmem:[#allocation7 + $0x190] sm:$0xff]  }
0x1c0a   : > { %9361 = vmatprep.mubr.msk.bf16.mxu0 %vm10422_vm0, %v10421_v34  ;;  %9344 = vmatpush3.bf16.msra.mxu1 %v9877_v51  ;;  %v9897_v51 = vld [vmem:[#allocation7 + $0x1a8] sm:$0xff]  }
0x1c0b   : > { %9345 = vmatprep.subr.bf16.mxu1 %v10421_v34  ;;  %9360 = vmatpush3.bf16.msra.mxu0 %v9885_v59 }
0x1c0c   : > { %9365 = vmatprep.subr.bf16.mxu0 %v9888_v36 }
0x1c0e   : > { %9346 = vmatpush3.bf16.msra.mxu1 %v9878_v52  ;;  %v9898_v52 = vld [vmem:[#allocation7 + $0x1b0] sm:$0xff]  }
0x1c0f   : > { %9347 = vmatprep.subr.bf16.mxu1 %v10421_v34 }
0x1c12   : > { %9348 = vmatpush3.bf16.msra.mxu1 %v9879_v53  ;;  %v9899_v53 = vld [vmem:[#allocation7 + $0x1b8] sm:$0xff]  }
0x1c13   : > { %9349 = vmatprep.subr.bf16.mxu1 %v10421_v34 }
0x1c16   : > { %9350 = vmatpush3.bf16.msra.mxu1 %v9880_v55  ;;  %v8148_v55 = vld [vmem:[#allocation11 + $0x6] ss:$0 sm:$0xff] }
0x1c17   : > { %9351 = vmatprep.subr.bf16.mxu1 %v10421_v34 }
0x1c1a   : > { %9352 = vmatpush3.bf16.msra.mxu1 %v9881_v56 }
0x1c1b   : > { %9353 = vmatprep.subr.bf16.mxu1 %v10421_v34 }
0x1c1e   : > { %9354 = vmatpush3.bf16.msra.mxu1 %v9882_v57 }
0x1c1f   : > { %9385 = vmatprep.subr.bf16.mxu1 %v9883_v58 }
0x1cc4   : > { %v5556_v60 = vpop.f32.mrb[120].mxu1 }
0x1cc5   : > { %v9319_v61 = vpop.f32.mrb[121].mxu1  ;;  %v5691_v2 = vpack.c.bf16 %v5556_v60, %v5556_v60 }
0x1cc6   : > { %v5559_v62 = vpop.f32.mrb[122].mxu1 }
0x1cc7   : > { %v9320_v63 = vpop.f32.mrb[123].mxu1  ;;  %v5716_v6 = vunpack.c.l.b16 %v5691_v2 }
0x1ccc   : > { %v5599_v1 = vpop.f32.mrb[168].mxu0 }
0x1ccd   : > { %v5692_v24 = vpack.c.bf16 %v5599_v1, %v5599_v1  ;;  %v9325_v3 = vpop.f32.mrb[169].mxu0 }
0x1cce   : > { %v5602_v49 = vpop.f32.mrb[170].mxu0 }
0x1ccf   : > { %v5717_v4 = vunpack.c.l.b16 %v5692_v24  ;;  %v9326_v5 = vpop.f32.mrb[171].mxu0 }
0x1cd1   : > { %v5720_v7 = vrot.slane %v5717_v4, 7 }
0x1cd3   : > { %v5721_v8 = vsel %vm1266_vm2, %v5720_v7, %v5716_v6 }
0x1cd4   : > { %v5642_v9 = vpop.f32.mrb[124].mxu1 }
0x1cd5   : > { %v5693_v10 = vpack.c.bf16 %v5642_v9, %v5642_v9  ;;  %v9331_v40 = vpop.f32.mrb[125].mxu1 }
0x1cd6   : > { %v5645_v11 = vpop.f32.mrb[126].mxu1 }
0x1cd7   : > { %v5718_v12 = vunpack.c.l.b16 %v5693_v10  ;;  %v9332_v14 = vpop.f32.mrb[127].mxu1 }
0x1cd9   : > { %v5722_v15 = vrot.slane %v5718_v12, 6 }
0x1cdb   : > { %v5723_v16 = vsel %vm1269_vm3, %v5722_v15, %v5721_v8 }
0x1cdc   : > { %v5685_v18 = vpop.f32.mrb[172].mxu0 }
0x1cdd   : > { %v5694_v19 = vpack.c.bf16 %v5685_v18, %v5685_v18  ;;  %v9337_v20 = vpop.f32.mrb[173].mxu0  ;;  %v8139_v18 = vld [vmem:[#allocation8 + $0x6] ss:$0 sm:$0xff] }
0x1cde   : > { %v5688_v21 = vpop.f32.mrb[174].mxu0 }
0x1cdf   : > { %v5719_v22 = vunpack.c.l.b16 %v5694_v19  ;;  %v9338_v23 = vpop.f32.mrb[175].mxu0 }
0x1ce1   : > { %v5724_v25 = vrot.slane %v5719_v22, 5 }
0x1ce3   : > { %v5725_v26 = vsel %vm1272_vm4, %v5724_v25, %v5723_v16 }
0x1ce4   : > { %v5726_v27 = vpack.c.b16 %v5725_v26, %v5725_v26 }
0x1ce6   : > { %9356 = vmatmul.mubr.bf16.vlgmr.msra.gmra.mrb[128].mxu1 %v5726_v27 }
0x1ce7   : > { %9386 = vmatpush3.bf16.msra.mxu1 %v9883_v58  ;;  %9401 = vmatprep.mubr.bf16.mxu1 %v10833_v13 }
0x1ce8   : > { %9387 = vmatprep.subr.bf16.mxu1 %v9884_v31 }
0x1ceb   : > { %9388 = vmatpush3.bf16.msra.mxu1 %v9884_v31 }
0x1cec   : > { %9389 = vmatprep.subr.bf16.mxu1 %v9886_v32 }
0x1cef   : > { %9390 = vmatpush3.bf16.msra.mxu1 %v9886_v32 }
0x1cf0   : > { %9391 = vmatprep.subr.bf16.mxu1 %v9887_v35 }
0x1cf3   : > { %9392 = vmatpush3.bf16.msra.mxu1 %v9887_v35 }
0x1cf4   : > { %9393 = vmatprep.subr.bf16.mxu1 %v9889_v37 }
0x1cf7   : > { %9394 = vmatpush3.bf16.msra.mxu1 %v9889_v37 }
0x1cf8   : > { %9395 = vmatprep.subr.bf16.mxu1 %v9891_v38 }
0x1cfb   : > { %9396 = vmatpush3.bf16.msra.mxu1 %v9891_v38 }
0x1cfc   : > { %9397 = vmatprep.subr.bf16.mxu1 %v9893_v39 }
0x1cff   : > { %9398 = vmatpush3.bf16.msra.mxu1 %v9893_v39 }
0x1d00   : > { %9399 = vmatprep.subr.bf16.mxu1 %v9895_v41 }
0x1d03   : > { %9400 = vmatpush3.bf16.msra.mxu1 %v9895_v41 }
0x1d04   : > { %9433 = vmatprep.subr.bf16.mxu1 %v10421_v34 }
0x1d06   : > { %9402 = vmatmul.mubr.bf16.vlgmr.msra.gmra.mrb[132].mxu1 %v10847_v28 }
0x1d07   : > { %9405 = vmatprep.mubr.bf16.mxu1 %v10849_v29  ;;  %9434 = vmatpush3.bf16.msra.mxu1 %v10833_v13 }
0x1d08   : > { %9445 = vmatprep.subr.bf16.mxu1 %v10421_v34 }
0x1d0e   : > { %9406 = vmatmul.mubr.bf16.gmra.mrb[136].mxu1 %v10858_v33 }
0x1d0f   : > { %9435 = vmatprep.mubr.msk.bf16.mxu1 %vm10422_vm0, %v10421_v34 }
0x1db9   : > { %v5810_v0 = vpop.f32.mrb[128].mxu1 }
0x1dba   : > { %v5816_v42 = vpack.c.bf16 %v5810_v0, %v5810_v0  ;;  %v9357_v43 = vpop.f32.mrb[129].mxu1 }
0x1dbb   : > { %v5813_v45 = vpop.f32.mrb[130].mxu1 }
0x1dbc   : > { %v9358_v46 = vpop.f32.mrb[131].mxu1  ;;  %9362 = vmatmul.mubr.msk.bf16.vlgmr.msra.gmra.mrb[176].mxu0 %vm799_vm1, %v5816_v42 }
0x1dbd   : > { %9366 = vmatpush3.bf16.msra.mxu0 %v9888_v36  ;;  %9381 = vmatprep.mubr.bf16.mxu0 %v10838_v17 }
0x1dbe   : > { %9367 = vmatprep.subr.bf16.mxu0 %v9890_v44 }
0x1dc1   : > { %9368 = vmatpush3.bf16.msra.mxu0 %v9890_v44 }
0x1dc2   : > { %9369 = vmatprep.subr.bf16.mxu0 %v9892_v47 }
0x1dc5   : > { %9370 = vmatpush3.bf16.msra.mxu0 %v9892_v47 }
0x1dc6   : > { %9371 = vmatprep.subr.bf16.mxu0 %v9894_v48 }
0x1dc9   : > { %9372 = vmatpush3.bf16.msra.mxu0 %v9894_v48 }
0x1dca   : > { %9373 = vmatprep.subr.bf16.mxu0 %v9896_v50 }
0x1dcd   : > { %9374 = vmatpush3.bf16.msra.mxu0 %v9896_v50 }
0x1dce   : > { %9375 = vmatprep.subr.bf16.mxu0 %v9897_v51 }
0x1dd1   : > { %9376 = vmatpush3.bf16.msra.mxu0 %v9897_v51 }
0x1dd2   : > { %9377 = vmatprep.subr.bf16.mxu0 %v9898_v52 }
0x1dd5   : > { %9378 = vmatpush3.bf16.msra.mxu0 %v9898_v52 }
0x1dd6   : > { %9379 = vmatprep.subr.bf16.mxu0 %v9899_v53 }
0x1dd9   : > { %9380 = vmatpush3.bf16.msra.mxu0 %v9899_v53  ;;  %v9403_v56 = vpop.f32.mrb[132].mxu1 }
0x1dda   : > { %9409 = vmatprep.subr.bf16.mxu0 %v10421_v34  ;;  %v6108_v57 = vadd.f32 %v9403_v56, %v8148_v55  ;;  %v6099_v58 = vpop.f32.mrb[133].mxu1 }
0x1ddb   : > { %v6100_v59 = vadd.f32 %v8148_v55, %v6099_v58  ;;  %v9404_v60 = vpop.f32.mrb[134].mxu1 }
0x1ddc   : > { %9382 = vmatmul.mubr.bf16.vlgmr.msra.gmra.mrb[180].mxu0 %v10851_v30  ;;  %v6111_v61 = vadd.f32 %v9404_v60, %v8148_v55  ;;  %v6102_v62 = vpop.f32.mrb[135].mxu1 }
0x1ddd   : > { %9411 = vmatprep.mubr.msk.bf16.mxu0 %vm10422_vm0, %v10421_v34  ;;  %v6103_v63 = vadd.f32 %v8148_v55, %v6102_v62 }
0x1dde   : > { %v6143_v1 = vpack.c.bf16 %v6111_v61, %v6108_v57 }
0x1ddf   : > { %v6142_v2 = vpack.c.bf16 %v6103_v63, %v6100_v59 }
0x1de0   : > { %v6196_v26 = vsel %vm799_vm1, %v6143_v1, 0 }
0x1de1   : > { %v6150_v24 = vsel %vm799_vm1, %v6142_v2, 0  ;;  %v9407_v3 = vpop.f32.mrb[136].mxu1 }
0x1de2   : > { %9410 = vmatpush3.bf16.xpose.msra.mxu0 %v6150_v24  ;;  %v6115_v49 = vpop.f32.mrb[137].mxu1  ;;  %v6124_v5 = vadd.f32 %v9407_v3, %v8148_v55 }
0x1de3   : > { %9415 = vmatprep.subr.bf16.mxu0 %v10421_v34  ;;  %v9408_v4 = vpop.f32.mrb[138].mxu1  ;;  %v6116_v6 = vadd.f32 %v8148_v55, %v6115_v49 }
0x1de4   : > { %v6127_v7 = vadd.f32 %v9408_v4, %v8148_v55  ;;  %v6118_v8 = vpop.f32.mrb[139].mxu1 }
0x1de5   : > { %v6119_v9 = vadd.f32 %v8148_v55, %v6118_v8 }
0x1de6   : > { %v6145_v10 = vpack.c.bf16 %v6127_v7, %v6124_v5 }
0x1de7   : > { %v6144_v40 = vpack.c.bf16 %v6119_v9, %v6116_v6 }
0x1de8   : > { %v6288_v36 = vsel %vm799_vm1, %v6145_v10, 0 }
0x1de9   : > { %v6242_v31 = vsel %vm799_vm1, %v6144_v40, 0 }
0x1e8f   : > { %v5863_v11 = vpop.f32.mrb[176].mxu0 }
0x1e90   : > { %v11341_v12 = vadd.f32 %v5863_v11, %v11263_v54  ;;  %v9363_v14 = vpop.f32.mrb[177].mxu0 }
0x1e91   : > { %v5866_v15 = vpop.f32.mrb[178].mxu0 }
0x1e92   : > { %v9364_v16 = vpop.f32.mrb[179].mxu0 }
0x1eaf   : > { %v9383_v19 = vpop.f32.mrb[180].mxu0 }
0x1eb0   : > { %v5977_v20 = vpop.f32.mrb[181].mxu0  ;;  %v5986_v32 = vadd.f32 %v9383_v19, %v8139_v18 }
0x1eb1   : > { %v5978_v21 = vadd.f32 %v8139_v18, %v5977_v20  ;;  %v9384_v22 = vpop.f32.mrb[182].mxu0 }
0x1eb2   : > { %v5980_v23 = vpop.f32.mrb[183].mxu0  ;;  %v8258_v35 = vpack.c.bf16 %v5986_v32, %v5986_v32  ;;  %v5989_v37 = vadd.f32 %v9384_v22, %v8139_v18 }
0x1eb3   : > { %v8256_v25 = vpack.c.bf16 %v5978_v21, %v5978_v21  ;;  %v5981_v54 = vadd.f32 %v8139_v18, %v5980_v23 }
0x1eb4   : > { %v8259_v38 = vpack.c.bf16 %v5989_v37, %v5989_v37 }
0x1eb5   : > { %9412 = vmatmul.mubr.msk.bf16.vlgmr.msra.gmra.mrb[184].mxu0 %vm799_vm1, %v8256_v25  ;;  %v8257_v27 = vpack.c.bf16 %v5981_v54, %v5981_v54 }
0x1eb6   : > { %9416 = vmatpush3.bf16.xpose.msra.mxu0 %v6196_v26  ;;  %9417 = vmatprep.mubr.msk.bf16.mxu0 %vm10422_vm0, %v10421_v34 }
0x1eb7   : > { %9421 = vmatprep.subr.bf16.mxu0 %v10421_v34 }
0x1ebd   : > { %9418 = vmatmul.mubr.msk.bf16.vlgmr.msra.gmra.mrb[188].mxu0 %vm799_vm1, %v8257_v27 }
0x1ebe   : > { %9422 = vmatpush3.bf16.xpose.msra.mxu0 %v6242_v31  ;;  %9423 = vmatprep.mubr.msk.bf16.mxu0 %vm10422_vm0, %v10421_v34 }
0x1ebf   : > { %9427 = vmatprep.subr.bf16.mxu0 %v10421_v34 }
0x1ec5   : > { %9424 = vmatmul.mubr.msk.bf16.vlgmr.msra.gmra.mrb[192].mxu0 %vm799_vm1, %v8258_v35 }
0x1ec6   : > { %9428 = vmatpush3.bf16.xpose.msra.mxu0 %v6288_v36  ;;  %9429 = vmatprep.mubr.msk.bf16.mxu0 %vm10422_vm0, %v10421_v34 }
0x1ec7   : > { %9439 = vmatprep.subr.bf16.mxu0 %v10421_v34 }
0x1ecd   : > { %9430 = vmatmul.mubr.msk.bf16.vlgmr.msra.gmra.mrb[196].mxu0 %vm799_vm1, %v8259_v38 }
0x1ece   : > { %9440 = vmatpush3.bf16.msra.mxu0 %v10847_v28  ;;  %9441 = vmatprep.mubr.msk.bf16.mxu0 %vm10422_vm0, %v10421_v34 }
0x1ecf   : > { %9451 = vmatprep.subr.bf16.mxu0 %v10421_v34 }
0x1f88   : > { %v6186_v39 = vpop.f32.mrb[184].mxu0 }
0x1f89   : > { %v9413_v41 = vpop.f32.mrb[185].mxu0  ;;  %v6330_v0 = vsel %vm799_vm1, %v6186_v39, -inf }
0x1f8a   : > { %6331 = vmax.xlane.f32.xlu0 %v6330_v0  ;;  %v6189_v42 = vpop.f32.mrb[186].mxu0 }
0x1f8b   : > { %v9414_v43 = vpop.f32.mrb[187].mxu0 }
0x1f90   : > { %v6232_v44 = vpop.f32.mrb[188].mxu0 }
0x1f91   : > { %v9419_v45 = vpop.f32.mrb[189].mxu0  ;;  %v6333_v46 = vsel %vm799_vm1, %v6232_v44, -inf }
0x1f92   : > { %6334 = vmax.xlane.f32.xlu1 %v6333_v46  ;;  %v6235_v47 = vpop.f32.mrb[190].mxu0 }
0x1f93   : > { %v9420_v48 = vpop.f32.mrb[191].mxu0 }
0x1f98   : > { %v6278_v50 = vpop.f32.mrb[192].mxu0 }
0x1f99   : > { %v9425_v51 = vpop.f32.mrb[193].mxu0  ;;  %v6336_v52 = vsel %vm799_vm1, %v6278_v50, -inf }
0x1f9a   : > { %6337 = vmax.xlane.f32.xlu0 %v6336_v52  ;;  %v6281_v53 = vpop.f32.mrb[194].mxu0 }
0x1f9b   : > { %v9426_v55 = vpop.f32.mrb[195].mxu0 }
0x1fa0   : > { %v6324_v56 = vpop.f32.mrb[196].mxu0 }
0x1fa1   : > { %v9431_v57 = vpop.f32.mrb[197].mxu0  ;;  %v6339_v58 = vsel %vm799_vm1, %v6324_v56, -inf }
0x1fa2   : > { %6340 = vmax.xlane.f32.xlu1 %v6339_v58  ;;  %v6327_v59 = vpop.f32.mrb[198].mxu0 }
0x1fa3   : > { %v9432_v60 = vpop.f32.mrb[199].mxu0 }
0x2017   : > { %v6332_v61 = vpop.xlane.xlu0 %6331 }
0x2018   : > { %v6342_v62 = vsub.f32 %v6186_v39, %v6332_v61 }
0x201a   : > { %v6346_v63 = vmul.f32 1.442695, %v6342_v62 }
0x201c   : > { %10030 = vpow2.f32 %v6346_v63 }
0x201f   : > { %v6335_v1 = vpop.xlane.xlu1 %6334 }
0x2020   : > { %v6343_v2 = vsub.f32 %v6232_v44, %v6335_v1 }
0x2022   : > { %v6348_v24 = vmul.f32 1.442695, %v6343_v2 }
0x2024   : > { %10032 = vpow2.f32 %v6348_v24 }
0x2026   : > { %v10031_v3 = vpop.eup %10030 }
0x2027   : > { %v6338_v49 = vpop.xlane.xlu0 %6337  ;;  %v6354_v4 = vsel %vm799_vm1, %v10031_v3, 0.0 }
0x2028   : > { %v6344_v5 = vsub.f32 %v6278_v50, %v6338_v49  ;;  %6355 = vadd.xlane.f32.xlu0 %v6354_v4 }
0x202a   : > { %v6350_v6 = vmul.f32 1.442695, %v6344_v5 }
0x202c   : > { %10034 = vpow2.f32 %v6350_v6 }
0x202e   : > { %v10033_v7 = vpop.eup %10032 }
0x202f   : > { %v6341_v8 = vpop.xlane.xlu1 %6340  ;;  %v6357_v9 = vsel %vm799_vm1, %v10033_v7, 0.0 }
0x2030   : > { %v6345_v10 = vsub.f32 %v6324_v56, %v6341_v8  ;;  %6358 = vadd.xlane.f32.xlu1 %v6357_v9  ;;  %v9900_v8 = vld [vmem:[#allocation13 + $0x180] sm:$0xff]   ;;  %v9901_v9 = vld [vmem:[#allocation13 + $0x188] sm:$0xff]  }
0x2032   : > { %v6352_v40 = vmul.f32 1.442695, %v6345_v10  ;;  %v9902_v10 = vld [vmem:[#allocation13 + $0x190] sm:$0xff]  }
0x2034   : > { %10036 = vpow2.f32 %v6352_v40  ;;  %v9903_v40 = vld [vmem:[#allocation13 + $0x198] sm:$0xff]  }
0x2036   : > { %v10035_v11 = vpop.eup %10034 }
0x2037   : > { %v6360_v14 = vsel %vm799_vm1, %v10035_v11, 0.0 }
0x2038   : > { %6361 = vadd.xlane.f32.xlu0 %v6360_v14  ;;  %v9905_v14 = vld [vmem:[#allocation13 + $0x1a8] sm:$0xff]  }
0x203e   : > { %v10037_v15 = vpop.eup %10036 }
0x203f   : > { %v6363_v16 = vsel %vm799_vm1, %v10037_v15, 0.0 }
0x2040   : > { %6364 = vadd.xlane.f32.xlu1 %v6363_v16  ;;  %v9907_v16 = vld [vmem:[#allocation13 + $0x1b8] sm:$0xff]  }
0x20b5   : > { %v6356_v18 = vpop.xlane.xlu0 %6355 }
0x20b6   : > { %10038 = vrcp.f32 %v6356_v18  ;;  %v9908_v18 = vld [vmem:[#allocation10 + $0x1c0] sm:$0xff]  }
0x20bd   : > { %v6359_v19 = vpop.xlane.xlu1 %6358 }
0x20be   : > { %10040 = vrcp.f32 %v6359_v19  ;;  %v9910_v19 = vld [vmem:[#allocation14 + $0x30] sm:$0xff]  }
0x20c0   : > { %v10039_v20 = vpop.eup %10038 }
0x20c1   : > { %v6370_v21 = vmul.f32 %v10039_v20, %v10031_v3 }
0x20c3   : > { %v6374_v22 = vsel %vm799_vm1, %v6370_v21, 0.0 }
0x20c4   : > { %v6375_v23 = vrot.slane %v6374_v22, 4 }
0x20c5   : > { %v6362_v25 = vpop.xlane.xlu0 %6361 }
0x20c6   : > { %v6376_v26 = vadd.f32 %v6375_v23, %v6374_v22  ;;  %10042 = vrcp.f32 %v6362_v25 }
0x20c8   : > { %v10041_v54 = vpop.eup %10040  ;;  %v6377_v27 = vrot.slane %v6376_v26, 2 }
0x20c9   : > { %v6371_v31 = vmul.f32 %v10041_v54, %v10033_v7 }
0x20ca   : > { %v6378_v32 = vadd.f32 %v6377_v27, %v6376_v26 }
0x20cb   : > { %v6381_v35 = vsel %vm799_vm1, %v6371_v31, 0.0 }
0x20cc   : > { %v6379_v36 = vrot.slane %v6378_v32, 1  ;;  %v6382_v37 = vrot.slane %v6381_v35, 4 }
0x20cd   : > { %v6365_v38 = vpop.xlane.xlu1 %6364 }
0x20ce   : > { %v6383_v39 = vadd.f32 %v6382_v37, %v6381_v35  ;;  %10044 = vrcp.f32 %v6365_v38  ;;  %v6380_v41 = vadd.f32 %v6379_v36, %v6378_v32 }
0x20d0   : > { %v10043_v0 = vpop.eup %10042  ;;  %v6384_v42 = vrot.slane %v6383_v39, 2  ;;  %v6402_v43 = vmul.f32 0.125, %v6380_v41 }
0x20d1   : > { %v6372_v44 = vmul.f32 %v10043_v0, %v10035_v11  ;;  %v9904_v11 = vld [vmem:[#allocation13 + $0x1a0] sm:$0xff]  }
0x20d2   : > { %v6406_v45 = vpack.c.bf16 %v6402_v43, %v6402_v43  ;;  %v6385_v46 = vadd.f32 %v6384_v42, %v6383_v39 }
0x20d3   : > { %v6388_v47 = vsel %vm799_vm1, %v6372_v44, 0.0 }
0x20d4   : > { %v6389_v48 = vrot.slane %v6388_v47, 4  ;;  %9436 = vmatmul.mubr.msk.bf16.vlgmr.msra.gmra.mrb[140].mxu1 %vm799_vm1, %v6406_v45  ;;  %v6386_v50 = vrot.slane %v6385_v46, 1 }
0x20d5   : > { %9446 = vmatpush3.bf16.msra.mxu1 %v10849_v29  ;;  %9447 = vmatprep.mubr.msk.bf16.mxu1 %vm10422_vm0, %v10421_v34 }
0x20d6   : > { %v6390_v51 = vadd.f32 %v6389_v48, %v6388_v47  ;;  %v6387_v52 = vadd.f32 %v6386_v50, %v6385_v46  ;;  %9457 = vmatprep.subr.bf16.mxu1 %v10421_v34 }
0x20d8   : > { %v10045_v53 = vpop.eup %10044  ;;  %v6391_v55 = vrot.slane %v6390_v51, 2  ;;  %v6403_v56 = vmul.f32 0.125, %v6387_v52 }
0x20d9   : > { %v6373_v57 = vmul.f32 %v10045_v53, %v10037_v15  ;;  %v9906_v15 = vld [vmem:[#allocation13 + $0x1b0] sm:$0xff]  }
0x20da   : > { %v6407_v58 = vpack.c.bf16 %v6403_v56, %v6403_v56  ;;  %v6392_v59 = vadd.f32 %v6391_v55, %v6390_v51 }
0x20db   : > { %v6395_v60 = vsel %vm799_vm1, %v6373_v57, 0.0 }
0x20dc   : > { %v6396_v61 = vrot.slane %v6395_v60, 4  ;;  %9442 = vmatmul.mubr.msk.bf16.vlgmr.msra.gmra.mrb[200].mxu0 %vm799_vm1, %v6407_v58  ;;  %v6393_v62 = vrot.slane %v6392_v59, 1  ;;  %v9909_v58 = vld [vmem:[#allocation10 + $0x1c8] sm:$0xff]  }
0x20dd   : > { %9452 = vmatpush3.bf16.msra.mxu0 %v10858_v33  ;;  %9453 = vmatprep.mubr.msk.bf16.mxu0 %vm10422_vm0, %v10421_v34 }
0x20de   : > { %v6397_v63 = vadd.f32 %v6396_v61, %v6395_v60  ;;  %v6394_v1 = vadd.f32 %v6393_v62, %v6392_v59  ;;  %9477 = vmatprep.subr.bf16.mxu0 %v10421_v34  ;;  %v9911_v59 = vld [vmem:[#allocation10 + $0x1d0] sm:$0xff]   ;;  %v9912_v60 = vld [vmem:[#allocation10 + $0x1d8] sm:$0xff]   ;;  %v9914_v62 = vld [vmem:[#allocation10 + $0x1e0] sm:$0xff]  }
0x20df   : > { %v9913_v61 = vld [vmem:[#allocation7 + $0x1c0] sm:$0xff]  }
0x20e0   : > { %v6398_v2 = vrot.slane %v6397_v63, 2  ;;  %v6404_v24 = vmul.f32 0.125, %v6394_v1  ;;  %v9918_v1 = vld [vmem:[#allocation10 + $0x1f0] sm:$0xff]  }
0x20e2   : > { %v6408_v3 = vpack.c.bf16 %v6404_v24, %v6404_v24  ;;  %v6399_v49 = vadd.f32 %v6398_v2, %v6397_v63  ;;  %v9916_v63 = vld [vmem:[#allocation10 + $0x1e8] sm:$0xff]   ;;  %v9920_v2 = vld [vmem:[#allocation10 + $0x1f8] sm:$0xff]  }
0x20e4   : > { %9448 = vmatmul.mubr.msk.bf16.vlgmr.msra.gmra.mrb[144].mxu1 %vm799_vm1, %v6408_v3  ;;  %v6400_v4 = vrot.slane %v6399_v49, 1 }
0x20e5   : > { %9473 = vmatprep.mubr.msk.bf16.mxu1 %vm10422_vm0, %v10421_v34  ;;  %9458 = vmatpush3.bf16.msra.mxu1 %v9900_v8  ;;  %v9921_v8 = vld [vmem:[#allocation7 + $0x1e0] sm:$0xff]  }
0x20e6   : > { %v6401_v5 = vadd.f32 %v6400_v4, %v6399_v49  ;;  %9459 = vmatprep.subr.bf16.mxu1 %v10421_v34  ;;  %v9915_v4 = vld [vmem:[#allocation7 + $0x1c8] sm:$0xff]  }
0x20e8   : > { %v6405_v6 = vmul.f32 0.125, %v6401_v5 }
0x20e9   : > { %9460 = vmatpush3.bf16.msra.mxu1 %v9901_v9  ;;  %v9922_v9 = vld [vmem:[#allocation7 + $0x1e8] sm:$0xff]  }
0x20ea   : > { %v6409_v7 = vpack.c.bf16 %v6405_v6, %v6405_v6  ;;  %9461 = vmatprep.subr.bf16.mxu1 %v10421_v34 }
0x20ec   : > { %9454 = vmatmul.mubr.msk.bf16.vlgmr.msra.gmra.mrb[204].mxu0 %vm799_vm1, %v6409_v7  ;;  %v9919_v7 = vld [vmem:[#allocation7 + $0x1d8] sm:$0xff]  }
0x20ed   : > { %9479 = vmatprep.mubr.msk.bf16.mxu0 %vm10422_vm0, %v10421_v34  ;;  %9462 = vmatpush3.bf16.msra.mxu1 %v9902_v10  ;;  %v9923_v10 = vld [vmem:[#allocation7 + $0x1f0] sm:$0xff]  }
0x20ee   : > { %9463 = vmatprep.subr.bf16.mxu1 %v10421_v34  ;;  %9478 = vmatpush3.bf16.msra.mxu0 %v9910_v19 }
0x20ef   : > { %9483 = vmatprep.subr.bf16.mxu0 %v9913_v61 }
0x20f1   : > { %9464 = vmatpush3.bf16.msra.mxu1 %v9903_v40  ;;  %v9924_v40 = vld [vmem:[#allocation7 + $0x1f8] sm:$0xff]  }
0x20f2   : > { %9465 = vmatprep.subr.bf16.mxu1 %v10421_v34 }
0x20f5   : > { %9466 = vmatpush3.bf16.msra.mxu1 %v9904_v11 }
0x20f6   : > { %9467 = vmatprep.subr.bf16.mxu1 %v10421_v34 }
0x20f9   : > { %9468 = vmatpush3.bf16.msra.mxu1 %v9905_v14 }
0x20fa   : > { %9469 = vmatprep.subr.bf16.mxu1 %v10421_v34 }
0x20fd   : > { %9470 = vmatpush3.bf16.msra.mxu1 %v9906_v15 }
0x20fe   : > { %9471 = vmatprep.subr.bf16.mxu1 %v10421_v34 }
0x2101   : > { %9472 = vmatpush3.bf16.msra.mxu1 %v9907_v16 }
0x2102   : > { %9503 = vmatprep.subr.bf16.mxu1 %v9908_v18 }
0x21a7   : > { %v6447_v20 = vpop.f32.mrb[140].mxu1 }
0x21a8   : > { %v9437_v21 = vpop.f32.mrb[141].mxu1  ;;  %v6582_v26 = vpack.c.bf16 %v6447_v20, %v6447_v20 }
0x21a9   : > { %v6450_v22 = vpop.f32.mrb[142].mxu1 }
0x21aa   : > { %v9438_v23 = vpop.f32.mrb[143].mxu1  ;;  %v6607_v36 = vunpack.c.l.b16 %v6582_v26 }
0x21af   : > { %v6490_v25 = vpop.f32.mrb[200].mxu0 }
0x21b0   : > { %v6583_v54 = vpack.c.bf16 %v6490_v25, %v6490_v25  ;;  %v9443_v27 = vpop.f32.mrb[201].mxu0 }
0x21b1   : > { %v6493_v31 = vpop.f32.mrb[202].mxu0 }
0x21b2   : > { %v6608_v32 = vunpack.c.l.b16 %v6583_v54  ;;  %v9444_v35 = vpop.f32.mrb[203].mxu0 }
0x21b4   : > { %v6611_v37 = vrot.slane %v6608_v32, 7 }
0x21b6   : > { %v6612_v38 = vsel %vm1266_vm2, %v6611_v37, %v6607_v36 }
0x21b7   : > { %v6533_v39 = vpop.f32.mrb[144].mxu1 }
0x21b8   : > { %v6584_v41 = vpack.c.bf16 %v6533_v39, %v6533_v39  ;;  %v9449_v0 = vpop.f32.mrb[145].mxu1 }
0x21b9   : > { %v6536_v42 = vpop.f32.mrb[146].mxu1 }
0x21ba   : > { %v6609_v43 = vunpack.c.l.b16 %v6584_v41  ;;  %v9450_v44 = vpop.f32.mrb[147].mxu1 }
0x21bb   : > { %v8179_v44 = vld [vmem:[#allocation8 + $0x7] ss:$0 sm:$0xff] }
0x21bc   : > { %v6613_v45 = vrot.slane %v6609_v43, 6 }
0x21be   : > { %v6614_v46 = vsel %vm1269_vm3, %v6613_v45, %v6612_v38 }
0x21bf   : > { %v6576_v47 = vpop.f32.mrb[204].mxu0 }
0x21c0   : > { %v6585_v48 = vpack.c.bf16 %v6576_v47, %v6576_v47  ;;  %v9455_v50 = vpop.f32.mrb[205].mxu0 }
0x21c1   : > { %v6579_v51 = vpop.f32.mrb[206].mxu0 }
0x21c2   : > { %v6610_v52 = vunpack.c.l.b16 %v6585_v48  ;;  %v9456_v53 = vpop.f32.mrb[207].mxu0 }
0x21c4   : > { %v6615_v55 = vrot.slane %v6610_v52, 5 }
0x21c6   : > { %v6616_v56 = vsel %vm1272_vm4, %v6615_v55, %v6614_v46 }
0x21c7   : > { %v6617_v57 = vpack.c.b16 %v6616_v56, %v6616_v56 }
0x21c9   : > { %9474 = vmatmul.mubr.bf16.vlgmr.msra.gmra.mrb[148].mxu1 %v6617_v57 }
0x21ca   : > { %9504 = vmatpush3.bf16.msra.mxu1 %v9908_v18  ;;  %9519 = vmatprep.mubr.bf16.mxu1 %v10833_v13 }
0x21cb   : > { %9505 = vmatprep.subr.bf16.mxu1 %v9909_v58 }
0x21ce   : > { %9506 = vmatpush3.bf16.msra.mxu1 %v9909_v58 }
0x21cf   : > { %9507 = vmatprep.subr.bf16.mxu1 %v9911_v59 }
0x21d2   : > { %9508 = vmatpush3.bf16.msra.mxu1 %v9911_v59 }
0x21d3   : > { %9509 = vmatprep.subr.bf16.mxu1 %v9912_v60 }
0x21d6   : > { %9510 = vmatpush3.bf16.msra.mxu1 %v9912_v60 }
0x21d7   : > { %9511 = vmatprep.subr.bf16.mxu1 %v9914_v62 }
0x21da   : > { %9512 = vmatpush3.bf16.msra.mxu1 %v9914_v62 }
0x21db   : > { %9513 = vmatprep.subr.bf16.mxu1 %v9916_v63 }
0x21de   : > { %9514 = vmatpush3.bf16.msra.mxu1 %v9916_v63 }
0x21df   : > { %9515 = vmatprep.subr.bf16.mxu1 %v9918_v1 }
0x21e2   : > { %9516 = vmatpush3.bf16.msra.mxu1 %v9918_v1 }
0x21e3   : > { %9517 = vmatprep.subr.bf16.mxu1 %v9920_v2 }
0x21e6   : > { %9518 = vmatpush3.bf16.msra.mxu1 %v9920_v2 }
0x21e7   : > { %9551 = vmatprep.subr.bf16.mxu1 %v10421_v34 }
0x21e9   : > { %9520 = vmatmul.mubr.bf16.vlgmr.msra.gmra.mrb[152].mxu1 %v10847_v28 }
0x21ea   : > { %9523 = vmatprep.mubr.bf16.mxu1 %v10849_v29  ;;  %9552 = vmatpush3.bf16.msra.mxu1 %v10833_v13  ;;  %v9917_v13 = vld [vmem:[#allocation7 + $0x1d0] sm:$0xff]  }
0x21eb   : > { %9563 = vmatprep.subr.bf16.mxu1 %v10421_v34 }
0x21f1   : > { %9524 = vmatmul.mubr.bf16.gmra.mrb[156].mxu1 %v10858_v33 }
0x21f2   : > { %9553 = vmatprep.mubr.msk.bf16.mxu1 %vm10422_vm0, %v10421_v34 }
0x229c   : > { %v6701_v24 = vpop.f32.mrb[148].mxu1 }
0x229d   : > { %v6707_v3 = vpack.c.bf16 %v6701_v24, %v6701_v24  ;;  %v9475_v49 = vpop.f32.mrb[149].mxu1 }
0x229e   : > { %v6704_v5 = vpop.f32.mrb[150].mxu1 }
0x229f   : > { %v9476_v6 = vpop.f32.mrb[151].mxu1  ;;  %9480 = vmatmul.mubr.msk.bf16.vlgmr.msra.gmra.mrb[208].mxu0 %vm799_vm1, %v6707_v3 }
0x22a0   : > { %9484 = vmatpush3.bf16.msra.mxu0 %v9913_v61  ;;  %9499 = vmatprep.mubr.bf16.mxu0 %v10838_v17  ;;  %v8188_v17 = vld [vmem:[#allocation11 + $0x7] ss:$0 sm:$0xff] }
0x22a1   : > { %9485 = vmatprep.subr.bf16.mxu0 %v9915_v4 }
0x22a4   : > { %9486 = vmatpush3.bf16.msra.mxu0 %v9915_v4 }
0x22a5   : > { %9487 = vmatprep.subr.bf16.mxu0 %v9917_v13 }
0x22a8   : > { %9488 = vmatpush3.bf16.msra.mxu0 %v9917_v13 }
0x22a9   : > { %9489 = vmatprep.subr.bf16.mxu0 %v9919_v7 }
0x22ac   : > { %9490 = vmatpush3.bf16.msra.mxu0 %v9919_v7 }
0x22ad   : > { %9491 = vmatprep.subr.bf16.mxu0 %v9921_v8 }
0x22b0   : > { %9492 = vmatpush3.bf16.msra.mxu0 %v9921_v8 }
0x22b1   : > { %9493 = vmatprep.subr.bf16.mxu0 %v9922_v9 }
0x22b4   : > { %9494 = vmatpush3.bf16.msra.mxu0 %v9922_v9 }
0x22b5   : > { %9495 = vmatprep.subr.bf16.mxu0 %v9923_v10 }
0x22b8   : > { %9496 = vmatpush3.bf16.msra.mxu0 %v9923_v10 }
0x22b9   : > { %9497 = vmatprep.subr.bf16.mxu0 %v9924_v40 }
0x22bc   : > { %9498 = vmatpush3.bf16.msra.mxu0 %v9924_v40  ;;  %v9521_v11 = vpop.f32.mrb[152].mxu1 }
0x22bd   : > { %9527 = vmatprep.subr.bf16.mxu0 %v10421_v34  ;;  %v6999_v14 = vadd.f32 %v9521_v11, %v8188_v17  ;;  %v6990_v15 = vpop.f32.mrb[153].mxu1 }
0x22be   : > { %v6991_v16 = vadd.f32 %v8188_v17, %v6990_v15  ;;  %v9522_v18 = vpop.f32.mrb[154].mxu1 }
0x22bf   : > { %9500 = vmatmul.mubr.bf16.vlgmr.msra.gmra.mrb[212].mxu0 %v10851_v30  ;;  %v7002_v19 = vadd.f32 %v9522_v18, %v8188_v17  ;;  %v6993_v20 = vpop.f32.mrb[155].mxu1 }
0x22c0   : > { %9529 = vmatprep.mubr.msk.bf16.mxu0 %vm10422_vm0, %v10421_v34  ;;  %v6994_v21 = vadd.f32 %v8188_v17, %v6993_v20 }
0x22c1   : > { %v7034_v22 = vpack.c.bf16 %v7002_v19, %v6999_v14 }
0x22c2   : > { %v7033_v23 = vpack.c.bf16 %v6994_v21, %v6991_v16 }
0x22c3   : > { %v7087_v52 = vsel %vm799_vm1, %v7034_v22, 0 }
0x22c4   : > { %v7041_v25 = vsel %vm799_vm1, %v7033_v23, 0  ;;  %v9525_v30 = vpop.f32.mrb[156].mxu1 }
0x22c5   : > { %9528 = vmatpush3.bf16.xpose.msra.mxu0 %v7041_v25  ;;  %v7006_v26 = vpop.f32.mrb[157].mxu1  ;;  %v7015_v27 = vadd.f32 %v9525_v30, %v8188_v17 }
0x22c6   : > { %9533 = vmatprep.subr.bf16.mxu0 %v10421_v34  ;;  %v9526_v54 = vpop.f32.mrb[158].mxu1  ;;  %v7007_v31 = vadd.f32 %v8188_v17, %v7006_v26 }
0x22c7   : > { %v7018_v32 = vadd.f32 %v9526_v54, %v8188_v17  ;;  %v7009_v35 = vpop.f32.mrb[159].mxu1 }
0x22c8   : > { %v7010_v36 = vadd.f32 %v8188_v17, %v7009_v35 }
0x22c9   : > { %v7036_v37 = vpack.c.bf16 %v7018_v32, %v7015_v27 }
0x22ca   : > { %v7035_v38 = vpack.c.bf16 %v7010_v36, %v7007_v31 }
0x22cb   : > { %v7179_v58 = vsel %vm799_vm1, %v7036_v37, 0 }
0x22cc   : > { %v7133_v55 = vsel %vm799_vm1, %v7035_v38, 0 }
0x2372   : > { %v6754_v39 = vpop.f32.mrb[208].mxu0 }
0x2373   : > { %v11419_v41 = vadd.f32 %v6754_v39, %v11341_v12  ;;  %v9481_v0 = vpop.f32.mrb[209].mxu0 }
0x2374   : > { %v6757_v42 = vpop.f32.mrb[210].mxu0 }
0x2375   : > { %v9482_v43 = vpop.f32.mrb[211].mxu0 }
0x2392   : > { %v9501_v45 = vpop.f32.mrb[212].mxu0 }
0x2393   : > { %v6868_v46 = vpop.f32.mrb[213].mxu0  ;;  %v6877_v56 = vadd.f32 %v9501_v45, %v8179_v44 }
0x2394   : > { %v6869_v47 = vadd.f32 %v8179_v44, %v6868_v46  ;;  %v9502_v48 = vpop.f32.mrb[214].mxu0 }
0x2395   : > { %v6871_v50 = vpop.f32.mrb[215].mxu0  ;;  %v8262_v57 = vpack.c.bf16 %v6877_v56, %v6877_v56  ;;  %v6880_v59 = vadd.f32 %v9502_v48, %v8179_v44 }
0x2396   : > { %v8260_v51 = vpack.c.bf16 %v6869_v47, %v6869_v47  ;;  %v6872_v12 = vadd.f32 %v8179_v44, %v6871_v50 }
0x2397   : > { %v8263_v60 = vpack.c.bf16 %v6880_v59, %v6880_v59 }
0x2398   : > { %9530 = vmatmul.mubr.msk.bf16.vlgmr.msra.gmra.mrb[216].mxu0 %vm799_vm1, %v8260_v51  ;;  %v8261_v53 = vpack.c.bf16 %v6872_v12, %v6872_v12 }
0x2399   : > { %9534 = vmatpush3.bf16.xpose.msra.mxu0 %v7087_v52  ;;  %9535 = vmatprep.mubr.msk.bf16.mxu0 %vm10422_vm0, %v10421_v34 }
0x239a   : > { %9539 = vmatprep.subr.bf16.mxu0 %v10421_v34 }
0x23a0   : > { %9536 = vmatmul.mubr.msk.bf16.vlgmr.msra.gmra.mrb[220].mxu0 %vm799_vm1, %v8261_v53 }
0x23a1   : > { %9540 = vmatpush3.bf16.xpose.msra.mxu0 %v7133_v55  ;;  %9541 = vmatprep.mubr.msk.bf16.mxu0 %vm10422_vm0, %v10421_v34 }
0x23a2   : > { %9545 = vmatprep.subr.bf16.mxu0 %v10421_v34 }
0x23a8   : > { %9542 = vmatmul.mubr.msk.bf16.vlgmr.msra.gmra.mrb[224].mxu0 %vm799_vm1, %v8262_v57 }
0x23a9   : > { %9546 = vmatpush3.bf16.xpose.msra.mxu0 %v7179_v58  ;;  %9547 = vmatprep.mubr.msk.bf16.mxu0 %vm10422_vm0, %v10421_v34 }
0x23aa   : > { %9557 = vmatprep.subr.bf16.mxu0 %v10421_v34 }
0x23b0   : > { %9548 = vmatmul.mubr.msk.bf16.vlgmr.msra.gmra.mrb[228].mxu0 %vm799_vm1, %v8263_v60 }
0x23b1   : > { %9558 = vmatpush3.bf16.msra.mxu0 %v10847_v28  ;;  %9559 = vmatprep.mubr.msk.bf16.mxu0 %vm10422_vm0, %v10421_v34 }
0x23b2   : > { %9569 = vmatprep.subr.bf16.mxu0 %v10421_v34 }
0x246b   : > { %v7077_v61 = vpop.f32.mrb[216].mxu0 }
0x246c   : > { %v9531_v62 = vpop.f32.mrb[217].mxu0  ;;  %v7221_v63 = vsel %vm799_vm1, %v7077_v61, -inf }
0x246d   : > { %7222 = vmax.xlane.f32.xlu0 %v7221_v63  ;;  %v7080_v1 = vpop.f32.mrb[218].mxu0 }
0x246e   : > { %v9532_v2 = vpop.f32.mrb[219].mxu0 }
0x2473   : > { %v7123_v24 = vpop.f32.mrb[220].mxu0 }
0x2474   : > { %v9537_v3 = vpop.f32.mrb[221].mxu0  ;;  %v7224_v49 = vsel %vm799_vm1, %v7123_v24, -inf }
0x2475   : > { %7225 = vmax.xlane.f32.xlu1 %v7224_v49  ;;  %v7126_v4 = vpop.f32.mrb[222].mxu0 }
0x2476   : > { %v9538_v5 = vpop.f32.mrb[223].mxu0 }
0x247b   : > { %v7169_v28 = vpop.f32.mrb[224].mxu0 }
0x247c   : > { %v9543_v6 = vpop.f32.mrb[225].mxu0  ;;  %v7227_v13 = vsel %vm799_vm1, %v7169_v28, -inf }
0x247d   : > { %7228 = vmax.xlane.f32.xlu0 %v7227_v13  ;;  %v7172_v7 = vpop.f32.mrb[226].mxu0 }
0x247e   : > { %v9544_v8 = vpop.f32.mrb[227].mxu0 }
0x2483   : > { %v7215_v9 = vpop.f32.mrb[228].mxu0 }
0x2484   : > { %v9549_v10 = vpop.f32.mrb[229].mxu0  ;;  %v7230_v40 = vsel %vm799_vm1, %v7215_v9, -inf }
0x2485   : > { %7231 = vmax.xlane.f32.xlu1 %v7230_v40  ;;  %v7218_v17 = vpop.f32.mrb[230].mxu0 }
0x2486   : > { %v9550_v11 = vpop.f32.mrb[231].mxu0 }
0x24fa   : > { %v7223_v14 = vpop.xlane.xlu0 %7222 }
0x24fb   : > { %v7233_v15 = vsub.f32 %v7077_v61, %v7223_v14 }
0x24fd   : > { %v7237_v16 = vmul.f32 1.442695, %v7233_v15 }
0x24ff   : > { %10046 = vpow2.f32 %v7237_v16 }
0x2502   : > { %v7226_v18 = vpop.xlane.xlu1 %7225 }
0x2503   : > { %v7234_v19 = vsub.f32 %v7123_v24, %v7226_v18 }
0x2505   : > { %v7239_v20 = vmul.f32 1.442695, %v7234_v19 }
0x2507   : > { %10048 = vpow2.f32 %v7239_v20 }
0x2509   : > { %v10047_v21 = vpop.eup %10046 }
0x250a   : > { %v7229_v22 = vpop.xlane.xlu0 %7228  ;;  %v7245_v23 = vsel %vm799_vm1, %v10047_v21, 0.0 }
0x250b   : > { %v7235_v25 = vsub.f32 %v7169_v28, %v7229_v22  ;;  %7246 = vadd.xlane.f32.xlu0 %v7245_v23  ;;  %v9926_v22 = vld [vmem:[#allocation13 + $0x1c8] sm:$0xff]   ;;  %v9927_v23 = vld [vmem:[#allocation13 + $0x1d0] sm:$0xff]  }
0x250d   : > { %v7241_v30 = vmul.f32 1.442695, %v7235_v25  ;;  %v9928_v25 = vld [vmem:[#allocation13 + $0x1d8] sm:$0xff]  }
0x250f   : > { %10050 = vpow2.f32 %v7241_v30  ;;  %v9929_v30 = vld [vmem:[#allocation13 + $0x1e0] sm:$0xff]  }
0x2511   : > { %v10049_v26 = vpop.eup %10048 }
0x2512   : > { %v7232_v54 = vpop.xlane.xlu1 %7231  ;;  %v7248_v27 = vsel %vm799_vm1, %v10049_v26, 0.0 }
0x2513   : > { %v7236_v31 = vsub.f32 %v7215_v9, %v7232_v54  ;;  %7249 = vadd.xlane.f32.xlu1 %v7248_v27  ;;  %v9931_v54 = vld [vmem:[#allocation13 + $0x1f0] sm:$0xff]   ;;  %v9932_v27 = vld [vmem:[#allocation13 + $0x1f8] sm:$0xff]  }
0x2515   : > { %v7243_v32 = vmul.f32 1.442695, %v7236_v31  ;;  %v9933_v31 = vld [vmem:[#allocation14 + $0x38] sm:$0xff]  }
0x2517   : > { %10052 = vpow2.f32 %v7243_v32 }
0x2519   : > { %v10051_v35 = vpop.eup %10050 }
0x251a   : > { %v7251_v36 = vsel %vm799_vm1, %v10051_v35, 0.0 }
0x251b   : > { %7252 = vadd.xlane.f32.xlu0 %v7251_v36 }
0x2521   : > { %v10053_v37 = vpop.eup %10052 }
0x2522   : > { %v7254_v38 = vsel %vm799_vm1, %v10053_v37, 0.0 }
0x2523   : > { %7255 = vadd.xlane.f32.xlu1 %v7254_v38 }
0x2598   : > { %v7247_v39 = vpop.xlane.xlu0 %7246 }
0x2599   : > { %10054 = vrcp.f32 %v7247_v39 }
0x25a0   : > { %v7250_v0 = vpop.xlane.xlu1 %7249 }
0x25a1   : > { %10056 = vrcp.f32 %v7250_v0 }
0x25a3   : > { %v10055_v42 = vpop.eup %10054 }
0x25a4   : > { %v7261_v43 = vmul.f32 %v10055_v42, %v10047_v21  ;;  %v9925_v21 = vld [vmem:[#allocation13 + $0x1c0] sm:$0xff]  }
0x25a6   : > { %v7265_v44 = vsel %vm799_vm1, %v7261_v43, 0.0 }
0x25a7   : > { %v7266_v45 = vrot.slane %v7265_v44, 4 }
0x25a8   : > { %v7253_v46 = vpop.xlane.xlu0 %7252 }
0x25a9   : > { %v7267_v47 = vadd.f32 %v7266_v45, %v7265_v44  ;;  %10058 = vrcp.f32 %v7253_v46 }
0x25ab   : > { %v10057_v48 = vpop.eup %10056  ;;  %v7268_v50 = vrot.slane %v7267_v47, 2 }
0x25ac   : > { %v7262_v51 = vmul.f32 %v10057_v48, %v10049_v26  ;;  %v9930_v26 = vld [vmem:[#allocation13 + $0x1e8] sm:$0xff]  }
0x25ad   : > { %v7269_v52 = vadd.f32 %v7268_v50, %v7267_v47 }
0x25ae   : > { %v7272_v12 = vsel %vm799_vm1, %v7262_v51, 0.0 }
0x25af   : > { %v7270_v53 = vrot.slane %v7269_v52, 1  ;;  %v7273_v55 = vrot.slane %v7272_v12, 4 }
0x25b0   : > { %v7256_v56 = vpop.xlane.xlu1 %7255 }
0x25b1   : > { %v7274_v57 = vadd.f32 %v7273_v55, %v7272_v12  ;;  %10060 = vrcp.f32 %v7256_v56  ;;  %v7271_v58 = vadd.f32 %v7270_v53, %v7269_v52 }
0x25b3   : > { %v10059_v59 = vpop.eup %10058  ;;  %v7275_v60 = vrot.slane %v7274_v57, 2  ;;  %v7293_v61 = vmul.f32 0.125, %v7271_v58 }
0x25b4   : > { %v7263_v62 = vmul.f32 %v10059_v59, %v10051_v35 }
0x25b5   : > { %v7297_v63 = vpack.c.bf16 %v7293_v61, %v7293_v61  ;;  %v7276_v1 = vadd.f32 %v7275_v60, %v7274_v57 }
0x25b6   : > { %v7279_v2 = vsel %vm799_vm1, %v7263_v62, 0.0 }
0x25b7   : > { %v7280_v24 = vrot.slane %v7279_v2, 4  ;;  %9554 = vmatmul.mubr.msk.bf16.vlgmr.msra.gmra.mrb[160].mxu1 %vm799_vm1, %v7297_v63  ;;  %v7277_v3 = vrot.slane %v7276_v1, 1 }
0x25b8   : > { %9564 = vmatpush3.bf16.msra.mxu1 %v10849_v29  ;;  %9565 = vmatprep.mubr.msk.bf16.mxu1 %vm10422_vm0, %v10421_v34 }
0x25b9   : > { %v7281_v49 = vadd.f32 %v7280_v24, %v7279_v2  ;;  %v7278_v4 = vadd.f32 %v7277_v3, %v7276_v1  ;;  %9575 = vmatprep.subr.bf16.mxu1 %v10421_v34 }
0x25bb   : > { %v10061_v5 = vpop.eup %10060  ;;  %v7282_v28 = vrot.slane %v7281_v49, 2  ;;  %v7294_v6 = vmul.f32 0.125, %v7278_v4 }
0x25bc   : > { %v7264_v13 = vmul.f32 %v10061_v5, %v10053_v37 }
0x25bd   : > { %v7298_v7 = vpack.c.bf16 %v7294_v6, %v7294_v6  ;;  %v7283_v8 = vadd.f32 %v7282_v28, %v7281_v49  ;;  %v10423_v28 = vmov 1966171168  }
0x25be   : > { %v7286_v9 = vsel %vm799_vm1, %v7264_v13, 0.0  ;;  %v7662_v6 = vunpack.c.l.s4 %v10423_v28  ;;  %v7664_v13 = vlaneseq }
0x25bf   : > { %v7287_v10 = vrot.slane %v7286_v9, 4  ;;  %9560 = vmatmul.mubr.msk.bf16.vlgmr.msra.gmra.mrb[232].mxu0 %vm799_vm1, %v7298_v7  ;;  %v7284_v40 = vrot.slane %v7283_v8, 1 }
0x25c0   : > { %9570 = vmatpush3.bf16.msra.mxu0 %v10858_v33  ;;  %9571 = vmatprep.mubr.msk.bf16.mxu0 %vm10422_vm0, %v10421_v34  ;;  %v7663_v7 = vunpack.c.0.s8 %v7662_v6 }
0x25c1   : > { %v7288_v29 = vadd.f32 %v7287_v10, %v7286_v9  ;;  %v7285_v17 = vadd.f32 %v7284_v40, %v7283_v8  ;;  %9595 = vmatprep.subr.bf16.mxu0 %v10421_v34  ;;  %v7665_v8 = vshrl.u32 %v7664_v13, 7  ;;  %v8219_v10 = vld [vmem:[#allocation16] ss:$0 sm:$0xff] }
0x25c3   : > { %v7289_v11 = vrot.slane %v7288_v29, 2  ;;  %v7295_v14 = vmul.f32 0.125, %v7285_v17 }
0x25c5   : > { %v7299_v15 = vpack.c.bf16 %v7295_v14, %v7295_v14  ;;  %v7290_v16 = vadd.f32 %v7289_v11, %v7288_v29  ;;  %v7666_v29 = vsub.s32 %v7663_v7, %v7665_v8 }
0x25c7   : > { %9566 = vmatmul.mubr.msk.bf16.vlgmr.msra.gmra.mrb[164].mxu1 %vm799_vm1, %v7299_v15  ;;  %v7291_v18 = vrot.slane %v7290_v16, 1 }
0x25c8   : > { %9591 = vmatprep.mubr.msk.bf16.mxu1 %vm10422_vm0, %v10421_v34  ;;  %9576 = vmatpush3.bf16.msra.mxu1 %v9925_v21 }
0x25c9   : > { %v7292_v19 = vadd.f32 %v7291_v18, %v7290_v16  ;;  %9577 = vmatprep.subr.bf16.mxu1 %v10421_v34 }
0x25cb   : > { %v7296_v20 = vmul.f32 0.125, %v7292_v19 }
0x25cc   : > { %9578 = vmatpush3.bf16.msra.mxu1 %v9926_v22 }
0x25cd   : > { %v7300_v33 = vpack.c.bf16 %v7296_v20, %v7296_v20  ;;  %9579 = vmatprep.subr.bf16.mxu1 %v10421_v34 }
0x25cf   : > { %9572 = vmatmul.mubr.msk.bf16.vlgmr.msra.gmra.mrb[236].mxu0 %vm799_vm1, %v7300_v33 }
0x25d0   : > { %9597 = vmatprep.mubr.msk.bf16.mxu0 %vm10422_vm0, %v10421_v34  ;;  %9580 = vmatpush3.bf16.msra.mxu1 %v9927_v23 }
0x25d1   : > { %9581 = vmatprep.subr.bf16.mxu1 %v10421_v34  ;;  %9596 = vmatpush3.bf16.msra.mxu0 %v9933_v31 }
0x25d4   : > { %9582 = vmatpush3.bf16.msra.mxu1 %v9928_v25 }
0x25d5   : > { %9583 = vmatprep.subr.bf16.mxu1 %v10421_v34 }
0x25d8   : > { %9584 = vmatpush3.bf16.msra.mxu1 %v9929_v30 }
0x25d9   : > { %9585 = vmatprep.subr.bf16.mxu1 %v10421_v34 }
0x25dc   : > { %9586 = vmatpush3.bf16.msra.mxu1 %v9930_v26 }
0x25dd   : > { %9587 = vmatprep.subr.bf16.mxu1 %v10421_v34 }
0x25e0   : > { %9588 = vmatpush3.bf16.msra.mxu1 %v9931_v54 }
0x25e1   : > { %9589 = vmatprep.subr.bf16.mxu1 %v10421_v34 }
0x25e4   : > { %9590 = vmatpush3.bf16.msra.mxu1 %v9932_v27 }
0x268a   : > { %v7338_v32 = vpop.f32.mrb[160].mxu1 }
0x268b   : > { %v9555_v35 = vpop.f32.mrb[161].mxu1  ;;  %v7473_v39 = vpack.c.bf16 %v7338_v32, %v7338_v32 }
0x268c   : > { %v7341_v36 = vpop.f32.mrb[162].mxu1 }
0x268d   : > { %v9556_v37 = vpop.f32.mrb[163].mxu1  ;;  %v7498_v46 = vunpack.c.l.b16 %v7473_v39 }
0x2692   : > { %v7381_v38 = vpop.f32.mrb[232].mxu0 }
0x2693   : > { %v7474_v0 = vpack.c.bf16 %v7381_v38, %v7381_v38  ;;  %v9561_v42 = vpop.f32.mrb[233].mxu0 }
0x2694   : > { %v7384_v43 = vpop.f32.mrb[234].mxu0 }
0x2695   : > { %v7499_v44 = vunpack.c.l.b16 %v7474_v0  ;;  %v9562_v45 = vpop.f32.mrb[235].mxu0 }
0x2697   : > { %v7502_v47 = vrot.slane %v7499_v44, 7 }
0x2699   : > { %v7503_v48 = vsel %vm1266_vm2, %v7502_v47, %v7498_v46 }
0x269a   : > { %v7424_v34 = vpop.f32.mrb[164].mxu1 }
0x269b   : > { %v7475_v50 = vpack.c.bf16 %v7424_v34, %v7424_v34  ;;  %v9567_v51 = vpop.f32.mrb[165].mxu1 }
0x269c   : > { %v7427_v52 = vpop.f32.mrb[166].mxu1 }
0x269d   : > { %v7500_v12 = vunpack.c.l.b16 %v7475_v50  ;;  %v9568_v53 = vpop.f32.mrb[167].mxu1 }
0x269f   : > { %v7504_v55 = vrot.slane %v7500_v12, 6 }
0x26a1   : > { %v7505_v56 = vsel %vm1269_vm3, %v7504_v55, %v7503_v48 }
0x26a2   : > { %v7467_v57 = vpop.f32.mrb[236].mxu0 }
0x26a3   : > { %v7476_v58 = vpack.c.bf16 %v7467_v57, %v7467_v57  ;;  %v9573_v59 = vpop.f32.mrb[237].mxu0 }
0x26a4   : > { %v7470_v60 = vpop.f32.mrb[238].mxu0 }
0x26a5   : > { %v7501_v61 = vunpack.c.l.b16 %v7476_v58  ;;  %v9574_v62 = vpop.f32.mrb[239].mxu0 }
0x26a7   : > { %v7506_v63 = vrot.slane %v7501_v61, 5 }
0x26a9   : > { %v7507_v1 = vsel %vm1272_vm4, %v7506_v63, %v7505_v56 }
0x26aa   : > { %v7508_v2 = vpack.c.b16 %v7507_v1, %v7507_v1 }
0x26ac   : > { %9592 = vmatmul.mubr.bf16.vlgmr.msra.gmra.mrb[168].mxu1 %v7508_v2 }
0x277f   : > { %v7592_v24 = vpop.f32.mrb[168].mxu1 }
0x2780   : > { %v7598_v3 = vpack.c.bf16 %v7592_v24, %v7592_v24  ;;  %v9593_v49 = vpop.f32.mrb[169].mxu1 }
0x2781   : > { %v7595_v4 = vpop.f32.mrb[170].mxu1 }
0x2782   : > { %v9594_v5 = vpop.f32.mrb[171].mxu1  ;;  %9598 = vmatmul.mubr.msk.bf16.vlgmr.msra.gmra.mrb[240].mxu0 %vm799_vm1, %v7598_v3 }
0x2855   : > { %v7645_v9 = vpop.f32.mrb[240].mxu0 }
0x2856   : > { %v7651_v40 = vadd.f32 %v7645_v9, %v11419_v41  ;;  %v9599_v17 = vpop.f32.mrb[241].mxu0 }
0x2857   : > { %v7648_v11 = vpop.f32.mrb[242].mxu0 }
0x2858   : > { %v7659_v14 = vadd.f32 %v8219_v10, %v7651_v40  ;;  %v9600_v15 = vpop.f32.mrb[243].mxu0 }
0x285a   : > { %v7667_v16 = vrot.slane %v7659_v14, %v7666_v29 }
0x285c   : > { %v7668_v18 = vcombine.high %v7667_v16, %v7667_v16  ;;  %v7675_v19 = vrot.slane %v7667_v16, %v7666_v29  ;;  %8220 = vst.sshfl [vmem:[%s490_s28] sm:$0x1 pattern:$0x73625140] %v7667_v16 }
0x285e   : > { %v7682_v20 = vrot.slane %v7668_v18, %v7666_v29  ;;  %v7683_v33 = vcombine.high %v7675_v19, %v7675_v19  ;;  %8221 = vst.sshfl [vmem:[%s490_s28 + $0x1] sm:$0x1 pattern:$0x73625140] %v7668_v18 }
0x2860   : > { %v7684_v41 = vcombine.high %v7682_v20, %v7682_v20  ;;  %7691 = vst [vmem:[%s490_s28 + $0x2] sm:$0x1] %v7683_v33 }
0x2862   : > { %7692 = vst [vmem:[%s490_s28 + $0x3] sm:$0x1] %v7684_v41 }
0x2863   : > { %10331 = shalt.err (!%p10328_p3)
}
0x2864   : > { %s10332_s26 = scalar_lea.hbm %s11488_s27, 64  ;;  %s10336_s5 = scalar_lea.hbm %s11582_s22, 128 }
0x2865   : > { %p10333_p10 = scmp.ne.s32.totalorder %s11488_s27, %s10332_s26  ;;  %p10337_p12 = scmp.lt.u32.totalorder %s11488_s27, %s11582_s22 }
0x2866   : > { %p10338_p2 = scmp.lt.u32.totalorder %s10336_s5, %s10332_s26  ;;  %p10340_p6 = scmp.lt.u32.totalorder %s10332_s26, %s11488_s27 }
0x2867   : > { %p10334_p1 = pnand %p10333_p10, %p11583_p9 }
0x2868   : > { %p10339_p13 = por %p10338_p2, %p10337_p12 }
0x2869   : > { %p10335_p11 = pneg %p10334_p1 }
0x286a   : > { %p10341_p0 = por %p10340_p6, %p10339_p13 }
0x286c   : > { %p10342_p5 = pnand %p10341_p0, %p10335_p11 }
0x286e   : > { %10345 = shalt.err (!%p10342_p5)
}
0x286f   : > { %s10425_s24 = smov 16   ;;  %s10426_s28 = smov 1  }
0x2870   : > { %9633 = dma.vmem_to_hbm [thread:$0]  (%p11583_p9), %s11483_s14, 64, %s11488_s27, %s7694_s18, %s10425_s24, %s10425_s24, %s10426_s28  }
0x2871 PF: > { %s7722_s23 = sand.u32 1, %s10392_s30   ;;  %p11584_p7 = scmp.ne.s32.totalorder %s11570_s29, 0 }
0x2872   : > { %p11585_p8 = scmp.ge.s32.totalorder %s10404_s12, 2  ;;  %s7723_s0 = scalar_lea.sflag [#allocation4], %s7722_s23 }
0x2874   : > { %p9665_p4 = pnand %p11585_p8, %p11584_p7 }
0x2876   : > { %10387 = dma.done.wait (!%p9665_p4), %s7723_s0, 64  }
0x2877   : > { %10389 = vsyncadd (!%p9665_p4), %s7723_s0, 4294967232  ;;  %p28_p3 = scmp.ge.s32.totalorder %s10679_s19, 4   ;;  %s11586_s30 = smov %s10396_s10 }
0x2878   : > { %s11587_s10 = smov %s10400_s11  ;;  %s11588_s11 = smov %s10691_s2 }
0x2879   : > { %s11589_s12 = smov %s10679_s19  ;;  %30 = sbr.rel (!%p28_p3) target bundleno = 18 (0x12), region = 184 }
0x2880   :  { %7728 = vsyncpa [#allocation3], 1 }
0x2881   :  { %7730 = vsyncpa [#allocation3 + $0x1], 1 }
0x2882   :  { %7731 = vsyncpa [#allocation6], 1 }
0x2883   :  { %7733 = vsyncpa [#allocation6 + $0x1], 1 }
0x2884   :  { %7734 = vsyncpa [#allocation9], 1 }
0x2885   :  { %7735 = vsyncpa [#allocation12], 1 }
0x2886   :  { %7736 = vsyncpa [#allocation15], 1 }
0x2887   :  { %7737 = vsyncpa [#allocation4], 1 }
0x2888   :  { %7739 = vsyncpa [#allocation4 + $0x1], 1 }

// kernel: tpu_custom_call.1
= control target key start
LH: loop header
LB: loop body
LE: loop exit
PB: predicated region body
PF: predicated region fallthrough
CT: control target
= control target key end

     0   :  { %s11532_s0 = inlined_call_operand.hbm [shape: f32[8,8,128], index: 0, kind: input, shape index: {}]   ;;  %s11533_s1 = inlined_call_operand.hbm [shape: f32[8,16,128], index: 1, kind: input, shape index: {}]   ;;  %s11534_s2 = inlined_call_operand.hbm [shape: bf16[8,128,16], index: 2, kind: input, shape index: {}]   ;;  %s11535_s3 = inlined_call_operand.hbm [shape: f32[8,1,16], index: 3, kind: input, shape index: {}]   ;;  %s11536_s4 = inlined_call_operand.hbm [shape: bf16[8,128,16], index: 4, kind: input, shape index: {}]   ;;  %s11537_s5 = inlined_call_operand.hbm [shape: f32[8,1,16], index: 5, kind: input, shape index: {}]   ;;  %s11538_s6 = inlined_call_operand.hbm [shape: bf16[8,128,16], index: 6, kind: input, shape index: {}]   ;;  %s11539_s7 = inlined_call_operand.hbm [shape: bf16[8,16,128], index: 7, kind: input, shape index: {}]   ;;  %s11540_s8 = inlined_call_operand.hbm [shape: f32[1,128], index: 8, kind: input, shape index: {}]   ;;  %s11541_s9 = inlined_call_operand.hbm [shape: f32[8,1,128], index: 9, kind: output, shape index: {}]  }
   0x1   :  { %11550 = sst [smem:[#allocation25_spill]] %s11532_s0 }
   0x2   :  { %11551 = sst [smem:[#allocation26_spill]] %s11534_s2 }
   0x3   :  { %11552 = sst [smem:[#allocation27_spill]] %s11535_s3 }
   0x4   :  { %11553 = sst [smem:[#allocation28_spill]] %s11536_s4 }
   0x5   :  { %11554 = sst [smem:[#allocation29_spill]] %s11537_s5 }
   0x6   :  { %11555 = sst [smem:[#allocation30_spill]] %s11538_s6 }
   0x7   :  { %11556 = sst [smem:[#allocation31_spill]] %s11541_s9 }
   0x8   :  { %14 = vsyncpa [#allocation3], 0 }
   0x9   :  { %16 = vsyncpa [#allocation3 + $0x1], 0 }
   0xa   :  { %17 = vsyncpa [#allocation6], 0 }
   0xb   :  { %19 = vsyncpa [#allocation6 + $0x1], 0 }
   0xc   :  { %20 = vsyncpa [#allocation9], 0 }
   0xd   :  { %21 = vsyncpa [#allocation12], 0 }
   0xe   :  { %22 = vsyncpa [#allocation15], 0 }
   0xf   :  { %23 = vsyncpa [#allocation4], 0 }
  0x10   :  { %25 = vsyncpa [#allocation4 + $0x1], 0  ;;  %s10477_s30 = smov 0   ;;  %s10479_s10 = smov 0  }
  0x11   :  { %s10481_s11 = smov 0   ;;  %s10483_s12 = smov 0  }
  0x12 LB: > { %s10406_s13 = smov [#allocation7]   ;;  %s10498_s15 = sadd.s32 4294967295, %s10404_s12   ;;  %s10404_s12 = sphi %s10483_s12, %s11589_s12   ;;  %s10400_s11 = sphi %s10481_s11, %s11588_s11   ;;  %s10396_s10 = sphi %s10479_s10, %s11587_s10   ;;  %s10392_s30 = sphi %s10477_s30, %s11586_s30  }
  0x13   : > { %s273_s14 = sshll.u32 %s10406_s13, 4  ;;  %p7870_p0 = scmp.ge.s32.totalorder %s10404_s12, 1  ;;  %s10503_s14 = int_to_ptr.vmem [resolvable:$true] %s273_s14 }
  0x14   : > { %p11545_p1 = scmp.eq.s32.totalorder %s10498_s15, 0  ;;  %p261_p2 = scmp.lt.s32.totalorder %s10404_s12, 3 }
  0x15   : > { %s10407_s17 = smov [#allocation8]   ;;  %s10408_s20 = smov [#allocation11]  }
  0x16   : > { %p10505_p3 = pnand %p7870_p0, %p261_p2  ;;  %s286_s18 = sshll.u32 %s10407_s17, 4  ;;  %s10518_s18 = int_to_ptr.vmem [resolvable:$true] %s286_s18 }
  0x17   : > { %s10520_s21 = sshll.u32 %s10408_s20, 4  ;;  %s11559_s2 = sld [smem:[#allocation26_spill]]  ;;  %s313_s21 = int_to_ptr.vmem [resolvable:$true] %s10520_s21 }
  0x18   : > { %s11557_s16 = scalar_select %p10505_p3, 1, 0 }
  0x19   : > { %p9635_p5 = pneg %p10505_p3 }
  0x1b   : > { %p10514_p6 = pnand %p9635_p5, %p11545_p1 }
  0x1d   : > { %s10062_s24 = scalar_lea.hbm %s11559_s2, 8192  ;;  %p10530_p8 = pneg %p10514_p6 }
  0x1e   : > { %p10063_p7 = scmp.ne.s32.totalorder %s11559_s2, %s10062_s24  ;;  %p10069_p11 = scmp.lt.u32.totalorder %s10062_s24, %s11559_s2 }
  0x20   : > { %p10065_p9 = pnand %p10530_p8, %p10063_p7 }
  0x22   : > { %p10066_p10 = pneg %p10065_p9 }
  0x24   : > { %p10071_p12 = pnand %p10069_p11, %p10066_p10 }
  0x26   : > { %10074 = shalt.err (!%p10071_p12)
}
  0x27   : > { %s10075_s13 = scalar_lea.vmem %s10503_s14, 8192  ;;  %p10083_p5 = scmp.lt.s32.totalorder %s10503_s14, %s10503_s14 }
  0x28   : > { %p10076_p13 = scmp.ne.s32.totalorder %s10503_s14, %s10075_s13  ;;  %p10084_p4 = scmp.lt.s32.totalorder %s10075_s13, %s10075_s13 }
  0x2a   : > { %p10078_p0 = pnand %p10076_p13, %p10530_p8  ;;  %p10085_p7 = por %p10084_p4, %p10083_p5 }
  0x2c   : > { %p10079_p2 = pneg %p10078_p0 }
  0x2e   : > { %p10086_p9 = pnand %p10085_p7, %p10079_p2 }
  0x30   : > { %10089 = shalt.err (!%p10086_p9)
}
  0x31   : > { %s11543_s17 = smov 64   ;;  %s11547_s20 = smov 4  }
  0x32   : > { %9638 = dma.hbm_to_vmem [thread:$0]  (!%p10514_p6), %s11559_s2, 8192, %s10503_s14, [#allocation6], %s11543_s17, %s11543_s17, %s11547_s20  }
  0x33   : > { %s11561_s3 = sld [smem:[#allocation27_spill]] }
  0x39   : > { %s10090_s26 = scalar_lea.hbm %s11561_s3, 128 }
  0x3a   : > { %p10091_p4 = scmp.ne.s32.totalorder %s11561_s3, %s10090_s26  ;;  %p10097_p12 = scmp.lt.u32.totalorder %s10090_s26, %s11561_s3 }
  0x3c   : > { %p10093_p10 = pnand %p10091_p4, %p10530_p8 }
  0x3e   : > { %p10094_p11 = pneg %p10093_p10 }
  0x40   : > { %p10099_p13 = pnand %p10097_p12, %p10094_p11 }
  0x42   : > { %10102 = shalt.err (!%p10099_p13)
}
  0x43   : > { %s10103_s14 = scalar_lea.vmem %s10518_s18, 128  ;;  %p10111_p7 = scmp.lt.s32.totalorder %s10518_s18, %s10518_s18 }
  0x44   : > { %p10104_p0 = scmp.ne.s32.totalorder %s10518_s18, %s10103_s14  ;;  %p10112_p9 = scmp.lt.s32.totalorder %s10103_s14, %s10103_s14 }
  0x46   : > { %p10106_p2 = pnand %p10104_p0, %p10530_p8  ;;  %p10113_p4 = por %p10112_p9, %p10111_p7 }
  0x48   : > { %p10107_p5 = pneg %p10106_p2 }
  0x4a   : > { %p10114_p10 = pnand %p10113_p4, %p10107_p5 }
  0x4c   : > { %10117 = shalt.err (!%p10114_p10)
}
  0x4d   : > { %s10411_s22 = smov 16   ;;  %s10412_s9 = smov 1  }
  0x4e   : > { %9641 = dma.hbm_to_vmem [thread:$0]  (!%p10514_p6), %s11561_s3, 128, %s10518_s18, [#allocation9], %s10411_s22, %s10411_s22, %s10412_s9  }
  0x4f   : > { %s11562_s5 = sld [smem:[#allocation29_spill]] }
  0x55   : > { %s10118_s28 = scalar_lea.hbm %s11562_s5, 128 }
  0x56   : > { %p10119_p11 = scmp.ne.s32.totalorder %s11562_s5, %s10118_s28  ;;  %p10125_p0 = scmp.lt.u32.totalorder %s10118_s28, %s11562_s5 }
  0x58   : > { %p10121_p12 = pnand %p10119_p11, %p10530_p8 }
  0x5a   : > { %p10122_p13 = pneg %p10121_p12 }
  0x5c   : > { %p10127_p2 = pnand %p10125_p0, %p10122_p13 }
  0x5e   : > { %10130 = shalt.err (!%p10127_p2)
}
  0x5f   : > { %s10131_s23 = scalar_lea.vmem %s313_s21, 128  ;;  %p10139_p4 = scmp.lt.s32.totalorder %s313_s21, %s313_s21 }
  0x60   : > { %p10132_p5 = scmp.ne.s32.totalorder %s313_s21, %s10131_s23  ;;  %p10140_p10 = scmp.lt.s32.totalorder %s10131_s23, %s10131_s23 }
  0x62   : > { %p10134_p7 = pnand %p10132_p5, %p10530_p8  ;;  %p10141_p1 = por %p10140_p10, %p10139_p4 }
  0x64   : > { %p10135_p9 = pneg %p10134_p7 }
  0x66   : > { %p10142_p3 = pnand %p10141_p1, %p10135_p9 }
  0x68   : > { %10145 = shalt.err (!%p10142_p3)
}
  0x69   : > { %9647 = dma.hbm_to_vmem [thread:$0]  (!%p10514_p6), %s11562_s5, 128, %s313_s21, [#allocation12], %s10411_s22, %s10411_s22, %s10412_s9  }
  0x6a   : > { %s10413_s17 = smov [#allocation14]   ;;  %s10414_s26 = smov [#allocation10]  }
  0x6b   : > { %s338_s25 = sshll.u32 %s10413_s17, 4  ;;  %s299_s28 = sshll.u32 %s10414_s26, 4  ;;  %s339_s25 = int_to_ptr.vmem [resolvable:$true] %s338_s25  ;;  %s300_s28 = int_to_ptr.vmem [resolvable:$true] %s299_s28 }
  0x6c   : > { %s10146_s14 = scalar_lea.hbm %s11539_s7, 1024 }
  0x6d   : > { %p10147_p1 = scmp.ne.s32.totalorder %s11539_s7, %s10146_s14  ;;  %p10153_p12 = scmp.lt.u32.totalorder %s10146_s14, %s11539_s7 }
  0x6f   : > { %p10149_p3 = pnand %p10147_p1, %p10530_p8 }
  0x71   : > { %p10150_p11 = pneg %p10149_p3 }
  0x73   : > { %p10155_p13 = pnand %p10153_p12, %p10150_p11 }
  0x75   : > { %10158 = shalt.err (!%p10155_p13)
}
  0x76   : > { %s10159_s21 = scalar_lea.vmem %s339_s25, 1024  ;;  %p10167_p7 = scmp.lt.s32.totalorder %s339_s25, %s339_s25 }
  0x77   : > { %p10160_p0 = scmp.ne.s32.totalorder %s339_s25, %s10159_s21  ;;  %p10168_p9 = scmp.lt.s32.totalorder %s10159_s21, %s10159_s21 }
  0x79   : > { %p10162_p2 = pnand %p10160_p0, %p10530_p8  ;;  %p10169_p4 = por %p10168_p9, %p10167_p7 }
  0x7b   : > { %p10163_p5 = pneg %p10162_p2 }
  0x7d   : > { %p10170_p10 = pnand %p10169_p4, %p10163_p5 }
  0x7f   : > { %10173 = shalt.err (!%p10170_p10)
}
  0x80   : > { %s11563_s20 = smov 4   ;;  %s11564_s22 = smov 64  }
  0x81   : > { %9653 = dma.hbm_to_vmem [thread:$0]  (!%p10514_p6), %s11539_s7, 1024, %s339_s25, [#allocation15], %s11564_s22, %s11564_s22, %s11563_s20  }
  0x82   : > { %s11565_s4 = sld [smem:[#allocation28_spill]] }
  0x88   : > { %s10174_s26 = scalar_lea.hbm %s11565_s4, 8192 }
  0x89   : > { %p10175_p1 = scmp.ne.s32.totalorder %s11565_s4, %s10174_s26  ;;  %p10181_p12 = scmp.lt.u32.totalorder %s10174_s26, %s11565_s4 }
  0x8b   : > { %p10177_p3 = pnand %p10175_p1, %p10530_p8 }
  0x8d   : > { %p10178_p11 = pneg %p10177_p3 }
  0x8f   : > { %p10183_p13 = pnand %p10181_p12, %p10178_p11 }
  0x91   : > { %10186 = shalt.err (!%p10183_p13)
}
  0x92   : > { %s10187_s18 = scalar_lea.vmem %s300_s28, 8192  ;;  %p10195_p7 = scmp.lt.s32.totalorder %s300_s28, %s300_s28 }
  0x93   : > { %p10188_p0 = scmp.ne.s32.totalorder %s300_s28, %s10187_s18  ;;  %p10196_p9 = scmp.lt.s32.totalorder %s10187_s18, %s10187_s18 }
  0x95   : > { %p10190_p2 = pnand %p10188_p0, %p10530_p8  ;;  %p10197_p4 = por %p10196_p9, %p10195_p7 }
  0x97   : > { %p10191_p5 = pneg %p10190_p2 }
  0x99   : > { %p10198_p10 = pnand %p10197_p4, %p10191_p5 }
  0x9b   : > { %10201 = shalt.err (!%p10198_p10)
}
  0x9c   : > { %9644 = dma.hbm_to_vmem [thread:$0]  (!%p10514_p6), %s11565_s4, 8192, %s300_s28, [#allocation9], %s11564_s22, %s11564_s22, %s11563_s20  }
  0x9d   : > { %s10415_s2 = smov [#allocation13]   ;;  %s10416_s24 = smov [#allocation16]  }
  0x9e   : > { %s325_s9 = sshll.u32 %s10415_s2, 4  ;;  %s352_s17 = sshll.u32 %s10416_s24, 4  ;;  %s326_s9 = int_to_ptr.vmem [resolvable:$true] %s325_s9  ;;  %s353_s17 = int_to_ptr.vmem [resolvable:$true] %s352_s17 }
  0x9f   : > { %s11566_s6 = sld [smem:[#allocation30_spill]] }
  0xa5   : > { %s10202_s13 = scalar_lea.hbm %s11566_s6, 8192 }
  0xa6   : > { %p10203_p1 = scmp.ne.s32.totalorder %s11566_s6, %s10202_s13  ;;  %p10209_p12 = scmp.lt.u32.totalorder %s10202_s13, %s11566_s6 }
  0xa8   : > { %p10205_p3 = pnand %p10203_p1, %p10530_p8 }
  0xaa   : > { %p10206_p11 = pneg %p10205_p3 }
  0xac   : > { %p10211_p13 = pnand %p10209_p12, %p10206_p11 }
  0xae   : > { %10214 = shalt.err (!%p10211_p13)
}
  0xaf   : > { %s10215_s28 = scalar_lea.vmem %s326_s9, 8192  ;;  %p10223_p7 = scmp.lt.s32.totalorder %s326_s9, %s326_s9 }
  0xb0   : > { %p10216_p0 = scmp.ne.s32.totalorder %s326_s9, %s10215_s28  ;;  %p10224_p9 = scmp.lt.s32.totalorder %s10215_s28, %s10215_s28 }
  0xb2   : > { %p10218_p2 = pnand %p10216_p0, %p10530_p8  ;;  %p10225_p4 = por %p10224_p9, %p10223_p7 }
  0xb4   : > { %p10219_p5 = pneg %p10218_p2 }
  0xb6   : > { %p10226_p10 = pnand %p10225_p4, %p10219_p5 }
  0xb8   : > { %10229 = shalt.err (!%p10226_p10)
}
  0xb9   : > { %9650 = dma.hbm_to_vmem [thread:$0]  (!%p10514_p6), %s11566_s6, 8192, %s326_s9, [#allocation12], %s11564_s22, %s11564_s22, %s11563_s20  }
  0xba   : > { %s10230_s29 = scalar_lea.hbm %s11540_s8, 16 }
  0xbb   : > { %p10231_p1 = scmp.ne.s32.totalorder %s11540_s8, %s10230_s29  ;;  %p10237_p12 = scmp.lt.u32.totalorder %s10230_s29, %s11540_s8 }
  0xbd   : > { %p10233_p3 = pnand %p10231_p1, %p10530_p8 }
  0xbf   : > { %p10234_p11 = pneg %p10233_p3 }
  0xc1   : > { %p10239_p13 = pnand %p10237_p12, %p10234_p11 }
  0xc3   : > { %10242 = shalt.err (!%p10239_p13)
}
  0xc4   : > { %s10243_s25 = scalar_lea.vmem %s353_s17, 16  ;;  %s10250_s20 = scalar_lea.vmem %s353_s17, 32 }
  0xc5   : > { %p10244_p0 = scmp.ne.s32.totalorder %s353_s17, %s10243_s25  ;;  %p10251_p7 = scmp.lt.s32.totalorder %s353_s17, %s353_s17 }
  0xc6   : > { %p10252_p9 = scmp.lt.s32.totalorder %s10250_s20, %s10243_s25 }
  0xc7   : > { %p10246_p2 = pnand %p10244_p0, %p10530_p8 }
  0xc8   : > { %p10253_p4 = por %p10252_p9, %p10251_p7 }
  0xc9   : > { %p10247_p5 = pneg %p10246_p2 }
  0xcb   : > { %p10254_p10 = pnand %p10253_p4, %p10247_p5 }
  0xcd   : > { %10257 = shalt.err (!%p10254_p10)
}
  0xce   : > { %9656 = dma.hbm_to_vmem [thread:$0]  (!%p10514_p6), %s11540_s8, 16, %s353_s17, [#allocation15]  }
  0xcf   : > { %s7869_s27 = sadd.s32 4294967294, %s10404_s12   ;;  %s10679_s19 = sadd.s32 1, %s10404_s12  }
  0xd0   : > { %s38_s28 = sadd.s32 1, %s10400_s11  ;;  %s35_s21 = ssub.s32 %s10404_s12, %s10679_s19 }
  0xd1   : > { %p45_p8 = scmp.ne.s32.totalorder %s10400_s11, %s10396_s10  ;;  %p36_p1 = scmp.eq.s32.totalorder %s35_s21, 0 }
  0xd2   : > { %p46_p3 = scmp.eq.s32.totalorder %s10404_s12, 0  ;;  %p51_p11 = scmp.ne.s32.totalorder %s10396_s10, %s10392_s30 }
  0xd3   : > { %p248_p12 = scmp.eq.s32.totalorder %s10498_s15, 1  ;;  %p11567_p0 = scmp.eq.s32.totalorder %s10498_s15, 0 }
  0xd4   : > { %s10691_s2 = scalar_select %p36_p1, %s10400_s11, %s38_s28  }
  0xd5   : > { %p47_p13 = por %p46_p3, %p45_p8  ;;  %p10695_p2 = por %p11567_p0, %p51_p11 }
  0xd6   : > { %p10699_p6 = por %p248_p12, %p45_p8  ;;  %p254_p5 = scmp.eq.s32.totalorder %s7869_s27, 1 }
  0xd7   : > { %p9675_p7 = scmp.lt.s32.totalorder %s10404_s12, 2  ;;  %s10705_s26 = sand.u32 1, %s10400_s11  }
  0xd8   : > { %s11569_s17 = scalar_select %p10699_p6, 1, 0 }
  0xd9   : > { %p10707_p9 = por %p254_p5, %p51_p11  ;;  %s7879_s13 = sshll.u32 %s10705_s26, 5 }
  0xda   : > { %s8227_s14 = sshll.u32 %s10404_s12, 9  ;;  %s11571_s0 = sld [smem:[#allocation25_spill]] }
  0xdb   : > { %s11570_s29 = scalar_select %p10707_p9, 1, 0 }
  0xdc   : > { %s367_s20 = scalar_lea.vmem [#allocation2], %s7879_s13  ;;  %p10718_p4 = pnand %p9675_p7, %p47_p13 }
  0xdd   : > { %s374_s22 = sshll.u32 %s367_s20, 4  ;;  %s364_s27 = scalar_lea.sflag [#allocation3], %s10705_s26  ;;  %s10722_s22 = int_to_ptr.vmem [resolvable:$true] %s374_s22 }
  0xde   : > { %p10260_p8 = pneg %p10718_p4 }
  0xe0   : > { %s10716_s25 = scalar_lea.hbm %s11571_s0, %s8227_s14  ;;  %s10263_s14 = scalar_lea.hbm %s11571_s0, 1024 }
  0xe1   : > { %s10258_s28 = scalar_lea.hbm %s10716_s25, 512  ;;  %p10264_p11 = scmp.lt.u32.totalorder %s10716_s25, %s11571_s0 }
  0xe2   : > { %p10259_p10 = scmp.ne.s32.totalorder %s10716_s25, %s10258_s28  ;;  %p10265_p12 = scmp.lt.u32.totalorder %s10263_s14, %s10258_s28 }
  0xe3   : > { %p10267_p0 = scmp.lt.u32.totalorder %s10258_s28, %s10716_s25 }
  0xe4   : > { %p10261_p1 = pnand %p10260_p8, %p10259_p10  ;;  %p10266_p13 = por %p10265_p12, %p10264_p11 }
  0xe6   : > { %p10262_p3 = pneg %p10261_p1  ;;  %p10268_p5 = por %p10267_p0, %p10266_p13 }
  0xe8   : > { %p10269_p7 = pnand %p10268_p5, %p10262_p3 }
  0xea   : > { %10272 = shalt.err (!%p10269_p7)
}
  0xeb   : > { %s10273_s20 = scalar_lea.vmem %s10722_s22, 512  ;;  %s10417_s21 = smov [#allocation2]  }
  0xec   : > { %p10274_p10 = scmp.ne.s32.totalorder %s10722_s22, %s10273_s20  ;;  %s10278_s13 = sshll.u32 %s10417_s21, 4  ;;  %s10279_s13 = int_to_ptr.vmem [resolvable:$false] %s10278_s13 }
  0xed   : > { %s10280_s23 = scalar_lea.vmem %s10279_s13, 1024  ;;  %p10281_p6 = scmp.lt.s32.totalorder %s10722_s22, %s10279_s13 }
  0xee   : > { %p10276_p1 = pnand %p10274_p10, %p10260_p8  ;;  %p10282_p11 = scmp.lt.s32.totalorder %s10280_s23, %s10273_s20 }
  0xf0   : > { %p10277_p9 = pneg %p10276_p1  ;;  %p10283_p12 = por %p10282_p11, %p10281_p6 }
  0xf2   : > { %p10284_p13 = pnand %p10283_p12, %p10277_p9 }
  0xf4   : > { %10287 = shalt.err (!%p10284_p13)
}
  0xf5   : > { %s10418_s28 = smov 128   ;;  %s10419_s14 = smov 8  }
  0xf6   : > { %9660 = dma.hbm_to_vmem [thread:$0]  (!%p10718_p4), %s10716_s25, 512, %s10722_s22, %s364_s27, %s10418_s28, %s10418_s28, %s10419_s14  }
  0xf7   : > { %s384_s18 = sand.u32 1, %s10404_s12   ;;  %s7882_s20 = sshll.u32 %s10705_s26, 6 }
  0xf8   : > { %s8229_s21 = sshll.u32 %s10404_s12, 10  ;;  %s388_s13 = scalar_lea.vmem [#allocation5], %s7882_s20 }
  0xf9   : > { %s396_s23 = sshll.u32 %s388_s13, 4  ;;  %s10761_s4 = scalar_lea.hbm %s11533_s1, %s8229_s21  ;;  %s10763_s23 = int_to_ptr.vmem [resolvable:$true] %s396_s23 }
  0xfa   : > { %s10765_s5 = scalar_lea.sflag [#allocation6], %s384_s18  ;;  %s10288_s6 = scalar_lea.hbm %s10761_s4, 1024 }
  0xfb   : > { %p10289_p6 = scmp.ne.s32.totalorder %s10761_s4, %s10288_s6  ;;  %s10293_s0 = scalar_lea.hbm %s11533_s1, 2048 }
  0xfc   : > { %p10294_p0 = scmp.lt.u32.totalorder %s10761_s4, %s11533_s1  ;;  %p10295_p5 = scmp.lt.u32.totalorder %s10293_s0, %s10288_s6 }
  0xfd   : > { %p10291_p9 = pnand %p10289_p6, %p10260_p8  ;;  %p10297_p10 = scmp.lt.u32.totalorder %s10288_s6, %s10761_s4 }
  0xfe   : > { %p10296_p7 = por %p10295_p5, %p10294_p0 }
  0xff   : > { %p10292_p3 = pneg %p10291_p9 }
 0x100   : > { %p10298_p1 = por %p10297_p10, %p10296_p7 }
 0x102   : > { %p10299_p11 = pnand %p10298_p1, %p10292_p3 }
 0x104   : > { %10302 = shalt.err (!%p10299_p11)
}
 0x105   : > { %s10303_s27 = scalar_lea.vmem %s10763_s23, 1024  ;;  %s10420_s18 = smov [#allocation5]  }
 0x106   : > { %p10304_p12 = scmp.ne.s32.totalorder %s10763_s23, %s10303_s27  ;;  %s10308_s20 = sshll.u32 %s10420_s18, 4  ;;  %s10309_s20 = int_to_ptr.vmem [resolvable:$false] %s10308_s20 }
 0x107   : > { %s10310_s21 = scalar_lea.vmem %s10309_s20, 2048  ;;  %p10311_p9 = scmp.lt.s32.totalorder %s10763_s23, %s10309_s20 }
 0x108   : > { %p10306_p13 = pnand %p10304_p12, %p10260_p8  ;;  %p10312_p0 = scmp.lt.s32.totalorder %s10310_s21, %s10303_s27 }
 0x10a   : > { %p10307_p6 = pneg %p10306_p13  ;;  %p10313_p5 = por %p10312_p0, %p10311_p9 }
 0x10c   : > { %p10314_p7 = pnand %p10313_p5, %p10307_p6 }
 0x10e   : > { %10317 = shalt.err (!%p10314_p7)
}
 0x10f   : > { %9663 = dma.hbm_to_vmem [thread:$0]  (!%p10718_p4), %s10761_s4, 1024, %s10763_s23, %s10765_s5, %s10418_s28, %s10418_s28, %s10419_s14  }
 0x110   : > { %p11573_p8 = scmp.ne.s32.totalorder %s11557_s16, 0 }
 0x111   : > { %s10797_s6 = sand.u32 (!%p11573_p8), 1, %s10396_s10  }
 0x112   : > { %408 = sbr.rel (%p11573_p8) target bundleno = 10353 (0x2871), region = 56  ;;  %s7887_s13 = sshll.u32 (!%p11573_p8), %s10797_s6, 5 }
 0x113   : > { %s411_s26 = scalar_lea.sflag (!%p11573_p8), [#allocation3], %s10797_s6  ;;  %s10801_s25 = scalar_lea.vmem (!%p11573_p8), [#allocation2], %s7887_s13 }
 0x119   : > { %10363 = dma.done.wait (%p10695_p2), %s411_s26, 512  }
 0x11a   : > { %10365 = vsyncadd (%p10695_p2), %s411_s26, 4294966784  ;;  %s419_s4 = sand.u32 1, %s10498_s15   ;;  %s7888_s5 = sshll.u32 %s10797_s6, 6 }
 0x11b   : > { %s420_s16 = scalar_lea.sflag [#allocation6], %s419_s4  ;;  %s10809_s9 = scalar_lea.vmem [#allocation5], %s7888_s5 }
 0x11c   : > { %10367 = dma.done.wait (%p10695_p2), %s420_s16, 1024  }
 0x11d   : > { %10369 = vsyncadd (%p10695_p2), %s420_s16, 4294966272  ;;  %p11574_p4 = scmp.eq.s32.totalorder %s10498_s15, 0 }
 0x11f   : > { %10371 = dma.done.wait (%p11574_p4), [#allocation6], 8192   ;;  %p11575_p3 = pmov %p11574_p4 }
 0x121   : > { %10373 = vsyncadd (%p11575_p3), [#allocation6], 4294959104  ;;  %p11576_p10 = pmov %p11575_p3 }
 0x122   : > { %p11577_p1 = pmov %p11575_p3 }
 0x123   : > { %10375 = dma.done.wait (%p11576_p10), [#allocation9], 8320  }
 0x124   : > { %10377 = vsyncadd (%p11577_p1), [#allocation9], 4294958976  ;;  %p11578_p11 = pmov %p11577_p1 }
 0x125   : > { %p11579_p12 = pmov %p11577_p1 }
 0x126   : > { %10379 = dma.done.wait (%p11578_p11), [#allocation12], 8320  }
 0x127   : > { %10381 = vsyncadd (%p11579_p12), [#allocation12], 4294958976  ;;  %p11580_p2 = pmov %p11577_p1 }
 0x128   : > { %p11581_p13 = pmov %p11577_p1 }
 0x129   : > { %10383 = dma.done.wait (%p11580_p2), [#allocation15], 1040  }
 0x12a   : > { %10385 = vsyncadd (%p11581_p13), [#allocation15], 4294966256  ;;  %v9734_v0 = vld [vmem:[#allocation10] sm:$0xff]   ;;  %v9735_v1 = vld [vmem:[#allocation10 + $0x8] sm:$0xff]   ;;  %v10421_v34 = vmov 0.0   ;;  %vm10422_vm0 = vmmov 0  }
 0x12b   : > { %8677 = vmatprep.subr.bf16.mxu1 %v9734_v0  ;;  %v9736_v2 = vld [vmem:[#allocation7] sm:$0xff]   ;;  %v9737_v3 = vld [vmem:[#allocation10 + $0x10] sm:$0xff]   ;;  %v9738_v4 = vld [vmem:[#allocation7 + $0x8] sm:$0xff]   ;;  %vm799_vm1 = vcmask 130048   ;;  %vm1266_vm2 = vcmask 1041409   ;;  %vm1269_vm3 = vcmask 1042434  }
 0x12c   : > { %8678 = vmatpush3.bf16.msra.mxu1 %v9734_v0  ;;  %8657 = vmatprep.subr.bf16.mxu0 %v9736_v2  ;;  %v9740_v5 = vld [vmem:[#allocation7 + $0x10] sm:$0xff]   ;;  %v9739_v6 = vld [vmem:[#allocation10 + $0x18] sm:$0xff]   ;;  %v9742_v7 = vld [vmem:[#allocation7 + $0x18] sm:$0xff]   ;;  %vm1272_vm4 = vcmask 1043459   ;;  %s7896_s24 = sshll.u32 %s10797_s6, 2  ;;  %s8264_s23 = sshll.u32 %s10498_s15, 6 }
 0x12d   : > { %8679 = vmatprep.subr.bf16.mxu1 %v9735_v1  ;;  %8658 = vmatpush3.bf16.msra.mxu0 %v9736_v2  ;;  %v9741_v8 = vld [vmem:[#allocation10 + $0x20] sm:$0xff]   ;;  %v9744_v9 = vld [vmem:[#allocation7 + $0x20] sm:$0xff]   ;;  %v9743_v12 = vld [vmem:[#allocation10 + $0x28] sm:$0xff]   ;;  %s490_s28 = scalar_lea.vmem [#allocation17], %s7896_s24  ;;  %s11582_s22 = sld [smem:[#allocation31_spill]] }
 0x12e   : > { %8659 = vmatprep.subr.bf16.mxu0 %v9738_v4  ;;  %v503_v10 = vld [vmem:[%s10809_s9] sm:$0xff]  ;;  %v504_v11 = vld [vmem:[%s10809_s9 + $0x8] sm:$0xff]  ;;  %v9745_v18 = vld [vmem:[#allocation10 + $0x30] sm:$0xff]   ;;  %s7707_s14 = sshll.u32 %s490_s28, 4  ;;  %s7694_s18 = scalar_lea.sflag [#allocation4], %s10797_s6  ;;  %s11483_s14 = int_to_ptr.vmem [resolvable:$true] %s7707_s14 }
 0x12f   : > { %v10833_v13 = vpack.c.bf16 %v504_v11, %v503_v10  ;;  %v495_v14 = vld [vmem:[%s10801_s25] sm:$0xff]  ;;  %v496_v15 = vld [vmem:[%s10801_s25 + $0x8] sm:$0xff]  ;;  %v9748_v19 = vld [vmem:[#allocation7 + $0x30] sm:$0xff]   ;;  %s10318_s20 = scalar_lea.vmem %s11483_s14, 64  ;;  %p11583_p9 = scmp.ne.s32.totalorder %s11569_s17, 0 }
 0x130   : > { %8680 = vmatpush3.bf16.msra.mxu1 %v9735_v1  ;;  %v9746_v16 = vld [vmem:[#allocation7 + $0x28] sm:$0xff]   ;;  %v10838_v17 = vpack.c.bf16 %v496_v15, %v495_v14  ;;  %v9747_v20 = vld [vmem:[#allocation10 + $0x38] sm:$0xff]   ;;  %v9749_v21 = vld [vmem:[#allocation7 + $0x38] sm:$0xff]   ;;  %p10319_p6 = scmp.ne.s32.totalorder %s11483_s14, %s10318_s20  ;;  %s10424_s15 = smov [#allocation17]  }
 0x131   : > { %8681 = vmatprep.subr.bf16.mxu1 %v9737_v3  ;;  %8660 = vmatpush3.bf16.msra.mxu0 %v9738_v4  ;;  %v505_v22 = vld [vmem:[%s10809_s9 + $0x10] sm:$0xff]  ;;  %v506_v23 = vld [vmem:[%s10809_s9 + $0x18] sm:$0xff]  ;;  %v507_v24 = vld [vmem:[%s10809_s9 + $0x20] sm:$0xff]  ;;  %s10322_s21 = sshll.u32 %s10424_s15, 4  ;;  %s10323_s21 = int_to_ptr.vmem [resolvable:$false] %s10322_s21 }
 0x132   : > { %8661 = vmatprep.subr.bf16.mxu0 %v9740_v5  ;;  %8693 = vmatprep.mubr.bf16.mxu1 %v10833_v13  ;;  %v508_v25 = vld [vmem:[%s10809_s9 + $0x28] sm:$0xff]  ;;  %v497_v26 = vld [vmem:[%s10801_s25 + $0x10] sm:$0xff]  ;;  %v498_v27 = vld [vmem:[%s10801_s25 + $0x18] sm:$0xff]  ;;  %v10847_v28 = vpack.c.bf16 %v506_v23, %v505_v22  ;;  %p10320_p0 = pnand %p10319_p6, %p11583_p9  ;;  %s10324_s13 = scalar_lea.vmem %s10323_s21, 128 }
 0x133   : > { %8673 = vmatprep.mubr.bf16.mxu0 %v10838_v17  ;;  %v10849_v29 = vpack.c.bf16 %v508_v25, %v507_v24  ;;  %v10851_v30 = vpack.c.bf16 %v498_v27, %v497_v26  ;;  %v509_v31 = vld [vmem:[%s10809_s9 + $0x30] sm:$0xff]  ;;  %v510_v32 = vld [vmem:[%s10809_s9 + $0x38] sm:$0xff]  ;;  %v7908_v36 = vld [vmem:[#allocation11] ss:$0 sm:$0xff]  ;;  %s11488_s27 = scalar_lea.hbm %s11582_s22, %s8264_s23  ;;  %p10325_p7 = scmp.lt.s32.totalorder %s11483_s14, %s10323_s21 }
 0x134   : > { %8682 = vmatpush3.bf16.msra.mxu1 %v9737_v3  ;;  %v10858_v33 = vpack.c.bf16 %v510_v32, %v509_v31  ;;  %v7897_v48 = vld [vmem:[#allocation8] ss:$0 sm:$0xff]  ;;  %p10321_p5 = pneg %p10320_p0  ;;  %p10326_p8 = scmp.lt.s32.totalorder %s10324_s13, %s10318_s20 }
 0x135   : > { %8683 = vmatprep.subr.bf16.mxu1 %v9739_v6  ;;  %8662 = vmatpush3.bf16.msra.mxu0 %v9740_v5 }
 0x136   : > { %8663 = vmatprep.subr.bf16.mxu0 %v9742_v7  ;;  %p10327_p4 = por %p10326_p8, %p10325_p7 }
 0x138   : > { %8684 = vmatpush3.bf16.msra.mxu1 %v9739_v6  ;;  %p10328_p3 = pnand %p10327_p4, %p10321_p5 }
 0x139   : > { %8685 = vmatprep.subr.bf16.mxu1 %v9741_v8  ;;  %8664 = vmatpush3.bf16.msra.mxu0 %v9742_v7 }
 0x13a   : > { %8665 = vmatprep.subr.bf16.mxu0 %v9744_v9 }
 0x13c   : > { %8686 = vmatpush3.bf16.msra.mxu1 %v9741_v8 }
 0x13d   : > { %8687 = vmatprep.subr.bf16.mxu1 %v9743_v12  ;;  %8666 = vmatpush3.bf16.msra.mxu0 %v9744_v9 }
 0x13e   : > { %8667 = vmatprep.subr.bf16.mxu0 %v9746_v16 }
 0x140   : > { %8688 = vmatpush3.bf16.msra.mxu1 %v9743_v12 }
 0x141   : > { %8689 = vmatprep.subr.bf16.mxu1 %v9745_v18  ;;  %8668 = vmatpush3.bf16.msra.mxu0 %v9746_v16 }
 0x142   : > { %8669 = vmatprep.subr.bf16.mxu0 %v9748_v19 }
 0x144   : > { %8690 = vmatpush3.bf16.msra.mxu1 %v9745_v18 }
 0x145   : > { %8691 = vmatprep.subr.bf16.mxu1 %v9747_v20  ;;  %8670 = vmatpush3.bf16.msra.mxu0 %v9748_v19 }
 0x146   : > { %8671 = vmatprep.subr.bf16.mxu0 %v9749_v21 }
 0x148   : > { %8692 = vmatpush3.bf16.msra.mxu1 %v9747_v20 }
 0x149   : > { %8672 = vmatpush3.bf16.msra.mxu0 %v9749_v21  ;;  %8725 = vmatprep.subr.bf16.mxu1 %v10421_v34 }
 0x14a   : > { %8701 = vmatprep.subr.bf16.mxu0 %v10421_v34 }
 0x14b   : > { %8694 = vmatmul.mubr.bf16.vlgmr.msra.gmra.mrb[0].mxu1 %v10847_v28 }
 0x14c   : > { %8697 = vmatprep.mubr.bf16.mxu1 %v10849_v29  ;;  %8674 = vmatmul.mubr.bf16.vlgmr.msra.gmra.mrb[0].mxu0 %v10851_v30 }
 0x14d   : > { %8726 = vmatpush3.bf16.msra.mxu1 %v10833_v13  ;;  %8703 = vmatprep.mubr.msk.bf16.mxu0 %vm10422_vm0, %v10421_v34 }
 0x14e   : > { %8737 = vmatprep.subr.bf16.mxu1 %v10421_v34 }
 0x153   : > { %8698 = vmatmul.mubr.bf16.gmra.mrb[4].mxu1 %v10858_v33 }
 0x154   : > { %8727 = vmatprep.mubr.msk.bf16.mxu1 %vm10422_vm0, %v10421_v34 }
 0x21e   : > { %v8695_v35 = vpop.f32.mrb[0].mxu1 }
 0x21f   : > { %v752_v37 = vpop.f32.mrb[1].mxu1  ;;  %v8675_v39 = vpop.f32.mrb[0].mxu0  ;;  %v761_v40 = vadd.f32 %v8695_v35, %v7908_v36 }
 0x220   : > { %v8696_v38 = vpop.f32.mrb[2].mxu1  ;;  %v632_v43 = vpop.f32.mrb[1].mxu0  ;;  %v753_v44 = vadd.f32 %v7908_v36, %v752_v37  ;;  %v641_v4 = vadd.f32 %v8675_v39, %v7897_v48 }
 0x221   : > { %v764_v41 = vadd.f32 %v8696_v38, %v7908_v36  ;;  %v755_v42 = vpop.f32.mrb[3].mxu1  ;;  %v8676_v46 = vpop.f32.mrb[2].mxu0  ;;  %v633_v51 = vadd.f32 %v7897_v48, %v632_v43 }
 0x222   : > { %v756_v45 = vadd.f32 %v7908_v36, %v755_v42  ;;  %v635_v49 = vpop.f32.mrb[3].mxu0  ;;  %v8234_v5 = vpack.c.bf16 %v641_v4, %v641_v4  ;;  %v644_v7 = vadd.f32 %v8676_v46, %v7897_v48 }
 0x223   : > { %v796_v47 = vpack.c.bf16 %v764_v41, %v761_v40  ;;  %v8232_v60 = vpack.c.bf16 %v633_v51, %v633_v51  ;;  %v636_v1 = vadd.f32 %v7897_v48, %v635_v49 }
 0x224   : > { %v795_v50 = vpack.c.bf16 %v756_v45, %v753_v44  ;;  %v8235_v8 = vpack.c.bf16 %v644_v7, %v644_v7 }
 0x225   : > { %v850_v0 = vsel %vm799_vm1, %v796_v47, 0  ;;  %v8233_v2 = vpack.c.bf16 %v636_v1, %v636_v1 }
 0x226   : > { %v804_v52 = vsel %vm799_vm1, %v795_v50, 0  ;;  %v8699_v53 = vpop.f32.mrb[4].mxu1 }
 0x227   : > { %8702 = vmatpush3.bf16.xpose.msra.mxu0 %v804_v52  ;;  %v777_v54 = vadd.f32 %v8699_v53, %v7908_v36  ;;  %v768_v55 = vpop.f32.mrb[5].mxu1 }
 0x228   : > { %v769_v56 = vadd.f32 %v7908_v36, %v768_v55  ;;  %v8700_v57 = vpop.f32.mrb[6].mxu1  ;;  %8707 = vmatprep.subr.bf16.mxu0 %v10421_v34 }
 0x229   : > { %v780_v58 = vadd.f32 %v8700_v57, %v7908_v36  ;;  %v771_v59 = vpop.f32.mrb[7].mxu1 }
 0x22a   : > { %v772_v61 = vadd.f32 %v7908_v36, %v771_v59 }
 0x22b   : > { %v798_v62 = vpack.c.bf16 %v780_v58, %v777_v54 }
 0x22c   : > { %v797_v63 = vpack.c.bf16 %v772_v61, %v769_v56 }
 0x22d   : > { %v942_v6 = vsel %vm799_vm1, %v798_v62, 0 }
 0x22e   : > { %8704 = vmatmul.mubr.msk.bf16.vlgmr.msra.gmra.mrb[4].mxu0 %vm799_vm1, %v8232_v60  ;;  %v896_v3 = vsel %vm799_vm1, %v797_v63, 0 }
 0x22f   : > { %8708 = vmatpush3.bf16.xpose.msra.mxu0 %v850_v0  ;;  %8709 = vmatprep.mubr.msk.bf16.mxu0 %vm10422_vm0, %v10421_v34 }
 0x230   : > { %8713 = vmatprep.subr.bf16.mxu0 %v10421_v34 }
 0x236   : > { %8710 = vmatmul.mubr.msk.bf16.vlgmr.msra.gmra.mrb[8].mxu0 %vm799_vm1, %v8233_v2 }
 0x237   : > { %8714 = vmatpush3.bf16.xpose.msra.mxu0 %v896_v3  ;;  %8715 = vmatprep.mubr.msk.bf16.mxu0 %vm10422_vm0, %v10421_v34 }
 0x238   : > { %8719 = vmatprep.subr.bf16.mxu0 %v10421_v34 }
 0x23e   : > { %8716 = vmatmul.mubr.msk.bf16.vlgmr.msra.gmra.mrb[12].mxu0 %vm799_vm1, %v8234_v5 }
 0x23f   : > { %8720 = vmatpush3.bf16.xpose.msra.mxu0 %v942_v6  ;;  %8721 = vmatprep.mubr.msk.bf16.mxu0 %vm10422_vm0, %v10421_v34 }
 0x240   : > { %8731 = vmatprep.subr.bf16.mxu0 %v10421_v34 }
 0x246   : > { %8722 = vmatmul.mubr.msk.bf16.vlgmr.msra.gmra.mrb[16].mxu0 %vm799_vm1, %v8235_v8 }
 0x247   : > { %8732 = vmatpush3.bf16.msra.mxu0 %v10847_v28  ;;  %8733 = vmatprep.mubr.msk.bf16.mxu0 %vm10422_vm0, %v10421_v34 }
 0x248   : > { %8743 = vmatprep.subr.bf16.mxu0 %v10421_v34 }
 0x301   : > { %v840_v9 = vpop.f32.mrb[4].mxu0 }
 0x302   : > { %v8705_v10 = vpop.f32.mrb[5].mxu0  ;;  %v984_v11 = vsel %vm799_vm1, %v840_v9, -inf }
 0x303   : > { %985 = vmax.xlane.f32.xlu0 %v984_v11  ;;  %v843_v12 = vpop.f32.mrb[6].mxu0 }
 0x304   : > { %v8706_v14 = vpop.f32.mrb[7].mxu0 }
 0x309   : > { %v886_v15 = vpop.f32.mrb[8].mxu0 }
 0x30a   : > { %v8711_v16 = vpop.f32.mrb[9].mxu0  ;;  %v987_v18 = vsel %vm799_vm1, %v886_v15, -inf }
 0x30b   : > { %988 = vmax.xlane.f32.xlu0 %v987_v18  ;;  %v889_v19 = vpop.f32.mrb[10].mxu0 }
 0x30c   : > { %v8712_v20 = vpop.f32.mrb[11].mxu0 }
 0x311   : > { %v932_v21 = vpop.f32.mrb[12].mxu0 }
 0x312   : > { %v8717_v22 = vpop.f32.mrb[13].mxu0  ;;  %v990_v23 = vsel %vm799_vm1, %v932_v21, -inf }
 0x313   : > { %991 = vmax.xlane.f32.xlu1 %v990_v23  ;;  %v935_v24 = vpop.f32.mrb[14].mxu0 }
 0x314   : > { %v8718_v25 = vpop.f32.mrb[15].mxu0 }
 0x319   : > { %v978_v26 = vpop.f32.mrb[16].mxu0 }
 0x31a   : > { %v8723_v27 = vpop.f32.mrb[17].mxu0  ;;  %v993_v31 = vsel %vm799_vm1, %v978_v26, -inf }
 0x31b   : > { %994 = vmax.xlane.f32.xlu1 %v993_v31  ;;  %v981_v32 = vpop.f32.mrb[18].mxu0 }
 0x31c   : > { %v8724_v35 = vpop.f32.mrb[19].mxu0 }
 0x390   : > { %v986_v36 = vpop.xlane.xlu0 %985 }
 0x391   : > { %v996_v37 = vsub.f32 %v840_v9, %v986_v36 }
 0x393   : > { %v1000_v38 = vmul.f32 1.442695, %v996_v37 }
 0x395   : > { %9934 = vpow2.f32 %v1000_v38 }
 0x398   : > { %v989_v39 = vpop.xlane.xlu0 %988 }
 0x399   : > { %v997_v40 = vsub.f32 %v886_v15, %v989_v39 }
 0x39b   : > { %v1002_v41 = vmul.f32 1.442695, %v997_v40 }
 0x39d   : > { %9936 = vpow2.f32 %v1002_v41 }
 0x39f   : > { %v9935_v42 = vpop.eup %9934 }
 0x3a0   : > { %v992_v43 = vpop.xlane.xlu1 %991  ;;  %v1008_v44 = vsel %vm799_vm1, %v9935_v42, 0.0 }
 0x3a1   : > { %v998_v45 = vsub.f32 %v932_v21, %v992_v43  ;;  %1009 = vadd.xlane.f32.xlu0 %v1008_v44 }
 0x3a3   : > { %v1004_v46 = vmul.f32 1.442695, %v998_v45 }
 0x3a5   : > { %9938 = vpow2.f32 %v1004_v46 }
 0x3a7   : > { %v9937_v47 = vpop.eup %9936 }
 0x3a8   : > { %v995_v48 = vpop.xlane.xlu1 %994  ;;  %v1011_v49 = vsel %vm799_vm1, %v9937_v47, 0.0 }
 0x3a9   : > { %v999_v50 = vsub.f32 %v978_v26, %v995_v48  ;;  %1012 = vadd.xlane.f32.xlu1 %v1011_v49  ;;  %v9751_v48 = vld [vmem:[#allocation13 + $0x8] sm:$0xff]   ;;  %v9752_v49 = vld [vmem:[#allocation13 + $0x10] sm:$0xff]  }
 0x3ab   : > { %v1006_v51 = vmul.f32 1.442695, %v999_v50  ;;  %v9753_v50 = vld [vmem:[#allocation13 + $0x18] sm:$0xff]  }
 0x3ad   : > { %9940 = vpow2.f32 %v1006_v51  ;;  %v9754_v51 = vld [vmem:[#allocation13 + $0x20] sm:$0xff]  }
 0x3af   : > { %v9939_v52 = vpop.eup %9938 }
 0x3b0   : > { %v1014_v53 = vsel %vm799_vm1, %v9939_v52, 0.0 }
 0x3b1   : > { %1015 = vadd.xlane.f32.xlu0 %v1014_v53  ;;  %v9756_v53 = vld [vmem:[#allocation13 + $0x30] sm:$0xff]  }
 0x3b7   : > { %v9941_v54 = vpop.eup %9940 }
 0x3b8   : > { %v1017_v55 = vsel %vm799_vm1, %v9941_v54, 0.0 }
 0x3b9   : > { %1018 = vadd.xlane.f32.xlu1 %v1017_v55  ;;  %v10924_v55 = vld [vmem:[#allocation10 + $0x40] sm:$0xff]  }
 0x42e   : > { %v1010_v56 = vpop.xlane.xlu0 %1009 }
 0x42f   : > { %9942 = vrcp.f32 %v1010_v56  ;;  %v9760_v56 = vld [vmem:[#allocation7 + $0x40] sm:$0xff]  }
 0x436   : > { %v1013_v57 = vpop.xlane.xlu1 %1012 }
 0x437   : > { %9944 = vrcp.f32 %v1013_v57  ;;  %v9762_v57 = vld [vmem:[#allocation7 + $0x48] sm:$0xff]  }
 0x439   : > { %v9943_v58 = vpop.eup %9942 }
 0x43a   : > { %v1024_v59 = vmul.f32 %v9943_v58, %v9935_v42  ;;  %v9764_v58 = vld [vmem:[#allocation7 + $0x50] sm:$0xff]  }
 0x43c   : > { %v1028_v60 = vsel %vm799_vm1, %v1024_v59, 0.0  ;;  %v9766_v59 = vld [vmem:[#allocation7 + $0x58] sm:$0xff]  }
 0x43d   : > { %v1029_v61 = vrot.slane %v1028_v60, 4 }
 0x43e   : > { %v1016_v62 = vpop.xlane.xlu0 %1015 }
 0x43f   : > { %v1030_v63 = vadd.f32 %v1029_v61, %v1028_v60  ;;  %9946 = vrcp.f32 %v1016_v62  ;;  %v9768_v60 = vld [vmem:[#allocation7 + $0x60] sm:$0xff]   ;;  %v9770_v61 = vld [vmem:[#allocation7 + $0x68] sm:$0xff]   ;;  %v9772_v62 = vld [vmem:[#allocation7 + $0x70] sm:$0xff]  }
 0x441   : > { %v9945_v0 = vpop.eup %9944  ;;  %v1031_v1 = vrot.slane %v1030_v63, 2 }
 0x442   : > { %v1025_v2 = vmul.f32 %v9945_v0, %v9937_v47  ;;  %v9750_v47 = vld [vmem:[#allocation13] sm:$0xff]  }
 0x443   : > { %v1032_v3 = vadd.f32 %v1031_v1, %v1030_v63  ;;  %v9773_v63 = vld [vmem:[#allocation7 + $0x78] sm:$0xff]  }
 0x444   : > { %v1035_v4 = vsel %vm799_vm1, %v1025_v2, 0.0 }
 0x445   : > { %v1033_v5 = vrot.slane %v1032_v3, 1  ;;  %v1036_v6 = vrot.slane %v1035_v4, 4 }
 0x446   : > { %v1019_v7 = vpop.xlane.xlu1 %1018 }
 0x447   : > { %v1037_v8 = vadd.f32 %v1036_v6, %v1035_v4  ;;  %9948 = vrcp.f32 %v1019_v7  ;;  %v1034_v9 = vadd.f32 %v1033_v5, %v1032_v3 }
 0x449   : > { %v9947_v10 = vpop.eup %9946  ;;  %v1038_v11 = vrot.slane %v1037_v8, 2  ;;  %v1057_v12 = vmul.f32 0.125, %v1034_v9 }
 0x44a   : > { %v1026_v14 = vmul.f32 %v9947_v10, %v9939_v52  ;;  %v9755_v52 = vld [vmem:[#allocation13 + $0x28] sm:$0xff]  }
 0x44b   : > { %v1061_v15 = vpack.c.bf16 %v1057_v12, %v1057_v12  ;;  %v1039_v16 = vadd.f32 %v1038_v11, %v1037_v8 }
 0x44c   : > { %v1042_v18 = vsel %vm799_vm1, %v1026_v14, 0.0 }
 0x44d   : > { %v1043_v19 = vrot.slane %v1042_v18, 4  ;;  %8728 = vmatmul.mubr.msk.bf16.vlgmr.msra.gmra.mrb[8].mxu1 %vm799_vm1, %v1061_v15  ;;  %v1040_v20 = vrot.slane %v1039_v16, 1 }
 0x44e   : > { %8738 = vmatpush3.bf16.msra.mxu1 %v10849_v29  ;;  %8739 = vmatprep.mubr.msk.bf16.mxu1 %vm10422_vm0, %v10421_v34 }
 0x44f   : > { %v1044_v21 = vadd.f32 %v1043_v19, %v1042_v18  ;;  %v1041_v22 = vadd.f32 %v1040_v20, %v1039_v16  ;;  %8749 = vmatprep.subr.bf16.mxu1 %v10421_v34 }
 0x451   : > { %v9949_v23 = vpop.eup %9948  ;;  %v1045_v24 = vrot.slane %v1044_v21, 2  ;;  %v1058_v25 = vmul.f32 0.125, %v1041_v22 }
 0x452   : > { %v1027_v26 = vmul.f32 %v9949_v23, %v9941_v54  ;;  %v9757_v54 = vld [vmem:[#allocation13 + $0x38] sm:$0xff]  }
 0x453   : > { %v1062_v27 = vpack.c.bf16 %v1058_v25, %v1058_v25  ;;  %v1046_v31 = vadd.f32 %v1045_v24, %v1044_v21 }
 0x454   : > { %v1049_v32 = vsel %vm799_vm1, %v1027_v26, 0.0 }
 0x455   : > { %v1050_v35 = vrot.slane %v1049_v32, 4  ;;  %8734 = vmatmul.mubr.msk.bf16.vlgmr.msra.gmra.mrb[20].mxu0 %vm799_vm1, %v1062_v27  ;;  %v1047_v36 = vrot.slane %v1046_v31, 1 }
 0x456   : > { %8744 = vmatpush3.bf16.msra.mxu0 %v10858_v33  ;;  %8745 = vmatprep.mubr.msk.bf16.mxu0 %vm10422_vm0, %v10421_v34 }
 0x457   : > { %v1051_v37 = vadd.f32 %v1050_v35, %v1049_v32  ;;  %v1048_v38 = vadd.f32 %v1047_v36, %v1046_v31  ;;  %8769 = vmatprep.subr.bf16.mxu0 %v9760_v56 }
 0x459   : > { %v1052_v39 = vrot.slane %v1051_v37, 2  ;;  %v1059_v40 = vmul.f32 0.125, %v1048_v38  ;;  %v9759_v38 = vld [vmem:[#allocation10 + $0x48] sm:$0xff]  }
 0x45b   : > { %v1063_v41 = vpack.c.bf16 %v1059_v40, %v1059_v40  ;;  %v1053_v42 = vadd.f32 %v1052_v39, %v1051_v37  ;;  %v9761_v39 = vld [vmem:[#allocation10 + $0x50] sm:$0xff]   ;;  %v9763_v40 = vld [vmem:[#allocation10 + $0x58] sm:$0xff]  }
 0x45d   : > { %8740 = vmatmul.mubr.msk.bf16.vlgmr.msra.gmra.mrb[12].mxu1 %vm799_vm1, %v1063_v41  ;;  %v1054_v43 = vrot.slane %v1053_v42, 1  ;;  %v9765_v41 = vld [vmem:[#allocation10 + $0x60] sm:$0xff]  }
 0x45e   : > { %8765 = vmatprep.mubr.msk.bf16.mxu1 %vm10422_vm0, %v10421_v34  ;;  %8750 = vmatpush3.bf16.msra.mxu1 %v9750_v47 }
 0x45f   : > { %v1055_v44 = vadd.f32 %v1054_v43, %v1053_v42  ;;  %8751 = vmatprep.subr.bf16.mxu1 %v10421_v34  ;;  %v9767_v42 = vld [vmem:[#allocation10 + $0x68] sm:$0xff]   ;;  %v9769_v43 = vld [vmem:[#allocation10 + $0x70] sm:$0xff]  }
 0x461   : > { %v1060_v45 = vmul.f32 0.125, %v1055_v44  ;;  %v9771_v44 = vld [vmem:[#allocation10 + $0x78] sm:$0xff]  }
 0x462   : > { %8752 = vmatpush3.bf16.msra.mxu1 %v9751_v48 }
 0x463   : > { %v1064_v46 = vpack.c.bf16 %v1060_v45, %v1060_v45  ;;  %8753 = vmatprep.subr.bf16.mxu1 %v10421_v34 }
 0x465   : > { %8746 = vmatmul.mubr.msk.bf16.vlgmr.msra.gmra.mrb[24].mxu0 %vm799_vm1, %v1064_v46 }
 0x466   : > { %8785 = vmatprep.mubr.bf16.mxu0 %v10838_v17  ;;  %8754 = vmatpush3.bf16.msra.mxu1 %v9752_v49 }
 0x467   : > { %8755 = vmatprep.subr.bf16.mxu1 %v10421_v34  ;;  %8770 = vmatpush3.bf16.msra.mxu0 %v9760_v56 }
 0x468   : > { %8771 = vmatprep.subr.bf16.mxu0 %v9762_v57 }
 0x46a   : > { %8756 = vmatpush3.bf16.msra.mxu1 %v9753_v50 }
 0x46b   : > { %8757 = vmatprep.subr.bf16.mxu1 %v10421_v34  ;;  %8772 = vmatpush3.bf16.msra.mxu0 %v9762_v57 }
 0x46c   : > { %8773 = vmatprep.subr.bf16.mxu0 %v9764_v58 }
 0x46e   : > { %8758 = vmatpush3.bf16.msra.mxu1 %v9754_v51 }
 0x46f   : > { %8759 = vmatprep.subr.bf16.mxu1 %v10421_v34  ;;  %8774 = vmatpush3.bf16.msra.mxu0 %v9764_v58 }
 0x470   : > { %8775 = vmatprep.subr.bf16.mxu0 %v9766_v59 }
 0x472   : > { %8760 = vmatpush3.bf16.msra.mxu1 %v9755_v52 }
 0x473   : > { %8761 = vmatprep.subr.bf16.mxu1 %v10421_v34  ;;  %8776 = vmatpush3.bf16.msra.mxu0 %v9766_v59 }
 0x474   : > { %8777 = vmatprep.subr.bf16.mxu0 %v9768_v60 }
 0x476   : > { %8762 = vmatpush3.bf16.msra.mxu1 %v9756_v53 }
 0x477   : > { %8763 = vmatprep.subr.bf16.mxu1 %v10421_v34  ;;  %8778 = vmatpush3.bf16.msra.mxu0 %v9768_v60 }
 0x478   : > { %8779 = vmatprep.subr.bf16.mxu0 %v9770_v61 }
 0x47a   : > { %8764 = vmatpush3.bf16.msra.mxu1 %v9757_v54  ;;  %v7946_v54 = vld [vmem:[#allocation11 + $0x1] ss:$0 sm:$0xff] }
 0x47b   : > { %8789 = vmatprep.subr.bf16.mxu1 %v10924_v55  ;;  %8780 = vmatpush3.bf16.msra.mxu0 %v9770_v61 }
 0x47c   : > { %8781 = vmatprep.subr.bf16.mxu0 %v9772_v62 }
 0x47f   : > { %8782 = vmatpush3.bf16.msra.mxu0 %v9772_v62 }
 0x480   : > { %8783 = vmatprep.subr.bf16.mxu0 %v9773_v63 }
 0x483   : > { %8784 = vmatpush3.bf16.msra.mxu0 %v9773_v63  ;;  %v7937_v63 = vld [vmem:[#allocation8 + $0x1] ss:$0 sm:$0xff] }
 0x484   : > { %8813 = vmatprep.subr.bf16.mxu0 %v10421_v34 }
 0x486   : > { %8786 = vmatmul.mubr.bf16.vlgmr.msra.gmra.mrb[28].mxu0 %v10851_v30 }
 0x487   : > { %8815 = vmatprep.mubr.msk.bf16.mxu0 %vm10422_vm0, %v10421_v34 }
 0x520   : > { %v1102_v0 = vpop.f32.mrb[8].mxu1 }
 0x521   : > { %v8729_v1 = vpop.f32.mrb[9].mxu1  ;;  %v1237_v5 = vpack.c.bf16 %v1102_v0, %v1102_v0 }
 0x522   : > { %v1105_v2 = vpop.f32.mrb[10].mxu1 }
 0x523   : > { %v8730_v3 = vpop.f32.mrb[11].mxu1  ;;  %v1261_v11 = vunpack.c.l.b16 %v1237_v5 }
 0x528   : > { %v1145_v4 = vpop.f32.mrb[20].mxu0 }
 0x529   : > { %v1238_v6 = vpack.c.bf16 %v1145_v4, %v1145_v4  ;;  %v8735_v7 = vpop.f32.mrb[21].mxu0 }
 0x52a   : > { %v1148_v8 = vpop.f32.mrb[22].mxu0 }
 0x52b   : > { %v1262_v9 = vunpack.c.l.b16 %v1238_v6  ;;  %v8736_v10 = vpop.f32.mrb[23].mxu0 }
 0x52d   : > { %v1265_v12 = vrot.slane %v1262_v9, 7 }
 0x52f   : > { %v1267_v14 = vsel %vm1266_vm2, %v1265_v12, %v1261_v11 }
 0x530   : > { %v1188_v15 = vpop.f32.mrb[12].mxu1 }
 0x531   : > { %v1239_v16 = vpack.c.bf16 %v1188_v15, %v1188_v15  ;;  %v8741_v18 = vpop.f32.mrb[13].mxu1 }
 0x532   : > { %v1191_v19 = vpop.f32.mrb[14].mxu1 }
 0x533   : > { %v1263_v20 = vunpack.c.l.b16 %v1239_v16  ;;  %v8742_v21 = vpop.f32.mrb[15].mxu1 }
 0x535   : > { %v1268_v22 = vrot.slane %v1263_v20, 6 }
 0x537   : > { %v1270_v23 = vsel %vm1269_vm3, %v1268_v22, %v1267_v14 }
 0x538   : > { %v1231_v24 = vpop.f32.mrb[24].mxu0 }
 0x539   : > { %v1240_v25 = vpack.c.bf16 %v1231_v24, %v1231_v24  ;;  %v8747_v26 = vpop.f32.mrb[25].mxu0 }
 0x53a   : > { %v1234_v27 = vpop.f32.mrb[26].mxu0 }
 0x53b   : > { %v1264_v31 = vunpack.c.l.b16 %v1240_v25  ;;  %v8748_v32 = vpop.f32.mrb[27].mxu0 }
 0x53d   : > { %v1271_v35 = vrot.slane %v1264_v31, 5 }
 0x53f   : > { %v1273_v36 = vsel %vm1272_vm4, %v1271_v35, %v1270_v23 }
 0x540   : > { %v1274_v37 = vpack.c.b16 %v1273_v36, %v1273_v36 }
 0x542   : > { %8766 = vmatmul.mubr.bf16.vlgmr.msra.gmra.mrb[16].mxu1 %v1274_v37 }
 0x543   : > { %8790 = vmatpush3.bf16.msra.mxu1 %v10924_v55  ;;  %8805 = vmatprep.mubr.bf16.mxu1 %v10833_v13 }
 0x544   : > { %8791 = vmatprep.subr.bf16.mxu1 %v9759_v38 }
 0x547   : > { %8792 = vmatpush3.bf16.msra.mxu1 %v9759_v38 }
 0x548   : > { %8793 = vmatprep.subr.bf16.mxu1 %v9761_v39 }
 0x54b   : > { %8794 = vmatpush3.bf16.msra.mxu1 %v9761_v39 }
 0x54c   : > { %8795 = vmatprep.subr.bf16.mxu1 %v9763_v40 }
 0x54f   : > { %8796 = vmatpush3.bf16.msra.mxu1 %v9763_v40 }
 0x550   : > { %8797 = vmatprep.subr.bf16.mxu1 %v9765_v41 }
 0x553   : > { %8798 = vmatpush3.bf16.msra.mxu1 %v9765_v41 }
 0x554   : > { %8799 = vmatprep.subr.bf16.mxu1 %v9767_v42 }
 0x557   : > { %8800 = vmatpush3.bf16.msra.mxu1 %v9767_v42 }
 0x558   : > { %8801 = vmatprep.subr.bf16.mxu1 %v9769_v43 }
 0x559   : > { %v8787_v45 = vpop.f32.mrb[28].mxu0 }
 0x55a   : > { %v1474_v46 = vpop.f32.mrb[29].mxu0  ;;  %v1483_v20 = vadd.f32 %v8787_v45, %v7937_v63 }
 0x55b   : > { %8802 = vmatpush3.bf16.msra.mxu1 %v9769_v43  ;;  %v8788_v47 = vpop.f32.mrb[30].mxu0  ;;  %v1475_v1 = vadd.f32 %v7937_v63, %v1474_v46 }
 0x55c   : > { %8803 = vmatprep.subr.bf16.mxu1 %v9771_v44  ;;  %v1477_v48 = vpop.f32.mrb[31].mxu0  ;;  %v8238_v21 = vpack.c.bf16 %v1483_v20, %v1483_v20  ;;  %v1486_v23 = vadd.f32 %v8788_v47, %v7937_v63 }
 0x55d   : > { %v8236_v10 = vpack.c.bf16 %v1475_v1, %v1475_v1  ;;  %v1478_v16 = vadd.f32 %v7937_v63, %v1477_v48 }
 0x55e   : > { %v8239_v24 = vpack.c.bf16 %v1486_v23, %v1486_v23 }
 0x55f   : > { %8804 = vmatpush3.bf16.msra.mxu1 %v9771_v44  ;;  %v8237_v18 = vpack.c.bf16 %v1478_v16, %v1478_v16 }
 0x560   : > { %8843 = vmatprep.subr.bf16.mxu1 %v10421_v34 }
 0x562   : > { %8806 = vmatmul.mubr.bf16.vlgmr.msra.gmra.mrb[20].mxu1 %v10847_v28 }
 0x563   : > { %8809 = vmatprep.mubr.bf16.mxu1 %v10849_v29  ;;  %8844 = vmatpush3.bf16.msra.mxu1 %v10847_v28 }
 0x564   : > { %8855 = vmatprep.subr.bf16.mxu1 %v10421_v34 }
 0x56a   : > { %8810 = vmatmul.mubr.bf16.gmra.mrb[24].mxu1 %v10858_v33 }
 0x56b   : > { %8845 = vmatprep.mubr.msk.bf16.mxu1 %vm10422_vm0, %v10421_v34 }
 0x615   : > { %v10944_v49 = vpop.f32.mrb[16].mxu1 }
 0x616   : > { %v8767_v50 = vpop.f32.mrb[17].mxu1 }
 0x617   : > { %v1361_v51 = vpop.f32.mrb[18].mxu1 }
 0x618   : > { %v8768_v52 = vpop.f32.mrb[19].mxu1 }
 0x635   : > { %v8807_v53 = vpop.f32.mrb[20].mxu1 }
 0x636   : > { %v1596_v55 = vpop.f32.mrb[21].mxu1  ;;  %v1605_v57 = vadd.f32 %v8807_v53, %v7946_v54 }
 0x637   : > { %v8808_v56 = vpop.f32.mrb[22].mxu1  ;;  %v1597_v60 = vadd.f32 %v7946_v54, %v1596_v55 }
 0x638   : > { %v1608_v58 = vadd.f32 %v8808_v56, %v7946_v54  ;;  %v1599_v59 = vpop.f32.mrb[23].mxu1 }
 0x639   : > { %v1600_v61 = vadd.f32 %v7946_v54, %v1599_v59 }
 0x63a   : > { %v1640_v62 = vpack.c.bf16 %v1608_v58, %v1605_v57 }
 0x63b   : > { %v1639_v0 = vpack.c.bf16 %v1600_v61, %v1597_v60 }
 0x63c   : > { %v1693_v15 = vsel %vm799_vm1, %v1640_v62, 0 }
 0x63d   : > { %v1647_v2 = vsel %vm799_vm1, %v1639_v0, 0  ;;  %v8811_v3 = vpop.f32.mrb[24].mxu1 }
 0x63e   : > { %8814 = vmatpush3.bf16.xpose.msra.mxu0 %v1647_v2  ;;  %v1621_v4 = vadd.f32 %v8811_v3, %v7946_v54  ;;  %v1612_v5 = vpop.f32.mrb[25].mxu1 }
 0x63f   : > { %v1613_v6 = vadd.f32 %v7946_v54, %v1612_v5  ;;  %v8812_v7 = vpop.f32.mrb[26].mxu1  ;;  %8819 = vmatprep.subr.bf16.mxu0 %v10421_v34 }
 0x640   : > { %v1624_v8 = vadd.f32 %v8812_v7, %v7946_v54  ;;  %v1615_v9 = vpop.f32.mrb[27].mxu1 }
 0x641   : > { %v1616_v11 = vadd.f32 %v7946_v54, %v1615_v9 }
 0x642   : > { %v1642_v12 = vpack.c.bf16 %v1624_v8, %v1621_v4 }
 0x643   : > { %v1641_v14 = vpack.c.bf16 %v1616_v11, %v1613_v6 }
 0x644   : > { %v1785_v22 = vsel %vm799_vm1, %v1642_v12, 0 }
 0x645   : > { %8816 = vmatmul.mubr.msk.bf16.vlgmr.msra.gmra.mrb[32].mxu0 %vm799_vm1, %v8236_v10  ;;  %v1739_v19 = vsel %vm799_vm1, %v1641_v14, 0 }
 0x646   : > { %8820 = vmatpush3.bf16.xpose.msra.mxu0 %v1693_v15  ;;  %8821 = vmatprep.mubr.msk.bf16.mxu0 %vm10422_vm0, %v10421_v34 }
 0x647   : > { %8825 = vmatprep.subr.bf16.mxu0 %v10421_v34 }
 0x64d   : > { %8822 = vmatmul.mubr.msk.bf16.vlgmr.msra.gmra.mrb[36].mxu0 %vm799_vm1, %v8237_v18 }
 0x64e   : > { %8826 = vmatpush3.bf16.xpose.msra.mxu0 %v1739_v19  ;;  %8827 = vmatprep.mubr.msk.bf16.mxu0 %vm10422_vm0, %v10421_v34 }
 0x64f   : > { %8831 = vmatprep.subr.bf16.mxu0 %v10421_v34 }
 0x655   : > { %8828 = vmatmul.mubr.msk.bf16.vlgmr.msra.gmra.mrb[40].mxu0 %vm799_vm1, %v8238_v21 }
 0x656   : > { %8832 = vmatpush3.bf16.xpose.msra.mxu0 %v1785_v22  ;;  %8833 = vmatprep.mubr.msk.bf16.mxu0 %vm10422_vm0, %v10421_v34 }
 0x657   : > { %8837 = vmatprep.subr.bf16.mxu0 %v10421_v34 }
 0x65d   : > { %8834 = vmatmul.mubr.msk.bf16.vlgmr.msra.gmra.mrb[44].mxu0 %vm799_vm1, %v8239_v24 }
 0x65e   : > { %8838 = vmatpush3.bf16.msra.mxu0 %v10833_v13  ;;  %8839 = vmatprep.mubr.msk.bf16.mxu0 %vm10422_vm0, %v10421_v34 }
 0x65f   : > { %8849 = vmatprep.subr.bf16.mxu0 %v10421_v34 }
 0x718   : > { %v1683_v25 = vpop.f32.mrb[32].mxu0 }
 0x719   : > { %v8817_v26 = vpop.f32.mrb[33].mxu0  ;;  %v1827_v27 = vsel %vm799_vm1, %v1683_v25, -inf }
 0x71a   : > { %1828 = vmax.xlane.f32.xlu0 %v1827_v27  ;;  %v1686_v31 = vpop.f32.mrb[34].mxu0 }
 0x71b   : > { %v8818_v32 = vpop.f32.mrb[35].mxu0 }
 0x720   : > { %v1729_v35 = vpop.f32.mrb[36].mxu0 }
 0x721   : > { %v8823_v36 = vpop.f32.mrb[37].mxu0  ;;  %v1830_v37 = vsel %vm799_vm1, %v1729_v35, -inf }
 0x722   : > { %1831 = vmax.xlane.f32.xlu1 %v1830_v37  ;;  %v1732_v38 = vpop.f32.mrb[38].mxu0 }
 0x723   : > { %v8824_v39 = vpop.f32.mrb[39].mxu0 }
 0x728   : > { %v1775_v40 = vpop.f32.mrb[40].mxu0 }
 0x729   : > { %v8829_v41 = vpop.f32.mrb[41].mxu0  ;;  %v1833_v42 = vsel %vm799_vm1, %v1775_v40, -inf }
 0x72a   : > { %1834 = vmax.xlane.f32.xlu0 %v1833_v42  ;;  %v1778_v43 = vpop.f32.mrb[42].mxu0 }
 0x72b   : > { %v8830_v44 = vpop.f32.mrb[43].mxu0 }
 0x730   : > { %v1821_v45 = vpop.f32.mrb[44].mxu0 }
 0x731   : > { %v8835_v46 = vpop.f32.mrb[45].mxu0  ;;  %v1836_v47 = vsel %vm799_vm1, %v1821_v45, -inf }
 0x732   : > { %1837 = vmax.xlane.f32.xlu1 %v1836_v47  ;;  %v1824_v48 = vpop.f32.mrb[46].mxu0 }
 0x733   : > { %v8836_v50 = vpop.f32.mrb[47].mxu0 }
 0x7a7   : > { %v1829_v51 = vpop.xlane.xlu0 %1828 }
 0x7a8   : > { %v1839_v52 = vsub.f32 %v1683_v25, %v1829_v51 }
 0x7aa   : > { %v1843_v53 = vmul.f32 1.442695, %v1839_v52 }
 0x7ac   : > { %9950 = vpow2.f32 %v1843_v53 }
 0x7af   : > { %v1832_v54 = vpop.xlane.xlu1 %1831 }
 0x7b0   : > { %v1840_v55 = vsub.f32 %v1729_v35, %v1832_v54 }
 0x7b2   : > { %v1845_v56 = vmul.f32 1.442695, %v1840_v55 }
 0x7b4   : > { %9952 = vpow2.f32 %v1845_v56 }
 0x7b6   : > { %v9951_v57 = vpop.eup %9950 }
 0x7b7   : > { %v1835_v58 = vpop.xlane.xlu0 %1834  ;;  %v1851_v59 = vsel %vm799_vm1, %v9951_v57, 0.0 }
 0x7b8   : > { %v1841_v60 = vsub.f32 %v1775_v40, %v1835_v58  ;;  %1852 = vadd.xlane.f32.xlu0 %v1851_v59 }
 0x7ba   : > { %v1847_v61 = vmul.f32 1.442695, %v1841_v60 }
 0x7bc   : > { %9954 = vpow2.f32 %v1847_v61 }
 0x7be   : > { %v9953_v62 = vpop.eup %9952 }
 0x7bf   : > { %v1838_v63 = vpop.xlane.xlu1 %1837  ;;  %v1854_v0 = vsel %vm799_vm1, %v9953_v62, 0.0 }
 0x7c0   : > { %v1842_v1 = vsub.f32 %v1821_v45, %v1838_v63  ;;  %1855 = vadd.xlane.f32.xlu1 %v1854_v0  ;;  %v9774_v63 = vld [vmem:[#allocation13 + $0x40] sm:$0xff]   ;;  %v9775_v0 = vld [vmem:[#allocation13 + $0x48] sm:$0xff]  }
 0x7c2   : > { %v1849_v2 = vmul.f32 1.442695, %v1842_v1  ;;  %v9776_v1 = vld [vmem:[#allocation13 + $0x50] sm:$0xff]  }
 0x7c4   : > { %9956 = vpow2.f32 %v1849_v2  ;;  %v9777_v2 = vld [vmem:[#allocation13 + $0x58] sm:$0xff]  }
 0x7c6   : > { %v9955_v3 = vpop.eup %9954 }
 0x7c7   : > { %v1857_v4 = vsel %vm799_vm1, %v9955_v3, 0.0 }
 0x7c8   : > { %1858 = vadd.xlane.f32.xlu0 %v1857_v4  ;;  %v9779_v4 = vld [vmem:[#allocation13 + $0x68] sm:$0xff]  }
 0x7ce   : > { %v9957_v5 = vpop.eup %9956 }
 0x7cf   : > { %v1860_v6 = vsel %vm799_vm1, %v9957_v5, 0.0 }
 0x7d0   : > { %1861 = vadd.xlane.f32.xlu1 %v1860_v6  ;;  %v9781_v6 = vld [vmem:[#allocation13 + $0x78] sm:$0xff]  }
 0x845   : > { %v1853_v7 = vpop.xlane.xlu0 %1852 }
 0x846   : > { %9958 = vrcp.f32 %v1853_v7  ;;  %v9782_v7 = vld [vmem:[#allocation10 + $0x80] sm:$0xff]  }
 0x84d   : > { %v1856_v8 = vpop.xlane.xlu1 %1855 }
 0x84e   : > { %9960 = vrcp.f32 %v1856_v8  ;;  %v9783_v8 = vld [vmem:[#allocation14 + $0x8] sm:$0xff]  }
 0x850   : > { %v9959_v9 = vpop.eup %9958 }
 0x851   : > { %v1867_v10 = vmul.f32 %v9959_v9, %v9951_v57 }
 0x853   : > { %v1871_v11 = vsel %vm799_vm1, %v1867_v10, 0.0 }
 0x854   : > { %v1872_v12 = vrot.slane %v1871_v11, 4 }
 0x855   : > { %v1859_v14 = vpop.xlane.xlu0 %1858 }
 0x856   : > { %v1873_v15 = vadd.f32 %v1872_v12, %v1871_v11  ;;  %9962 = vrcp.f32 %v1859_v14 }
 0x858   : > { %v9961_v16 = vpop.eup %9960  ;;  %v1874_v18 = vrot.slane %v1873_v15, 2 }
 0x859   : > { %v1868_v19 = vmul.f32 %v9961_v16, %v9953_v62 }
 0x85a   : > { %v1875_v20 = vadd.f32 %v1874_v18, %v1873_v15 }
 0x85b   : > { %v1878_v21 = vsel %vm799_vm1, %v1868_v19, 0.0 }
 0x85c   : > { %v1879_v22 = vrot.slane %v1878_v21, 4  ;;  %v1876_v23 = vrot.slane %v1875_v20, 1 }
 0x85d   : > { %v1862_v24 = vpop.xlane.xlu1 %1861 }
 0x85e   : > { %v1880_v25 = vadd.f32 %v1879_v22, %v1878_v21  ;;  %9964 = vrcp.f32 %v1862_v24  ;;  %v1877_v26 = vadd.f32 %v1876_v23, %v1875_v20 }
 0x860   : > { %v9963_v27 = vpop.eup %9962  ;;  %v1881_v31 = vrot.slane %v1880_v25, 2  ;;  %v1899_v32 = vmul.f32 0.125, %v1877_v26 }
 0x861   : > { %v1869_v35 = vmul.f32 %v9963_v27, %v9955_v3  ;;  %v9778_v3 = vld [vmem:[#allocation13 + $0x60] sm:$0xff]  }
 0x862   : > { %v1882_v36 = vadd.f32 %v1881_v31, %v1880_v25  ;;  %v1903_v37 = vpack.c.bf16 %v1899_v32, %v1899_v32 }
 0x863   : > { %v1885_v38 = vsel %vm799_vm1, %v1869_v35, 0.0 }
 0x864   : > { %v1883_v39 = vrot.slane %v1882_v36, 1  ;;  %v1886_v40 = vrot.slane %v1885_v38, 4  ;;  %8840 = vmatmul.mubr.msk.bf16.vlgmr.msra.gmra.mrb[48].mxu0 %vm799_vm1, %v1903_v37 }
 0x865   : > { %8850 = vmatpush3.bf16.msra.mxu0 %v10849_v29  ;;  %8851 = vmatprep.mubr.msk.bf16.mxu0 %vm10422_vm0, %v10421_v34 }
 0x866   : > { %v1887_v41 = vadd.f32 %v1886_v40, %v1885_v38  ;;  %v1884_v42 = vadd.f32 %v1883_v39, %v1882_v36  ;;  %8861 = vmatprep.subr.bf16.mxu0 %v10421_v34 }
 0x868   : > { %v9965_v43 = vpop.eup %9964  ;;  %v1888_v44 = vrot.slane %v1887_v41, 2  ;;  %v1900_v45 = vmul.f32 0.125, %v1884_v42 }
 0x869   : > { %v1870_v46 = vmul.f32 %v9965_v43, %v9957_v5  ;;  %v9780_v5 = vld [vmem:[#allocation13 + $0x70] sm:$0xff]  }
 0x86a   : > { %v1904_v47 = vpack.c.bf16 %v1900_v45, %v1900_v45  ;;  %v1889_v48 = vadd.f32 %v1888_v44, %v1887_v41 }
 0x86b   : > { %v1892_v50 = vsel %vm799_vm1, %v1870_v46, 0.0 }
 0x86c   : > { %v1893_v51 = vrot.slane %v1892_v50, 4  ;;  %8846 = vmatmul.mubr.msk.bf16.vlgmr.msra.gmra.mrb[28].mxu1 %vm799_vm1, %v1904_v47  ;;  %v1890_v52 = vrot.slane %v1889_v48, 1  ;;  %v9784_v47 = vld [vmem:[#allocation10 + $0x88] sm:$0xff]  }
 0x86d   : > { %8856 = vmatpush3.bf16.msra.mxu1 %v10858_v33  ;;  %8857 = vmatprep.mubr.msk.bf16.mxu1 %vm10422_vm0, %v10421_v34 }
 0x86e   : > { %v1894_v53 = vadd.f32 %v1893_v51, %v1892_v50  ;;  %v1891_v54 = vadd.f32 %v1890_v52, %v1889_v48  ;;  %8881 = vmatprep.subr.bf16.mxu1 %v10421_v34  ;;  %v9785_v48 = vld [vmem:[#allocation10 + $0x90] sm:$0xff]   ;;  %v9787_v50 = vld [vmem:[#allocation10 + $0x98] sm:$0xff]   ;;  %v9789_v51 = vld [vmem:[#allocation10 + $0xa0] sm:$0xff]  }
 0x86f   : > { %v9791_v52 = vld [vmem:[#allocation10 + $0xa8] sm:$0xff]  }
 0x870   : > { %v1895_v55 = vrot.slane %v1894_v53, 2  ;;  %v1901_v56 = vmul.f32 0.125, %v1891_v54  ;;  %v9795_v54 = vld [vmem:[#allocation10 + $0xb8] sm:$0xff]  }
 0x872   : > { %v1905_v57 = vpack.c.bf16 %v1901_v56, %v1901_v56  ;;  %v1896_v58 = vadd.f32 %v1895_v55, %v1894_v53  ;;  %v9793_v53 = vld [vmem:[#allocation10 + $0xb0] sm:$0xff]   ;;  %v9786_v56 = vld [vmem:[#allocation14] sm:$0xff]  }
 0x874   : > { %8852 = vmatmul.mubr.msk.bf16.vlgmr.msra.gmra.mrb[52].mxu0 %vm799_vm1, %v1905_v57  ;;  %v1897_v59 = vrot.slane %v1896_v58, 1 }
 0x875   : > { %8877 = vmatprep.mubr.msk.bf16.mxu0 %vm10422_vm0, %v10421_v34  ;;  %8862 = vmatpush3.bf16.msra.mxu0 %v9774_v63  ;;  %v9790_v63 = vld [vmem:[#allocation7 + $0x88] sm:$0xff]  }
 0x876   : > { %v1898_v60 = vadd.f32 %v1897_v59, %v1896_v58  ;;  %8863 = vmatprep.subr.bf16.mxu0 %v10421_v34  ;;  %v9788_v59 = vld [vmem:[#allocation7 + $0x80] sm:$0xff]  }
 0x878   : > { %v1902_v61 = vmul.f32 0.125, %v1898_v60 }
 0x879   : > { %8864 = vmatpush3.bf16.msra.mxu0 %v9775_v0  ;;  %v9792_v0 = vld [vmem:[#allocation7 + $0x90] sm:$0xff]  }
 0x87a   : > { %v1906_v62 = vpack.c.bf16 %v1902_v61, %v1902_v61  ;;  %8865 = vmatprep.subr.bf16.mxu0 %v10421_v34 }
 0x87c   : > { %8858 = vmatmul.mubr.msk.bf16.vlgmr.msra.gmra.mrb[32].mxu1 %vm799_vm1, %v1906_v62  ;;  %v1364_v62 = vpack.c.bf16 %v10944_v49, %v10944_v49  ;;  %v9798_v49 = vld [vmem:[#allocation7 + $0xb0] sm:$0xff]  }
 0x87d   : > { %8883 = vmatprep.mubr.msk.bf16.mxu1 %vm10422_vm0, %v10421_v34  ;;  %8866 = vmatpush3.bf16.msra.mxu0 %v9776_v1  ;;  %v9794_v1 = vld [vmem:[#allocation7 + $0x98] sm:$0xff]  }
 0x87e   : > { %8867 = vmatprep.subr.bf16.mxu0 %v10421_v34  ;;  %8882 = vmatpush3.bf16.msra.mxu1 %v9783_v8 }
 0x87f   : > { %8887 = vmatprep.subr.bf16.mxu1 %v10421_v34 }
 0x881   : > { %8868 = vmatpush3.bf16.msra.mxu0 %v9777_v2  ;;  %v9796_v2 = vld [vmem:[#allocation7 + $0xa0] sm:$0xff]  }
 0x882   : > { %8869 = vmatprep.subr.bf16.mxu0 %v10421_v34 }
 0x885   : > { %8870 = vmatpush3.bf16.msra.mxu0 %v9778_v3  ;;  %v9797_v3 = vld [vmem:[#allocation7 + $0xa8] sm:$0xff]  }
 0x886   : > { %8871 = vmatprep.subr.bf16.mxu0 %v10421_v34 }
 0x889   : > { %8872 = vmatpush3.bf16.msra.mxu0 %v9779_v4  ;;  %v9799_v4 = vld [vmem:[#allocation7 + $0xb8] sm:$0xff]  }
 0x88a   : > { %8873 = vmatprep.subr.bf16.mxu0 %v10421_v34 }
 0x88d   : > { %8874 = vmatpush3.bf16.msra.mxu0 %v9780_v5  ;;  %v7988_v5 = vld [vmem:[#allocation11 + $0x2] ss:$0 sm:$0xff] }
 0x88e   : > { %8875 = vmatprep.subr.bf16.mxu0 %v10421_v34 }
 0x891   : > { %8876 = vmatpush3.bf16.msra.mxu0 %v9781_v6 }
 0x892   : > { %8913 = vmatprep.subr.bf16.mxu0 %v9782_v7 }
 0x937   : > { %v1944_v9 = vpop.f32.mrb[48].mxu0 }
 0x938   : > { %v8841_v10 = vpop.f32.mrb[49].mxu0  ;;  %v2079_v15 = vpack.c.bf16 %v1944_v9, %v1944_v9 }
 0x939   : > { %v1947_v11 = vpop.f32.mrb[50].mxu0 }
 0x93a   : > { %v8842_v12 = vpop.f32.mrb[51].mxu0  ;;  %v2104_v22 = vunpack.c.l.b16 %v2079_v15 }
 0x93f   : > { %v1987_v14 = vpop.f32.mrb[28].mxu1 }
 0x940   : > { %v2080_v16 = vpack.c.bf16 %v1987_v14, %v1987_v14  ;;  %v8847_v18 = vpop.f32.mrb[29].mxu1 }
 0x941   : > { %v1990_v19 = vpop.f32.mrb[30].mxu1 }
 0x942   : > { %v2105_v20 = vunpack.c.l.b16 %v2080_v16  ;;  %v8848_v21 = vpop.f32.mrb[31].mxu1 }
 0x944   : > { %v2108_v23 = vrot.slane %v2105_v20, 7 }
 0x946   : > { %v2109_v24 = vsel %vm1266_vm2, %v2108_v23, %v2104_v22 }
 0x947   : > { %v2030_v25 = vpop.f32.mrb[52].mxu0 }
 0x948   : > { %v2081_v26 = vpack.c.bf16 %v2030_v25, %v2030_v25  ;;  %v8853_v27 = vpop.f32.mrb[53].mxu0 }
 0x949   : > { %v2033_v31 = vpop.f32.mrb[54].mxu0 }
 0x94a   : > { %v2106_v32 = vunpack.c.l.b16 %v2081_v26  ;;  %v8854_v35 = vpop.f32.mrb[55].mxu0 }
 0x94c   : > { %v2110_v36 = vrot.slane %v2106_v32, 6 }
 0x94e   : > { %v2111_v37 = vsel %vm1269_vm3, %v2110_v36, %v2109_v24 }
 0x94f   : > { %v2073_v38 = vpop.f32.mrb[32].mxu1 }
 0x950   : > { %v2082_v39 = vpack.c.bf16 %v2073_v38, %v2073_v38  ;;  %v8859_v40 = vpop.f32.mrb[33].mxu1 }
 0x951   : > { %v2076_v41 = vpop.f32.mrb[34].mxu1 }
 0x952   : > { %v2107_v42 = vunpack.c.l.b16 %v2082_v39  ;;  %v8860_v43 = vpop.f32.mrb[35].mxu1 }
 0x954   : > { %v2112_v44 = vrot.slane %v2107_v42, 5 }
 0x956   : > { %v2113_v45 = vsel %vm1272_vm4, %v2112_v44, %v2111_v37  ;;  %v7979_v44 = vld [vmem:[#allocation8 + $0x2] ss:$0 sm:$0xff] }
 0x957   : > { %v2114_v46 = vpack.c.b16 %v2113_v45, %v2113_v45 }
 0x959   : > { %8878 = vmatmul.mubr.bf16.vlgmr.msra.gmra.mrb[56].mxu0 %v2114_v46 }
 0x95a   : > { %8914 = vmatpush3.bf16.msra.mxu0 %v9782_v7  ;;  %8929 = vmatprep.mubr.bf16.mxu0 %v10833_v13 }
 0x95b   : > { %8915 = vmatprep.subr.bf16.mxu0 %v9784_v47 }
 0x95e   : > { %8916 = vmatpush3.bf16.msra.mxu0 %v9784_v47 }
 0x95f   : > { %8917 = vmatprep.subr.bf16.mxu0 %v9785_v48 }
 0x962   : > { %8918 = vmatpush3.bf16.msra.mxu0 %v9785_v48 }
 0x963   : > { %8919 = vmatprep.subr.bf16.mxu0 %v9787_v50 }
 0x966   : > { %8920 = vmatpush3.bf16.msra.mxu0 %v9787_v50 }
 0x967   : > { %8921 = vmatprep.subr.bf16.mxu0 %v9789_v51 }
 0x96a   : > { %8922 = vmatpush3.bf16.msra.mxu0 %v9789_v51 }
 0x96b   : > { %8923 = vmatprep.subr.bf16.mxu0 %v9791_v52 }
 0x96e   : > { %8924 = vmatpush3.bf16.msra.mxu0 %v9791_v52 }
 0x96f   : > { %8925 = vmatprep.subr.bf16.mxu0 %v9793_v53 }
 0x972   : > { %8926 = vmatpush3.bf16.msra.mxu0 %v9793_v53 }
 0x973   : > { %8927 = vmatprep.subr.bf16.mxu0 %v9795_v54 }
 0x976   : > { %8928 = vmatpush3.bf16.msra.mxu0 %v9795_v54 }
 0x977   : > { %8955 = vmatprep.subr.bf16.mxu0 %v10421_v34 }
 0x979   : > { %8930 = vmatmul.mubr.bf16.vlgmr.msra.gmra.mrb[60].mxu0 %v10847_v28 }
 0x97a   : > { %8933 = vmatprep.mubr.bf16.mxu0 %v10849_v29 }
 0x981   : > { %8934 = vmatmul.mubr.bf16.gmra.mrb[64].mxu0 %v10858_v33 }
 0x982   : > { %8957 = vmatprep.mubr.msk.bf16.mxu0 %vm10422_vm0, %v10421_v34 }
 0xa2c   : > { %v2198_v55 = vpop.f32.mrb[56].mxu0 }
 0xa2d   : > { %v2204_v57 = vpack.c.bf16 %v2198_v55, %v2198_v55  ;;  %v8879_v58 = vpop.f32.mrb[57].mxu0 }
 0xa2e   : > { %v2201_v60 = vpop.f32.mrb[58].mxu0 }
 0xa2f   : > { %v8880_v61 = vpop.f32.mrb[59].mxu0  ;;  %8884 = vmatmul.mubr.msk.bf16.vlgmr.msra.gmra.mrb[36].mxu1 %vm799_vm1, %v2204_v57 }
 0xa30   : > { %8888 = vmatpush3.bf16.msra.mxu1 %v9786_v56  ;;  %8889 = vmatprep.mubr.msk.bf16.mxu1 %vm10422_vm0, %v10421_v34 }
 0xa31   : > { %8893 = vmatprep.subr.bf16.mxu1 %v9788_v59 }
 0xa37   : > { %8890 = vmatmul.mubr.msk.bf16.vlgmr.msra.gmra.mrb[40].mxu1 %vm799_vm1, %v1364_v62 }
 0xa38   : > { %8894 = vmatpush3.bf16.msra.mxu1 %v9788_v59  ;;  %8909 = vmatprep.mubr.bf16.mxu1 %v10838_v17 }
 0xa39   : > { %8895 = vmatprep.subr.bf16.mxu1 %v9790_v63 }
 0xa3c   : > { %8896 = vmatpush3.bf16.msra.mxu1 %v9790_v63 }
 0xa3d   : > { %8897 = vmatprep.subr.bf16.mxu1 %v9792_v0 }
 0xa40   : > { %8898 = vmatpush3.bf16.msra.mxu1 %v9792_v0 }
 0xa41   : > { %8899 = vmatprep.subr.bf16.mxu1 %v9794_v1 }
 0xa44   : > { %8900 = vmatpush3.bf16.msra.mxu1 %v9794_v1 }
 0xa45   : > { %8901 = vmatprep.subr.bf16.mxu1 %v9796_v2 }
 0xa48   : > { %8902 = vmatpush3.bf16.msra.mxu1 %v9796_v2 }
 0xa49   : > { %8903 = vmatprep.subr.bf16.mxu1 %v9797_v3 }
 0xa4c   : > { %8904 = vmatpush3.bf16.msra.mxu1 %v9797_v3  ;;  %v8931_v6 = vpop.f32.mrb[60].mxu0 }
 0xa4d   : > { %8905 = vmatprep.subr.bf16.mxu1 %v9798_v49  ;;  %v2544_v7 = vadd.f32 %v8931_v6, %v7988_v5  ;;  %v2535_v8 = vpop.f32.mrb[61].mxu0 }
 0xa4e   : > { %v2536_v9 = vadd.f32 %v7988_v5, %v2535_v8  ;;  %v8932_v10 = vpop.f32.mrb[62].mxu0 }
 0xa4f   : > { %v2547_v11 = vadd.f32 %v8932_v10, %v7988_v5  ;;  %v2538_v12 = vpop.f32.mrb[63].mxu0 }
 0xa50   : > { %8906 = vmatpush3.bf16.msra.mxu1 %v9798_v49  ;;  %v2539_v14 = vadd.f32 %v7988_v5, %v2538_v12 }
 0xa51   : > { %8907 = vmatprep.subr.bf16.mxu1 %v9799_v4  ;;  %v2579_v15 = vpack.c.bf16 %v2547_v11, %v2544_v7 }
 0xa52   : > { %v2578_v16 = vpack.c.bf16 %v2539_v14, %v2536_v9 }
 0xa53   : > { %v2632_v54 = vsel %vm799_vm1, %v2579_v15, 0 }
 0xa54   : > { %8908 = vmatpush3.bf16.msra.mxu1 %v9799_v4  ;;  %v8935_v18 = vpop.f32.mrb[64].mxu0  ;;  %v2586_v19 = vsel %vm799_vm1, %v2578_v16, 0 }
 0xa55   : > { %8937 = vmatprep.subr.bf16.mxu1 %v10421_v34  ;;  %v2560_v20 = vadd.f32 %v8935_v18, %v7988_v5  ;;  %v2551_v21 = vpop.f32.mrb[65].mxu0 }
 0xa56   : > { %v2552_v22 = vadd.f32 %v7988_v5, %v2551_v21  ;;  %v8936_v23 = vpop.f32.mrb[66].mxu0 }
 0xa57   : > { %8910 = vmatmul.mubr.bf16.vlgmr.msra.gmra.mrb[44].mxu1 %v10851_v30  ;;  %v2563_v24 = vadd.f32 %v8936_v23, %v7988_v5  ;;  %v2554_v27 = vpop.f32.mrb[67].mxu0 }
 0xa58   : > { %8939 = vmatprep.mubr.msk.bf16.mxu1 %vm10422_vm0, %v10421_v34  ;;  %v2555_v31 = vadd.f32 %v7988_v5, %v2554_v27 }
 0xa59   : > { %v2581_v25 = vpack.c.bf16 %v2563_v24, %v2560_v20 }
 0xa5a   : > { %v2580_v32 = vpack.c.bf16 %v2555_v31, %v2552_v22 }
 0xa5b   : > { %v2724_v26 = vsel %vm799_vm1, %v2581_v25, 0 }
 0xa5c   : > { %8956 = vmatpush3.bf16.xpose.msra.mxu0 %v2724_v26  ;;  %v2678_v57 = vsel %vm799_vm1, %v2580_v32, 0 }
 0xa5d   : > { %8938 = vmatpush3.bf16.xpose.msra.mxu1 %v2586_v19  ;;  %8967 = vmatprep.subr.bf16.mxu0 %v10421_v34 }
 0xa5e   : > { %8943 = vmatprep.subr.bf16.mxu1 %v10421_v34 }
 0xb02   : > { %v2251_v35 = vpop.f32.mrb[36].mxu1 }
 0xb03   : > { %v8885_v36 = vpop.f32.mrb[37].mxu1 }
 0xb04   : > { %v2254_v37 = vpop.f32.mrb[38].mxu1 }
 0xb05   : > { %v8886_v38 = vpop.f32.mrb[39].mxu1 }
 0xb0a   : > { %v2300_v39 = vpop.f32.mrb[40].mxu1 }
 0xb0b   : > { %v11029_v40 = vadd.f32 %v2300_v39, %v2251_v35  ;;  %v8891_v41 = vpop.f32.mrb[41].mxu1 }
 0xb0c   : > { %v2303_v42 = vpop.f32.mrb[42].mxu1 }
 0xb0d   : > { %v8892_v43 = vpop.f32.mrb[43].mxu1 }
 0xb2a   : > { %v8911_v45 = vpop.f32.mrb[44].mxu1 }
 0xb2b   : > { %v2413_v46 = vpop.f32.mrb[45].mxu1  ;;  %v2422_v58 = vadd.f32 %v8911_v45, %v7979_v44 }
 0xb2c   : > { %v2414_v47 = vadd.f32 %v7979_v44, %v2413_v46  ;;  %v8912_v48 = vpop.f32.mrb[46].mxu1 }
 0xb2d   : > { %v2425_v50 = vadd.f32 %v8912_v48, %v7979_v44  ;;  %v2416_v51 = vpop.f32.mrb[47].mxu1  ;;  %v8242_v59 = vpack.c.bf16 %v2422_v58, %v2422_v58 }
 0xb2e   : > { %v8240_v52 = vpack.c.bf16 %v2414_v47, %v2414_v47  ;;  %v2417_v55 = vadd.f32 %v7979_v44, %v2416_v51 }
 0xb2f   : > { %v8243_v53 = vpack.c.bf16 %v2425_v50, %v2425_v50 }
 0xb30   : > { %8940 = vmatmul.mubr.msk.bf16.vlgmr.msra.gmra.mrb[48].mxu1 %vm799_vm1, %v8240_v52  ;;  %v8241_v56 = vpack.c.bf16 %v2417_v55, %v2417_v55 }
 0xb31   : > { %8944 = vmatpush3.bf16.xpose.msra.mxu1 %v2632_v54  ;;  %8958 = vmatmul.mubr.msk.bf16.vlgmr.msra.gmra.mrb[68].mxu0 %vm799_vm1, %v8243_v53 }
 0xb32   : > { %8945 = vmatprep.mubr.msk.bf16.mxu1 %vm10422_vm0, %v10421_v34  ;;  %8949 = vmatprep.subr.bf16.mxu1 %v10421_v34 }
 0xb33   : > { %8968 = vmatpush3.bf16.msra.mxu0 %v10847_v28  ;;  %8969 = vmatprep.mubr.msk.bf16.mxu0 %vm10422_vm0, %v10421_v34 }
 0xb34   : > { %8979 = vmatprep.subr.bf16.mxu0 %v10421_v34 }
 0xb38   : > { %8946 = vmatmul.mubr.msk.bf16.vlgmr.msra.gmra.mrb[52].mxu1 %vm799_vm1, %v8241_v56 }
 0xb39   : > { %8950 = vmatpush3.bf16.xpose.msra.mxu1 %v2678_v57  ;;  %8951 = vmatprep.mubr.msk.bf16.mxu1 %vm10422_vm0, %v10421_v34 }
 0xb3a   : > { %8961 = vmatprep.subr.bf16.mxu1 %v10421_v34 }
 0xb40   : > { %8952 = vmatmul.mubr.msk.bf16.vlgmr.msra.gmra.mrb[56].mxu1 %vm799_vm1, %v8242_v59 }
 0xb41   : > { %8962 = vmatpush3.bf16.msra.mxu1 %v10833_v13  ;;  %8963 = vmatprep.mubr.msk.bf16.mxu1 %vm10422_vm0, %v10421_v34 }
 0xb42   : > { %8973 = vmatprep.subr.bf16.mxu1 %v10421_v34 }
 0xc03   : > { %v2622_v60 = vpop.f32.mrb[48].mxu1 }
 0xc04   : > { %v8941_v61 = vpop.f32.mrb[49].mxu1  ;;  %v2760_v62 = vpop.f32.mrb[68].mxu0  ;;  %v2766_v63 = vsel %vm799_vm1, %v2622_v60, -inf }
 0xc05   : > { %v8959_v0 = vpop.f32.mrb[69].mxu0  ;;  %2767 = vmax.xlane.f32.xlu0 %v2766_v63  ;;  %v2625_v1 = vpop.f32.mrb[50].mxu1  ;;  %v2775_v9 = vsel %vm799_vm1, %v2760_v62, -inf }
 0xc06   : > { %v8942_v2 = vpop.f32.mrb[51].mxu1  ;;  %v2763_v3 = vpop.f32.mrb[70].mxu0 }
 0xc07   : > { %v8960_v49 = vpop.f32.mrb[71].mxu0 }
 0xc0b   : > { %v2668_v4 = vpop.f32.mrb[52].mxu1 }
 0xc0c   : > { %v8947_v5 = vpop.f32.mrb[53].mxu1  ;;  %v2769_v6 = vsel %vm799_vm1, %v2668_v4, -inf }
 0xc0d   : > { %2770 = vmax.xlane.f32.xlu1 %v2769_v6  ;;  %v2671_v7 = vpop.f32.mrb[54].mxu1 }
 0xc0e   : > { %v8948_v8 = vpop.f32.mrb[55].mxu1 }
 0xc11   : > { %2776 = vmax.xlane.f32.xlu1 %v2775_v9 }
 0xc13   : > { %v2714_v10 = vpop.f32.mrb[56].mxu1 }
 0xc14   : > { %v8953_v11 = vpop.f32.mrb[57].mxu1  ;;  %v2772_v12 = vsel %vm799_vm1, %v2714_v10, -inf }
 0xc15   : > { %2773 = vmax.xlane.f32.xlu0 %v2772_v12  ;;  %v2717_v14 = vpop.f32.mrb[58].mxu1 }
 0xc16   : > { %v8954_v15 = vpop.f32.mrb[59].mxu1 }
 0xc92   : > { %v2768_v16 = vpop.xlane.xlu0 %2767 }
 0xc93   : > { %v2778_v18 = vsub.f32 %v2622_v60, %v2768_v16 }
 0xc95   : > { %v2782_v19 = vmul.f32 1.442695, %v2778_v18 }
 0xc97   : > { %9966 = vpow2.f32 %v2782_v19 }
 0xc9a   : > { %v2771_v20 = vpop.xlane.xlu1 %2770 }
 0xc9b   : > { %v2779_v21 = vsub.f32 %v2668_v4, %v2771_v20 }
 0xc9d   : > { %v2784_v22 = vmul.f32 1.442695, %v2779_v21 }
 0xc9e   : > { %v2777_v23 = vpop.xlane.xlu1 %2776 }
 0xc9f   : > { %9968 = vpow2.f32 %v2784_v22  ;;  %v2781_v24 = vsub.f32 %v2760_v62, %v2777_v23 }
 0xca1   : > { %v9967_v25 = vpop.eup %9966  ;;  %v2788_v26 = vmul.f32 1.442695, %v2781_v24 }
 0xca2   : > { %v2774_v27 = vpop.xlane.xlu0 %2773  ;;  %v2790_v31 = vsel %vm799_vm1, %v9967_v25, 0.0 }
 0xca3   : > { %9970 = vpow2.f32 %v2788_v26  ;;  %v2780_v32 = vsub.f32 %v2714_v10, %v2774_v27  ;;  %2791 = vadd.xlane.f32.xlu0 %v2790_v31  ;;  %v9800_v27 = vld [vmem:[#allocation13 + $0x80] sm:$0xff]  }
 0xca5   : > { %v2786_v35 = vmul.f32 1.442695, %v2780_v32 }
 0xca7   : > { %9972 = vpow2.f32 %v2786_v35  ;;  %v9801_v35 = vld [vmem:[#allocation13 + $0x88] sm:$0xff]  }
 0xca9   : > { %v9969_v36 = vpop.eup %9968 }
 0xcaa   : > { %v2793_v37 = vsel %vm799_vm1, %v9969_v36, 0.0 }
 0xcab   : > { %2794 = vadd.xlane.f32.xlu1 %v2793_v37  ;;  %v9803_v37 = vld [vmem:[#allocation13 + $0x98] sm:$0xff]  }
 0xcad   : > { %v9971_v38 = vpop.eup %9970 }
 0xcae   : > { %v2799_v39 = vsel %vm799_vm1, %v9971_v38, 0.0 }
 0xcaf   : > { %2800 = vadd.xlane.f32.xlu1 %v2799_v39  ;;  %v9805_v39 = vld [vmem:[#allocation13 + $0xa8] sm:$0xff]  }
 0xcb1   : > { %v9973_v41 = vpop.eup %9972 }
 0xcb2   : > { %v2796_v42 = vsel %vm799_vm1, %v9973_v41, 0.0 }
 0xcb3   : > { %2797 = vadd.xlane.f32.xlu0 %v2796_v42  ;;  %v9807_v42 = vld [vmem:[#allocation13 + $0xb8] sm:$0xff]  }
 0xd30   : > { %v2792_v43 = vpop.xlane.xlu0 %2791 }
 0xd31   : > { %9974 = vrcp.f32 %v2792_v43  ;;  %v9808_v43 = vld [vmem:[#allocation10 + $0xc0] sm:$0xff]  }
 0xd38   : > { %v2795_v44 = vpop.xlane.xlu1 %2794 }
 0xd39   : > { %9976 = vrcp.f32 %v2795_v44  ;;  %v9810_v44 = vld [vmem:[#allocation14 + $0x10] sm:$0xff]  }
 0xd3b   : > { %v9975_v45 = vpop.eup %9974 }
 0xd3c   : > { %v2806_v46 = vmul.f32 %v9975_v45, %v9967_v25  ;;  %v2801_v47 = vpop.xlane.xlu1 %2800 }
 0xd3d   : > { %9978 = vrcp.f32 %v2801_v47 }
 0xd3e   : > { %v2810_v48 = vsel %vm799_vm1, %v2806_v46, 0.0 }
 0xd3f   : > { %v2811_v50 = vrot.slane %v2810_v48, 4 }
 0xd40   : > { %v2798_v51 = vpop.xlane.xlu0 %2797 }
 0xd41   : > { %v2812_v52 = vadd.f32 %v2811_v50, %v2810_v48  ;;  %9980 = vrcp.f32 %v2798_v51 }
 0xd43   : > { %v9977_v53 = vpop.eup %9976  ;;  %v2813_v54 = vrot.slane %v2812_v52, 2 }
 0xd44   : > { %v2807_v55 = vmul.f32 %v9977_v53, %v9969_v36  ;;  %v9802_v36 = vld [vmem:[#allocation13 + $0x90] sm:$0xff]  }
 0xd45   : > { %v2814_v56 = vadd.f32 %v2813_v54, %v2812_v52 }
 0xd46   : > { %v2817_v57 = vsel %vm799_vm1, %v2807_v55, 0.0 }
 0xd47   : > { %v9979_v58 = vpop.eup %9978  ;;  %v2818_v59 = vrot.slane %v2817_v57, 4  ;;  %v2815_v60 = vrot.slane %v2814_v56, 1 }
 0xd48   : > { %v2809_v61 = vmul.f32 %v9979_v58, %v9971_v38  ;;  %v9804_v38 = vld [vmem:[#allocation13 + $0xa0] sm:$0xff]  }
 0xd49   : > { %v2819_v62 = vadd.f32 %v2818_v59, %v2817_v57  ;;  %v2816_v63 = vadd.f32 %v2815_v60, %v2814_v56 }
 0xd4a   : > { %v2831_v0 = vsel %vm799_vm1, %v2809_v61, 0.0 }
 0xd4b   : > { %v9981_v1 = vpop.eup %9980  ;;  %v2820_v2 = vrot.slane %v2819_v62, 2  ;;  %v2832_v3 = vrot.slane %v2831_v0, 4  ;;  %v2838_v49 = vmul.f32 0.125, %v2816_v63 }
 0xd4c   : > { %v2808_v4 = vmul.f32 %v9981_v1, %v9973_v41  ;;  %v9806_v41 = vld [vmem:[#allocation13 + $0xb0] sm:$0xff]  }
 0xd4d   : > { %v2833_v5 = vadd.f32 %v2832_v3, %v2831_v0  ;;  %v2842_v6 = vpack.c.bf16 %v2838_v49, %v2838_v49  ;;  %v2821_v7 = vadd.f32 %v2820_v2, %v2819_v62 }
 0xd4e   : > { %v2824_v8 = vsel %vm799_vm1, %v2808_v4, 0.0 }
 0xd4f   : > { %v2834_v9 = vrot.slane %v2833_v5, 2  ;;  %v2825_v10 = vrot.slane %v2824_v8, 4  ;;  %8964 = vmatmul.mubr.msk.bf16.vlgmr.msra.gmra.mrb[60].mxu1 %vm799_vm1, %v2842_v6  ;;  %v2822_v11 = vrot.slane %v2821_v7, 1 }
 0xd50   : > { %8974 = vmatpush3.bf16.msra.mxu1 %v10849_v29  ;;  %8975 = vmatprep.mubr.msk.bf16.mxu1 %vm10422_vm0, %v10421_v34 }
 0xd51   : > { %v2826_v12 = vadd.f32 %v2825_v10, %v2824_v8  ;;  %v2823_v14 = vadd.f32 %v2822_v11, %v2821_v7  ;;  %v2835_v15 = vadd.f32 %v2834_v9, %v2833_v5  ;;  %8985 = vmatprep.subr.bf16.mxu1 %v10421_v34 }
 0xd53   : > { %v2827_v16 = vrot.slane %v2826_v12, 2  ;;  %v2839_v18 = vmul.f32 0.125, %v2823_v14  ;;  %v2836_v19 = vrot.slane %v2835_v15, 1  ;;  %v9811_v14 = vld [vmem:[#allocation10 + $0xd0] sm:$0xff]  }
 0xd55   : > { %v2843_v20 = vpack.c.bf16 %v2839_v18, %v2839_v18  ;;  %v2828_v21 = vadd.f32 %v2827_v16, %v2826_v12  ;;  %v2837_v22 = vadd.f32 %v2836_v19, %v2835_v15  ;;  %v9809_v12 = vld [vmem:[#allocation10 + $0xc8] sm:$0xff]   ;;  %v9812_v15 = vld [vmem:[#allocation10 + $0xd8] sm:$0xff]   ;;  %v9814_v18 = vld [vmem:[#allocation10 + $0xe0] sm:$0xff]  }
 0xd56   : > { %v9813_v16 = vld [vmem:[#allocation7 + $0xc0] sm:$0xff]   ;;  %v9816_v19 = vld [vmem:[#allocation10 + $0xe8] sm:$0xff]  }
 0xd57   : > { %8970 = vmatmul.mubr.msk.bf16.vlgmr.msra.gmra.mrb[72].mxu0 %vm799_vm1, %v2843_v20  ;;  %v2829_v23 = vrot.slane %v2828_v21, 1  ;;  %v2841_v25 = vmul.f32 0.125, %v2837_v22  ;;  %v9818_v20 = vld [vmem:[#allocation10 + $0xf0] sm:$0xff]  }
 0xd58   : > { %8980 = vmatpush3.bf16.msra.mxu0 %v10858_v33  ;;  %8981 = vmatprep.mubr.msk.bf16.mxu0 %vm10422_vm0, %v10421_v34 }
 0xd59   : > { %v2830_v24 = vadd.f32 %v2829_v23, %v2828_v21  ;;  %9005 = vmatprep.subr.bf16.mxu0 %v10421_v34  ;;  %v2845_v32 = vpack.c.bf16 %v2841_v25, %v2841_v25  ;;  %v9820_v21 = vld [vmem:[#allocation10 + $0xf8] sm:$0xff]   ;;  %v9815_v25 = vld [vmem:[#allocation7 + $0xc8] sm:$0xff]  }
 0xd5b   : > { %v2840_v26 = vmul.f32 0.125, %v2830_v24 }
 0xd5d   : > { %v2844_v31 = vpack.c.bf16 %v2840_v26, %v2840_v26 }
 0xd5f   : > { %8976 = vmatmul.mubr.msk.bf16.vlgmr.msra.gmra.mrb[64].mxu1 %vm799_vm1, %v2844_v31  ;;  %8982 = vmatmul.mubr.msk.bf16.vlgmr.msra.gmra.mrb[76].mxu0 %vm799_vm1, %v2845_v32  ;;  %v9817_v31 = vld [vmem:[#allocation7 + $0xd0] sm:$0xff]   ;;  %v9819_v32 = vld [vmem:[#allocation7 + $0xd8] sm:$0xff]  }
 0xd60   : > { %8986 = vmatpush3.bf16.msra.mxu1 %v9800_v27  ;;  %9001 = vmatprep.mubr.msk.bf16.mxu1 %vm10422_vm0, %v10421_v34 }
 0xd61   : > { %8987 = vmatprep.subr.bf16.mxu1 %v10421_v34  ;;  %9007 = vmatprep.mubr.msk.bf16.mxu0 %vm10422_vm0, %v10421_v34 }
 0xd62   : > { %9006 = vmatpush3.bf16.msra.mxu0 %v9810_v44 }
 0xd63   : > { %9011 = vmatprep.subr.bf16.mxu0 %v9813_v16 }
 0xd64   : > { %8988 = vmatpush3.bf16.msra.mxu1 %v9801_v35  ;;  %v9821_v35 = vld [vmem:[#allocation7 + $0xe0] sm:$0xff]  }
 0xd65   : > { %8989 = vmatprep.subr.bf16.mxu1 %v10421_v34 }
 0xd68   : > { %8990 = vmatpush3.bf16.msra.mxu1 %v9802_v36  ;;  %v9822_v36 = vld [vmem:[#allocation7 + $0xe8] sm:$0xff]  }
 0xd69   : > { %8991 = vmatprep.subr.bf16.mxu1 %v10421_v34 }
 0xd6c   : > { %8992 = vmatpush3.bf16.msra.mxu1 %v9803_v37  ;;  %v9823_v37 = vld [vmem:[#allocation7 + $0xf0] sm:$0xff]  }
 0xd6d   : > { %8993 = vmatprep.subr.bf16.mxu1 %v10421_v34 }
 0xd70   : > { %8994 = vmatpush3.bf16.msra.mxu1 %v9804_v38  ;;  %v9824_v38 = vld [vmem:[#allocation7 + $0xf8] sm:$0xff]  }
 0xd71   : > { %8995 = vmatprep.subr.bf16.mxu1 %v10421_v34 }
 0xd74   : > { %8996 = vmatpush3.bf16.msra.mxu1 %v9805_v39  ;;  %v8028_v39 = vld [vmem:[#allocation11 + $0x3] ss:$0 sm:$0xff] }
 0xd75   : > { %8997 = vmatprep.subr.bf16.mxu1 %v10421_v34 }
 0xd78   : > { %8998 = vmatpush3.bf16.msra.mxu1 %v9806_v41 }
 0xd79   : > { %8999 = vmatprep.subr.bf16.mxu1 %v10421_v34 }
 0xd7c   : > { %9000 = vmatpush3.bf16.msra.mxu1 %v9807_v42 }
 0xd7d   : > { %9031 = vmatprep.subr.bf16.mxu1 %v9808_v43 }
 0xe22   : > { %v2883_v45 = vpop.f32.mrb[60].mxu1 }
 0xe23   : > { %v8965_v46 = vpop.f32.mrb[61].mxu1  ;;  %v3018_v51 = vpack.c.bf16 %v2883_v45, %v2883_v45 }
 0xe24   : > { %v2886_v47 = vpop.f32.mrb[62].mxu1 }
 0xe25   : > { %v8966_v48 = vpop.f32.mrb[63].mxu1  ;;  %v3043_v57 = vunpack.c.l.b16 %v3018_v51 }
 0xe2a   : > { %v2926_v50 = vpop.f32.mrb[72].mxu0 }
 0xe2b   : > { %v3019_v52 = vpack.c.bf16 %v2926_v50, %v2926_v50  ;;  %v8971_v53 = vpop.f32.mrb[73].mxu0 }
 0xe2c   : > { %v2929_v54 = vpop.f32.mrb[74].mxu0 }
 0xe2d   : > { %v3044_v55 = vunpack.c.l.b16 %v3019_v52  ;;  %v8972_v56 = vpop.f32.mrb[75].mxu0 }
 0xe2f   : > { %v3047_v58 = vrot.slane %v3044_v55, 7 }
 0xe31   : > { %v3048_v59 = vsel %vm1266_vm2, %v3047_v58, %v3043_v57 }
 0xe32   : > { %v2969_v60 = vpop.f32.mrb[64].mxu1  ;;  %v3012_v61 = vpop.f32.mrb[76].mxu0 }
 0xe33   : > { %v3020_v62 = vpack.c.bf16 %v2969_v60, %v2969_v60  ;;  %v3021_v63 = vpack.c.bf16 %v3012_v61, %v3012_v61  ;;  %v8977_v0 = vpop.f32.mrb[65].mxu1  ;;  %v8983_v1 = vpop.f32.mrb[77].mxu0 }
 0xe34   : > { %v2972_v2 = vpop.f32.mrb[66].mxu1  ;;  %v3015_v3 = vpop.f32.mrb[78].mxu0 }
 0xe35   : > { %v3045_v49 = vunpack.c.l.b16 %v3020_v62  ;;  %v3046_v4 = vunpack.c.l.b16 %v3021_v63  ;;  %v8978_v5 = vpop.f32.mrb[67].mxu1  ;;  %v8984_v6 = vpop.f32.mrb[79].mxu0 }
 0xe37   : > { %v3049_v7 = vrot.slane %v3045_v49, 6  ;;  %v3051_v8 = vrot.slane %v3046_v4, 5  ;;  %v8019_v49 = vld [vmem:[#allocation8 + $0x3] ss:$0 sm:$0xff] }
 0xe39   : > { %v3050_v9 = vsel %vm1269_vm3, %v3049_v7, %v3048_v59 }
 0xe3a   : > { %v3052_v10 = vsel %vm1272_vm4, %v3051_v8, %v3050_v9 }
 0xe3b   : > { %v3053_v11 = vpack.c.b16 %v3052_v10, %v3052_v10 }
 0xe3d   : > { %9002 = vmatmul.mubr.bf16.vlgmr.msra.gmra.mrb[68].mxu1 %v3053_v11 }
 0xe3e   : > { %9032 = vmatpush3.bf16.msra.mxu1 %v9808_v43  ;;  %9047 = vmatprep.mubr.bf16.mxu1 %v10833_v13 }
 0xe3f   : > { %9033 = vmatprep.subr.bf16.mxu1 %v9809_v12 }
 0xe42   : > { %9034 = vmatpush3.bf16.msra.mxu1 %v9809_v12 }
 0xe43   : > { %9035 = vmatprep.subr.bf16.mxu1 %v9811_v14 }
 0xe46   : > { %9036 = vmatpush3.bf16.msra.mxu1 %v9811_v14 }
 0xe47   : > { %9037 = vmatprep.subr.bf16.mxu1 %v9812_v15 }
 0xe4a   : > { %9038 = vmatpush3.bf16.msra.mxu1 %v9812_v15 }
 0xe4b   : > { %9039 = vmatprep.subr.bf16.mxu1 %v9814_v18 }
 0xe4e   : > { %9040 = vmatpush3.bf16.msra.mxu1 %v9814_v18 }
 0xe4f   : > { %9041 = vmatprep.subr.bf16.mxu1 %v9816_v19 }
 0xe52   : > { %9042 = vmatpush3.bf16.msra.mxu1 %v9816_v19 }
 0xe53   : > { %9043 = vmatprep.subr.bf16.mxu1 %v9818_v20 }
 0xe56   : > { %9044 = vmatpush3.bf16.msra.mxu1 %v9818_v20 }
 0xe57   : > { %9045 = vmatprep.subr.bf16.mxu1 %v9820_v21 }
 0xe5a   : > { %9046 = vmatpush3.bf16.msra.mxu1 %v9820_v21 }
 0xe5b   : > { %9079 = vmatprep.subr.bf16.mxu1 %v10421_v34 }
 0xe5d   : > { %9048 = vmatmul.mubr.bf16.vlgmr.msra.gmra.mrb[72].mxu1 %v10847_v28 }
 0xe5e   : > { %9051 = vmatprep.mubr.bf16.mxu1 %v10849_v29  ;;  %9080 = vmatpush3.bf16.msra.mxu1 %v10833_v13 }
 0xe5f   : > { %9091 = vmatprep.subr.bf16.mxu1 %v10421_v34 }
 0xe65   : > { %9052 = vmatmul.mubr.bf16.gmra.mrb[76].mxu1 %v10858_v33 }
 0xe66   : > { %9081 = vmatprep.mubr.msk.bf16.mxu1 %vm10422_vm0, %v10421_v34 }
 0xf10   : > { %v3137_v22 = vpop.f32.mrb[68].mxu1 }
 0xf11   : > { %v3143_v23 = vpack.c.bf16 %v3137_v22, %v3137_v22  ;;  %v9003_v24 = vpop.f32.mrb[69].mxu1 }
 0xf12   : > { %v3140_v26 = vpop.f32.mrb[70].mxu1 }
 0xf13   : > { %v9004_v27 = vpop.f32.mrb[71].mxu1  ;;  %9008 = vmatmul.mubr.msk.bf16.vlgmr.msra.gmra.mrb[80].mxu0 %vm799_vm1, %v3143_v23 }
 0xf14   : > { %9012 = vmatpush3.bf16.msra.mxu0 %v9813_v16  ;;  %9027 = vmatprep.mubr.bf16.mxu0 %v10838_v17 }
 0xf15   : > { %9013 = vmatprep.subr.bf16.mxu0 %v9815_v25 }
 0xf18   : > { %9014 = vmatpush3.bf16.msra.mxu0 %v9815_v25 }
 0xf19   : > { %9015 = vmatprep.subr.bf16.mxu0 %v9817_v31 }
 0xf1c   : > { %9016 = vmatpush3.bf16.msra.mxu0 %v9817_v31 }
 0xf1d   : > { %9017 = vmatprep.subr.bf16.mxu0 %v9819_v32 }
 0xf20   : > { %9018 = vmatpush3.bf16.msra.mxu0 %v9819_v32 }
 0xf21   : > { %9019 = vmatprep.subr.bf16.mxu0 %v9821_v35 }
 0xf24   : > { %9020 = vmatpush3.bf16.msra.mxu0 %v9821_v35 }
 0xf25   : > { %9021 = vmatprep.subr.bf16.mxu0 %v9822_v36 }
 0xf28   : > { %9022 = vmatpush3.bf16.msra.mxu0 %v9822_v36 }
 0xf29   : > { %9023 = vmatprep.subr.bf16.mxu0 %v9823_v37 }
 0xf2c   : > { %9024 = vmatpush3.bf16.msra.mxu0 %v9823_v37 }
 0xf2d   : > { %9025 = vmatprep.subr.bf16.mxu0 %v9824_v38 }
 0xf30   : > { %9026 = vmatpush3.bf16.msra.mxu0 %v9824_v38  ;;  %v9049_v41 = vpop.f32.mrb[72].mxu1 }
 0xf31   : > { %9055 = vmatprep.subr.bf16.mxu0 %v10421_v34  ;;  %v3435_v42 = vadd.f32 %v9049_v41, %v8028_v39  ;;  %v3426_v43 = vpop.f32.mrb[73].mxu1 }
 0xf32   : > { %v3427_v44 = vadd.f32 %v8028_v39, %v3426_v43  ;;  %v9050_v45 = vpop.f32.mrb[74].mxu1 }
 0xf33   : > { %9028 = vmatmul.mubr.bf16.vlgmr.msra.gmra.mrb[84].mxu0 %v10851_v30  ;;  %v3438_v46 = vadd.f32 %v9050_v45, %v8028_v39  ;;  %v3429_v47 = vpop.f32.mrb[75].mxu1 }
 0xf34   : > { %9057 = vmatprep.mubr.msk.bf16.mxu0 %vm10422_vm0, %v10421_v34  ;;  %v3430_v48 = vadd.f32 %v8028_v39, %v3429_v47 }
 0xf35   : > { %v3470_v50 = vpack.c.bf16 %v3438_v46, %v3435_v42 }
 0xf36   : > { %v3469_v51 = vpack.c.bf16 %v3430_v48, %v3427_v44 }
 0xf37   : > { %v3523_v10 = vsel %vm799_vm1, %v3470_v50, 0 }
 0xf38   : > { %v3477_v52 = vsel %vm799_vm1, %v3469_v51, 0  ;;  %v9053_v53 = vpop.f32.mrb[76].mxu1 }
 0xf39   : > { %9056 = vmatpush3.bf16.xpose.msra.mxu0 %v3477_v52  ;;  %v3442_v54 = vpop.f32.mrb[77].mxu1  ;;  %v3451_v56 = vadd.f32 %v9053_v53, %v8028_v39 }
 0xf3a   : > { %9061 = vmatprep.subr.bf16.mxu0 %v10421_v34  ;;  %v9054_v55 = vpop.f32.mrb[78].mxu1  ;;  %v3443_v57 = vadd.f32 %v8028_v39, %v3442_v54 }
 0xf3b   : > { %v3454_v58 = vadd.f32 %v9054_v55, %v8028_v39  ;;  %v3445_v59 = vpop.f32.mrb[79].mxu1 }
 0xf3c   : > { %v3446_v60 = vadd.f32 %v8028_v39, %v3445_v59 }
 0xf3d   : > { %v3472_v61 = vpack.c.bf16 %v3454_v58, %v3451_v56 }
 0xf3e   : > { %v3471_v62 = vpack.c.bf16 %v3446_v60, %v3443_v57 }
 0xf3f   : > { %v3615_v16 = vsel %vm799_vm1, %v3472_v61, 0 }
 0xf40   : > { %v3569_v12 = vsel %vm799_vm1, %v3471_v62, 0 }
 0xfe6   : > { %v3190_v63 = vpop.f32.mrb[80].mxu0 }
 0xfe7   : > { %v11107_v0 = vadd.f32 %v3190_v63, %v11029_v40  ;;  %v9009_v1 = vpop.f32.mrb[81].mxu0 }
 0xfe8   : > { %v3193_v2 = vpop.f32.mrb[82].mxu0 }
 0xfe9   : > { %v9010_v3 = vpop.f32.mrb[83].mxu0 }
0x1006   : > { %v9029_v4 = vpop.f32.mrb[84].mxu0 }
0x1007   : > { %v3304_v5 = vpop.f32.mrb[85].mxu0  ;;  %v3313_v14 = vadd.f32 %v9029_v4, %v8019_v49 }
0x1008   : > { %v3305_v6 = vadd.f32 %v8019_v49, %v3304_v5  ;;  %v9030_v7 = vpop.f32.mrb[86].mxu0 }
0x1009   : > { %v3307_v8 = vpop.f32.mrb[87].mxu0  ;;  %v8246_v15 = vpack.c.bf16 %v3313_v14, %v3313_v14  ;;  %v3316_v18 = vadd.f32 %v9030_v7, %v8019_v49 }
0x100a   : > { %v8244_v9 = vpack.c.bf16 %v3305_v6, %v3305_v6  ;;  %v3308_v40 = vadd.f32 %v8019_v49, %v3307_v8 }
0x100b   : > { %v8247_v19 = vpack.c.bf16 %v3316_v18, %v3316_v18 }
0x100c   : > { %9058 = vmatmul.mubr.msk.bf16.vlgmr.msra.gmra.mrb[88].mxu0 %vm799_vm1, %v8244_v9  ;;  %v8245_v11 = vpack.c.bf16 %v3308_v40, %v3308_v40 }
0x100d   : > { %9062 = vmatpush3.bf16.xpose.msra.mxu0 %v3523_v10  ;;  %9063 = vmatprep.mubr.msk.bf16.mxu0 %vm10422_vm0, %v10421_v34 }
0x100e   : > { %9067 = vmatprep.subr.bf16.mxu0 %v10421_v34 }
0x1014   : > { %9064 = vmatmul.mubr.msk.bf16.vlgmr.msra.gmra.mrb[92].mxu0 %vm799_vm1, %v8245_v11 }
0x1015   : > { %9068 = vmatpush3.bf16.xpose.msra.mxu0 %v3569_v12  ;;  %9069 = vmatprep.mubr.msk.bf16.mxu0 %vm10422_vm0, %v10421_v34 }
0x1016   : > { %9073 = vmatprep.subr.bf16.mxu0 %v10421_v34 }
0x101c   : > { %9070 = vmatmul.mubr.msk.bf16.vlgmr.msra.gmra.mrb[96].mxu0 %vm799_vm1, %v8246_v15 }
0x101d   : > { %9074 = vmatpush3.bf16.xpose.msra.mxu0 %v3615_v16  ;;  %9075 = vmatprep.mubr.msk.bf16.mxu0 %vm10422_vm0, %v10421_v34 }
0x101e   : > { %9085 = vmatprep.subr.bf16.mxu0 %v10421_v34 }
0x1024   : > { %9076 = vmatmul.mubr.msk.bf16.vlgmr.msra.gmra.mrb[100].mxu0 %vm799_vm1, %v8247_v19 }
0x1025   : > { %9086 = vmatpush3.bf16.msra.mxu0 %v10847_v28  ;;  %9087 = vmatprep.mubr.msk.bf16.mxu0 %vm10422_vm0, %v10421_v34 }
0x1026   : > { %9097 = vmatprep.subr.bf16.mxu0 %v10421_v34 }
0x10df   : > { %v3513_v20 = vpop.f32.mrb[88].mxu0 }
0x10e0   : > { %v9059_v21 = vpop.f32.mrb[89].mxu0  ;;  %v3657_v22 = vsel %vm799_vm1, %v3513_v20, -inf }
0x10e1   : > { %3658 = vmax.xlane.f32.xlu0 %v3657_v22  ;;  %v3516_v23 = vpop.f32.mrb[90].mxu0 }
0x10e2   : > { %v9060_v24 = vpop.f32.mrb[91].mxu0 }
0x10e7   : > { %v3559_v25 = vpop.f32.mrb[92].mxu0 }
0x10e8   : > { %v9065_v26 = vpop.f32.mrb[93].mxu0  ;;  %v3660_v27 = vsel %vm799_vm1, %v3559_v25, -inf }
0x10e9   : > { %3661 = vmax.xlane.f32.xlu1 %v3660_v27  ;;  %v3562_v31 = vpop.f32.mrb[94].mxu0 }
0x10ea   : > { %v9066_v32 = vpop.f32.mrb[95].mxu0 }
0x10ef   : > { %v3605_v35 = vpop.f32.mrb[96].mxu0 }
0x10f0   : > { %v9071_v36 = vpop.f32.mrb[97].mxu0  ;;  %v3663_v37 = vsel %vm799_vm1, %v3605_v35, -inf }
0x10f1   : > { %3664 = vmax.xlane.f32.xlu0 %v3663_v37  ;;  %v3608_v38 = vpop.f32.mrb[98].mxu0 }
0x10f2   : > { %v9072_v39 = vpop.f32.mrb[99].mxu0 }
0x10f7   : > { %v3651_v41 = vpop.f32.mrb[100].mxu0 }
0x10f8   : > { %v9077_v42 = vpop.f32.mrb[101].mxu0  ;;  %v3666_v43 = vsel %vm799_vm1, %v3651_v41, -inf }
0x10f9   : > { %3667 = vmax.xlane.f32.xlu1 %v3666_v43  ;;  %v3654_v44 = vpop.f32.mrb[102].mxu0 }
0x10fa   : > { %v9078_v45 = vpop.f32.mrb[103].mxu0 }
0x116e   : > { %v3659_v46 = vpop.xlane.xlu0 %3658 }
0x116f   : > { %v3669_v47 = vsub.f32 %v3513_v20, %v3659_v46 }
0x1171   : > { %v3673_v48 = vmul.f32 1.442695, %v3669_v47 }
0x1173   : > { %9982 = vpow2.f32 %v3673_v48 }
0x1176   : > { %v3662_v50 = vpop.xlane.xlu1 %3661 }
0x1177   : > { %v3670_v51 = vsub.f32 %v3559_v25, %v3662_v50 }
0x1179   : > { %v3675_v52 = vmul.f32 1.442695, %v3670_v51 }
0x117b   : > { %9984 = vpow2.f32 %v3675_v52 }
0x117d   : > { %v9983_v53 = vpop.eup %9982 }
0x117e   : > { %v3665_v54 = vpop.xlane.xlu0 %3664  ;;  %v3681_v55 = vsel %vm799_vm1, %v9983_v53, 0.0 }
0x117f   : > { %v3671_v56 = vsub.f32 %v3605_v35, %v3665_v54  ;;  %3682 = vadd.xlane.f32.xlu0 %v3681_v55 }
0x1181   : > { %v3677_v57 = vmul.f32 1.442695, %v3671_v56 }
0x1183   : > { %9986 = vpow2.f32 %v3677_v57 }
0x1185   : > { %v9985_v58 = vpop.eup %9984 }
0x1186   : > { %v3668_v59 = vpop.xlane.xlu1 %3667  ;;  %v3684_v60 = vsel %vm799_vm1, %v9985_v58, 0.0 }
0x1187   : > { %v3672_v61 = vsub.f32 %v3651_v41, %v3668_v59  ;;  %3685 = vadd.xlane.f32.xlu1 %v3684_v60  ;;  %v9825_v59 = vld [vmem:[#allocation13 + $0xc0] sm:$0xff]   ;;  %v9826_v60 = vld [vmem:[#allocation13 + $0xc8] sm:$0xff]  }
0x1189   : > { %v3679_v62 = vmul.f32 1.442695, %v3672_v61  ;;  %v9827_v61 = vld [vmem:[#allocation13 + $0xd0] sm:$0xff]  }
0x118b   : > { %9988 = vpow2.f32 %v3679_v62  ;;  %v9828_v62 = vld [vmem:[#allocation13 + $0xd8] sm:$0xff]  }
0x118d   : > { %v9987_v63 = vpop.eup %9986 }
0x118e   : > { %v3687_v1 = vsel %vm799_vm1, %v9987_v63, 0.0 }
0x118f   : > { %3688 = vadd.xlane.f32.xlu0 %v3687_v1  ;;  %v9830_v1 = vld [vmem:[#allocation13 + $0xe8] sm:$0xff]  }
0x1195   : > { %v9989_v2 = vpop.eup %9988 }
0x1196   : > { %v3690_v3 = vsel %vm799_vm1, %v9989_v2, 0.0 }
0x1197   : > { %3691 = vadd.xlane.f32.xlu1 %v3690_v3  ;;  %v9832_v3 = vld [vmem:[#allocation13 + $0xf8] sm:$0xff]  }
0x120c   : > { %v3683_v49 = vpop.xlane.xlu0 %3682 }
0x120d   : > { %9990 = vrcp.f32 %v3683_v49  ;;  %v9833_v49 = vld [vmem:[#allocation10 + $0x100] sm:$0xff]  }
0x1214   : > { %v3686_v4 = vpop.xlane.xlu1 %3685 }
0x1215   : > { %9992 = vrcp.f32 %v3686_v4  ;;  %v9835_v4 = vld [vmem:[#allocation14 + $0x18] sm:$0xff]  }
0x1217   : > { %v9991_v5 = vpop.eup %9990 }
0x1218   : > { %v3697_v6 = vmul.f32 %v9991_v5, %v9983_v53 }
0x121a   : > { %v3701_v7 = vsel %vm799_vm1, %v3697_v6, 0.0 }
0x121b   : > { %v3702_v8 = vrot.slane %v3701_v7, 4 }
0x121c   : > { %v3689_v9 = vpop.xlane.xlu0 %3688 }
0x121d   : > { %v3703_v10 = vadd.f32 %v3702_v8, %v3701_v7  ;;  %9994 = vrcp.f32 %v3689_v9 }
0x121f   : > { %v9993_v40 = vpop.eup %9992  ;;  %v3704_v11 = vrot.slane %v3703_v10, 2 }
0x1220   : > { %v3698_v12 = vmul.f32 %v9993_v40, %v9985_v58 }
0x1221   : > { %v3705_v14 = vadd.f32 %v3704_v11, %v3703_v10 }
0x1222   : > { %v3708_v15 = vsel %vm799_vm1, %v3698_v12, 0.0 }
0x1223   : > { %v3706_v16 = vrot.slane %v3705_v14, 1  ;;  %v3709_v18 = vrot.slane %v3708_v15, 4 }
0x1224   : > { %v3692_v19 = vpop.xlane.xlu1 %3691 }
0x1225   : > { %v3710_v20 = vadd.f32 %v3709_v18, %v3708_v15  ;;  %9996 = vrcp.f32 %v3692_v19  ;;  %v3707_v21 = vadd.f32 %v3706_v16, %v3705_v14 }
0x1227   : > { %v9995_v22 = vpop.eup %9994  ;;  %v3711_v23 = vrot.slane %v3710_v20, 2  ;;  %v3729_v24 = vmul.f32 0.125, %v3707_v21 }
0x1228   : > { %v3699_v25 = vmul.f32 %v9995_v22, %v9987_v63  ;;  %v9829_v63 = vld [vmem:[#allocation13 + $0xe0] sm:$0xff]  }
0x1229   : > { %v3733_v26 = vpack.c.bf16 %v3729_v24, %v3729_v24  ;;  %v3712_v27 = vadd.f32 %v3711_v23, %v3710_v20 }
0x122a   : > { %v3715_v31 = vsel %vm799_vm1, %v3699_v25, 0.0 }
0x122b   : > { %v3716_v32 = vrot.slane %v3715_v31, 4  ;;  %9082 = vmatmul.mubr.msk.bf16.vlgmr.msra.gmra.mrb[80].mxu1 %vm799_vm1, %v3733_v26  ;;  %v3713_v35 = vrot.slane %v3712_v27, 1 }
0x122c   : > { %9092 = vmatpush3.bf16.msra.mxu1 %v10849_v29  ;;  %9093 = vmatprep.mubr.msk.bf16.mxu1 %vm10422_vm0, %v10421_v34 }
0x122d   : > { %v3717_v36 = vadd.f32 %v3716_v32, %v3715_v31  ;;  %v3714_v37 = vadd.f32 %v3713_v35, %v3712_v27  ;;  %9103 = vmatprep.subr.bf16.mxu1 %v10421_v34 }
0x122f   : > { %v9997_v38 = vpop.eup %9996  ;;  %v3718_v39 = vrot.slane %v3717_v36, 2  ;;  %v3730_v41 = vmul.f32 0.125, %v3714_v37 }
0x1230   : > { %v3700_v42 = vmul.f32 %v9997_v38, %v9989_v2  ;;  %v9831_v2 = vld [vmem:[#allocation13 + $0xf0] sm:$0xff]  }
0x1231   : > { %v3734_v43 = vpack.c.bf16 %v3730_v41, %v3730_v41  ;;  %v3719_v44 = vadd.f32 %v3718_v39, %v3717_v36 }
0x1232   : > { %v3722_v45 = vsel %vm799_vm1, %v3700_v42, 0.0 }
0x1233   : > { %v3723_v46 = vrot.slane %v3722_v45, 4  ;;  %9088 = vmatmul.mubr.msk.bf16.vlgmr.msra.gmra.mrb[104].mxu0 %vm799_vm1, %v3734_v43  ;;  %v3720_v47 = vrot.slane %v3719_v44, 1  ;;  %v9834_v43 = vld [vmem:[#allocation10 + $0x108] sm:$0xff]  }
0x1234   : > { %9098 = vmatpush3.bf16.msra.mxu0 %v10858_v33  ;;  %9099 = vmatprep.mubr.msk.bf16.mxu0 %vm10422_vm0, %v10421_v34 }
0x1235   : > { %v3724_v48 = vadd.f32 %v3723_v46, %v3722_v45  ;;  %v3721_v50 = vadd.f32 %v3720_v47, %v3719_v44  ;;  %9123 = vmatprep.subr.bf16.mxu0 %v10421_v34  ;;  %v9836_v44 = vld [vmem:[#allocation10 + $0x110] sm:$0xff]   ;;  %v9837_v45 = vld [vmem:[#allocation10 + $0x118] sm:$0xff]   ;;  %v9839_v47 = vld [vmem:[#allocation10 + $0x120] sm:$0xff]  }
0x1236   : > { %v9838_v46 = vld [vmem:[#allocation7 + $0x100] sm:$0xff]  }
0x1237   : > { %v3725_v51 = vrot.slane %v3724_v48, 2  ;;  %v3731_v52 = vmul.f32 0.125, %v3721_v50  ;;  %v9843_v50 = vld [vmem:[#allocation10 + $0x130] sm:$0xff]  }
0x1239   : > { %v3735_v53 = vpack.c.bf16 %v3731_v52, %v3731_v52  ;;  %v3726_v54 = vadd.f32 %v3725_v51, %v3724_v48  ;;  %v9841_v48 = vld [vmem:[#allocation10 + $0x128] sm:$0xff]   ;;  %v9845_v51 = vld [vmem:[#allocation10 + $0x138] sm:$0xff]  }
0x123b   : > { %9094 = vmatmul.mubr.msk.bf16.vlgmr.msra.gmra.mrb[84].mxu1 %vm799_vm1, %v3735_v53  ;;  %v3727_v55 = vrot.slane %v3726_v54, 1 }
0x123c   : > { %9119 = vmatprep.mubr.msk.bf16.mxu1 %vm10422_vm0, %v10421_v34  ;;  %9104 = vmatpush3.bf16.msra.mxu1 %v9825_v59  ;;  %v9844_v59 = vld [vmem:[#allocation7 + $0x118] sm:$0xff]  }
0x123d   : > { %v3728_v56 = vadd.f32 %v3727_v55, %v3726_v54  ;;  %9105 = vmatprep.subr.bf16.mxu1 %v10421_v34  ;;  %v9840_v55 = vld [vmem:[#allocation7 + $0x108] sm:$0xff]  }
0x123f   : > { %v3732_v57 = vmul.f32 0.125, %v3728_v56 }
0x1240   : > { %9106 = vmatpush3.bf16.msra.mxu1 %v9826_v60  ;;  %v9846_v60 = vld [vmem:[#allocation7 + $0x120] sm:$0xff]  }
0x1241   : > { %v3736_v58 = vpack.c.bf16 %v3732_v57, %v3732_v57  ;;  %9107 = vmatprep.subr.bf16.mxu1 %v10421_v34 }
0x1243   : > { %9100 = vmatmul.mubr.msk.bf16.vlgmr.msra.gmra.mrb[108].mxu0 %vm799_vm1, %v3736_v58  ;;  %v9842_v58 = vld [vmem:[#allocation7 + $0x110] sm:$0xff]  }
0x1244   : > { %9125 = vmatprep.mubr.msk.bf16.mxu0 %vm10422_vm0, %v10421_v34  ;;  %9108 = vmatpush3.bf16.msra.mxu1 %v9827_v61  ;;  %v9847_v61 = vld [vmem:[#allocation7 + $0x128] sm:$0xff]  }
0x1245   : > { %9109 = vmatprep.subr.bf16.mxu1 %v10421_v34  ;;  %9124 = vmatpush3.bf16.msra.mxu0 %v9835_v4 }
0x1246   : > { %9129 = vmatprep.subr.bf16.mxu0 %v9838_v46 }
0x1248   : > { %9110 = vmatpush3.bf16.msra.mxu1 %v9828_v62  ;;  %v9848_v62 = vld [vmem:[#allocation7 + $0x130] sm:$0xff]  }
0x1249   : > { %9111 = vmatprep.subr.bf16.mxu1 %v10421_v34 }
0x124c   : > { %9112 = vmatpush3.bf16.msra.mxu1 %v9829_v63  ;;  %v9849_v63 = vld [vmem:[#allocation7 + $0x138] sm:$0xff]  }
0x124d   : > { %9113 = vmatprep.subr.bf16.mxu1 %v10421_v34 }
0x1250   : > { %9114 = vmatpush3.bf16.msra.mxu1 %v9830_v1  ;;  %v8068_v1 = vld [vmem:[#allocation11 + $0x4] ss:$0 sm:$0xff] }
0x1251   : > { %9115 = vmatprep.subr.bf16.mxu1 %v10421_v34 }
0x1254   : > { %9116 = vmatpush3.bf16.msra.mxu1 %v9831_v2 }
0x1255   : > { %9117 = vmatprep.subr.bf16.mxu1 %v10421_v34 }
0x1258   : > { %9118 = vmatpush3.bf16.msra.mxu1 %v9832_v3 }
0x1259   : > { %9149 = vmatprep.subr.bf16.mxu1 %v9833_v49 }
0x12fe   : > { %v3774_v5 = vpop.f32.mrb[80].mxu1 }
0x12ff   : > { %v9083_v6 = vpop.f32.mrb[81].mxu1  ;;  %v3909_v10 = vpack.c.bf16 %v3774_v5, %v3774_v5 }
0x1300   : > { %v3777_v7 = vpop.f32.mrb[82].mxu1 }
0x1301   : > { %v9084_v8 = vpop.f32.mrb[83].mxu1  ;;  %v3934_v16 = vunpack.c.l.b16 %v3909_v10 }
0x1306   : > { %v3817_v9 = vpop.f32.mrb[104].mxu0 }
0x1307   : > { %v3910_v40 = vpack.c.bf16 %v3817_v9, %v3817_v9  ;;  %v9089_v11 = vpop.f32.mrb[105].mxu0 }
0x1308   : > { %v3820_v12 = vpop.f32.mrb[106].mxu0 }
0x1309   : > { %v3935_v14 = vunpack.c.l.b16 %v3910_v40  ;;  %v9090_v15 = vpop.f32.mrb[107].mxu0 }
0x130b   : > { %v3938_v18 = vrot.slane %v3935_v14, 7 }
0x130d   : > { %v3939_v19 = vsel %vm1266_vm2, %v3938_v18, %v3934_v16 }
0x130e   : > { %v3860_v20 = vpop.f32.mrb[84].mxu1 }
0x130f   : > { %v3911_v21 = vpack.c.bf16 %v3860_v20, %v3860_v20  ;;  %v9095_v22 = vpop.f32.mrb[85].mxu1 }
0x1310   : > { %v3863_v23 = vpop.f32.mrb[86].mxu1 }
0x1311   : > { %v3936_v24 = vunpack.c.l.b16 %v3911_v21  ;;  %v9096_v25 = vpop.f32.mrb[87].mxu1 }
0x1313   : > { %v3940_v26 = vrot.slane %v3936_v24, 6 }
0x1315   : > { %v3941_v27 = vsel %vm1269_vm3, %v3940_v26, %v3939_v19 }
0x1316   : > { %v3903_v31 = vpop.f32.mrb[108].mxu0 }
0x1317   : > { %v3912_v32 = vpack.c.bf16 %v3903_v31, %v3903_v31  ;;  %v9101_v35 = vpop.f32.mrb[109].mxu0  ;;  %v8059_v31 = vld [vmem:[#allocation8 + $0x4] ss:$0 sm:$0xff] }
0x1318   : > { %v3906_v36 = vpop.f32.mrb[110].mxu0 }
0x1319   : > { %v3937_v37 = vunpack.c.l.b16 %v3912_v32  ;;  %v9102_v38 = vpop.f32.mrb[111].mxu0 }
0x131b   : > { %v3942_v39 = vrot.slane %v3937_v37, 5 }
0x131d   : > { %v3943_v41 = vsel %vm1272_vm4, %v3942_v39, %v3941_v27 }
0x131e   : > { %v3944_v42 = vpack.c.b16 %v3943_v41, %v3943_v41 }
0x1320   : > { %9120 = vmatmul.mubr.bf16.vlgmr.msra.gmra.mrb[88].mxu1 %v3944_v42 }
0x1321   : > { %9150 = vmatpush3.bf16.msra.mxu1 %v9833_v49  ;;  %9165 = vmatprep.mubr.bf16.mxu1 %v10833_v13 }
0x1322   : > { %9151 = vmatprep.subr.bf16.mxu1 %v9834_v43 }
0x1325   : > { %9152 = vmatpush3.bf16.msra.mxu1 %v9834_v43 }
0x1326   : > { %9153 = vmatprep.subr.bf16.mxu1 %v9836_v44 }
0x1329   : > { %9154 = vmatpush3.bf16.msra.mxu1 %v9836_v44 }
0x132a   : > { %9155 = vmatprep.subr.bf16.mxu1 %v9837_v45 }
0x132d   : > { %9156 = vmatpush3.bf16.msra.mxu1 %v9837_v45 }
0x132e   : > { %9157 = vmatprep.subr.bf16.mxu1 %v9839_v47 }
0x1331   : > { %9158 = vmatpush3.bf16.msra.mxu1 %v9839_v47 }
0x1332   : > { %9159 = vmatprep.subr.bf16.mxu1 %v9841_v48 }
0x1335   : > { %9160 = vmatpush3.bf16.msra.mxu1 %v9841_v48 }
0x1336   : > { %9161 = vmatprep.subr.bf16.mxu1 %v9843_v50 }
0x1339   : > { %9162 = vmatpush3.bf16.msra.mxu1 %v9843_v50 }
0x133a   : > { %9163 = vmatprep.subr.bf16.mxu1 %v9845_v51 }
0x133d   : > { %9164 = vmatpush3.bf16.msra.mxu1 %v9845_v51 }
0x133e   : > { %9197 = vmatprep.subr.bf16.mxu1 %v10421_v34 }
0x1340   : > { %9166 = vmatmul.mubr.bf16.vlgmr.msra.gmra.mrb[92].mxu1 %v10847_v28 }
0x1341   : > { %9169 = vmatprep.mubr.bf16.mxu1 %v10849_v29  ;;  %9198 = vmatpush3.bf16.msra.mxu1 %v10833_v13 }
0x1342   : > { %9209 = vmatprep.subr.bf16.mxu1 %v10421_v34 }
0x1348   : > { %9170 = vmatmul.mubr.bf16.gmra.mrb[96].mxu1 %v10858_v33 }
0x1349   : > { %9199 = vmatprep.mubr.msk.bf16.mxu1 %vm10422_vm0, %v10421_v34 }
0x13f3   : > { %v4028_v52 = vpop.f32.mrb[88].mxu1 }
0x13f4   : > { %v4034_v53 = vpack.c.bf16 %v4028_v52, %v4028_v52  ;;  %v9121_v54 = vpop.f32.mrb[89].mxu1 }
0x13f5   : > { %v4031_v56 = vpop.f32.mrb[90].mxu1 }
0x13f6   : > { %v9122_v57 = vpop.f32.mrb[91].mxu1  ;;  %9126 = vmatmul.mubr.msk.bf16.vlgmr.msra.gmra.mrb[112].mxu0 %vm799_vm1, %v4034_v53 }
0x13f7   : > { %9130 = vmatpush3.bf16.msra.mxu0 %v9838_v46  ;;  %9145 = vmatprep.mubr.bf16.mxu0 %v10838_v17 }
0x13f8   : > { %9131 = vmatprep.subr.bf16.mxu0 %v9840_v55 }
0x13fb   : > { %9132 = vmatpush3.bf16.msra.mxu0 %v9840_v55 }
0x13fc   : > { %9133 = vmatprep.subr.bf16.mxu0 %v9842_v58 }
0x13ff   : > { %9134 = vmatpush3.bf16.msra.mxu0 %v9842_v58 }
0x1400   : > { %9135 = vmatprep.subr.bf16.mxu0 %v9844_v59 }
0x1403   : > { %9136 = vmatpush3.bf16.msra.mxu0 %v9844_v59 }
0x1404   : > { %9137 = vmatprep.subr.bf16.mxu0 %v9846_v60 }
0x1407   : > { %9138 = vmatpush3.bf16.msra.mxu0 %v9846_v60 }
0x1408   : > { %9139 = vmatprep.subr.bf16.mxu0 %v9847_v61 }
0x140b   : > { %9140 = vmatpush3.bf16.msra.mxu0 %v9847_v61 }
0x140c   : > { %9141 = vmatprep.subr.bf16.mxu0 %v9848_v62 }
0x140f   : > { %9142 = vmatpush3.bf16.msra.mxu0 %v9848_v62 }
0x1410   : > { %9143 = vmatprep.subr.bf16.mxu0 %v9849_v63 }
0x1413   : > { %9144 = vmatpush3.bf16.msra.mxu0 %v9849_v63  ;;  %v9167_v2 = vpop.f32.mrb[92].mxu1 }
0x1414   : > { %9173 = vmatprep.subr.bf16.mxu0 %v10421_v34  ;;  %v4326_v3 = vadd.f32 %v9167_v2, %v8068_v1  ;;  %v4317_v49 = vpop.f32.mrb[93].mxu1 }
0x1415   : > { %v4318_v4 = vadd.f32 %v8068_v1, %v4317_v49  ;;  %v9168_v5 = vpop.f32.mrb[94].mxu1 }
0x1416   : > { %9146 = vmatmul.mubr.bf16.vlgmr.msra.gmra.mrb[116].mxu0 %v10851_v30  ;;  %v4329_v6 = vadd.f32 %v9168_v5, %v8068_v1  ;;  %v4320_v7 = vpop.f32.mrb[95].mxu1 }
0x1417   : > { %9175 = vmatprep.mubr.msk.bf16.mxu0 %vm10422_vm0, %v10421_v34  ;;  %v4321_v8 = vadd.f32 %v8068_v1, %v4320_v7 }
0x1418   : > { %v4361_v9 = vpack.c.bf16 %v4329_v6, %v4326_v3 }
0x1419   : > { %v4360_v10 = vpack.c.bf16 %v4321_v8, %v4318_v4 }
0x141a   : > { %v4414_v41 = vsel %vm799_vm1, %v4361_v9, 0 }
0x141b   : > { %v4368_v40 = vsel %vm799_vm1, %v4360_v10, 0  ;;  %v9171_v11 = vpop.f32.mrb[96].mxu1 }
0x141c   : > { %9174 = vmatpush3.bf16.xpose.msra.mxu0 %v4368_v40  ;;  %v4333_v12 = vpop.f32.mrb[97].mxu1  ;;  %v4342_v15 = vadd.f32 %v9171_v11, %v8068_v1 }
0x141d   : > { %9179 = vmatprep.subr.bf16.mxu0 %v10421_v34  ;;  %v9172_v14 = vpop.f32.mrb[98].mxu1  ;;  %v4334_v16 = vadd.f32 %v8068_v1, %v4333_v12 }
0x141e   : > { %v4345_v18 = vadd.f32 %v9172_v14, %v8068_v1  ;;  %v4336_v19 = vpop.f32.mrb[99].mxu1 }
0x141f   : > { %v4337_v20 = vadd.f32 %v8068_v1, %v4336_v19 }
0x1420   : > { %v4363_v21 = vpack.c.bf16 %v4345_v18, %v4342_v15 }
0x1421   : > { %v4362_v22 = vpack.c.bf16 %v4337_v20, %v4334_v16 }
0x1422   : > { %v4506_v46 = vsel %vm799_vm1, %v4363_v21, 0 }
0x1423   : > { %v4460_v43 = vsel %vm799_vm1, %v4362_v22, 0 }
0x14c9   : > { %v4081_v23 = vpop.f32.mrb[112].mxu0 }
0x14ca   : > { %v11185_v24 = vadd.f32 %v4081_v23, %v11107_v0  ;;  %v9127_v25 = vpop.f32.mrb[113].mxu0 }
0x14cb   : > { %v4084_v26 = vpop.f32.mrb[114].mxu0 }
0x14cc   : > { %v9128_v27 = vpop.f32.mrb[115].mxu0 }
0x14e9   : > { %v9147_v32 = vpop.f32.mrb[116].mxu0 }
0x14ea   : > { %v4195_v35 = vpop.f32.mrb[117].mxu0  ;;  %v4204_v44 = vadd.f32 %v9147_v32, %v8059_v31 }
0x14eb   : > { %v4196_v36 = vadd.f32 %v8059_v31, %v4195_v35  ;;  %v9148_v37 = vpop.f32.mrb[118].mxu0 }
0x14ec   : > { %v4198_v38 = vpop.f32.mrb[119].mxu0  ;;  %v8250_v45 = vpack.c.bf16 %v4204_v44, %v4204_v44  ;;  %v4207_v47 = vadd.f32 %v9148_v37, %v8059_v31 }
0x14ed   : > { %v8248_v39 = vpack.c.bf16 %v4196_v36, %v4196_v36  ;;  %v4199_v0 = vadd.f32 %v8059_v31, %v4198_v38 }
0x14ee   : > { %v8251_v48 = vpack.c.bf16 %v4207_v47, %v4207_v47 }
0x14ef   : > { %9176 = vmatmul.mubr.msk.bf16.vlgmr.msra.gmra.mrb[120].mxu0 %vm799_vm1, %v8248_v39  ;;  %v8249_v42 = vpack.c.bf16 %v4199_v0, %v4199_v0 }
0x14f0   : > { %9180 = vmatpush3.bf16.xpose.msra.mxu0 %v4414_v41  ;;  %9181 = vmatprep.mubr.msk.bf16.mxu0 %vm10422_vm0, %v10421_v34 }
0x14f1   : > { %9185 = vmatprep.subr.bf16.mxu0 %v10421_v34 }
0x14f7   : > { %9182 = vmatmul.mubr.msk.bf16.vlgmr.msra.gmra.mrb[124].mxu0 %vm799_vm1, %v8249_v42 }
0x14f8   : > { %9186 = vmatpush3.bf16.xpose.msra.mxu0 %v4460_v43  ;;  %9187 = vmatprep.mubr.msk.bf16.mxu0 %vm10422_vm0, %v10421_v34 }
0x14f9   : > { %9191 = vmatprep.subr.bf16.mxu0 %v10421_v34 }
0x14ff   : > { %9188 = vmatmul.mubr.msk.bf16.vlgmr.msra.gmra.mrb[128].mxu0 %vm799_vm1, %v8250_v45 }
0x1500   : > { %9192 = vmatpush3.bf16.xpose.msra.mxu0 %v4506_v46  ;;  %9193 = vmatprep.mubr.msk.bf16.mxu0 %vm10422_vm0, %v10421_v34 }
0x1501   : > { %9203 = vmatprep.subr.bf16.mxu0 %v10421_v34 }
0x1507   : > { %9194 = vmatmul.mubr.msk.bf16.vlgmr.msra.gmra.mrb[132].mxu0 %vm799_vm1, %v8251_v48 }
0x1508   : > { %9204 = vmatpush3.bf16.msra.mxu0 %v10847_v28  ;;  %9205 = vmatprep.mubr.msk.bf16.mxu0 %vm10422_vm0, %v10421_v34 }
0x1509   : > { %9215 = vmatprep.subr.bf16.mxu0 %v10421_v34 }
0x15c2   : > { %v4404_v50 = vpop.f32.mrb[120].mxu0 }
0x15c3   : > { %v9177_v51 = vpop.f32.mrb[121].mxu0  ;;  %v4548_v52 = vsel %vm799_vm1, %v4404_v50, -inf }
0x15c4   : > { %4549 = vmax.xlane.f32.xlu0 %v4548_v52  ;;  %v4407_v53 = vpop.f32.mrb[122].mxu0 }
0x15c5   : > { %v9178_v54 = vpop.f32.mrb[123].mxu0 }
0x15ca   : > { %v4450_v55 = vpop.f32.mrb[124].mxu0 }
0x15cb   : > { %v9183_v56 = vpop.f32.mrb[125].mxu0  ;;  %v4551_v57 = vsel %vm799_vm1, %v4450_v55, -inf }
0x15cc   : > { %4552 = vmax.xlane.f32.xlu1 %v4551_v57  ;;  %v4453_v58 = vpop.f32.mrb[126].mxu0 }
0x15cd   : > { %v9184_v59 = vpop.f32.mrb[127].mxu0 }
0x15d2   : > { %v4496_v60 = vpop.f32.mrb[128].mxu0 }
0x15d3   : > { %v9189_v61 = vpop.f32.mrb[129].mxu0  ;;  %v4554_v62 = vsel %vm799_vm1, %v4496_v60, -inf }
0x15d4   : > { %4555 = vmax.xlane.f32.xlu0 %v4554_v62  ;;  %v4499_v63 = vpop.f32.mrb[130].mxu0 }
0x15d5   : > { %v9190_v1 = vpop.f32.mrb[131].mxu0 }
0x15da   : > { %v4542_v2 = vpop.f32.mrb[132].mxu0 }
0x15db   : > { %v9195_v3 = vpop.f32.mrb[133].mxu0  ;;  %v4557_v49 = vsel %vm799_vm1, %v4542_v2, -inf }
0x15dc   : > { %4558 = vmax.xlane.f32.xlu1 %v4557_v49  ;;  %v4545_v4 = vpop.f32.mrb[134].mxu0 }
0x15dd   : > { %v9196_v5 = vpop.f32.mrb[135].mxu0 }
0x1651   : > { %v4550_v6 = vpop.xlane.xlu0 %4549 }
0x1652   : > { %v4560_v7 = vsub.f32 %v4404_v50, %v4550_v6 }
0x1654   : > { %v4564_v8 = vmul.f32 1.442695, %v4560_v7 }
0x1656   : > { %9998 = vpow2.f32 %v4564_v8 }
0x1659   : > { %v4553_v9 = vpop.xlane.xlu1 %4552 }
0x165a   : > { %v4561_v10 = vsub.f32 %v4450_v55, %v4553_v9 }
0x165c   : > { %v4566_v40 = vmul.f32 1.442695, %v4561_v10 }
0x165e   : > { %10000 = vpow2.f32 %v4566_v40 }
0x1660   : > { %v9999_v11 = vpop.eup %9998 }
0x1661   : > { %v4556_v12 = vpop.xlane.xlu0 %4555  ;;  %v4572_v14 = vsel %vm799_vm1, %v9999_v11, 0.0 }
0x1662   : > { %v4562_v15 = vsub.f32 %v4496_v60, %v4556_v12  ;;  %4573 = vadd.xlane.f32.xlu0 %v4572_v14 }
0x1664   : > { %v4568_v16 = vmul.f32 1.442695, %v4562_v15 }
0x1666   : > { %10002 = vpow2.f32 %v4568_v16 }
0x1668   : > { %v10001_v18 = vpop.eup %10000 }
0x1669   : > { %v4559_v19 = vpop.xlane.xlu1 %4558  ;;  %v4575_v20 = vsel %vm799_vm1, %v10001_v18, 0.0 }
0x166a   : > { %v4563_v21 = vsub.f32 %v4542_v2, %v4559_v19  ;;  %4576 = vadd.xlane.f32.xlu1 %v4575_v20  ;;  %v9850_v19 = vld [vmem:[#allocation13 + $0x100] sm:$0xff]   ;;  %v9851_v20 = vld [vmem:[#allocation13 + $0x108] sm:$0xff]  }
0x166c   : > { %v4570_v22 = vmul.f32 1.442695, %v4563_v21  ;;  %v9852_v21 = vld [vmem:[#allocation13 + $0x110] sm:$0xff]  }
0x166e   : > { %10004 = vpow2.f32 %v4570_v22  ;;  %v9853_v22 = vld [vmem:[#allocation13 + $0x118] sm:$0xff]  }
0x1670   : > { %v10003_v23 = vpop.eup %10002 }
0x1671   : > { %v4578_v25 = vsel %vm799_vm1, %v10003_v23, 0.0 }
0x1672   : > { %4579 = vadd.xlane.f32.xlu0 %v4578_v25  ;;  %v9855_v25 = vld [vmem:[#allocation13 + $0x128] sm:$0xff]  }
0x1678   : > { %v10005_v26 = vpop.eup %10004 }
0x1679   : > { %v4581_v27 = vsel %vm799_vm1, %v10005_v26, 0.0 }
0x167a   : > { %4582 = vadd.xlane.f32.xlu1 %v4581_v27  ;;  %v9857_v27 = vld [vmem:[#allocation13 + $0x138] sm:$0xff]  }
0x16ef   : > { %v4574_v31 = vpop.xlane.xlu0 %4573 }
0x16f0   : > { %10006 = vrcp.f32 %v4574_v31  ;;  %v9858_v31 = vld [vmem:[#allocation10 + $0x140] sm:$0xff]  }
0x16f7   : > { %v4577_v32 = vpop.xlane.xlu1 %4576 }
0x16f8   : > { %10008 = vrcp.f32 %v4577_v32  ;;  %v9860_v32 = vld [vmem:[#allocation14 + $0x20] sm:$0xff]  }
0x16fa   : > { %v10007_v35 = vpop.eup %10006 }
0x16fb   : > { %v4588_v36 = vmul.f32 %v10007_v35, %v9999_v11 }
0x16fd   : > { %v4592_v37 = vsel %vm799_vm1, %v4588_v36, 0.0 }
0x16fe   : > { %v4593_v38 = vrot.slane %v4592_v37, 4 }
0x16ff   : > { %v4580_v39 = vpop.xlane.xlu0 %4579 }
0x1700   : > { %v4594_v41 = vadd.f32 %v4593_v38, %v4592_v37  ;;  %10010 = vrcp.f32 %v4580_v39 }
0x1702   : > { %v10009_v0 = vpop.eup %10008  ;;  %v4595_v42 = vrot.slane %v4594_v41, 2 }
0x1703   : > { %v4589_v43 = vmul.f32 %v10009_v0, %v10001_v18 }
0x1704   : > { %v4596_v44 = vadd.f32 %v4595_v42, %v4594_v41 }
0x1705   : > { %v4599_v45 = vsel %vm799_vm1, %v4589_v43, 0.0 }
0x1706   : > { %v4597_v46 = vrot.slane %v4596_v44, 1  ;;  %v4600_v47 = vrot.slane %v4599_v45, 4 }
0x1707   : > { %v4583_v48 = vpop.xlane.xlu1 %4582 }
0x1708   : > { %v4601_v50 = vadd.f32 %v4600_v47, %v4599_v45  ;;  %10012 = vrcp.f32 %v4583_v48  ;;  %v4598_v51 = vadd.f32 %v4597_v46, %v4596_v44 }
0x170a   : > { %v10011_v52 = vpop.eup %10010  ;;  %v4602_v53 = vrot.slane %v4601_v50, 2  ;;  %v4620_v54 = vmul.f32 0.125, %v4598_v51 }
0x170b   : > { %v4590_v55 = vmul.f32 %v10011_v52, %v10003_v23  ;;  %v9854_v23 = vld [vmem:[#allocation13 + $0x120] sm:$0xff]  }
0x170c   : > { %v4624_v56 = vpack.c.bf16 %v4620_v54, %v4620_v54  ;;  %v4603_v57 = vadd.f32 %v4602_v53, %v4601_v50 }
0x170d   : > { %v4606_v58 = vsel %vm799_vm1, %v4590_v55, 0.0 }
0x170e   : > { %v4607_v59 = vrot.slane %v4606_v58, 4  ;;  %9200 = vmatmul.mubr.msk.bf16.vlgmr.msra.gmra.mrb[100].mxu1 %vm799_vm1, %v4624_v56  ;;  %v4604_v60 = vrot.slane %v4603_v57, 1 }
0x170f   : > { %9210 = vmatpush3.bf16.msra.mxu1 %v10849_v29  ;;  %9211 = vmatprep.mubr.msk.bf16.mxu1 %vm10422_vm0, %v10421_v34 }
0x1710   : > { %v4608_v61 = vadd.f32 %v4607_v59, %v4606_v58  ;;  %v4605_v62 = vadd.f32 %v4604_v60, %v4603_v57  ;;  %9221 = vmatprep.subr.bf16.mxu1 %v10421_v34 }
0x1712   : > { %v10013_v63 = vpop.eup %10012  ;;  %v4609_v1 = vrot.slane %v4608_v61, 2  ;;  %v4621_v2 = vmul.f32 0.125, %v4605_v62 }
0x1713   : > { %v4591_v3 = vmul.f32 %v10013_v63, %v10005_v26  ;;  %v9856_v26 = vld [vmem:[#allocation13 + $0x130] sm:$0xff]  }
0x1714   : > { %v4625_v49 = vpack.c.bf16 %v4621_v2, %v4621_v2  ;;  %v4610_v4 = vadd.f32 %v4609_v1, %v4608_v61 }
0x1715   : > { %v4613_v5 = vsel %vm799_vm1, %v4591_v3, 0.0 }
0x1716   : > { %v4614_v6 = vrot.slane %v4613_v5, 4  ;;  %9206 = vmatmul.mubr.msk.bf16.vlgmr.msra.gmra.mrb[136].mxu0 %vm799_vm1, %v4625_v49  ;;  %v4611_v7 = vrot.slane %v4610_v4, 1  ;;  %v9859_v49 = vld [vmem:[#allocation10 + $0x148] sm:$0xff]  }
0x1717   : > { %9216 = vmatpush3.bf16.msra.mxu0 %v10858_v33  ;;  %9217 = vmatprep.mubr.msk.bf16.mxu0 %vm10422_vm0, %v10421_v34 }
0x1718   : > { %v4615_v8 = vadd.f32 %v4614_v6, %v4613_v5  ;;  %v4612_v9 = vadd.f32 %v4611_v7, %v4610_v4  ;;  %9241 = vmatprep.subr.bf16.mxu0 %v10421_v34  ;;  %v9861_v4 = vld [vmem:[#allocation10 + $0x150] sm:$0xff]   ;;  %v9862_v5 = vld [vmem:[#allocation10 + $0x158] sm:$0xff]   ;;  %v9864_v7 = vld [vmem:[#allocation10 + $0x160] sm:$0xff]  }
0x1719   : > { %v9863_v6 = vld [vmem:[#allocation7 + $0x140] sm:$0xff]  }
0x171a   : > { %v4616_v10 = vrot.slane %v4615_v8, 2  ;;  %v4622_v40 = vmul.f32 0.125, %v4612_v9  ;;  %v9868_v9 = vld [vmem:[#allocation10 + $0x170] sm:$0xff]  }
0x171c   : > { %v4626_v11 = vpack.c.bf16 %v4622_v40, %v4622_v40  ;;  %v4617_v12 = vadd.f32 %v4616_v10, %v4615_v8  ;;  %v9866_v8 = vld [vmem:[#allocation10 + $0x168] sm:$0xff]   ;;  %v9870_v10 = vld [vmem:[#allocation10 + $0x178] sm:$0xff]  }
0x171e   : > { %9212 = vmatmul.mubr.msk.bf16.vlgmr.msra.gmra.mrb[104].mxu1 %vm799_vm1, %v4626_v11  ;;  %v4618_v14 = vrot.slane %v4617_v12, 1 }
0x171f   : > { %9237 = vmatprep.mubr.msk.bf16.mxu1 %vm10422_vm0, %v10421_v34  ;;  %9222 = vmatpush3.bf16.msra.mxu1 %v9850_v19  ;;  %v9869_v19 = vld [vmem:[#allocation7 + $0x158] sm:$0xff]  }
0x1720   : > { %v4619_v15 = vadd.f32 %v4618_v14, %v4617_v12  ;;  %9223 = vmatprep.subr.bf16.mxu1 %v10421_v34  ;;  %v9865_v14 = vld [vmem:[#allocation7 + $0x148] sm:$0xff]  }
0x1722   : > { %v4623_v16 = vmul.f32 0.125, %v4619_v15 }
0x1723   : > { %9224 = vmatpush3.bf16.msra.mxu1 %v9851_v20  ;;  %v9871_v20 = vld [vmem:[#allocation7 + $0x160] sm:$0xff]  }
0x1724   : > { %v4627_v18 = vpack.c.bf16 %v4623_v16, %v4623_v16  ;;  %9225 = vmatprep.subr.bf16.mxu1 %v10421_v34 }
0x1726   : > { %9218 = vmatmul.mubr.msk.bf16.vlgmr.msra.gmra.mrb[140].mxu0 %vm799_vm1, %v4627_v18  ;;  %v9867_v18 = vld [vmem:[#allocation7 + $0x150] sm:$0xff]  }
0x1727   : > { %9243 = vmatprep.mubr.msk.bf16.mxu0 %vm10422_vm0, %v10421_v34  ;;  %9226 = vmatpush3.bf16.msra.mxu1 %v9852_v21  ;;  %v9872_v21 = vld [vmem:[#allocation7 + $0x168] sm:$0xff]  }
0x1728   : > { %9227 = vmatprep.subr.bf16.mxu1 %v10421_v34  ;;  %9242 = vmatpush3.bf16.msra.mxu0 %v9860_v32 }
0x1729   : > { %9247 = vmatprep.subr.bf16.mxu0 %v9863_v6 }
0x172b   : > { %9228 = vmatpush3.bf16.msra.mxu1 %v9853_v22  ;;  %v9873_v22 = vld [vmem:[#allocation7 + $0x170] sm:$0xff]  }
0x172c   : > { %9229 = vmatprep.subr.bf16.mxu1 %v10421_v34 }
0x172f   : > { %9230 = vmatpush3.bf16.msra.mxu1 %v9854_v23  ;;  %v9874_v23 = vld [vmem:[#allocation7 + $0x178] sm:$0xff]  }
0x1730   : > { %9231 = vmatprep.subr.bf16.mxu1 %v10421_v34 }
0x1733   : > { %9232 = vmatpush3.bf16.msra.mxu1 %v9855_v25  ;;  %v8108_v25 = vld [vmem:[#allocation11 + $0x5] ss:$0 sm:$0xff] }
0x1734   : > { %9233 = vmatprep.subr.bf16.mxu1 %v10421_v34 }
0x1737   : > { %9234 = vmatpush3.bf16.msra.mxu1 %v9856_v26 }
0x1738   : > { %9235 = vmatprep.subr.bf16.mxu1 %v10421_v34 }
0x173b   : > { %9236 = vmatpush3.bf16.msra.mxu1 %v9857_v27 }
0x173c   : > { %9267 = vmatprep.subr.bf16.mxu1 %v9858_v31 }
0x17e1   : > { %v4665_v35 = vpop.f32.mrb[100].mxu1 }
0x17e2   : > { %v9201_v36 = vpop.f32.mrb[101].mxu1  ;;  %v4800_v41 = vpack.c.bf16 %v4665_v35, %v4665_v35 }
0x17e3   : > { %v4668_v37 = vpop.f32.mrb[102].mxu1 }
0x17e4   : > { %v9202_v38 = vpop.f32.mrb[103].mxu1  ;;  %v4825_v46 = vunpack.c.l.b16 %v4800_v41 }
0x17e9   : > { %v4708_v39 = vpop.f32.mrb[136].mxu0 }
0x17ea   : > { %v4801_v0 = vpack.c.bf16 %v4708_v39, %v4708_v39  ;;  %v9207_v42 = vpop.f32.mrb[137].mxu0 }
0x17eb   : > { %v4711_v43 = vpop.f32.mrb[138].mxu0 }
0x17ec   : > { %v4826_v44 = vunpack.c.l.b16 %v4801_v0  ;;  %v9208_v45 = vpop.f32.mrb[139].mxu0 }
0x17ee   : > { %v4829_v47 = vrot.slane %v4826_v44, 7 }
0x17f0   : > { %v4830_v48 = vsel %vm1266_vm2, %v4829_v47, %v4825_v46 }
0x17f1   : > { %v4751_v50 = vpop.f32.mrb[104].mxu1 }
0x17f2   : > { %v4802_v51 = vpack.c.bf16 %v4751_v50, %v4751_v50  ;;  %v9213_v52 = vpop.f32.mrb[105].mxu1 }
0x17f3   : > { %v4754_v53 = vpop.f32.mrb[106].mxu1 }
0x17f4   : > { %v4827_v54 = vunpack.c.l.b16 %v4802_v51  ;;  %v9214_v55 = vpop.f32.mrb[107].mxu1 }
0x17f6   : > { %v4831_v56 = vrot.slane %v4827_v54, 6 }
0x17f8   : > { %v4832_v57 = vsel %vm1269_vm3, %v4831_v56, %v4830_v48 }
0x17f9   : > { %v4794_v58 = vpop.f32.mrb[140].mxu0 }
0x17fa   : > { %v4803_v59 = vpack.c.bf16 %v4794_v58, %v4794_v58  ;;  %v9219_v60 = vpop.f32.mrb[141].mxu0  ;;  %v8099_v58 = vld [vmem:[#allocation8 + $0x5] ss:$0 sm:$0xff] }
0x17fb   : > { %v4797_v61 = vpop.f32.mrb[142].mxu0 }
0x17fc   : > { %v4828_v62 = vunpack.c.l.b16 %v4803_v59  ;;  %v9220_v63 = vpop.f32.mrb[143].mxu0 }
0x17fe   : > { %v4833_v1 = vrot.slane %v4828_v62, 5 }
0x1800   : > { %v4834_v2 = vsel %vm1272_vm4, %v4833_v1, %v4832_v57 }
0x1801   : > { %v4835_v3 = vpack.c.b16 %v4834_v2, %v4834_v2 }
0x1803   : > { %9238 = vmatmul.mubr.bf16.vlgmr.msra.gmra.mrb[108].mxu1 %v4835_v3 }
0x1804   : > { %9268 = vmatpush3.bf16.msra.mxu1 %v9858_v31  ;;  %9283 = vmatprep.mubr.bf16.mxu1 %v10833_v13 }
0x1805   : > { %9269 = vmatprep.subr.bf16.mxu1 %v9859_v49 }
0x1808   : > { %9270 = vmatpush3.bf16.msra.mxu1 %v9859_v49 }
0x1809   : > { %9271 = vmatprep.subr.bf16.mxu1 %v9861_v4 }
0x180c   : > { %9272 = vmatpush3.bf16.msra.mxu1 %v9861_v4 }
0x180d   : > { %9273 = vmatprep.subr.bf16.mxu1 %v9862_v5 }
0x1810   : > { %9274 = vmatpush3.bf16.msra.mxu1 %v9862_v5 }
0x1811   : > { %9275 = vmatprep.subr.bf16.mxu1 %v9864_v7 }
0x1814   : > { %9276 = vmatpush3.bf16.msra.mxu1 %v9864_v7 }
0x1815   : > { %9277 = vmatprep.subr.bf16.mxu1 %v9866_v8 }
0x1818   : > { %9278 = vmatpush3.bf16.msra.mxu1 %v9866_v8 }
0x1819   : > { %9279 = vmatprep.subr.bf16.mxu1 %v9868_v9 }
0x181c   : > { %9280 = vmatpush3.bf16.msra.mxu1 %v9868_v9 }
0x181d   : > { %9281 = vmatprep.subr.bf16.mxu1 %v9870_v10 }
0x1820   : > { %9282 = vmatpush3.bf16.msra.mxu1 %v9870_v10 }
0x1821   : > { %9315 = vmatprep.subr.bf16.mxu1 %v10421_v34 }
0x1823   : > { %9284 = vmatmul.mubr.bf16.vlgmr.msra.gmra.mrb[112].mxu1 %v10847_v28 }
0x1824   : > { %9287 = vmatprep.mubr.bf16.mxu1 %v10849_v29  ;;  %9316 = vmatpush3.bf16.msra.mxu1 %v10833_v13 }
0x1825   : > { %9327 = vmatprep.subr.bf16.mxu1 %v10421_v34 }
0x182b   : > { %9288 = vmatmul.mubr.bf16.gmra.mrb[116].mxu1 %v10858_v33 }
0x182c   : > { %9317 = vmatprep.mubr.msk.bf16.mxu1 %vm10422_vm0, %v10421_v34 }
0x18d6   : > { %v4919_v40 = vpop.f32.mrb[108].mxu1 }
0x18d7   : > { %v4925_v11 = vpack.c.bf16 %v4919_v40, %v4919_v40  ;;  %v9239_v12 = vpop.f32.mrb[109].mxu1 }
0x18d8   : > { %v4922_v15 = vpop.f32.mrb[110].mxu1 }
0x18d9   : > { %v9240_v16 = vpop.f32.mrb[111].mxu1  ;;  %9244 = vmatmul.mubr.msk.bf16.vlgmr.msra.gmra.mrb[144].mxu0 %vm799_vm1, %v4925_v11 }
0x18da   : > { %9248 = vmatpush3.bf16.msra.mxu0 %v9863_v6  ;;  %9263 = vmatprep.mubr.bf16.mxu0 %v10838_v17 }
0x18db   : > { %9249 = vmatprep.subr.bf16.mxu0 %v9865_v14 }
0x18de   : > { %9250 = vmatpush3.bf16.msra.mxu0 %v9865_v14 }
0x18df   : > { %9251 = vmatprep.subr.bf16.mxu0 %v9867_v18 }
0x18e2   : > { %9252 = vmatpush3.bf16.msra.mxu0 %v9867_v18 }
0x18e3   : > { %9253 = vmatprep.subr.bf16.mxu0 %v9869_v19 }
0x18e6   : > { %9254 = vmatpush3.bf16.msra.mxu0 %v9869_v19 }
0x18e7   : > { %9255 = vmatprep.subr.bf16.mxu0 %v9871_v20 }
0x18ea   : > { %9256 = vmatpush3.bf16.msra.mxu0 %v9871_v20 }
0x18eb   : > { %9257 = vmatprep.subr.bf16.mxu0 %v9872_v21 }
0x18ee   : > { %9258 = vmatpush3.bf16.msra.mxu0 %v9872_v21 }
0x18ef   : > { %9259 = vmatprep.subr.bf16.mxu0 %v9873_v22 }
0x18f2   : > { %9260 = vmatpush3.bf16.msra.mxu0 %v9873_v22 }
0x18f3   : > { %9261 = vmatprep.subr.bf16.mxu0 %v9874_v23 }
0x18f6   : > { %9262 = vmatpush3.bf16.msra.mxu0 %v9874_v23  ;;  %v9285_v26 = vpop.f32.mrb[112].mxu1 }
0x18f7   : > { %9291 = vmatprep.subr.bf16.mxu0 %v10421_v34  ;;  %v5217_v27 = vadd.f32 %v9285_v26, %v8108_v25  ;;  %v5208_v31 = vpop.f32.mrb[113].mxu1 }
0x18f8   : > { %v5209_v32 = vadd.f32 %v8108_v25, %v5208_v31  ;;  %v9286_v35 = vpop.f32.mrb[114].mxu1 }
0x18f9   : > { %9264 = vmatmul.mubr.bf16.vlgmr.msra.gmra.mrb[148].mxu0 %v10851_v30  ;;  %v5220_v36 = vadd.f32 %v9286_v35, %v8108_v25  ;;  %v5211_v37 = vpop.f32.mrb[115].mxu1 }
0x18fa   : > { %9293 = vmatprep.mubr.msk.bf16.mxu0 %vm10422_vm0, %v10421_v34  ;;  %v5212_v38 = vadd.f32 %v8108_v25, %v5211_v37 }
0x18fb   : > { %v5252_v39 = vpack.c.bf16 %v5220_v36, %v5217_v27 }
0x18fc   : > { %v5251_v41 = vpack.c.bf16 %v5212_v38, %v5209_v32 }
0x18fd   : > { %v5305_v2 = vsel %vm799_vm1, %v5252_v39, 0 }
0x18fe   : > { %v5259_v0 = vsel %vm799_vm1, %v5251_v41, 0  ;;  %v9289_v42 = vpop.f32.mrb[116].mxu1 }
0x18ff   : > { %9292 = vmatpush3.bf16.xpose.msra.mxu0 %v5259_v0  ;;  %v5224_v43 = vpop.f32.mrb[117].mxu1  ;;  %v5233_v45 = vadd.f32 %v9289_v42, %v8108_v25 }
0x1900   : > { %9297 = vmatprep.subr.bf16.mxu0 %v10421_v34  ;;  %v9290_v44 = vpop.f32.mrb[118].mxu1  ;;  %v5225_v46 = vadd.f32 %v8108_v25, %v5224_v43 }
0x1901   : > { %v5236_v47 = vadd.f32 %v9290_v44, %v8108_v25  ;;  %v5227_v48 = vpop.f32.mrb[119].mxu1 }
0x1902   : > { %v5228_v50 = vadd.f32 %v8108_v25, %v5227_v48 }
0x1903   : > { %v5254_v51 = vpack.c.bf16 %v5236_v47, %v5233_v45 }
0x1904   : > { %v5253_v52 = vpack.c.bf16 %v5228_v50, %v5225_v46 }
0x1905   : > { %v5397_v6 = vsel %vm799_vm1, %v5254_v51, 0 }
0x1906   : > { %v5351_v49 = vsel %vm799_vm1, %v5253_v52, 0 }
0x19ac   : > { %v4972_v53 = vpop.f32.mrb[144].mxu0 }
0x19ad   : > { %v11263_v54 = vadd.f32 %v4972_v53, %v11185_v24  ;;  %v9245_v55 = vpop.f32.mrb[145].mxu0 }
0x19ae   : > { %v4975_v56 = vpop.f32.mrb[146].mxu0 }
0x19af   : > { %v9246_v57 = vpop.f32.mrb[147].mxu0 }
0x19cc   : > { %v9265_v59 = vpop.f32.mrb[148].mxu0 }
0x19cd   : > { %v5086_v60 = vpop.f32.mrb[149].mxu0  ;;  %v5095_v4 = vadd.f32 %v9265_v59, %v8099_v58 }
0x19ce   : > { %v5087_v61 = vadd.f32 %v8099_v58, %v5086_v60  ;;  %v9266_v62 = vpop.f32.mrb[150].mxu0 }
0x19cf   : > { %v5089_v63 = vpop.f32.mrb[151].mxu0  ;;  %v8254_v5 = vpack.c.bf16 %v5095_v4, %v5095_v4  ;;  %v5098_v7 = vadd.f32 %v9266_v62, %v8099_v58 }
0x19d0   : > { %v8252_v1 = vpack.c.bf16 %v5087_v61, %v5087_v61  ;;  %v5090_v24 = vadd.f32 %v8099_v58, %v5089_v63 }
0x19d1   : > { %v8255_v8 = vpack.c.bf16 %v5098_v7, %v5098_v7 }
0x19d2   : > { %9294 = vmatmul.mubr.msk.bf16.vlgmr.msra.gmra.mrb[152].mxu0 %vm799_vm1, %v8252_v1  ;;  %v8253_v3 = vpack.c.bf16 %v5090_v24, %v5090_v24 }
0x19d3   : > { %9298 = vmatpush3.bf16.xpose.msra.mxu0 %v5305_v2  ;;  %9299 = vmatprep.mubr.msk.bf16.mxu0 %vm10422_vm0, %v10421_v34 }
0x19d4   : > { %9303 = vmatprep.subr.bf16.mxu0 %v10421_v34 }
0x19da   : > { %9300 = vmatmul.mubr.msk.bf16.vlgmr.msra.gmra.mrb[156].mxu0 %vm799_vm1, %v8253_v3 }
0x19db   : > { %9304 = vmatpush3.bf16.xpose.msra.mxu0 %v5351_v49  ;;  %9305 = vmatprep.mubr.msk.bf16.mxu0 %vm10422_vm0, %v10421_v34 }
0x19dc   : > { %9309 = vmatprep.subr.bf16.mxu0 %v10421_v34 }
0x19e2   : > { %9306 = vmatmul.mubr.msk.bf16.vlgmr.msra.gmra.mrb[160].mxu0 %vm799_vm1, %v8254_v5 }
0x19e3   : > { %9310 = vmatpush3.bf16.xpose.msra.mxu0 %v5397_v6  ;;  %9311 = vmatprep.mubr.msk.bf16.mxu0 %vm10422_vm0, %v10421_v34 }
0x19e4   : > { %9321 = vmatprep.subr.bf16.mxu0 %v10421_v34 }
0x19ea   : > { %9312 = vmatmul.mubr.msk.bf16.vlgmr.msra.gmra.mrb[164].mxu0 %vm799_vm1, %v8255_v8 }
0x19eb   : > { %9322 = vmatpush3.bf16.msra.mxu0 %v10847_v28  ;;  %9323 = vmatprep.mubr.msk.bf16.mxu0 %vm10422_vm0, %v10421_v34 }
0x19ec   : > { %9333 = vmatprep.subr.bf16.mxu0 %v10421_v34 }
0x1aa5   : > { %v5295_v9 = vpop.f32.mrb[152].mxu0 }
0x1aa6   : > { %v9295_v10 = vpop.f32.mrb[153].mxu0  ;;  %v5439_v40 = vsel %vm799_vm1, %v5295_v9, -inf }
0x1aa7   : > { %5440 = vmax.xlane.f32.xlu0 %v5439_v40  ;;  %v5298_v11 = vpop.f32.mrb[154].mxu0 }
0x1aa8   : > { %v9296_v12 = vpop.f32.mrb[155].mxu0 }
0x1aad   : > { %v5341_v14 = vpop.f32.mrb[156].mxu0 }
0x1aae   : > { %v9301_v15 = vpop.f32.mrb[157].mxu0  ;;  %v5442_v16 = vsel %vm799_vm1, %v5341_v14, -inf }
0x1aaf   : > { %5443 = vmax.xlane.f32.xlu1 %v5442_v16  ;;  %v5344_v18 = vpop.f32.mrb[158].mxu0 }
0x1ab0   : > { %v9302_v19 = vpop.f32.mrb[159].mxu0 }
0x1ab5   : > { %v5387_v20 = vpop.f32.mrb[160].mxu0 }
0x1ab6   : > { %v9307_v21 = vpop.f32.mrb[161].mxu0  ;;  %v5445_v22 = vsel %vm799_vm1, %v5387_v20, -inf }
0x1ab7   : > { %5446 = vmax.xlane.f32.xlu0 %v5445_v22  ;;  %v5390_v23 = vpop.f32.mrb[162].mxu0 }
0x1ab8   : > { %v9308_v25 = vpop.f32.mrb[163].mxu0 }
0x1abd   : > { %v5433_v26 = vpop.f32.mrb[164].mxu0 }
0x1abe   : > { %v9313_v27 = vpop.f32.mrb[165].mxu0  ;;  %v5448_v31 = vsel %vm799_vm1, %v5433_v26, -inf }
0x1abf   : > { %5449 = vmax.xlane.f32.xlu1 %v5448_v31  ;;  %v5436_v32 = vpop.f32.mrb[166].mxu0 }
0x1ac0   : > { %v9314_v35 = vpop.f32.mrb[167].mxu0 }
0x1b34   : > { %v5441_v36 = vpop.xlane.xlu0 %5440 }
0x1b35   : > { %v5451_v37 = vsub.f32 %v5295_v9, %v5441_v36 }
0x1b37   : > { %v5455_v38 = vmul.f32 1.442695, %v5451_v37 }
0x1b39   : > { %10014 = vpow2.f32 %v5455_v38 }
0x1b3c   : > { %v5444_v39 = vpop.xlane.xlu1 %5443 }
0x1b3d   : > { %v5452_v41 = vsub.f32 %v5341_v14, %v5444_v39 }
0x1b3f   : > { %v5457_v0 = vmul.f32 1.442695, %v5452_v41 }
0x1b41   : > { %10016 = vpow2.f32 %v5457_v0 }
0x1b43   : > { %v10015_v42 = vpop.eup %10014 }
0x1b44   : > { %v5447_v43 = vpop.xlane.xlu0 %5446  ;;  %v5463_v44 = vsel %vm799_vm1, %v10015_v42, 0.0 }
0x1b45   : > { %v5453_v45 = vsub.f32 %v5387_v20, %v5447_v43  ;;  %5464 = vadd.xlane.f32.xlu0 %v5463_v44 }
0x1b47   : > { %v5459_v46 = vmul.f32 1.442695, %v5453_v45 }
0x1b49   : > { %10018 = vpow2.f32 %v5459_v46 }
0x1b4b   : > { %v10017_v47 = vpop.eup %10016 }
0x1b4c   : > { %v5450_v48 = vpop.xlane.xlu1 %5449  ;;  %v5466_v50 = vsel %vm799_vm1, %v10017_v47, 0.0 }
0x1b4d   : > { %v5454_v51 = vsub.f32 %v5433_v26, %v5450_v48  ;;  %5467 = vadd.xlane.f32.xlu1 %v5466_v50  ;;  %v9875_v48 = vld [vmem:[#allocation13 + $0x140] sm:$0xff]   ;;  %v9876_v50 = vld [vmem:[#allocation13 + $0x148] sm:$0xff]  }
0x1b4f   : > { %v5461_v52 = vmul.f32 1.442695, %v5454_v51  ;;  %v9877_v51 = vld [vmem:[#allocation13 + $0x150] sm:$0xff]  }
0x1b51   : > { %10020 = vpow2.f32 %v5461_v52  ;;  %v9878_v52 = vld [vmem:[#allocation13 + $0x158] sm:$0xff]  }
0x1b53   : > { %v10019_v53 = vpop.eup %10018 }
0x1b54   : > { %v5469_v55 = vsel %vm799_vm1, %v10019_v53, 0.0 }
0x1b55   : > { %5470 = vadd.xlane.f32.xlu0 %v5469_v55  ;;  %v9880_v55 = vld [vmem:[#allocation13 + $0x168] sm:$0xff]  }
0x1b5b   : > { %v10021_v56 = vpop.eup %10020 }
0x1b5c   : > { %v5472_v57 = vsel %vm799_vm1, %v10021_v56, 0.0 }
0x1b5d   : > { %5473 = vadd.xlane.f32.xlu1 %v5472_v57  ;;  %v9882_v57 = vld [vmem:[#allocation13 + $0x178] sm:$0xff]  }
0x1bd2   : > { %v5465_v58 = vpop.xlane.xlu0 %5464 }
0x1bd3   : > { %10022 = vrcp.f32 %v5465_v58  ;;  %v9883_v58 = vld [vmem:[#allocation10 + $0x180] sm:$0xff]  }
0x1bda   : > { %v5468_v59 = vpop.xlane.xlu1 %5467 }
0x1bdb   : > { %10024 = vrcp.f32 %v5468_v59  ;;  %v9885_v59 = vld [vmem:[#allocation14 + $0x28] sm:$0xff]  }
0x1bdd   : > { %v10023_v60 = vpop.eup %10022 }
0x1bde   : > { %v5479_v61 = vmul.f32 %v10023_v60, %v10015_v42 }
0x1be0   : > { %v5483_v62 = vsel %vm799_vm1, %v5479_v61, 0.0 }
0x1be1   : > { %v5484_v63 = vrot.slane %v5483_v62, 4 }
0x1be2   : > { %v5471_v1 = vpop.xlane.xlu0 %5470 }
0x1be3   : > { %v5485_v2 = vadd.f32 %v5484_v63, %v5483_v62  ;;  %10026 = vrcp.f32 %v5471_v1 }
0x1be5   : > { %v10025_v24 = vpop.eup %10024  ;;  %v5486_v3 = vrot.slane %v5485_v2, 2 }
0x1be6   : > { %v5480_v49 = vmul.f32 %v10025_v24, %v10017_v47 }
0x1be7   : > { %v5487_v4 = vadd.f32 %v5486_v3, %v5485_v2 }
0x1be8   : > { %v5490_v5 = vsel %vm799_vm1, %v5480_v49, 0.0 }
0x1be9   : > { %v5488_v6 = vrot.slane %v5487_v4, 1  ;;  %v5491_v7 = vrot.slane %v5490_v5, 4 }
0x1bea   : > { %v5474_v8 = vpop.xlane.xlu1 %5473 }
0x1beb   : > { %v5492_v9 = vadd.f32 %v5491_v7, %v5490_v5  ;;  %10028 = vrcp.f32 %v5474_v8  ;;  %v5489_v10 = vadd.f32 %v5488_v6, %v5487_v4 }
0x1bed   : > { %v10027_v40 = vpop.eup %10026  ;;  %v5493_v11 = vrot.slane %v5492_v9, 2  ;;  %v5511_v12 = vmul.f32 0.125, %v5489_v10 }
0x1bee   : > { %v5481_v14 = vmul.f32 %v10027_v40, %v10019_v53  ;;  %v9879_v53 = vld [vmem:[#allocation13 + $0x160] sm:$0xff]  }
0x1bef   : > { %v5515_v15 = vpack.c.bf16 %v5511_v12, %v5511_v12  ;;  %v5494_v16 = vadd.f32 %v5493_v11, %v5492_v9 }
0x1bf0   : > { %v5497_v18 = vsel %vm799_vm1, %v5481_v14, 0.0 }
0x1bf1   : > { %v5498_v19 = vrot.slane %v5497_v18, 4  ;;  %9318 = vmatmul.mubr.msk.bf16.vlgmr.msra.gmra.mrb[120].mxu1 %vm799_vm1, %v5515_v15  ;;  %v5495_v20 = vrot.slane %v5494_v16, 1 }
0x1bf2   : > { %9328 = vmatpush3.bf16.msra.mxu1 %v10849_v29  ;;  %9329 = vmatprep.mubr.msk.bf16.mxu1 %vm10422_vm0, %v10421_v34 }
0x1bf3   : > { %v5499_v21 = vadd.f32 %v5498_v19, %v5497_v18  ;;  %v5496_v22 = vadd.f32 %v5495_v20, %v5494_v16  ;;  %9339 = vmatprep.subr.bf16.mxu1 %v10421_v34 }
0x1bf5   : > { %v10029_v23 = vpop.eup %10028  ;;  %v5500_v25 = vrot.slane %v5499_v21, 2  ;;  %v5512_v26 = vmul.f32 0.125, %v5496_v22 }
0x1bf6   : > { %v5482_v27 = vmul.f32 %v10029_v23, %v10021_v56  ;;  %v9881_v56 = vld [vmem:[#allocation13 + $0x170] sm:$0xff]  }
0x1bf7   : > { %v5516_v31 = vpack.c.bf16 %v5512_v26, %v5512_v26  ;;  %v5501_v32 = vadd.f32 %v5500_v25, %v5499_v21 }
0x1bf8   : > { %v5504_v35 = vsel %vm799_vm1, %v5482_v27, 0.0 }
0x1bf9   : > { %v5505_v36 = vrot.slane %v5504_v35, 4  ;;  %9324 = vmatmul.mubr.msk.bf16.vlgmr.msra.gmra.mrb[168].mxu0 %vm799_vm1, %v5516_v31  ;;  %v5502_v37 = vrot.slane %v5501_v32, 1  ;;  %v9884_v31 = vld [vmem:[#allocation10 + $0x188] sm:$0xff]  }
0x1bfa   : > { %9334 = vmatpush3.bf16.msra.mxu0 %v10858_v33  ;;  %9335 = vmatprep.mubr.msk.bf16.mxu0 %vm10422_vm0, %v10421_v34 }
0x1bfb   : > { %v5506_v38 = vadd.f32 %v5505_v36, %v5504_v35  ;;  %v5503_v39 = vadd.f32 %v5502_v37, %v5501_v32  ;;  %9359 = vmatprep.subr.bf16.mxu0 %v10421_v34  ;;  %v9886_v32 = vld [vmem:[#allocation10 + $0x190] sm:$0xff]   ;;  %v9887_v35 = vld [vmem:[#allocation10 + $0x198] sm:$0xff]   ;;  %v9889_v37 = vld [vmem:[#allocation10 + $0x1a0] sm:$0xff]  }
0x1bfc   : > { %v9888_v36 = vld [vmem:[#allocation7 + $0x180] sm:$0xff]  }
0x1bfd   : > { %v5507_v41 = vrot.slane %v5506_v38, 2  ;;  %v5513_v0 = vmul.f32 0.125, %v5503_v39  ;;  %v9893_v39 = vld [vmem:[#allocation10 + $0x1b0] sm:$0xff]  }
0x1bff   : > { %v5517_v42 = vpack.c.bf16 %v5513_v0, %v5513_v0  ;;  %v5508_v43 = vadd.f32 %v5507_v41, %v5506_v38  ;;  %v9891_v38 = vld [vmem:[#allocation10 + $0x1a8] sm:$0xff]   ;;  %v9895_v41 = vld [vmem:[#allocation10 + $0x1b8] sm:$0xff]  }
0x1c01   : > { %9330 = vmatmul.mubr.msk.bf16.vlgmr.msra.gmra.mrb[124].mxu1 %vm799_vm1, %v5517_v42  ;;  %v5509_v44 = vrot.slane %v5508_v43, 1 }
0x1c02   : > { %9355 = vmatprep.mubr.msk.bf16.mxu1 %vm10422_vm0, %v10421_v34  ;;  %9340 = vmatpush3.bf16.msra.mxu1 %v9875_v48  ;;  %v9894_v48 = vld [vmem:[#allocation7 + $0x198] sm:$0xff]  }
0x1c03   : > { %v5510_v45 = vadd.f32 %v5509_v44, %v5508_v43  ;;  %9341 = vmatprep.subr.bf16.mxu1 %v10421_v34  ;;  %v9890_v44 = vld [vmem:[#allocation7 + $0x188] sm:$0xff]  }
0x1c05   : > { %v5514_v46 = vmul.f32 0.125, %v5510_v45 }
0x1c06   : > { %9342 = vmatpush3.bf16.msra.mxu1 %v9876_v50  ;;  %v9896_v50 = vld [vmem:[#allocation7 + $0x1a0] sm:$0xff]  }
0x1c07   : > { %v5518_v47 = vpack.c.bf16 %v5514_v46, %v5514_v46  ;;  %9343 = vmatprep.subr.bf16.mxu1 %v10421_v34 }
0x1c09   : > { %9336 = vmatmul.mubr.msk.bf16.vlgmr.msra.gmra.mrb[172].mxu0 %vm799_vm1, %v5518_v47  ;;  %v9892_v47 = vld [vmem:[#allocation7 + $0x190] sm:$0xff]  }
0x1c0a   : > { %9361 = vmatprep.mubr.msk.bf16.mxu0 %vm10422_vm0, %v10421_v34  ;;  %9344 = vmatpush3.bf16.msra.mxu1 %v9877_v51  ;;  %v9897_v51 = vld [vmem:[#allocation7 + $0x1a8] sm:$0xff]  }
0x1c0b   : > { %9345 = vmatprep.subr.bf16.mxu1 %v10421_v34  ;;  %9360 = vmatpush3.bf16.msra.mxu0 %v9885_v59 }
0x1c0c   : > { %9365 = vmatprep.subr.bf16.mxu0 %v9888_v36 }
0x1c0e   : > { %9346 = vmatpush3.bf16.msra.mxu1 %v9878_v52  ;;  %v9898_v52 = vld [vmem:[#allocation7 + $0x1b0] sm:$0xff]  }
0x1c0f   : > { %9347 = vmatprep.subr.bf16.mxu1 %v10421_v34 }
0x1c12   : > { %9348 = vmatpush3.bf16.msra.mxu1 %v9879_v53  ;;  %v9899_v53 = vld [vmem:[#allocation7 + $0x1b8] sm:$0xff]  }
0x1c13   : > { %9349 = vmatprep.subr.bf16.mxu1 %v10421_v34 }
0x1c16   : > { %9350 = vmatpush3.bf16.msra.mxu1 %v9880_v55  ;;  %v8148_v55 = vld [vmem:[#allocation11 + $0x6] ss:$0 sm:$0xff] }
0x1c17   : > { %9351 = vmatprep.subr.bf16.mxu1 %v10421_v34 }
0x1c1a   : > { %9352 = vmatpush3.bf16.msra.mxu1 %v9881_v56 }
0x1c1b   : > { %9353 = vmatprep.subr.bf16.mxu1 %v10421_v34 }
0x1c1e   : > { %9354 = vmatpush3.bf16.msra.mxu1 %v9882_v57 }
0x1c1f   : > { %9385 = vmatprep.subr.bf16.mxu1 %v9883_v58 }
0x1cc4   : > { %v5556_v60 = vpop.f32.mrb[120].mxu1 }
0x1cc5   : > { %v9319_v61 = vpop.f32.mrb[121].mxu1  ;;  %v5691_v2 = vpack.c.bf16 %v5556_v60, %v5556_v60 }
0x1cc6   : > { %v5559_v62 = vpop.f32.mrb[122].mxu1 }
0x1cc7   : > { %v9320_v63 = vpop.f32.mrb[123].mxu1  ;;  %v5716_v6 = vunpack.c.l.b16 %v5691_v2 }
0x1ccc   : > { %v5599_v1 = vpop.f32.mrb[168].mxu0 }
0x1ccd   : > { %v5692_v24 = vpack.c.bf16 %v5599_v1, %v5599_v1  ;;  %v9325_v3 = vpop.f32.mrb[169].mxu0 }
0x1cce   : > { %v5602_v49 = vpop.f32.mrb[170].mxu0 }
0x1ccf   : > { %v5717_v4 = vunpack.c.l.b16 %v5692_v24  ;;  %v9326_v5 = vpop.f32.mrb[171].mxu0 }
0x1cd1   : > { %v5720_v7 = vrot.slane %v5717_v4, 7 }
0x1cd3   : > { %v5721_v8 = vsel %vm1266_vm2, %v5720_v7, %v5716_v6 }
0x1cd4   : > { %v5642_v9 = vpop.f32.mrb[124].mxu1 }
0x1cd5   : > { %v5693_v10 = vpack.c.bf16 %v5642_v9, %v5642_v9  ;;  %v9331_v40 = vpop.f32.mrb[125].mxu1 }
0x1cd6   : > { %v5645_v11 = vpop.f32.mrb[126].mxu1 }
0x1cd7   : > { %v5718_v12 = vunpack.c.l.b16 %v5693_v10  ;;  %v9332_v14 = vpop.f32.mrb[127].mxu1 }
0x1cd9   : > { %v5722_v15 = vrot.slane %v5718_v12, 6 }
0x1cdb   : > { %v5723_v16 = vsel %vm1269_vm3, %v5722_v15, %v5721_v8 }
0x1cdc   : > { %v5685_v18 = vpop.f32.mrb[172].mxu0 }
0x1cdd   : > { %v5694_v19 = vpack.c.bf16 %v5685_v18, %v5685_v18  ;;  %v9337_v20 = vpop.f32.mrb[173].mxu0  ;;  %v8139_v18 = vld [vmem:[#allocation8 + $0x6] ss:$0 sm:$0xff] }
0x1cde   : > { %v5688_v21 = vpop.f32.mrb[174].mxu0 }
0x1cdf   : > { %v5719_v22 = vunpack.c.l.b16 %v5694_v19  ;;  %v9338_v23 = vpop.f32.mrb[175].mxu0 }
0x1ce1   : > { %v5724_v25 = vrot.slane %v5719_v22, 5 }
0x1ce3   : > { %v5725_v26 = vsel %vm1272_vm4, %v5724_v25, %v5723_v16 }
0x1ce4   : > { %v5726_v27 = vpack.c.b16 %v5725_v26, %v5725_v26 }
0x1ce6   : > { %9356 = vmatmul.mubr.bf16.vlgmr.msra.gmra.mrb[128].mxu1 %v5726_v27 }
0x1ce7   : > { %9386 = vmatpush3.bf16.msra.mxu1 %v9883_v58  ;;  %9401 = vmatprep.mubr.bf16.mxu1 %v10833_v13 }
0x1ce8   : > { %9387 = vmatprep.subr.bf16.mxu1 %v9884_v31 }
0x1ceb   : > { %9388 = vmatpush3.bf16.msra.mxu1 %v9884_v31 }
0x1cec   : > { %9389 = vmatprep.subr.bf16.mxu1 %v9886_v32 }
0x1cef   : > { %9390 = vmatpush3.bf16.msra.mxu1 %v9886_v32 }
0x1cf0   : > { %9391 = vmatprep.subr.bf16.mxu1 %v9887_v35 }
0x1cf3   : > { %9392 = vmatpush3.bf16.msra.mxu1 %v9887_v35 }
0x1cf4   : > { %9393 = vmatprep.subr.bf16.mxu1 %v9889_v37 }
0x1cf7   : > { %9394 = vmatpush3.bf16.msra.mxu1 %v9889_v37 }
0x1cf8   : > { %9395 = vmatprep.subr.bf16.mxu1 %v9891_v38 }
0x1cfb   : > { %9396 = vmatpush3.bf16.msra.mxu1 %v9891_v38 }
0x1cfc   : > { %9397 = vmatprep.subr.bf16.mxu1 %v9893_v39 }
0x1cff   : > { %9398 = vmatpush3.bf16.msra.mxu1 %v9893_v39 }
0x1d00   : > { %9399 = vmatprep.subr.bf16.mxu1 %v9895_v41 }
0x1d03   : > { %9400 = vmatpush3.bf16.msra.mxu1 %v9895_v41 }
0x1d04   : > { %9433 = vmatprep.subr.bf16.mxu1 %v10421_v34 }
0x1d06   : > { %9402 = vmatmul.mubr.bf16.vlgmr.msra.gmra.mrb[132].mxu1 %v10847_v28 }
0x1d07   : > { %9405 = vmatprep.mubr.bf16.mxu1 %v10849_v29  ;;  %9434 = vmatpush3.bf16.msra.mxu1 %v10833_v13 }
0x1d08   : > { %9445 = vmatprep.subr.bf16.mxu1 %v10421_v34 }
0x1d0e   : > { %9406 = vmatmul.mubr.bf16.gmra.mrb[136].mxu1 %v10858_v33 }
0x1d0f   : > { %9435 = vmatprep.mubr.msk.bf16.mxu1 %vm10422_vm0, %v10421_v34 }
0x1db9   : > { %v5810_v0 = vpop.f32.mrb[128].mxu1 }
0x1dba   : > { %v5816_v42 = vpack.c.bf16 %v5810_v0, %v5810_v0  ;;  %v9357_v43 = vpop.f32.mrb[129].mxu1 }
0x1dbb   : > { %v5813_v45 = vpop.f32.mrb[130].mxu1 }
0x1dbc   : > { %v9358_v46 = vpop.f32.mrb[131].mxu1  ;;  %9362 = vmatmul.mubr.msk.bf16.vlgmr.msra.gmra.mrb[176].mxu0 %vm799_vm1, %v5816_v42 }
0x1dbd   : > { %9366 = vmatpush3.bf16.msra.mxu0 %v9888_v36  ;;  %9381 = vmatprep.mubr.bf16.mxu0 %v10838_v17 }
0x1dbe   : > { %9367 = vmatprep.subr.bf16.mxu0 %v9890_v44 }
0x1dc1   : > { %9368 = vmatpush3.bf16.msra.mxu0 %v9890_v44 }
0x1dc2   : > { %9369 = vmatprep.subr.bf16.mxu0 %v9892_v47 }
0x1dc5   : > { %9370 = vmatpush3.bf16.msra.mxu0 %v9892_v47 }
0x1dc6   : > { %9371 = vmatprep.subr.bf16.mxu0 %v9894_v48 }
0x1dc9   : > { %9372 = vmatpush3.bf16.msra.mxu0 %v9894_v48 }
0x1dca   : > { %9373 = vmatprep.subr.bf16.mxu0 %v9896_v50 }
0x1dcd   : > { %9374 = vmatpush3.bf16.msra.mxu0 %v9896_v50 }
0x1dce   : > { %9375 = vmatprep.subr.bf16.mxu0 %v9897_v51 }
0x1dd1   : > { %9376 = vmatpush3.bf16.msra.mxu0 %v9897_v51 }
0x1dd2   : > { %9377 = vmatprep.subr.bf16.mxu0 %v9898_v52 }
0x1dd5   : > { %9378 = vmatpush3.bf16.msra.mxu0 %v9898_v52 }
0x1dd6   : > { %9379 = vmatprep.subr.bf16.mxu0 %v9899_v53 }
0x1dd9   : > { %9380 = vmatpush3.bf16.msra.mxu0 %v9899_v53  ;;  %v9403_v56 = vpop.f32.mrb[132].mxu1 }
0x1dda   : > { %9409 = vmatprep.subr.bf16.mxu0 %v10421_v34  ;;  %v6108_v57 = vadd.f32 %v9403_v56, %v8148_v55  ;;  %v6099_v58 = vpop.f32.mrb[133].mxu1 }
0x1ddb   : > { %v6100_v59 = vadd.f32 %v8148_v55, %v6099_v58  ;;  %v9404_v60 = vpop.f32.mrb[134].mxu1 }
0x1ddc   : > { %9382 = vmatmul.mubr.bf16.vlgmr.msra.gmra.mrb[180].mxu0 %v10851_v30  ;;  %v6111_v61 = vadd.f32 %v9404_v60, %v8148_v55  ;;  %v6102_v62 = vpop.f32.mrb[135].mxu1 }
0x1ddd   : > { %9411 = vmatprep.mubr.msk.bf16.mxu0 %vm10422_vm0, %v10421_v34  ;;  %v6103_v63 = vadd.f32 %v8148_v55, %v6102_v62 }
0x1dde   : > { %v6143_v1 = vpack.c.bf16 %v6111_v61, %v6108_v57 }
0x1ddf   : > { %v6142_v2 = vpack.c.bf16 %v6103_v63, %v6100_v59 }
0x1de0   : > { %v6196_v26 = vsel %vm799_vm1, %v6143_v1, 0 }
0x1de1   : > { %v6150_v24 = vsel %vm799_vm1, %v6142_v2, 0  ;;  %v9407_v3 = vpop.f32.mrb[136].mxu1 }
0x1de2   : > { %9410 = vmatpush3.bf16.xpose.msra.mxu0 %v6150_v24  ;;  %v6115_v49 = vpop.f32.mrb[137].mxu1  ;;  %v6124_v5 = vadd.f32 %v9407_v3, %v8148_v55 }
0x1de3   : > { %9415 = vmatprep.subr.bf16.mxu0 %v10421_v34  ;;  %v9408_v4 = vpop.f32.mrb[138].mxu1  ;;  %v6116_v6 = vadd.f32 %v8148_v55, %v6115_v49 }
0x1de4   : > { %v6127_v7 = vadd.f32 %v9408_v4, %v8148_v55  ;;  %v6118_v8 = vpop.f32.mrb[139].mxu1 }
0x1de5   : > { %v6119_v9 = vadd.f32 %v8148_v55, %v6118_v8 }
0x1de6   : > { %v6145_v10 = vpack.c.bf16 %v6127_v7, %v6124_v5 }
0x1de7   : > { %v6144_v40 = vpack.c.bf16 %v6119_v9, %v6116_v6 }
0x1de8   : > { %v6288_v36 = vsel %vm799_vm1, %v6145_v10, 0 }
0x1de9   : > { %v6242_v31 = vsel %vm799_vm1, %v6144_v40, 0 }
0x1e8f   : > { %v5863_v11 = vpop.f32.mrb[176].mxu0 }
0x1e90   : > { %v11341_v12 = vadd.f32 %v5863_v11, %v11263_v54  ;;  %v9363_v14 = vpop.f32.mrb[177].mxu0 }
0x1e91   : > { %v5866_v15 = vpop.f32.mrb[178].mxu0 }
0x1e92   : > { %v9364_v16 = vpop.f32.mrb[179].mxu0 }
0x1eaf   : > { %v9383_v19 = vpop.f32.mrb[180].mxu0 }
0x1eb0   : > { %v5977_v20 = vpop.f32.mrb[181].mxu0  ;;  %v5986_v32 = vadd.f32 %v9383_v19, %v8139_v18 }
0x1eb1   : > { %v5978_v21 = vadd.f32 %v8139_v18, %v5977_v20  ;;  %v9384_v22 = vpop.f32.mrb[182].mxu0 }
0x1eb2   : > { %v5980_v23 = vpop.f32.mrb[183].mxu0  ;;  %v8258_v35 = vpack.c.bf16 %v5986_v32, %v5986_v32  ;;  %v5989_v37 = vadd.f32 %v9384_v22, %v8139_v18 }
0x1eb3   : > { %v8256_v25 = vpack.c.bf16 %v5978_v21, %v5978_v21  ;;  %v5981_v54 = vadd.f32 %v8139_v18, %v5980_v23 }
0x1eb4   : > { %v8259_v38 = vpack.c.bf16 %v5989_v37, %v5989_v37 }
0x1eb5   : > { %9412 = vmatmul.mubr.msk.bf16.vlgmr.msra.gmra.mrb[184].mxu0 %vm799_vm1, %v8256_v25  ;;  %v8257_v27 = vpack.c.bf16 %v5981_v54, %v5981_v54 }
0x1eb6   : > { %9416 = vmatpush3.bf16.xpose.msra.mxu0 %v6196_v26  ;;  %9417 = vmatprep.mubr.msk.bf16.mxu0 %vm10422_vm0, %v10421_v34 }
0x1eb7   : > { %9421 = vmatprep.subr.bf16.mxu0 %v10421_v34 }
0x1ebd   : > { %9418 = vmatmul.mubr.msk.bf16.vlgmr.msra.gmra.mrb[188].mxu0 %vm799_vm1, %v8257_v27 }
0x1ebe   : > { %9422 = vmatpush3.bf16.xpose.msra.mxu0 %v6242_v31  ;;  %9423 = vmatprep.mubr.msk.bf16.mxu0 %vm10422_vm0, %v10421_v34 }
0x1ebf   : > { %9427 = vmatprep.subr.bf16.mxu0 %v10421_v34 }
0x1ec5   : > { %9424 = vmatmul.mubr.msk.bf16.vlgmr.msra.gmra.mrb[192].mxu0 %vm799_vm1, %v8258_v35 }
0x1ec6   : > { %9428 = vmatpush3.bf16.xpose.msra.mxu0 %v6288_v36  ;;  %9429 = vmatprep.mubr.msk.bf16.mxu0 %vm10422_vm0, %v10421_v34 }
0x1ec7   : > { %9439 = vmatprep.subr.bf16.mxu0 %v10421_v34 }
0x1ecd   : > { %9430 = vmatmul.mubr.msk.bf16.vlgmr.msra.gmra.mrb[196].mxu0 %vm799_vm1, %v8259_v38 }
0x1ece   : > { %9440 = vmatpush3.bf16.msra.mxu0 %v10847_v28  ;;  %9441 = vmatprep.mubr.msk.bf16.mxu0 %vm10422_vm0, %v10421_v34 }
0x1ecf   : > { %9451 = vmatprep.subr.bf16.mxu0 %v10421_v34 }
0x1f88   : > { %v6186_v39 = vpop.f32.mrb[184].mxu0 }
0x1f89   : > { %v9413_v41 = vpop.f32.mrb[185].mxu0  ;;  %v6330_v0 = vsel %vm799_vm1, %v6186_v39, -inf }
0x1f8a   : > { %6331 = vmax.xlane.f32.xlu0 %v6330_v0  ;;  %v6189_v42 = vpop.f32.mrb[186].mxu0 }
0x1f8b   : > { %v9414_v43 = vpop.f32.mrb[187].mxu0 }
0x1f90   : > { %v6232_v44 = vpop.f32.mrb[188].mxu0 }
0x1f91   : > { %v9419_v45 = vpop.f32.mrb[189].mxu0  ;;  %v6333_v46 = vsel %vm799_vm1, %v6232_v44, -inf }
0x1f92   : > { %6334 = vmax.xlane.f32.xlu1 %v6333_v46  ;;  %v6235_v47 = vpop.f32.mrb[190].mxu0 }
0x1f93   : > { %v9420_v48 = vpop.f32.mrb[191].mxu0 }
0x1f98   : > { %v6278_v50 = vpop.f32.mrb[192].mxu0 }
0x1f99   : > { %v9425_v51 = vpop.f32.mrb[193].mxu0  ;;  %v6336_v52 = vsel %vm799_vm1, %v6278_v50, -inf }
0x1f9a   : > { %6337 = vmax.xlane.f32.xlu0 %v6336_v52  ;;  %v6281_v53 = vpop.f32.mrb[194].mxu0 }
0x1f9b   : > { %v9426_v55 = vpop.f32.mrb[195].mxu0 }
0x1fa0   : > { %v6324_v56 = vpop.f32.mrb[196].mxu0 }
0x1fa1   : > { %v9431_v57 = vpop.f32.mrb[197].mxu0  ;;  %v6339_v58 = vsel %vm799_vm1, %v6324_v56, -inf }
0x1fa2   : > { %6340 = vmax.xlane.f32.xlu1 %v6339_v58  ;;  %v6327_v59 = vpop.f32.mrb[198].mxu0 }
0x1fa3   : > { %v9432_v60 = vpop.f32.mrb[199].mxu0 }
0x2017   : > { %v6332_v61 = vpop.xlane.xlu0 %6331 }
0x2018   : > { %v6342_v62 = vsub.f32 %v6186_v39, %v6332_v61 }
0x201a   : > { %v6346_v63 = vmul.f32 1.442695, %v6342_v62 }
0x201c   : > { %10030 = vpow2.f32 %v6346_v63 }
0x201f   : > { %v6335_v1 = vpop.xlane.xlu1 %6334 }
0x2020   : > { %v6343_v2 = vsub.f32 %v6232_v44, %v6335_v1 }
0x2022   : > { %v6348_v24 = vmul.f32 1.442695, %v6343_v2 }
0x2024   : > { %10032 = vpow2.f32 %v6348_v24 }
0x2026   : > { %v10031_v3 = vpop.eup %10030 }
0x2027   : > { %v6338_v49 = vpop.xlane.xlu0 %6337  ;;  %v6354_v4 = vsel %vm799_vm1, %v10031_v3, 0.0 }
0x2028   : > { %v6344_v5 = vsub.f32 %v6278_v50, %v6338_v49  ;;  %6355 = vadd.xlane.f32.xlu0 %v6354_v4 }
0x202a   : > { %v6350_v6 = vmul.f32 1.442695, %v6344_v5 }
0x202c   : > { %10034 = vpow2.f32 %v6350_v6 }
0x202e   : > { %v10033_v7 = vpop.eup %10032 }
0x202f   : > { %v6341_v8 = vpop.xlane.xlu1 %6340  ;;  %v6357_v9 = vsel %vm799_vm1, %v10033_v7, 0.0 }
0x2030   : > { %v6345_v10 = vsub.f32 %v6324_v56, %v6341_v8  ;;  %6358 = vadd.xlane.f32.xlu1 %v6357_v9  ;;  %v9900_v8 = vld [vmem:[#allocation13 + $0x180] sm:$0xff]   ;;  %v9901_v9 = vld [vmem:[#allocation13 + $0x188] sm:$0xff]  }
0x2032   : > { %v6352_v40 = vmul.f32 1.442695, %v6345_v10  ;;  %v9902_v10 = vld [vmem:[#allocation13 + $0x190] sm:$0xff]  }
0x2034   : > { %10036 = vpow2.f32 %v6352_v40  ;;  %v9903_v40 = vld [vmem:[#allocation13 + $0x198] sm:$0xff]  }
0x2036   : > { %v10035_v11 = vpop.eup %10034 }
0x2037   : > { %v6360_v14 = vsel %vm799_vm1, %v10035_v11, 0.0 }
0x2038   : > { %6361 = vadd.xlane.f32.xlu0 %v6360_v14  ;;  %v9905_v14 = vld [vmem:[#allocation13 + $0x1a8] sm:$0xff]  }
0x203e   : > { %v10037_v15 = vpop.eup %10036 }
0x203f   : > { %v6363_v16 = vsel %vm799_vm1, %v10037_v15, 0.0 }
0x2040   : > { %6364 = vadd.xlane.f32.xlu1 %v6363_v16  ;;  %v9907_v16 = vld [vmem:[#allocation13 + $0x1b8] sm:$0xff]  }
0x20b5   : > { %v6356_v18 = vpop.xlane.xlu0 %6355 }
0x20b6   : > { %10038 = vrcp.f32 %v6356_v18  ;;  %v9908_v18 = vld [vmem:[#allocation10 + $0x1c0] sm:$0xff]  }
0x20bd   : > { %v6359_v19 = vpop.xlane.xlu1 %6358 }
0x20be   : > { %10040 = vrcp.f32 %v6359_v19  ;;  %v9910_v19 = vld [vmem:[#allocation14 + $0x30] sm:$0xff]  }
0x20c0   : > { %v10039_v20 = vpop.eup %10038 }
0x20c1   : > { %v6370_v21 = vmul.f32 %v10039_v20, %v10031_v3 }
0x20c3   : > { %v6374_v22 = vsel %vm799_vm1, %v6370_v21, 0.0 }
0x20c4   : > { %v6375_v23 = vrot.slane %v6374_v22, 4 }
0x20c5   : > { %v6362_v25 = vpop.xlane.xlu0 %6361 }
0x20c6   : > { %v6376_v26 = vadd.f32 %v6375_v23, %v6374_v22  ;;  %10042 = vrcp.f32 %v6362_v25 }
0x20c8   : > { %v10041_v54 = vpop.eup %10040  ;;  %v6377_v27 = vrot.slane %v6376_v26, 2 }
0x20c9   : > { %v6371_v31 = vmul.f32 %v10041_v54, %v10033_v7 }
0x20ca   : > { %v6378_v32 = vadd.f32 %v6377_v27, %v6376_v26 }
0x20cb   : > { %v6381_v35 = vsel %vm799_vm1, %v6371_v31, 0.0 }
0x20cc   : > { %v6379_v36 = vrot.slane %v6378_v32, 1  ;;  %v6382_v37 = vrot.slane %v6381_v35, 4 }
0x20cd   : > { %v6365_v38 = vpop.xlane.xlu1 %6364 }
0x20ce   : > { %v6383_v39 = vadd.f32 %v6382_v37, %v6381_v35  ;;  %10044 = vrcp.f32 %v6365_v38  ;;  %v6380_v41 = vadd.f32 %v6379_v36, %v6378_v32 }
0x20d0   : > { %v10043_v0 = vpop.eup %10042  ;;  %v6384_v42 = vrot.slane %v6383_v39, 2  ;;  %v6402_v43 = vmul.f32 0.125, %v6380_v41 }
0x20d1   : > { %v6372_v44 = vmul.f32 %v10043_v0, %v10035_v11  ;;  %v9904_v11 = vld [vmem:[#allocation13 + $0x1a0] sm:$0xff]  }
0x20d2   : > { %v6406_v45 = vpack.c.bf16 %v6402_v43, %v6402_v43  ;;  %v6385_v46 = vadd.f32 %v6384_v42, %v6383_v39 }
0x20d3   : > { %v6388_v47 = vsel %vm799_vm1, %v6372_v44, 0.0 }
0x20d4   : > { %v6389_v48 = vrot.slane %v6388_v47, 4  ;;  %9436 = vmatmul.mubr.msk.bf16.vlgmr.msra.gmra.mrb[140].mxu1 %vm799_vm1, %v6406_v45  ;;  %v6386_v50 = vrot.slane %v6385_v46, 1 }
0x20d5   : > { %9446 = vmatpush3.bf16.msra.mxu1 %v10849_v29  ;;  %9447 = vmatprep.mubr.msk.bf16.mxu1 %vm10422_vm0, %v10421_v34 }
0x20d6   : > { %v6390_v51 = vadd.f32 %v6389_v48, %v6388_v47  ;;  %v6387_v52 = vadd.f32 %v6386_v50, %v6385_v46  ;;  %9457 = vmatprep.subr.bf16.mxu1 %v10421_v34 }
0x20d8   : > { %v10045_v53 = vpop.eup %10044  ;;  %v6391_v55 = vrot.slane %v6390_v51, 2  ;;  %v6403_v56 = vmul.f32 0.125, %v6387_v52 }
0x20d9   : > { %v6373_v57 = vmul.f32 %v10045_v53, %v10037_v15  ;;  %v9906_v15 = vld [vmem:[#allocation13 + $0x1b0] sm:$0xff]  }
0x20da   : > { %v6407_v58 = vpack.c.bf16 %v6403_v56, %v6403_v56  ;;  %v6392_v59 = vadd.f32 %v6391_v55, %v6390_v51 }
0x20db   : > { %v6395_v60 = vsel %vm799_vm1, %v6373_v57, 0.0 }
0x20dc   : > { %v6396_v61 = vrot.slane %v6395_v60, 4  ;;  %9442 = vmatmul.mubr.msk.bf16.vlgmr.msra.gmra.mrb[200].mxu0 %vm799_vm1, %v6407_v58  ;;  %v6393_v62 = vrot.slane %v6392_v59, 1  ;;  %v9909_v58 = vld [vmem:[#allocation10 + $0x1c8] sm:$0xff]  }
0x20dd   : > { %9452 = vmatpush3.bf16.msra.mxu0 %v10858_v33  ;;  %9453 = vmatprep.mubr.msk.bf16.mxu0 %vm10422_vm0, %v10421_v34 }
0x20de   : > { %v6397_v63 = vadd.f32 %v6396_v61, %v6395_v60  ;;  %v6394_v1 = vadd.f32 %v6393_v62, %v6392_v59  ;;  %9477 = vmatprep.subr.bf16.mxu0 %v10421_v34  ;;  %v9911_v59 = vld [vmem:[#allocation10 + $0x1d0] sm:$0xff]   ;;  %v9912_v60 = vld [vmem:[#allocation10 + $0x1d8] sm:$0xff]   ;;  %v9914_v62 = vld [vmem:[#allocation10 + $0x1e0] sm:$0xff]  }
0x20df   : > { %v9913_v61 = vld [vmem:[#allocation7 + $0x1c0] sm:$0xff]  }
0x20e0   : > { %v6398_v2 = vrot.slane %v6397_v63, 2  ;;  %v6404_v24 = vmul.f32 0.125, %v6394_v1  ;;  %v9918_v1 = vld [vmem:[#allocation10 + $0x1f0] sm:$0xff]  }
0x20e2   : > { %v6408_v3 = vpack.c.bf16 %v6404_v24, %v6404_v24  ;;  %v6399_v49 = vadd.f32 %v6398_v2, %v6397_v63  ;;  %v9916_v63 = vld [vmem:[#allocation10 + $0x1e8] sm:$0xff]   ;;  %v9920_v2 = vld [vmem:[#allocation10 + $0x1f8] sm:$0xff]  }
0x20e4   : > { %9448 = vmatmul.mubr.msk.bf16.vlgmr.msra.gmra.mrb[144].mxu1 %vm799_vm1, %v6408_v3  ;;  %v6400_v4 = vrot.slane %v6399_v49, 1 }
0x20e5   : > { %9473 = vmatprep.mubr.msk.bf16.mxu1 %vm10422_vm0, %v10421_v34  ;;  %9458 = vmatpush3.bf16.msra.mxu1 %v9900_v8  ;;  %v9921_v8 = vld [vmem:[#allocation7 + $0x1e0] sm:$0xff]  }
0x20e6   : > { %v6401_v5 = vadd.f32 %v6400_v4, %v6399_v49  ;;  %9459 = vmatprep.subr.bf16.mxu1 %v10421_v34  ;;  %v9915_v4 = vld [vmem:[#allocation7 + $0x1c8] sm:$0xff]  }
0x20e8   : > { %v6405_v6 = vmul.f32 0.125, %v6401_v5 }
0x20e9   : > { %9460 = vmatpush3.bf16.msra.mxu1 %v9901_v9  ;;  %v9922_v9 = vld [vmem:[#allocation7 + $0x1e8] sm:$0xff]  }
0x20ea   : > { %v6409_v7 = vpack.c.bf16 %v6405_v6, %v6405_v6  ;;  %9461 = vmatprep.subr.bf16.mxu1 %v10421_v34 }
0x20ec   : > { %9454 = vmatmul.mubr.msk.bf16.vlgmr.msra.gmra.mrb[204].mxu0 %vm799_vm1, %v6409_v7  ;;  %v9919_v7 = vld [vmem:[#allocation7 + $0x1d8] sm:$0xff]  }
0x20ed   : > { %9479 = vmatprep.mubr.msk.bf16.mxu0 %vm10422_vm0, %v10421_v34  ;;  %9462 = vmatpush3.bf16.msra.mxu1 %v9902_v10  ;;  %v9923_v10 = vld [vmem:[#allocation7 + $0x1f0] sm:$0xff]  }
0x20ee   : > { %9463 = vmatprep.subr.bf16.mxu1 %v10421_v34  ;;  %9478 = vmatpush3.bf16.msra.mxu0 %v9910_v19 }
0x20ef   : > { %9483 = vmatprep.subr.bf16.mxu0 %v9913_v61 }
0x20f1   : > { %9464 = vmatpush3.bf16.msra.mxu1 %v9903_v40  ;;  %v9924_v40 = vld [vmem:[#allocation7 + $0x1f8] sm:$0xff]  }
0x20f2   : > { %9465 = vmatprep.subr.bf16.mxu1 %v10421_v34 }
0x20f5   : > { %9466 = vmatpush3.bf16.msra.mxu1 %v9904_v11 }
0x20f6   : > { %9467 = vmatprep.subr.bf16.mxu1 %v10421_v34 }
0x20f9   : > { %9468 = vmatpush3.bf16.msra.mxu1 %v9905_v14 }
0x20fa   : > { %9469 = vmatprep.subr.bf16.mxu1 %v10421_v34 }
0x20fd   : > { %9470 = vmatpush3.bf16.msra.mxu1 %v9906_v15 }
0x20fe   : > { %9471 = vmatprep.subr.bf16.mxu1 %v10421_v34 }
0x2101   : > { %9472 = vmatpush3.bf16.msra.mxu1 %v9907_v16 }
0x2102   : > { %9503 = vmatprep.subr.bf16.mxu1 %v9908_v18 }
0x21a7   : > { %v6447_v20 = vpop.f32.mrb[140].mxu1 }
0x21a8   : > { %v9437_v21 = vpop.f32.mrb[141].mxu1  ;;  %v6582_v26 = vpack.c.bf16 %v6447_v20, %v6447_v20 }
0x21a9   : > { %v6450_v22 = vpop.f32.mrb[142].mxu1 }
0x21aa   : > { %v9438_v23 = vpop.f32.mrb[143].mxu1  ;;  %v6607_v36 = vunpack.c.l.b16 %v6582_v26 }
0x21af   : > { %v6490_v25 = vpop.f32.mrb[200].mxu0 }
0x21b0   : > { %v6583_v54 = vpack.c.bf16 %v6490_v25, %v6490_v25  ;;  %v9443_v27 = vpop.f32.mrb[201].mxu0 }
0x21b1   : > { %v6493_v31 = vpop.f32.mrb[202].mxu0 }
0x21b2   : > { %v6608_v32 = vunpack.c.l.b16 %v6583_v54  ;;  %v9444_v35 = vpop.f32.mrb[203].mxu0 }
0x21b4   : > { %v6611_v37 = vrot.slane %v6608_v32, 7 }
0x21b6   : > { %v6612_v38 = vsel %vm1266_vm2, %v6611_v37, %v6607_v36 }
0x21b7   : > { %v6533_v39 = vpop.f32.mrb[144].mxu1 }
0x21b8   : > { %v6584_v41 = vpack.c.bf16 %v6533_v39, %v6533_v39  ;;  %v9449_v0 = vpop.f32.mrb[145].mxu1 }
0x21b9   : > { %v6536_v42 = vpop.f32.mrb[146].mxu1 }
0x21ba   : > { %v6609_v43 = vunpack.c.l.b16 %v6584_v41  ;;  %v9450_v44 = vpop.f32.mrb[147].mxu1 }
0x21bb   : > { %v8179_v44 = vld [vmem:[#allocation8 + $0x7] ss:$0 sm:$0xff] }
0x21bc   : > { %v6613_v45 = vrot.slane %v6609_v43, 6 }
0x21be   : > { %v6614_v46 = vsel %vm1269_vm3, %v6613_v45, %v6612_v38 }
0x21bf   : > { %v6576_v47 = vpop.f32.mrb[204].mxu0 }
0x21c0   : > { %v6585_v48 = vpack.c.bf16 %v6576_v47, %v6576_v47  ;;  %v9455_v50 = vpop.f32.mrb[205].mxu0 }
0x21c1   : > { %v6579_v51 = vpop.f32.mrb[206].mxu0 }
0x21c2   : > { %v6610_v52 = vunpack.c.l.b16 %v6585_v48  ;;  %v9456_v53 = vpop.f32.mrb[207].mxu0 }
0x21c4   : > { %v6615_v55 = vrot.slane %v6610_v52, 5 }
0x21c6   : > { %v6616_v56 = vsel %vm1272_vm4, %v6615_v55, %v6614_v46 }
0x21c7   : > { %v6617_v57 = vpack.c.b16 %v6616_v56, %v6616_v56 }
0x21c9   : > { %9474 = vmatmul.mubr.bf16.vlgmr.msra.gmra.mrb[148].mxu1 %v6617_v57 }
0x21ca   : > { %9504 = vmatpush3.bf16.msra.mxu1 %v9908_v18  ;;  %9519 = vmatprep.mubr.bf16.mxu1 %v10833_v13 }
0x21cb   : > { %9505 = vmatprep.subr.bf16.mxu1 %v9909_v58 }
0x21ce   : > { %9506 = vmatpush3.bf16.msra.mxu1 %v9909_v58 }
0x21cf   : > { %9507 = vmatprep.subr.bf16.mxu1 %v9911_v59 }
0x21d2   : > { %9508 = vmatpush3.bf16.msra.mxu1 %v9911_v59 }
0x21d3   : > { %9509 = vmatprep.subr.bf16.mxu1 %v9912_v60 }
0x21d6   : > { %9510 = vmatpush3.bf16.msra.mxu1 %v9912_v60 }
0x21d7   : > { %9511 = vmatprep.subr.bf16.mxu1 %v9914_v62 }
0x21da   : > { %9512 = vmatpush3.bf16.msra.mxu1 %v9914_v62 }
0x21db   : > { %9513 = vmatprep.subr.bf16.mxu1 %v9916_v63 }
0x21de   : > { %9514 = vmatpush3.bf16.msra.mxu1 %v9916_v63 }
0x21df   : > { %9515 = vmatprep.subr.bf16.mxu1 %v9918_v1 }
0x21e2   : > { %9516 = vmatpush3.bf16.msra.mxu1 %v9918_v1 }
0x21e3   : > { %9517 = vmatprep.subr.bf16.mxu1 %v9920_v2 }
0x21e6   : > { %9518 = vmatpush3.bf16.msra.mxu1 %v9920_v2 }
0x21e7   : > { %9551 = vmatprep.subr.bf16.mxu1 %v10421_v34 }
0x21e9   : > { %9520 = vmatmul.mubr.bf16.vlgmr.msra.gmra.mrb[152].mxu1 %v10847_v28 }
0x21ea   : > { %9523 = vmatprep.mubr.bf16.mxu1 %v10849_v29  ;;  %9552 = vmatpush3.bf16.msra.mxu1 %v10833_v13  ;;  %v9917_v13 = vld [vmem:[#allocation7 + $0x1d0] sm:$0xff]  }
0x21eb   : > { %9563 = vmatprep.subr.bf16.mxu1 %v10421_v34 }
0x21f1   : > { %9524 = vmatmul.mubr.bf16.gmra.mrb[156].mxu1 %v10858_v33 }
0x21f2   : > { %9553 = vmatprep.mubr.msk.bf16.mxu1 %vm10422_vm0, %v10421_v34 }
0x229c   : > { %v6701_v24 = vpop.f32.mrb[148].mxu1 }
0x229d   : > { %v6707_v3 = vpack.c.bf16 %v6701_v24, %v6701_v24  ;;  %v9475_v49 = vpop.f32.mrb[149].mxu1 }
0x229e   : > { %v6704_v5 = vpop.f32.mrb[150].mxu1 }
0x229f   : > { %v9476_v6 = vpop.f32.mrb[151].mxu1  ;;  %9480 = vmatmul.mubr.msk.bf16.vlgmr.msra.gmra.mrb[208].mxu0 %vm799_vm1, %v6707_v3 }
0x22a0   : > { %9484 = vmatpush3.bf16.msra.mxu0 %v9913_v61  ;;  %9499 = vmatprep.mubr.bf16.mxu0 %v10838_v17  ;;  %v8188_v17 = vld [vmem:[#allocation11 + $0x7] ss:$0 sm:$0xff] }
0x22a1   : > { %9485 = vmatprep.subr.bf16.mxu0 %v9915_v4 }
0x22a4   : > { %9486 = vmatpush3.bf16.msra.mxu0 %v9915_v4 }
0x22a5   : > { %9487 = vmatprep.subr.bf16.mxu0 %v9917_v13 }
0x22a8   : > { %9488 = vmatpush3.bf16.msra.mxu0 %v9917_v13 }
0x22a9   : > { %9489 = vmatprep.subr.bf16.mxu0 %v9919_v7 }
0x22ac   : > { %9490 = vmatpush3.bf16.msra.mxu0 %v9919_v7 }
0x22ad   : > { %9491 = vmatprep.subr.bf16.mxu0 %v9921_v8 }
0x22b0   : > { %9492 = vmatpush3.bf16.msra.mxu0 %v9921_v8 }
0x22b1   : > { %9493 = vmatprep.subr.bf16.mxu0 %v9922_v9 }
0x22b4   : > { %9494 = vmatpush3.bf16.msra.mxu0 %v9922_v9 }
0x22b5   : > { %9495 = vmatprep.subr.bf16.mxu0 %v9923_v10 }
0x22b8   : > { %9496 = vmatpush3.bf16.msra.mxu0 %v9923_v10 }
0x22b9   : > { %9497 = vmatprep.subr.bf16.mxu0 %v9924_v40 }
0x22bc   : > { %9498 = vmatpush3.bf16.msra.mxu0 %v9924_v40  ;;  %v9521_v11 = vpop.f32.mrb[152].mxu1 }
0x22bd   : > { %9527 = vmatprep.subr.bf16.mxu0 %v10421_v34  ;;  %v6999_v14 = vadd.f32 %v9521_v11, %v8188_v17  ;;  %v6990_v15 = vpop.f32.mrb[153].mxu1 }
0x22be   : > { %v6991_v16 = vadd.f32 %v8188_v17, %v6990_v15  ;;  %v9522_v18 = vpop.f32.mrb[154].mxu1 }
0x22bf   : > { %9500 = vmatmul.mubr.bf16.vlgmr.msra.gmra.mrb[212].mxu0 %v10851_v30  ;;  %v7002_v19 = vadd.f32 %v9522_v18, %v8188_v17  ;;  %v6993_v20 = vpop.f32.mrb[155].mxu1 }
0x22c0   : > { %9529 = vmatprep.mubr.msk.bf16.mxu0 %vm10422_vm0, %v10421_v34  ;;  %v6994_v21 = vadd.f32 %v8188_v17, %v6993_v20 }
0x22c1   : > { %v7034_v22 = vpack.c.bf16 %v7002_v19, %v6999_v14 }
0x22c2   : > { %v7033_v23 = vpack.c.bf16 %v6994_v21, %v6991_v16 }
0x22c3   : > { %v7087_v52 = vsel %vm799_vm1, %v7034_v22, 0 }
0x22c4   : > { %v7041_v25 = vsel %vm799_vm1, %v7033_v23, 0  ;;  %v9525_v30 = vpop.f32.mrb[156].mxu1 }
0x22c5   : > { %9528 = vmatpush3.bf16.xpose.msra.mxu0 %v7041_v25  ;;  %v7006_v26 = vpop.f32.mrb[157].mxu1  ;;  %v7015_v27 = vadd.f32 %v9525_v30, %v8188_v17 }
0x22c6   : > { %9533 = vmatprep.subr.bf16.mxu0 %v10421_v34  ;;  %v9526_v54 = vpop.f32.mrb[158].mxu1  ;;  %v7007_v31 = vadd.f32 %v8188_v17, %v7006_v26 }
0x22c7   : > { %v7018_v32 = vadd.f32 %v9526_v54, %v8188_v17  ;;  %v7009_v35 = vpop.f32.mrb[159].mxu1 }
0x22c8   : > { %v7010_v36 = vadd.f32 %v8188_v17, %v7009_v35 }
0x22c9   : > { %v7036_v37 = vpack.c.bf16 %v7018_v32, %v7015_v27 }
0x22ca   : > { %v7035_v38 = vpack.c.bf16 %v7010_v36, %v7007_v31 }
0x22cb   : > { %v7179_v58 = vsel %vm799_vm1, %v7036_v37, 0 }
0x22cc   : > { %v7133_v55 = vsel %vm799_vm1, %v7035_v38, 0 }
0x2372   : > { %v6754_v39 = vpop.f32.mrb[208].mxu0 }
0x2373   : > { %v11419_v41 = vadd.f32 %v6754_v39, %v11341_v12  ;;  %v9481_v0 = vpop.f32.mrb[209].mxu0 }
0x2374   : > { %v6757_v42 = vpop.f32.mrb[210].mxu0 }
0x2375   : > { %v9482_v43 = vpop.f32.mrb[211].mxu0 }
0x2392   : > { %v9501_v45 = vpop.f32.mrb[212].mxu0 }
0x2393   : > { %v6868_v46 = vpop.f32.mrb[213].mxu0  ;;  %v6877_v56 = vadd.f32 %v9501_v45, %v8179_v44 }
0x2394   : > { %v6869_v47 = vadd.f32 %v8179_v44, %v6868_v46  ;;  %v9502_v48 = vpop.f32.mrb[214].mxu0 }
0x2395   : > { %v6871_v50 = vpop.f32.mrb[215].mxu0  ;;  %v8262_v57 = vpack.c.bf16 %v6877_v56, %v6877_v56  ;;  %v6880_v59 = vadd.f32 %v9502_v48, %v8179_v44 }
0x2396   : > { %v8260_v51 = vpack.c.bf16 %v6869_v47, %v6869_v47  ;;  %v6872_v12 = vadd.f32 %v8179_v44, %v6871_v50 }
0x2397   : > { %v8263_v60 = vpack.c.bf16 %v6880_v59, %v6880_v59 }
0x2398   : > { %9530 = vmatmul.mubr.msk.bf16.vlgmr.msra.gmra.mrb[216].mxu0 %vm799_vm1, %v8260_v51  ;;  %v8261_v53 = vpack.c.bf16 %v6872_v12, %v6872_v12 }
0x2399   : > { %9534 = vmatpush3.bf16.xpose.msra.mxu0 %v7087_v52  ;;  %9535 = vmatprep.mubr.msk.bf16.mxu0 %vm10422_vm0, %v10421_v34 }
0x239a   : > { %9539 = vmatprep.subr.bf16.mxu0 %v10421_v34 }
0x23a0   : > { %9536 = vmatmul.mubr.msk.bf16.vlgmr.msra.gmra.mrb[220].mxu0 %vm799_vm1, %v8261_v53 }
0x23a1   : > { %9540 = vmatpush3.bf16.xpose.msra.mxu0 %v7133_v55  ;;  %9541 = vmatprep.mubr.msk.bf16.mxu0 %vm10422_vm0, %v10421_v34 }
0x23a2   : > { %9545 = vmatprep.subr.bf16.mxu0 %v10421_v34 }
0x23a8   : > { %9542 = vmatmul.mubr.msk.bf16.vlgmr.msra.gmra.mrb[224].mxu0 %vm799_vm1, %v8262_v57 }
0x23a9   : > { %9546 = vmatpush3.bf16.xpose.msra.mxu0 %v7179_v58  ;;  %9547 = vmatprep.mubr.msk.bf16.mxu0 %vm10422_vm0, %v10421_v34 }
0x23aa   : > { %9557 = vmatprep.subr.bf16.mxu0 %v10421_v34 }
0x23b0   : > { %9548 = vmatmul.mubr.msk.bf16.vlgmr.msra.gmra.mrb[228].mxu0 %vm799_vm1, %v8263_v60 }
0x23b1   : > { %9558 = vmatpush3.bf16.msra.mxu0 %v10847_v28  ;;  %9559 = vmatprep.mubr.msk.bf16.mxu0 %vm10422_vm0, %v10421_v34 }
0x23b2   : > { %9569 = vmatprep.subr.bf16.mxu0 %v10421_v34 }
0x246b   : > { %v7077_v61 = vpop.f32.mrb[216].mxu0 }
0x246c   : > { %v9531_v62 = vpop.f32.mrb[217].mxu0  ;;  %v7221_v63 = vsel %vm799_vm1, %v7077_v61, -inf }
0x246d   : > { %7222 = vmax.xlane.f32.xlu0 %v7221_v63  ;;  %v7080_v1 = vpop.f32.mrb[218].mxu0 }
0x246e   : > { %v9532_v2 = vpop.f32.mrb[219].mxu0 }
0x2473   : > { %v7123_v24 = vpop.f32.mrb[220].mxu0 }
0x2474   : > { %v9537_v3 = vpop.f32.mrb[221].mxu0  ;;  %v7224_v49 = vsel %vm799_vm1, %v7123_v24, -inf }
0x2475   : > { %7225 = vmax.xlane.f32.xlu1 %v7224_v49  ;;  %v7126_v4 = vpop.f32.mrb[222].mxu0 }
0x2476   : > { %v9538_v5 = vpop.f32.mrb[223].mxu0 }
0x247b   : > { %v7169_v28 = vpop.f32.mrb[224].mxu0 }
0x247c   : > { %v9543_v6 = vpop.f32.mrb[225].mxu0  ;;  %v7227_v13 = vsel %vm799_vm1, %v7169_v28, -inf }
0x247d   : > { %7228 = vmax.xlane.f32.xlu0 %v7227_v13  ;;  %v7172_v7 = vpop.f32.mrb[226].mxu0 }
0x247e   : > { %v9544_v8 = vpop.f32.mrb[227].mxu0 }
0x2483   : > { %v7215_v9 = vpop.f32.mrb[228].mxu0 }
0x2484   : > { %v9549_v10 = vpop.f32.mrb[229].mxu0  ;;  %v7230_v40 = vsel %vm799_vm1, %v7215_v9, -inf }
0x2485   : > { %7231 = vmax.xlane.f32.xlu1 %v7230_v40  ;;  %v7218_v17 = vpop.f32.mrb[230].mxu0 }
0x2486   : > { %v9550_v11 = vpop.f32.mrb[231].mxu0 }
0x24fa   : > { %v7223_v14 = vpop.xlane.xlu0 %7222 }
0x24fb   : > { %v7233_v15 = vsub.f32 %v7077_v61, %v7223_v14 }
0x24fd   : > { %v7237_v16 = vmul.f32 1.442695, %v7233_v15 }
0x24ff   : > { %10046 = vpow2.f32 %v7237_v16 }
0x2502   : > { %v7226_v18 = vpop.xlane.xlu1 %7225 }
0x2503   : > { %v7234_v19 = vsub.f32 %v7123_v24, %v7226_v18 }
0x2505   : > { %v7239_v20 = vmul.f32 1.442695, %v7234_v19 }
0x2507   : > { %10048 = vpow2.f32 %v7239_v20 }
0x2509   : > { %v10047_v21 = vpop.eup %10046 }
0x250a   : > { %v7229_v22 = vpop.xlane.xlu0 %7228  ;;  %v7245_v23 = vsel %vm799_vm1, %v10047_v21, 0.0 }
0x250b   : > { %v7235_v25 = vsub.f32 %v7169_v28, %v7229_v22  ;;  %7246 = vadd.xlane.f32.xlu0 %v7245_v23  ;;  %v9926_v22 = vld [vmem:[#allocation13 + $0x1c8] sm:$0xff]   ;;  %v9927_v23 = vld [vmem:[#allocation13 + $0x1d0] sm:$0xff]  }
0x250d   : > { %v7241_v30 = vmul.f32 1.442695, %v7235_v25  ;;  %v9928_v25 = vld [vmem:[#allocation13 + $0x1d8] sm:$0xff]  }
0x250f   : > { %10050 = vpow2.f32 %v7241_v30  ;;  %v9929_v30 = vld [vmem:[#allocation13 + $0x1e0] sm:$0xff]  }
0x2511   : > { %v10049_v26 = vpop.eup %10048 }
0x2512   : > { %v7232_v54 = vpop.xlane.xlu1 %7231  ;;  %v7248_v27 = vsel %vm799_vm1, %v10049_v26, 0.0 }
0x2513   : > { %v7236_v31 = vsub.f32 %v7215_v9, %v7232_v54  ;;  %7249 = vadd.xlane.f32.xlu1 %v7248_v27  ;;  %v9931_v54 = vld [vmem:[#allocation13 + $0x1f0] sm:$0xff]   ;;  %v9932_v27 = vld [vmem:[#allocation13 + $0x1f8] sm:$0xff]  }
0x2515   : > { %v7243_v32 = vmul.f32 1.442695, %v7236_v31  ;;  %v9933_v31 = vld [vmem:[#allocation14 + $0x38] sm:$0xff]  }
0x2517   : > { %10052 = vpow2.f32 %v7243_v32 }
0x2519   : > { %v10051_v35 = vpop.eup %10050 }
0x251a   : > { %v7251_v36 = vsel %vm799_vm1, %v10051_v35, 0.0 }
0x251b   : > { %7252 = vadd.xlane.f32.xlu0 %v7251_v36 }
0x2521   : > { %v10053_v37 = vpop.eup %10052 }
0x2522   : > { %v7254_v38 = vsel %vm799_vm1, %v10053_v37, 0.0 }
0x2523   : > { %7255 = vadd.xlane.f32.xlu1 %v7254_v38 }
0x2598   : > { %v7247_v39 = vpop.xlane.xlu0 %7246 }
0x2599   : > { %10054 = vrcp.f32 %v7247_v39 }
0x25a0   : > { %v7250_v0 = vpop.xlane.xlu1 %7249 }
0x25a1   : > { %10056 = vrcp.f32 %v7250_v0 }
0x25a3   : > { %v10055_v42 = vpop.eup %10054 }
0x25a4   : > { %v7261_v43 = vmul.f32 %v10055_v42, %v10047_v21  ;;  %v9925_v21 = vld [vmem:[#allocation13 + $0x1c0] sm:$0xff]  }
0x25a6   : > { %v7265_v44 = vsel %vm799_vm1, %v7261_v43, 0.0 }
0x25a7   : > { %v7266_v45 = vrot.slane %v7265_v44, 4 }
0x25a8   : > { %v7253_v46 = vpop.xlane.xlu0 %7252 }
0x25a9   : > { %v7267_v47 = vadd.f32 %v7266_v45, %v7265_v44  ;;  %10058 = vrcp.f32 %v7253_v46 }
0x25ab   : > { %v10057_v48 = vpop.eup %10056  ;;  %v7268_v50 = vrot.slane %v7267_v47, 2 }
0x25ac   : > { %v7262_v51 = vmul.f32 %v10057_v48, %v10049_v26  ;;  %v9930_v26 = vld [vmem:[#allocation13 + $0x1e8] sm:$0xff]  }
0x25ad   : > { %v7269_v52 = vadd.f32 %v7268_v50, %v7267_v47 }
0x25ae   : > { %v7272_v12 = vsel %vm799_vm1, %v7262_v51, 0.0 }
0x25af   : > { %v7270_v53 = vrot.slane %v7269_v52, 1  ;;  %v7273_v55 = vrot.slane %v7272_v12, 4 }
0x25b0   : > { %v7256_v56 = vpop.xlane.xlu1 %7255 }
0x25b1   : > { %v7274_v57 = vadd.f32 %v7273_v55, %v7272_v12  ;;  %10060 = vrcp.f32 %v7256_v56  ;;  %v7271_v58 = vadd.f32 %v7270_v53, %v7269_v52 }
0x25b3   : > { %v10059_v59 = vpop.eup %10058  ;;  %v7275_v60 = vrot.slane %v7274_v57, 2  ;;  %v7293_v61 = vmul.f32 0.125, %v7271_v58 }
0x25b4   : > { %v7263_v62 = vmul.f32 %v10059_v59, %v10051_v35 }
0x25b5   : > { %v7297_v63 = vpack.c.bf16 %v7293_v61, %v7293_v61  ;;  %v7276_v1 = vadd.f32 %v7275_v60, %v7274_v57 }
0x25b6   : > { %v7279_v2 = vsel %vm799_vm1, %v7263_v62, 0.0 }
0x25b7   : > { %v7280_v24 = vrot.slane %v7279_v2, 4  ;;  %9554 = vmatmul.mubr.msk.bf16.vlgmr.msra.gmra.mrb[160].mxu1 %vm799_vm1, %v7297_v63  ;;  %v7277_v3 = vrot.slane %v7276_v1, 1 }
0x25b8   : > { %9564 = vmatpush3.bf16.msra.mxu1 %v10849_v29  ;;  %9565 = vmatprep.mubr.msk.bf16.mxu1 %vm10422_vm0, %v10421_v34 }
0x25b9   : > { %v7281_v49 = vadd.f32 %v7280_v24, %v7279_v2  ;;  %v7278_v4 = vadd.f32 %v7277_v3, %v7276_v1  ;;  %9575 = vmatprep.subr.bf16.mxu1 %v10421_v34 }
0x25bb   : > { %v10061_v5 = vpop.eup %10060  ;;  %v7282_v28 = vrot.slane %v7281_v49, 2  ;;  %v7294_v6 = vmul.f32 0.125, %v7278_v4 }
0x25bc   : > { %v7264_v13 = vmul.f32 %v10061_v5, %v10053_v37 }
0x25bd   : > { %v7298_v7 = vpack.c.bf16 %v7294_v6, %v7294_v6  ;;  %v7283_v8 = vadd.f32 %v7282_v28, %v7281_v49  ;;  %v10423_v28 = vmov 1966171168  }
0x25be   : > { %v7286_v9 = vsel %vm799_vm1, %v7264_v13, 0.0  ;;  %v7662_v6 = vunpack.c.l.s4 %v10423_v28  ;;  %v7664_v13 = vlaneseq }
0x25bf   : > { %v7287_v10 = vrot.slane %v7286_v9, 4  ;;  %9560 = vmatmul.mubr.msk.bf16.vlgmr.msra.gmra.mrb[232].mxu0 %vm799_vm1, %v7298_v7  ;;  %v7284_v40 = vrot.slane %v7283_v8, 1 }
0x25c0   : > { %9570 = vmatpush3.bf16.msra.mxu0 %v10858_v33  ;;  %9571 = vmatprep.mubr.msk.bf16.mxu0 %vm10422_vm0, %v10421_v34  ;;  %v7663_v7 = vunpack.c.0.s8 %v7662_v6 }
0x25c1   : > { %v7288_v29 = vadd.f32 %v7287_v10, %v7286_v9  ;;  %v7285_v17 = vadd.f32 %v7284_v40, %v7283_v8  ;;  %9595 = vmatprep.subr.bf16.mxu0 %v10421_v34  ;;  %v7665_v8 = vshrl.u32 %v7664_v13, 7  ;;  %v8219_v10 = vld [vmem:[#allocation16] ss:$0 sm:$0xff] }
0x25c3   : > { %v7289_v11 = vrot.slane %v7288_v29, 2  ;;  %v7295_v14 = vmul.f32 0.125, %v7285_v17 }
0x25c5   : > { %v7299_v15 = vpack.c.bf16 %v7295_v14, %v7295_v14  ;;  %v7290_v16 = vadd.f32 %v7289_v11, %v7288_v29  ;;  %v7666_v29 = vsub.s32 %v7663_v7, %v7665_v8 }
0x25c7   : > { %9566 = vmatmul.mubr.msk.bf16.vlgmr.msra.gmra.mrb[164].mxu1 %vm799_vm1, %v7299_v15  ;;  %v7291_v18 = vrot.slane %v7290_v16, 1 }
0x25c8   : > { %9591 = vmatprep.mubr.msk.bf16.mxu1 %vm10422_vm0, %v10421_v34  ;;  %9576 = vmatpush3.bf16.msra.mxu1 %v9925_v21 }
0x25c9   : > { %v7292_v19 = vadd.f32 %v7291_v18, %v7290_v16  ;;  %9577 = vmatprep.subr.bf16.mxu1 %v10421_v34 }
0x25cb   : > { %v7296_v20 = vmul.f32 0.125, %v7292_v19 }
0x25cc   : > { %9578 = vmatpush3.bf16.msra.mxu1 %v9926_v22 }
0x25cd   : > { %v7300_v33 = vpack.c.bf16 %v7296_v20, %v7296_v20  ;;  %9579 = vmatprep.subr.bf16.mxu1 %v10421_v34 }
0x25cf   : > { %9572 = vmatmul.mubr.msk.bf16.vlgmr.msra.gmra.mrb[236].mxu0 %vm799_vm1, %v7300_v33 }
0x25d0   : > { %9597 = vmatprep.mubr.msk.bf16.mxu0 %vm10422_vm0, %v10421_v34  ;;  %9580 = vmatpush3.bf16.msra.mxu1 %v9927_v23 }
0x25d1   : > { %9581 = vmatprep.subr.bf16.mxu1 %v10421_v34  ;;  %9596 = vmatpush3.bf16.msra.mxu0 %v9933_v31 }
0x25d4   : > { %9582 = vmatpush3.bf16.msra.mxu1 %v9928_v25 }
0x25d5   : > { %9583 = vmatprep.subr.bf16.mxu1 %v10421_v34 }
0x25d8   : > { %9584 = vmatpush3.bf16.msra.mxu1 %v9929_v30 }
0x25d9   : > { %9585 = vmatprep.subr.bf16.mxu1 %v10421_v34 }
0x25dc   : > { %9586 = vmatpush3.bf16.msra.mxu1 %v9930_v26 }
0x25dd   : > { %9587 = vmatprep.subr.bf16.mxu1 %v10421_v34 }
0x25e0   : > { %9588 = vmatpush3.bf16.msra.mxu1 %v9931_v54 }
0x25e1   : > { %9589 = vmatprep.subr.bf16.mxu1 %v10421_v34 }
0x25e4   : > { %9590 = vmatpush3.bf16.msra.mxu1 %v9932_v27 }
0x268a   : > { %v7338_v32 = vpop.f32.mrb[160].mxu1 }
0x268b   : > { %v9555_v35 = vpop.f32.mrb[161].mxu1  ;;  %v7473_v39 = vpack.c.bf16 %v7338_v32, %v7338_v32 }
0x268c   : > { %v7341_v36 = vpop.f32.mrb[162].mxu1 }
0x268d   : > { %v9556_v37 = vpop.f32.mrb[163].mxu1  ;;  %v7498_v46 = vunpack.c.l.b16 %v7473_v39 }
0x2692   : > { %v7381_v38 = vpop.f32.mrb[232].mxu0 }
0x2693   : > { %v7474_v0 = vpack.c.bf16 %v7381_v38, %v7381_v38  ;;  %v9561_v42 = vpop.f32.mrb[233].mxu0 }
0x2694   : > { %v7384_v43 = vpop.f32.mrb[234].mxu0 }
0x2695   : > { %v7499_v44 = vunpack.c.l.b16 %v7474_v0  ;;  %v9562_v45 = vpop.f32.mrb[235].mxu0 }
0x2697   : > { %v7502_v47 = vrot.slane %v7499_v44, 7 }
0x2699   : > { %v7503_v48 = vsel %vm1266_vm2, %v7502_v47, %v7498_v46 }
0x269a   : > { %v7424_v34 = vpop.f32.mrb[164].mxu1 }
0x269b   : > { %v7475_v50 = vpack.c.bf16 %v7424_v34, %v7424_v34  ;;  %v9567_v51 = vpop.f32.mrb[165].mxu1 }
0x269c   : > { %v7427_v52 = vpop.f32.mrb[166].mxu1 }
0x269d   : > { %v7500_v12 = vunpack.c.l.b16 %v7475_v50  ;;  %v9568_v53 = vpop.f32.mrb[167].mxu1 }
0x269f   : > { %v7504_v55 = vrot.slane %v7500_v12, 6 }
0x26a1   : > { %v7505_v56 = vsel %vm1269_vm3, %v7504_v55, %v7503_v48 }
0x26a2   : > { %v7467_v57 = vpop.f32.mrb[236].mxu0 }
0x26a3   : > { %v7476_v58 = vpack.c.bf16 %v7467_v57, %v7467_v57  ;;  %v9573_v59 = vpop.f32.mrb[237].mxu0 }
0x26a4   : > { %v7470_v60 = vpop.f32.mrb[238].mxu0 }
0x26a5   : > { %v7501_v61 = vunpack.c.l.b16 %v7476_v58  ;;  %v9574_v62 = vpop.f32.mrb[239].mxu0 }
0x26a7   : > { %v7506_v63 = vrot.slane %v7501_v61, 5 }
0x26a9   : > { %v7507_v1 = vsel %vm1272_vm4, %v7506_v63, %v7505_v56 }
0x26aa   : > { %v7508_v2 = vpack.c.b16 %v7507_v1, %v7507_v1 }
0x26ac   : > { %9592 = vmatmul.mubr.bf16.vlgmr.msra.gmra.mrb[168].mxu1 %v7508_v2 }
0x277f   : > { %v7592_v24 = vpop.f32.mrb[168].mxu1 }
0x2780   : > { %v7598_v3 = vpack.c.bf16 %v7592_v24, %v7592_v24  ;;  %v9593_v49 = vpop.f32.mrb[169].mxu1 }
0x2781   : > { %v7595_v4 = vpop.f32.mrb[170].mxu1 }
0x2782   : > { %v9594_v5 = vpop.f32.mrb[171].mxu1  ;;  %9598 = vmatmul.mubr.msk.bf16.vlgmr.msra.gmra.mrb[240].mxu0 %vm799_vm1, %v7598_v3 }
0x2855   : > { %v7645_v9 = vpop.f32.mrb[240].mxu0 }
0x2856   : > { %v7651_v40 = vadd.f32 %v7645_v9, %v11419_v41  ;;  %v9599_v17 = vpop.f32.mrb[241].mxu0 }
0x2857   : > { %v7648_v11 = vpop.f32.mrb[242].mxu0 }
0x2858   : > { %v7659_v14 = vadd.f32 %v8219_v10, %v7651_v40  ;;  %v9600_v15 = vpop.f32.mrb[243].mxu0 }
0x285a   : > { %v7667_v16 = vrot.slane %v7659_v14, %v7666_v29 }
0x285c   : > { %v7668_v18 = vcombine.high %v7667_v16, %v7667_v16  ;;  %v7675_v19 = vrot.slane %v7667_v16, %v7666_v29  ;;  %8220 = vst.sshfl [vmem:[%s490_s28] sm:$0x1 pattern:$0x73625140] %v7667_v16 }
0x285e   : > { %v7682_v20 = vrot.slane %v7668_v18, %v7666_v29  ;;  %v7683_v33 = vcombine.high %v7675_v19, %v7675_v19  ;;  %8221 = vst.sshfl [vmem:[%s490_s28 + $0x1] sm:$0x1 pattern:$0x73625140] %v7668_v18 }
0x2860   : > { %v7684_v41 = vcombine.high %v7682_v20, %v7682_v20  ;;  %7691 = vst [vmem:[%s490_s28 + $0x2] sm:$0x1] %v7683_v33 }
0x2862   : > { %7692 = vst [vmem:[%s490_s28 + $0x3] sm:$0x1] %v7684_v41 }
0x2863   : > { %10331 = shalt.err (!%p10328_p3)
}
0x2864   : > { %s10332_s26 = scalar_lea.hbm %s11488_s27, 64  ;;  %s10336_s5 = scalar_lea.hbm %s11582_s22, 128 }
0x2865   : > { %p10333_p10 = scmp.ne.s32.totalorder %s11488_s27, %s10332_s26  ;;  %p10337_p12 = scmp.lt.u32.totalorder %s11488_s27, %s11582_s22 }
0x2866   : > { %p10338_p2 = scmp.lt.u32.totalorder %s10336_s5, %s10332_s26  ;;  %p10340_p6 = scmp.lt.u32.totalorder %s10332_s26, %s11488_s27 }
0x2867   : > { %p10334_p1 = pnand %p10333_p10, %p11583_p9 }
0x2868   : > { %p10339_p13 = por %p10338_p2, %p10337_p12 }
0x2869   : > { %p10335_p11 = pneg %p10334_p1 }
0x286a   : > { %p10341_p0 = por %p10340_p6, %p10339_p13 }
0x286c   : > { %p10342_p5 = pnand %p10341_p0, %p10335_p11 }
0x286e   : > { %10345 = shalt.err (!%p10342_p5)
}
0x286f   : > { %s10425_s24 = smov 16   ;;  %s10426_s28 = smov 1  }
0x2870   : > { %9633 = dma.vmem_to_hbm [thread:$0]  (%p11583_p9), %s11483_s14, 64, %s11488_s27, %s7694_s18, %s10425_s24, %s10425_s24, %s10426_s28  }
0x2871 PF: > { %s7722_s23 = sand.u32 1, %s10392_s30   ;;  %p11584_p7 = scmp.ne.s32.totalorder %s11570_s29, 0 }
0x2872   : > { %p11585_p8 = scmp.ge.s32.totalorder %s10404_s12, 2  ;;  %s7723_s0 = scalar_lea.sflag [#allocation4], %s7722_s23 }
0x2874   : > { %p9665_p4 = pnand %p11585_p8, %p11584_p7 }
0x2876   : > { %10387 = dma.done.wait (!%p9665_p4), %s7723_s0, 64  }
0x2877   : > { %10389 = vsyncadd (!%p9665_p4), %s7723_s0, 4294967232  ;;  %p28_p3 = scmp.ge.s32.totalorder %s10679_s19, 4   ;;  %s11586_s30 = smov %s10396_s10 }
0x2878   : > { %s11587_s10 = smov %s10400_s11  ;;  %s11588_s11 = smov %s10691_s2 }
0x2879   : > { %s11589_s12 = smov %s10679_s19  ;;  %30 = sbr.rel (!%p28_p3) target bundleno = 18 (0x12), region = 184 }
0x2880   :  { %7728 = vsyncpa [#allocation3], 1 }
0x2881   :  { %7730 = vsyncpa [#allocation3 + $0x1], 1 }
0x2882   :  { %7731 = vsyncpa [#allocation6], 1 }
0x2883   :  { %7733 = vsyncpa [#allocation6 + $0x1], 1 }
0x2884   :  { %7734 = vsyncpa [#allocation9], 1 }
0x2885   :  { %7735 = vsyncpa [#allocation12], 1 }
0x2886   :  { %7736 = vsyncpa [#allocation15], 1 }
0x2887   :  { %7737 = vsyncpa [#allocation4], 1 }
0x2888   :  { %7739 = vsyncpa [#allocation4 + $0x1], 1 }

</bundles_post_ra>
